<compile_context>
chip_gen: v7x
topology: tpu7x:2x2x1
jax: 0.10.0
libtpu: 0.0.40
codegen_flags: <defaults>
</compile_context>

<pallas_src>
import jax
import jax.numpy as jnp
from jax import lax
from jax.experimental import pallas as pl
from jax.experimental.pallas import tpu as pltpu

# ----------------------------- configuration ------------------------------
NUM_TARGET = 3
NUM_CONTROL = 5
HIDDEN = 32                      # logical hidden size (production default is 128)
HORIZON_PAST = 8
HORIZON_FUTURE = 4
NUM_OUTPUT = 1 * NUM_TARGET      # likelihood.get_num_parameters() == 1
D_IN = NUM_CONTROL + NUM_TARGET
BATCH = 2

HP = 128                         # per-gate lane padding (gate slices hit vreg boundaries)
SUB = 8                          # sublane quantum: batch padded to a multiple of 8


# --------------------- reference GRU cell (pure JAX) -----------------------
def _gru_cell(x, h, w_ih, w_hh, b_ih, b_hh):
    """PyTorch nn.GRU cell semantics (gate order: r, z, n)."""
    hs = h.shape[-1]
    gi = jnp.dot(x, w_ih, preferred_element_type=jnp.float32) + b_ih
    gh = jnp.dot(h, w_hh, preferred_element_type=jnp.float32) + b_hh
    i_r, i_z, i_n = gi[:, :hs], gi[:, hs:2 * hs], gi[:, 2 * hs:]
    h_r, h_z, h_n = gh[:, :hs], gh[:, hs:2 * hs], gh[:, 2 * hs:]
    r = jax.nn.sigmoid(i_r + h_r)
    z = jax.nn.sigmoid(i_z + h_z)
    n = jnp.tanh(i_n + r * h_n)
    return (1.0 - z) * n + z * h


# ------------------------------ Pallas kernel ------------------------------
def rnn_kernel(x_past_ref, cf_ref, y0_ref,
               w_ih0_ref, b_ih0_ref, w_hh0_ref, b_hh0n_ref,
               w_ihy_ref, w_roy_ref, b_roy_ref,
               w1_ih_ref, b1_ih_ref, w1_hh_ref, b1_hhn_ref,
               w_ro_ref, b_ro_ref,
               out_ref,
               gi_past_scr, gi_futc_scr, h1_hist_scr):
    # x_past_ref:  (T_past*B_pad, D_IN)   time-major, batch padded to 8
    # cf_ref:      (T_fut*B_pad,  D_IN)   control_future, feature-padded with zeros
    # y0_ref:      (B_pad, HP)            target_past[:, -1, :], lane-padded
    # out_ref:     (T_fut*B_pad, HP)      lane-dense output slab (single store)
    bb = y0_ref.shape[0]
    t_past = x_past_ref.shape[0] // bb
    t_fut = h1_hist_scr.shape[0] // bb

    # ---- hoisted non-recurrent layer-0 input projections (one matmul each) ----
    # b_ih0 and the r/z halves of b_hh0 are pre-folded into b_ih0_ref.
    gi_past_scr[...] = (
        jnp.dot(x_past_ref[...], w_ih0_ref[...],
                preferred_element_type=jnp.float32) + b_ih0_ref[...])
    gi_futc_scr[...] = (
        jnp.dot(cf_ref[...], w_ih0_ref[...],
                preferred_element_type=jnp.float32) + b_ih0_ref[...])

    # ---- per-step biases broadcast ONCE (JAX does not CSE broadcast_in_dim) ----
    bhh0n = jnp.broadcast_to(b_hh0n_ref[...], (bb, HP))        # n-gate hidden bias, layer 0
    b1ih = jnp.broadcast_to(b1_ih_ref[...], (bb, 3 * HP))      # layer-1 input-side biases
    b1hhn = jnp.broadcast_to(b1_hhn_ref[...], (bb, HP))        # n-gate hidden bias, layer 1
    broy = jnp.broadcast_to(b_roy_ref[...], (bb, 3 * HP))      # folded readout-bias feedback

    def gru_update(gi, gh, hn_bias, h_prev):
        # gi columns: [r | z | i_n]  (input side, biases already included)
        # gh columns: [r | z | h_n]  (hidden side, no bias; hn_bias added inside r*(.))
        r = jax.nn.sigmoid(gi[:, :HP] + gh[:, :HP])
        z = jax.nn.sigmoid(gi[:, HP:2 * HP] + gh[:, HP:2 * HP])
        n = jnp.tanh(gi[:, 2 * HP:] + r * (gh[:, 2 * HP:] + hn_bias))
        return (1.0 - z) * n + z * h_prev

    def layer1(h0_new, h1_prev):
        # two K=128 matmuls, no concat, no 256-row fused weight
        g_ih = jnp.dot(h0_new, w1_ih_ref[...],
                       preferred_element_type=jnp.float32) + b1ih
        g_hh = jnp.dot(h1_prev, w1_hh_ref[...],
                       preferred_element_type=jnp.float32)
        return gru_update(g_ih, g_hh, b1hhn, h1_prev)

    h0 = jnp.zeros((bb, HP), jnp.float32)
    h1 = jnp.zeros((bb, HP), jnp.float32)

    # ----- encode the past: only the recurrent matmuls stay on the serial chain -----
    def enc_body(t, carry):
        h0, h1 = carry
        row = pl.multiple_of(t * bb, SUB)
        gi = gi_past_scr[pl.ds(row, bb), :]                     # precomputed input gates
        gh = jnp.dot(h0, w_hh0_ref[...], preferred_element_type=jnp.float32)
        h0 = gru_update(gi, gh, bhh0n, h0)
        h1 = layer1(h0, h1)
        return h0, h1

    h0, h1 = lax.fori_loop(0, t_past, enc_body, (h0, h1), unroll=True)

    # ----- autoregressive decode of the future -----
    # Readout folded into the feedback:
    #   y_i @ W_ihy == h1_i @ (W_ro[:, :T] @ W_ihy) + b_ro[:T] @ W_ihy
    # so no readout matmul sits on the per-step chain; outputs are produced after the
    # loop from the stored h1 history in one batched matmul.
    fb0 = jnp.dot(y0_ref[...], w_ihy_ref[...], preferred_element_type=jnp.float32)

    def dec_body(i, carry):
        h0, h1, fb = carry
        row = pl.multiple_of(i * bb, SUB)
        gi = gi_futc_scr[pl.ds(row, bb), :] + fb                # ctrl proj + target feedback
        gh = jnp.dot(h0, w_hh0_ref[...], preferred_element_type=jnp.float32)
        h0 = gru_update(gi, gh, bhh0n, h0)
        h1 = layer1(h0, h1)
        h1_hist_scr[pl.ds(row, bb), :] = h1
        fb = jnp.dot(h1, w_roy_ref[...], preferred_element_type=jnp.float32) + broy
        return h0, h1, fb

    _ = lax.fori_loop(0, t_fut, dec_body, (h0, h1, fb0), unroll=True)

    # ----- batched, lane-dense readout of all future steps at once -----
    bro = jnp.broadcast_to(b_ro_ref[...], (t_fut * bb, HP))
    out_ref[...] = (jnp.dot(h1_hist_scr[...], w_ro_ref[...],
                            preferred_element_type=jnp.float32) + bro)

    # TODO(synk): weight-resident MXU driving (pltpu.matmul_push_rhs/acc_lhs/pop), dual-MXU
    # placement of the independent layer-0/layer-1 recurrent matmuls, and a batch-block
    # grid with dimension_semantics=("parallel",) (v7x dual-TC) are the next steps when
    # many independent series are stacked; omitted here to keep lowering portable.
    # TODO(synk): nn.Dropout(0.1) is identity in eval mode; training-mode dropout and a
    # stochastic likelihood.sample would need pltpu.prng_seed/prng_random_bits.


# ----------------------- weight repacking (one-time) ------------------------
def pack_params(p):
    """Repack PyTorch-style GRU/Linear params into fused, lane-aligned kernel weights."""
    H = HIDDEN
    f32 = jnp.float32
    assert H <= HP and NUM_OUTPUT <= HP and D_IN <= HP
    w_ih0 = p['w_ih0'].astype(f32)               # (D_IN, 3H)
    w_hh0 = p['w_hh0'].astype(f32)               # (H, 3H)
    b_ih0 = p['b_ih0'].reshape(-1).astype(f32)
    b_hh0 = p['b_hh0'].reshape(-1).astype(f32)
    w_ih1 = p['w_ih1'].astype(f32)
    w_hh1 = p['w_hh1'].astype(f32)
    b_ih1 = p['b_ih1'].reshape(-1).astype(f32)
    b_hh1 = p['b_hh1'].reshape(-1).astype(f32)
    w_ro = p['w_ro'].astype(f32)                 # (H, NUM_OUTPUT)
    b_ro = p['b_ro'].reshape(-1).astype(f32)

    def pad_gate_cols(w):
        """(rows, 3H) -> (rows, 3*HP): each gate gets its own 128-lane slot."""
        out = jnp.zeros((w.shape[0], 3 * HP), f32)
        for g in range(3):
            out = out.at[:, g * HP:g * HP + H].set(w[:, g * H:(g + 1) * H])
        return out

    def pad_rows(w, rows_pad):
        return jnp.zeros((rows_pad, w.shape[1]), f32).at[:w.shape[0], :].set(w)

    def pad_gate_bias(bvec):
        out = jnp.zeros((1, 3 * HP), f32)
        for g in range(3):
            out = out.at[0, g * HP:g * HP + H].set(bvec[g * H:(g + 1) * H])
        return out

    # layer-0 hoisted input projection; b_ih0 and the r/z halves of b_hh0 are folded
    # into its bias (the n half of b_hh0 must stay inside r*(.) -> B_HH0N).
    W_IH0 = pad_gate_cols(w_ih0)                                       # (D_IN, 3*HP)
    B_IH0 = pad_gate_bias(
        b_ih0 + jnp.concatenate([b_hh0[:2 * H], jnp.zeros((H,), f32)]))
    W_HH0 = pad_rows(pad_gate_cols(w_hh0), HP)                         # (HP, 3*HP)
    B_HH0N = jnp.zeros((1, HP), f32).at[0, :H].set(b_hh0[2 * H:])

    # target-feedback rows of W_ih0 (used once for y0 at decode step 0)
    w_ihy = w_ih0[NUM_CONTROL:, :]                                     # (NUM_TARGET, 3H)
    W_IHY = pad_rows(pad_gate_cols(w_ihy), HP)                         # (HP, 3*HP)

    # readout folded into the decode feedback (removes per-step readout + W0D):
    #   y_i @ W_ihy == h1_i @ (W_ro[:, :T] @ W_ihy) + b_ro[:T] @ W_ihy
    W_ROY = pad_rows(pad_gate_cols(w_ro[:, :NUM_TARGET] @ w_ihy), HP)  # (HP, 3*HP)
    B_ROY = pad_gate_bias(b_ro[:NUM_TARGET] @ w_ihy)                   # (1, 3*HP)

    # layer-1 (same folding: r/z halves of b_hh1 ride with the input-side GEMM)
    W1_IH = pad_rows(pad_gate_cols(w_ih1), HP)
    B1_IH = pad_gate_bias(
        b_ih1 + jnp.concatenate([b_hh1[:2 * H], jnp.zeros((H,), f32)]))
    W1_HH = pad_rows(pad_gate_cols(w_hh1), HP)
    B1_HHN = jnp.zeros((1, HP), f32).at[0, :H].set(b_hh1[2 * H:])

    # readout, lane-padded (padded output lanes stay exactly zero)
    W_RO = jnp.zeros((HP, HP), f32).at[:H, :NUM_OUTPUT].set(w_ro)
    B_RO = jnp.zeros((1, HP), f32).at[0, :NUM_OUTPUT].set(b_ro)

    return dict(w_ih0=W_IH0, b_ih0=B_IH0, w_hh0=W_HH0, b_hh0n=B_HH0N,
                w_ihy=W_IHY, w_roy=W_ROY, b_roy=B_ROY,
                w1_ih=W1_IH, b1_ih=B1_IH, w1_hh=W1_HH, b1_hhn=B1_HHN,
                w_ro=W_RO, b_ro=B_RO)


# ------------------------------- wrapper -----------------------------------
def rnn_forward(packed, target_past, control_past, control_future):
    """Matches ModelCore RNN.forward (eval mode, teacher_forcing=False).

    target_past:    (B, T_past, NUM_TARGET)
    control_past:   (B, T_past, NUM_CONTROL)
    control_future: (B, T_fut,  NUM_CONTROL)
    returns:        (B, T_fut,  NUM_OUTPUT)
    """
    b, t_past, _ = target_past.shape
    t_fut = control_future.shape[1]
    b_pad = ((b + SUB - 1) // SUB) * SUB

    # time-major, batch padded to a sublane multiple, flattened to (T*B_pad, D_IN)
    x = jnp.concatenate([control_past, target_past], axis=2)         # torch.cat dim=2
    x_tm = jnp.pad(jnp.transpose(x, (1, 0, 2)), ((0, 0), (0, b_pad - b), (0, 0)))
    x_2d = x_tm.reshape(t_past * b_pad, D_IN)

    # control_future: pad target-feature columns with zeros so W_ih0 can be reused
    cf_tm = jnp.pad(jnp.transpose(control_future, (1, 0, 2)),
                    ((0, 0), (0, b_pad - b), (0, D_IN - NUM_CONTROL)))
    cf_2d = cf_tm.reshape(t_fut * b_pad, D_IN)

    y0 = jnp.pad(target_past[:, -1, :], ((0, b_pad - b), (0, HP - NUM_TARGET)))

    weights = (packed['w_ih0'], packed['b_ih0'], packed['w_hh0'], packed['b_hh0n'],
               packed['w_ihy'], packed['w_roy'], packed['b_roy'],
               packed['w1_ih'], packed['b1_ih'], packed['w1_hh'], packed['b1_hhn'],
               packed['w_ro'], packed['b_ro'])
    args = (x_2d, cf_2d, y0) + weights

    # advisory cost estimate for XLA scheduling around the custom call
    step_mm = 2 * b_pad * HP * 3 * HP                       # one K=128 x N=384 matmul
    flops = (2 * (t_past + t_fut) * b_pad * D_IN * 3 * HP   # hoisted projections
             + (t_past * 3 + t_fut * 4) * step_mm           # recurrent serial chain
             + 2 * t_fut * b_pad * HP * HP)                 # batched readout
    transcendentals = (t_past + t_fut) * b_pad * 6 * HP
    bytes_accessed = 4 * (x_2d.size + cf_2d.size + y0.size
                          + sum(int(w.size) for w in weights) + t_fut * b_pad * HP)

    out_2d = pl.pallas_call(
        rnn_kernel,
        out_shape=jax.ShapeDtypeStruct((t_fut * b_pad, HP), jnp.float32),
        in_specs=[pl.BlockSpec(memory_space=pltpu.MemorySpace.VMEM)] * len(args),
        out_specs=pl.BlockSpec(memory_space=pltpu.MemorySpace.VMEM),
        scratch_shapes=[pltpu.VMEM((t_past * b_pad, 3 * HP), jnp.float32),  # gi0 past
                        pltpu.VMEM((t_fut * b_pad, 3 * HP), jnp.float32),   # gi0 ctrl-future
                        pltpu.VMEM((t_fut * b_pad, HP), jnp.float32)],      # h1 history
        cost_estimate=pl.CostEstimate(flops=int(flops),
                                      transcendentals=int(transcendentals),
                                      bytes_accessed=int(bytes_accessed)),
    )(*args)

    out_tm = out_2d.reshape(t_fut, b_pad, HP)
    return jnp.transpose(out_tm, (1, 0, 2))[:b, :, :NUM_OUTPUT]     # batch-first, unpadded


# ------------------------ deterministic parameter init ----------------------
def init_params(key):
    """Mimics PyTorch GRU/Linear init: U(-1/sqrt(H), 1/sqrt(H)); pre-transposed."""
    bound = 1.0 / float(HIDDEN) ** 0.5
    keys = jax.random.split(key, 10)

    def u(kk, shape):
        return jax.random.uniform(kk, shape, jnp.float32, -bound, bound)

    return dict(
        w_ih0=u(keys[0], (D_IN, 3 * HIDDEN)),
        w_hh0=u(keys[1], (HIDDEN, 3 * HIDDEN)),
        b_ih0=u(keys[2], (1, 3 * HIDDEN)),
        b_hh0=u(keys[3], (1, 3 * HIDDEN)),
        w_ih1=u(keys[4], (HIDDEN, 3 * HIDDEN)),
        w_hh1=u(keys[5], (HIDDEN, 3 * HIDDEN)),
        b_ih1=u(keys[6], (1, 3 * HIDDEN)),
        b_hh1=u(keys[7], (1, 3 * HIDDEN)),
        w_ro=u(keys[8], (HIDDEN, NUM_OUTPUT)),
        b_ro=u(keys[9], (1, NUM_OUTPUT)),
    )


# ---------------------------- pure-JAX reference ----------------------------
def rnn_reference(params, target_past, control_past, control_future):
    x = jnp.concatenate([control_past, target_past], axis=2)
    b = x.shape[0]
    h0 = jnp.zeros((b, HIDDEN), jnp.float32)
    h1 = jnp.zeros((b, HIDDEN), jnp.float32)
    for t in range(x.shape[1]):
        h0 = _gru_cell(x[:, t], h0, params['w_ih0'], params['w_hh0'],
                       params['b_ih0'], params['b_hh0'])
        h1 = _gru_cell(h0, h1, params['w_ih1'], params['w_hh1'],
                       params['b_ih1'], params['b_hh1'])
    y = target_past[:, -1, :]
    outs = []
    for i in range(control_future.shape[1]):
        x_i = jnp.concatenate([control_future[:, i], y], axis=-1)
        h0 = _gru_cell(x_i, h0, params['w_ih0'], params['w_hh0'],
                       params['b_ih0'], params['b_hh0'])
        h1 = _gru_cell(h0, h1, params['w_ih1'], params['w_hh1'],
                       params['b_ih1'], params['b_hh1'])
        out = jnp.dot(h1, params['w_ro'],
                      preferred_element_type=jnp.float32) + params['b_ro']
        outs.append(out)
        y = out[:, :NUM_TARGET]
    return jnp.stack(outs, axis=1)


# ---------------------------------- main ------------------------------------
if __name__ == "__main__":
    key = jax.random.PRNGKey(0)
    kseed, k1, k2, k3 = jax.random.split(key, 4)
    params = init_params(kseed)
    packed = pack_params(params)     # one-time weight repack (outside the hot path)

    target_past = jax.random.normal(k1, (BATCH, HORIZON_PAST, NUM_TARGET), jnp.float32)
    control_past = jax.random.normal(k2, (BATCH, HORIZON_PAST, NUM_CONTROL), jnp.float32)
    control_future = jax.random.normal(k3, (BATCH, HORIZON_FUTURE, NUM_CONTROL), jnp.float32)

    out = jax.jit(rnn_forward)(packed, target_past, control_past, control_future)
    out = jax.block_until_ready(out)
    assert out.shape == (BATCH, HORIZON_FUTURE, NUM_OUTPUT), out.shape

    ref = rnn_reference(params, target_past, control_past, control_future)
    max_err = float(jnp.max(jnp.abs(out - ref)))
    assert jnp.allclose(out, ref, atol=1e-2, rtol=1e-2), f"max_err={max_err}"

    print("KERNEL_OK")
</pallas_src>

<mosaic_0001>
module attributes {stable_mosaic.version = 11 : i64} {
  func.func @rnn_kernel(%arg0: memref<64x8xf32, #tpu.memory_space<vmem>>, %arg1: memref<32x8xf32, #tpu.memory_space<vmem>>, %arg2: memref<8x128xf32, #tpu.memory_space<vmem>>, %arg3: memref<8x384xf32, #tpu.memory_space<vmem>>, %arg4: memref<1x384xf32, #tpu.memory_space<vmem>>, %arg5: memref<128x384xf32, #tpu.memory_space<vmem>>, %arg6: memref<1x128xf32, #tpu.memory_space<vmem>>, %arg7: memref<128x384xf32, #tpu.memory_space<vmem>>, %arg8: memref<128x384xf32, #tpu.memory_space<vmem>>, %arg9: memref<1x384xf32, #tpu.memory_space<vmem>>, %arg10: memref<128x384xf32, #tpu.memory_space<vmem>>, %arg11: memref<1x384xf32, #tpu.memory_space<vmem>>, %arg12: memref<128x384xf32, #tpu.memory_space<vmem>>, %arg13: memref<1x128xf32, #tpu.memory_space<vmem>>, %arg14: memref<128x128xf32, #tpu.memory_space<vmem>>, %arg15: memref<1x128xf32, #tpu.memory_space<vmem>>, %arg16: memref<32x128xf32, #tpu.memory_space<vmem>>, %arg17: memref<64x384xf32, #tpu.memory_space<vmem>>, %arg18: memref<32x384xf32, #tpu.memory_space<vmem>>, %arg19: memref<32x128xf32, #tpu.memory_space<vmem>>) attributes {dimension_semantics = [], scalar_prefetch = 0 : i64, scratch_operands = 3 : i64, tpu.core_type = #tpu.core_type<tc>} {
    %c0 = arith.constant 0 : index
    %c0_0 = arith.constant 0 : index
    %0 = vector.load %arg0[%c0, %c0_0] : memref<64x8xf32, #tpu.memory_space<vmem>>, vector<64x8xf32>
    %c0_1 = arith.constant 0 : index
    %c0_2 = arith.constant 0 : index
    %1 = vector.load %arg3[%c0_1, %c0_2] : memref<8x384xf32, #tpu.memory_space<vmem>>, vector<8x384xf32>
    %cst = arith.constant dense<0.000000e+00> : vector<64x384xf32>
    %2 = tpu.matmul %0, %1, %cst {dimension_numbers = #tpu.dot_dimension_numbers<[1], [0], [0], [1], [0, 0, 1, 1], [], []>} : vector<64x8xf32>, vector<8x384xf32>, vector<64x384xf32> -> vector<64x384xf32>
    %c0_3 = arith.constant 0 : index
    %c0_4 = arith.constant 0 : index
    %3 = vector.load %arg4[%c0_3, %c0_4] : memref<1x384xf32, #tpu.memory_space<vmem>>, vector<1x384xf32>
    %4 = vector.broadcast %3 : vector<1x384xf32> to vector<64x384xf32>
    %5 = arith.addf %2, %4 : vector<64x384xf32>
    %c0_5 = arith.constant 0 : index
    %c0_6 = arith.constant 0 : index
    %6 = vector.load %arg17[%c0_5, %c0_6] : memref<64x384xf32, #tpu.memory_space<vmem>>, vector<64x384xf32>
    tpu.vector_store %arg17[%c0_5, %c0_6], %5 {strides = array<i32>} : memref<64x384xf32, #tpu.memory_space<vmem>>, vector<64x384xf32>,
    %c0_7 = arith.constant 0 : index
    %c0_8 = arith.constant 0 : index
    %7 = vector.load %arg1[%c0_7, %c0_8] : memref<32x8xf32, #tpu.memory_space<vmem>>, vector<32x8xf32>
    %c0_9 = arith.constant 0 : index
    %c0_10 = arith.constant 0 : index
    %8 = vector.load %arg3[%c0_9, %c0_10] : memref<8x384xf32, #tpu.memory_space<vmem>>, vector<8x384xf32>
    %cst_11 = arith.constant dense<0.000000e+00> : vector<32x384xf32>
    %9 = tpu.matmul %7, %8, %cst_11 {dimension_numbers = #tpu.dot_dimension_numbers<[1], [0], [0], [1], [0, 0, 1, 1], [], []>} : vector<32x8xf32>, vector<8x384xf32>, vector<32x384xf32> -> vector<32x384xf32>
    %c0_12 = arith.constant 0 : index
    %c0_13 = arith.constant 0 : index
    %10 = vector.load %arg4[%c0_12, %c0_13] : memref<1x384xf32, #tpu.memory_space<vmem>>, vector<1x384xf32>
    %11 = vector.broadcast %10 : vector<1x384xf32> to vector<32x384xf32>
    %12 = arith.addf %9, %11 : vector<32x384xf32>
    %c0_14 = arith.constant 0 : index
    %c0_15 = arith.constant 0 : index
    %13 = vector.load %arg18[%c0_14, %c0_15] : memref<32x384xf32, #tpu.memory_space<vmem>>, vector<32x384xf32>
    tpu.vector_store %arg18[%c0_14, %c0_15], %12 {strides = array<i32>} : memref<32x384xf32, #tpu.memory_space<vmem>>, vector<32x384xf32>,
    %c0_16 = arith.constant 0 : index
    %c0_17 = arith.constant 0 : index
    %14 = vector.load %arg6[%c0_16, %c0_17] : memref<1x128xf32, #tpu.memory_space<vmem>>, vector<1x128xf32>
    %15 = vector.shape_cast %14 : vector<1x128xf32> to vector<1x128xf32>
    %16 = vector.broadcast %15 : vector<1x128xf32> to vector<8x128xf32>
    %c0_18 = arith.constant 0 : index
    %c0_19 = arith.constant 0 : index
    %17 = vector.load %arg11[%c0_18, %c0_19] : memref<1x384xf32, #tpu.memory_space<vmem>>, vector<1x384xf32>
    %18 = vector.shape_cast %17 : vector<1x384xf32> to vector<1x384xf32>
    %19 = vector.broadcast %18 : vector<1x384xf32> to vector<8x384xf32>
    %c0_20 = arith.constant 0 : index
    %c0_21 = arith.constant 0 : index
    %20 = vector.load %arg13[%c0_20, %c0_21] : memref<1x128xf32, #tpu.memory_space<vmem>>, vector<1x128xf32>
    %21 = vector.shape_cast %20 : vector<1x128xf32> to vector<1x128xf32>
    %22 = vector.broadcast %21 : vector<1x128xf32> to vector<8x128xf32>
    %c0_22 = arith.constant 0 : index
    %c0_23 = arith.constant 0 : index
    %23 = vector.load %arg9[%c0_22, %c0_23] : memref<1x384xf32, #tpu.memory_space<vmem>>, vector<1x384xf32>
    %24 = vector.shape_cast %23 : vector<1x384xf32> to vector<1x384xf32>
    %25 = vector.broadcast %24 : vector<1x384xf32> to vector<8x384xf32>
    %cst_24 = arith.constant 0.000000e+00 : f32
    %26 = vector.broadcast %cst_24 : f32 to vector<8x128xf32>
    %cst_25 = arith.constant 0.000000e+00 : f32
    %27 = vector.broadcast %cst_25 : f32 to vector<8x128xf32>
    %c0_i32 = arith.constant 0 : i32
    %c8_i32 = arith.constant 8 : i32
    %28 = arith.muli %c0_i32, %c8_i32 : i32
    %29 = tpu.assume_multiple %28, 8 : i32
    %30 = arith.index_cast %29 : i32 to index
    %c0_26 = arith.constant 0 : index
    %31 = vector.load %arg17[%30, %c0_26] : memref<64x384xf32, #tpu.memory_space<vmem>>, vector<8x384xf32>
    %c0_27 = arith.constant 0 : index
    %c0_28 = arith.constant 0 : index
    %32 = vector.load %arg5[%c0_27, %c0_28] : memref<128x384xf32, #tpu.memory_space<vmem>>, vector<128x384xf32>
    %cst_29 = arith.constant dense<0.000000e+00> : vector<8x384xf32>
    %33 = tpu.matmul %26, %32, %cst_29 {dimension_numbers = #tpu.dot_dimension_numbers<[1], [0], [0], [1], [0, 0, 1, 1], [], []>} : vector<8x128xf32>, vector<128x384xf32>, vector<8x384xf32> -> vector<8x384xf32>
    %34 = vector.extract_strided_slice %31 {offsets = [0, 0], sizes = [8, 128], strides = [1, 1]} : vector<8x384xf32> to vector<8x128xf32>
    %35 = vector.extract_strided_slice %33 {offsets = [0, 0], sizes = [8, 128], strides = [1, 1]} : vector<8x384xf32> to vector<8x128xf32>
    %36 = arith.addf %34, %35 : vector<8x128xf32>
    %37 = arith.negf %36 : vector<8x128xf32>
    %38 = math.exp %37 : vector<8x128xf32>
    %cst_30 = arith.constant 1.000000e+00 : f32
    %39 = vector.broadcast %cst_30 : f32 to vector<8x128xf32>
    %40 = arith.addf %39, %38 : vector<8x128xf32>
    %41 = arith.divf %39, %40 : vector<8x128xf32>
    %42 = vector.extract_strided_slice %31 {offsets = [0, 128], sizes = [8, 128], strides = [1, 1]} : vector<8x384xf32> to vector<8x128xf32>
    %43 = vector.extract_strided_slice %33 {offsets = [0, 128], sizes = [8, 128], strides = [1, 1]} : vector<8x384xf32> to vector<8x128xf32>
    %44 = arith.addf %42, %43 : vector<8x128xf32>
    %45 = arith.negf %44 : vector<8x128xf32>
    %46 = math.exp %45 : vector<8x128xf32>
    %cst_31 = arith.constant 1.000000e+00 : f32
    %47 = vector.broadcast %cst_31 : f32 to vector<8x128xf32>
    %48 = arith.addf %47, %46 : vector<8x128xf32>
    %49 = arith.divf %47, %48 : vector<8x128xf32>
    %50 = vector.extract_strided_slice %31 {offsets = [0, 256], sizes = [8, 128], strides = [1, 1]} : vector<8x384xf32> to vector<8x128xf32>
    %51 = vector.extract_strided_slice %33 {offsets = [0, 256], sizes = [8, 128], strides = [1, 1]} : vector<8x384xf32> to vector<8x128xf32>
    %52 = arith.addf %51, %16 : vector<8x128xf32>
    %53 = arith.mulf %41, %52 : vector<8x128xf32>
    %54 = arith.addf %50, %53 : vector<8x128xf32>
    %55 = math.tanh %54 : vector<8x128xf32>
    %cst_32 = arith.constant 1.000000e+00 : f32
    %56 = vector.broadcast %cst_32 : f32 to vector<8x128xf32>
    %57 = arith.subf %56, %49 : vector<8x128xf32>
    %58 = arith.mulf %57, %55 : vector<8x128xf32>
    %59 = arith.mulf %49, %26 : vector<8x128xf32>
    %60 = arith.addf %58, %59 : vector<8x128xf32>
    %c0_33 = arith.constant 0 : index
    %c0_34 = arith.constant 0 : index
    %61 = vector.load %arg10[%c0_33, %c0_34] : memref<128x384xf32, #tpu.memory_space<vmem>>, vector<128x384xf32>
    %cst_35 = arith.constant dense<0.000000e+00> : vector<8x384xf32>
    %62 = tpu.matmul %60, %61, %cst_35 {dimension_numbers = #tpu.dot_dimension_numbers<[1], [0], [0], [1], [0, 0, 1, 1], [], []>} : vector<8x128xf32>, vector<128x384xf32>, vector<8x384xf32> -> vector<8x384xf32>
    %63 = arith.addf %62, %19 : vector<8x384xf32>
    %c0_36 = arith.constant 0 : index
    %c0_37 = arith.constant 0 : index
    %64 = vector.load %arg12[%c0_36, %c0_37] : memref<128x384xf32, #tpu.memory_space<vmem>>, vector<128x384xf32>
    %cst_38 = arith.constant dense<0.000000e+00> : vector<8x384xf32>
    %65 = tpu.matmul %27, %64, %cst_38 {dimension_numbers = #tpu.dot_dimension_numbers<[1], [0], [0], [1], [0, 0, 1, 1], [], []>} : vector<8x128xf32>, vector<128x384xf32>, vector<8x384xf32> -> vector<8x384xf32>
    %66 = vector.extract_strided_slice %63 {offsets = [0, 0], sizes = [8, 128], strides = [1, 1]} : vector<8x384xf32> to vector<8x128xf32>
    %67 = vector.extract_strided_slice %65 {offsets = [0, 0], sizes = [8, 128], strides = [1, 1]} : vector<8x384xf32> to vector<8x128xf32>
    %68 = arith.addf %66, %67 : vector<8x128xf32>
    %69 = arith.negf %68 : vector<8x128xf32>
    %70 = math.exp %69 : vector<8x128xf32>
    %cst_39 = arith.constant 1.000000e+00 : f32
    %71 = vector.broadcast %cst_39 : f32 to vector<8x128xf32>
    %72 = arith.addf %71, %70 : vector<8x128xf32>
    %73 = arith.divf %71, %72 : vector<8x128xf32>
    %74 = vector.extract_strided_slice %63 {offsets = [0, 128], sizes = [8, 128], strides = [1, 1]} : vector<8x384xf32> to vector<8x128xf32>
    %75 = vector.extract_strided_slice %65 {offsets = [0, 128], sizes = [8, 128], strides = [1, 1]} : vector<8x384xf32> to vector<8x128xf32>
    %76 = arith.addf %74, %75 : vector<8x128xf32>
    %77 = arith.negf %76 : vector<8x128xf32>
    %78 = math.exp %77 : vector<8x128xf32>
    %cst_40 = arith.constant 1.000000e+00 : f32
    %79 = vector.broadcast %cst_40 : f32 to vector<8x128xf32>
    %80 = arith.addf %79, %78 : vector<8x128xf32>
    %81 = arith.divf %79, %80 : vector<8x128xf32>
    %82 = vector.extract_strided_slice %63 {offsets = [0, 256], sizes = [8, 128], strides = [1, 1]} : vector<8x384xf32> to vector<8x128xf32>
    %83 = vector.extract_strided_slice %65 {offsets = [0, 256], sizes = [8, 128], strides = [1, 1]} : vector<8x384xf32> to vector<8x128xf32>
    %84 = arith.addf %83, %22 : vector<8x128xf32>
    %85 = arith.mulf %73, %84 : vector<8x128xf32>
    %86 = arith.addf %82, %85 : vector<8x128xf32>
    %87 = math.tanh %86 : vector<8x128xf32>
    %cst_41 = arith.constant 1.000000e+00 : f32
    %88 = vector.broadcast %cst_41 : f32 to vector<8x128xf32>
    %89 = arith.subf %88, %81 : vector<8x128xf32>
    %90 = arith.mulf %89, %87 : vector<8x128xf32>
    %91 = arith.mulf %81, %27 : vector<8x128xf32>
    %92 = arith.addf %90, %91 : vector<8x128xf32>
    %c1_i32 = arith.constant 1 : i32
    %c8_i32_42 = arith.constant 8 : i32
    %93 = arith.muli %c1_i32, %c8_i32_42 : i32
    %94 = tpu.assume_multiple %93, 8 : i32
    %95 = arith.index_cast %94 : i32 to index
    %c0_43 = arith.constant 0 : index
    %96 = vector.load %arg17[%95, %c0_43] : memref<64x384xf32, #tpu.memory_space<vmem>>, vector<8x384xf32>
    %c0_44 = arith.constant 0 : index
    %c0_45 = arith.constant 0 : index
    %97 = vector.load %arg5[%c0_44, %c0_45] : memref<128x384xf32, #tpu.memory_space<vmem>>, vector<128x384xf32>
    %cst_46 = arith.constant dense<0.000000e+00> : vector<8x384xf32>
    %98 = tpu.matmul %60, %97, %cst_46 {dimension_numbers = #tpu.dot_dimension_numbers<[1], [0], [0], [1], [0, 0, 1, 1], [], []>} : vector<8x128xf32>, vector<128x384xf32>, vector<8x384xf32> -> vector<8x384xf32>
    %99 = vector.extract_strided_slice %96 {offsets = [0, 0], sizes = [8, 128], strides = [1, 1]} : vector<8x384xf32> to vector<8x128xf32>
    %100 = vector.extract_strided_slice %98 {offsets = [0, 0], sizes = [8, 128], strides = [1, 1]} : vector<8x384xf32> to vector<8x128xf32>
    %101 = arith.addf %99, %100 : vector<8x128xf32>
    %102 = arith.negf %101 : vector<8x128xf32>
    %103 = math.exp %102 : vector<8x128xf32>
    %cst_47 = arith.constant 1.000000e+00 : f32
    %104 = vector.broadcast %cst_47 : f32 to vector<8x128xf32>
    %105 = arith.addf %104, %103 : vector<8x128xf32>
    %106 = arith.divf %104, %105 : vector<8x128xf32>
    %107 = vector.extract_strided_slice %96 {offsets = [0, 128], sizes = [8, 128], strides = [1, 1]} : vector<8x384xf32> to vector<8x128xf32>
    %108 = vector.extract_strided_slice %98 {offsets = [0, 128], sizes = [8, 128], strides = [1, 1]} : vector<8x384xf32> to vector<8x128xf32>
    %109 = arith.addf %107, %108 : vector<8x128xf32>
    %110 = arith.negf %109 : vector<8x128xf32>
    %111 = math.exp %110 : vector<8x128xf32>
    %cst_48 = arith.constant 1.000000e+00 : f32
    %112 = vector.broadcast %cst_48 : f32 to vector<8x128xf32>
    %113 = arith.addf %112, %111 : vector<8x128xf32>
    %114 = arith.divf %112, %113 : vector<8x128xf32>
    %115 = vector.extract_strided_slice %96 {offsets = [0, 256], sizes = [8, 128], strides = [1, 1]} : vector<8x384xf32> to vector<8x128xf32>
    %116 = vector.extract_strided_slice %98 {offsets = [0, 256], sizes = [8, 128], strides = [1, 1]} : vector<8x384xf32> to vector<8x128xf32>
    %117 = arith.addf %116, %16 : vector<8x128xf32>
    %118 = arith.mulf %106, %117 : vector<8x128xf32>
    %119 = arith.addf %115, %118 : vector<8x128xf32>
    %120 = math.tanh %119 : vector<8x128xf32>
    %cst_49 = arith.constant 1.000000e+00 : f32
    %121 = vector.broadcast %cst_49 : f32 to vector<8x128xf32>
    %122 = arith.subf %121, %114 : vector<8x128xf32>
    %123 = arith.mulf %122, %120 : vector<8x128xf32>
    %124 = arith.mulf %114, %60 : vector<8x128xf32>
    %125 = arith.addf %123, %124 : vector<8x128xf32>
    %c0_50 = arith.constant 0 : index
    %c0_51 = arith.constant 0 : index
    %126 = vector.load %arg10[%c0_50, %c0_51] : memref<128x384xf32, #tpu.memory_space<vmem>>, vector<128x384xf32>
    %cst_52 = arith.constant dense<0.000000e+00> : vector<8x384xf32>
    %127 = tpu.matmul %125, %126, %cst_52 {dimension_numbers = #tpu.dot_dimension_numbers<[1], [0], [0], [1], [0, 0, 1, 1], [], []>} : vector<8x128xf32>, vector<128x384xf32>, vector<8x384xf32> -> vector<8x384xf32>
    %128 = arith.addf %127, %19 : vector<8x384xf32>
    %c0_53 = arith.constant 0 : index
    %c0_54 = arith.constant 0 : index
    %129 = vector.load %arg12[%c0_53, %c0_54] : memref<128x384xf32, #tpu.memory_space<vmem>>, vector<128x384xf32>
    %cst_55 = arith.constant dense<0.000000e+00> : vector<8x384xf32>
    %130 = tpu.matmul %92, %129, %cst_55 {dimension_numbers = #tpu.dot_dimension_numbers<[1], [0], [0], [1], [0, 0, 1, 1], [], []>} : vector<8x128xf32>, vector<128x384xf32>, vector<8x384xf32> -> vector<8x384xf32>
    %131 = vector.extract_strided_slice %128 {offsets = [0, 0], sizes = [8, 128], strides = [1, 1]} : vector<8x384xf32> to vector<8x128xf32>
    %132 = vector.extract_strided_slice %130 {offsets = [0, 0], sizes = [8, 128], strides = [1, 1]} : vector<8x384xf32> to vector<8x128xf32>
    %133 = arith.addf %131, %132 : vector<8x128xf32>
    %134 = arith.negf %133 : vector<8x128xf32>
    %135 = math.exp %134 : vector<8x128xf32>
    %cst_56 = arith.constant 1.000000e+00 : f32
    %136 = vector.broadcast %cst_56 : f32 to vector<8x128xf32>
    %137 = arith.addf %136, %135 : vector<8x128xf32>
    %138 = arith.divf %136, %137 : vector<8x128xf32>
    %139 = vector.extract_strided_slice %128 {offsets = [0, 128], sizes = [8, 128], strides = [1, 1]} : vector<8x384xf32> to vector<8x128xf32>
    %140 = vector.extract_strided_slice %130 {offsets = [0, 128], sizes = [8, 128], strides = [1, 1]} : vector<8x384xf32> to vector<8x128xf32>
    %141 = arith.addf %139, %140 : vector<8x128xf32>
    %142 = arith.negf %141 : vector<8x128xf32>
    %143 = math.exp %142 : vector<8x128xf32>
    %cst_57 = arith.constant 1.000000e+00 : f32
    %144 = vector.broadcast %cst_57 : f32 to vector<8x128xf32>
    %145 = arith.addf %144, %143 : vector<8x128xf32>
    %146 = arith.divf %144, %145 : vector<8x128xf32>
    %147 = vector.extract_strided_slice %128 {offsets = [0, 256], sizes = [8, 128], strides = [1, 1]} : vector<8x384xf32> to vector<8x128xf32>
    %148 = vector.extract_strided_slice %130 {offsets = [0, 256], sizes = [8, 128], strides = [1, 1]} : vector<8x384xf32> to vector<8x128xf32>
    %149 = arith.addf %148, %22 : vector<8x128xf32>
    %150 = arith.mulf %138, %149 : vector<8x128xf32>
    %151 = arith.addf %147, %150 : vector<8x128xf32>
    %152 = math.tanh %151 : vector<8x128xf32>
    %cst_58 = arith.constant 1.000000e+00 : f32
    %153 = vector.broadcast %cst_58 : f32 to vector<8x128xf32>
    %154 = arith.subf %153, %146 : vector<8x128xf32>
    %155 = arith.mulf %154, %152 : vector<8x128xf32>
    %156 = arith.mulf %146, %92 : vector<8x128xf32>
    %157 = arith.addf %155, %156 : vector<8x128xf32>
    %c2_i32 = arith.constant 2 : i32
    %c8_i32_59 = arith.constant 8 : i32
    %158 = arith.muli %c2_i32, %c8_i32_59 : i32
    %159 = tpu.assume_multiple %158, 8 : i32
    %160 = arith.index_cast %159 : i32 to index
    %c0_60 = arith.constant 0 : index
    %161 = vector.load %arg17[%160, %c0_60] : memref<64x384xf32, #tpu.memory_space<vmem>>, vector<8x384xf32>
    %c0_61 = arith.constant 0 : index
    %c0_62 = arith.constant 0 : index
    %162 = vector.load %arg5[%c0_61, %c0_62] : memref<128x384xf32, #tpu.memory_space<vmem>>, vector<128x384xf32>
    %cst_63 = arith.constant dense<0.000000e+00> : vector<8x384xf32>
    %163 = tpu.matmul %125, %162, %cst_63 {dimension_numbers = #tpu.dot_dimension_numbers<[1], [0], [0], [1], [0, 0, 1, 1], [], []>} : vector<8x128xf32>, vector<128x384xf32>, vector<8x384xf32> -> vector<8x384xf32>
    %164 = vector.extract_strided_slice %161 {offsets = [0, 0], sizes = [8, 128], strides = [1, 1]} : vector<8x384xf32> to vector<8x128xf32>
    %165 = vector.extract_strided_slice %163 {offsets = [0, 0], sizes = [8, 128], strides = [1, 1]} : vector<8x384xf32> to vector<8x128xf32>
    %166 = arith.addf %164, %165 : vector<8x128xf32>
    %167 = arith.negf %166 : vector<8x128xf32>
    %168 = math.exp %167 : vector<8x128xf32>
    %cst_64 = arith.constant 1.000000e+00 : f32
    %169 = vector.broadcast %cst_64 : f32 to vector<8x128xf32>
    %170 = arith.addf %169, %168 : vector<8x128xf32>
    %171 = arith.divf %169, %170 : vector<8x128xf32>
    %172 = vector.extract_strided_slice %161 {offsets = [0, 128], sizes = [8, 128], strides = [1, 1]} : vector<8x384xf32> to vector<8x128xf32>
    %173 = vector.extract_strided_slice %163 {offsets = [0, 128], sizes = [8, 128], strides = [1, 1]} : vector<8x384xf32> to vector<8x128xf32>
    %174 = arith.addf %172, %173 : vector<8x128xf32>
    %175 = arith.negf %174 : vector<8x128xf32>
    %176 = math.exp %175 : vector<8x128xf32>
    %cst_65 = arith.constant 1.000000e+00 : f32
    %177 = vector.broadcast %cst_65 : f32 to vector<8x128xf32>
    %178 = arith.addf %177, %176 : vector<8x128xf32>
    %179 = arith.divf %177, %178 : vector<8x128xf32>
    %180 = vector.extract_strided_slice %161 {offsets = [0, 256], sizes = [8, 128], strides = [1, 1]} : vector<8x384xf32> to vector<8x128xf32>
    %181 = vector.extract_strided_slice %163 {offsets = [0, 256], sizes = [8, 128], strides = [1, 1]} : vector<8x384xf32> to vector<8x128xf32>
    %182 = arith.addf %181, %16 : vector<8x128xf32>
    %183 = arith.mulf %171, %182 : vector<8x128xf32>
    %184 = arith.addf %180, %183 : vector<8x128xf32>
    %185 = math.tanh %184 : vector<8x128xf32>
    %cst_66 = arith.constant 1.000000e+00 : f32
    %186 = vector.broadcast %cst_66 : f32 to vector<8x128xf32>
    %187 = arith.subf %186, %179 : vector<8x128xf32>
    %188 = arith.mulf %187, %185 : vector<8x128xf32>
    %189 = arith.mulf %179, %125 : vector<8x128xf32>
    %190 = arith.addf %188, %189 : vector<8x128xf32>
    %c0_67 = arith.constant 0 : index
    %c0_68 = arith.constant 0 : index
    %191 = vector.load %arg10[%c0_67, %c0_68] : memref<128x384xf32, #tpu.memory_space<vmem>>, vector<128x384xf32>
    %cst_69 = arith.constant dense<0.000000e+00> : vector<8x384xf32>
    %192 = tpu.matmul %190, %191, %cst_69 {dimension_numbers = #tpu.dot_dimension_numbers<[1], [0], [0], [1], [0, 0, 1, 1], [], []>} : vector<8x128xf32>, vector<128x384xf32>, vector<8x384xf32> -> vector<8x384xf32>
    %193 = arith.addf %192, %19 : vector<8x384xf32>
    %c0_70 = arith.constant 0 : index
    %c0_71 = arith.constant 0 : index
    %194 = vector.load %arg12[%c0_70, %c0_71] : memref<128x384xf32, #tpu.memory_space<vmem>>, vector<128x384xf32>
    %cst_72 = arith.constant dense<0.000000e+00> : vector<8x384xf32>
    %195 = tpu.matmul %157, %194, %cst_72 {dimension_numbers = #tpu.dot_dimension_numbers<[1], [0], [0], [1], [0, 0, 1, 1], [], []>} : vector<8x128xf32>, vector<128x384xf32>, vector<8x384xf32> -> vector<8x384xf32>
    %196 = vector.extract_strided_slice %193 {offsets = [0, 0], sizes = [8, 128], strides = [1, 1]} : vector<8x384xf32> to vector<8x128xf32>
    %197 = vector.extract_strided_slice %195 {offsets = [0, 0], sizes = [8, 128], strides = [1, 1]} : vector<8x384xf32> to vector<8x128xf32>
    %198 = arith.addf %196, %197 : vector<8x128xf32>
    %199 = arith.negf %198 : vector<8x128xf32>
    %200 = math.exp %199 : vector<8x128xf32>
    %cst_73 = arith.constant 1.000000e+00 : f32
    %201 = vector.broadcast %cst_73 : f32 to vector<8x128xf32>
    %202 = arith.addf %201, %200 : vector<8x128xf32>
    %203 = arith.divf %201, %202 : vector<8x128xf32>
    %204 = vector.extract_strided_slice %193 {offsets = [0, 128], sizes = [8, 128], strides = [1, 1]} : vector<8x384xf32> to vector<8x128xf32>
    %205 = vector.extract_strided_slice %195 {offsets = [0, 128], sizes = [8, 128], strides = [1, 1]} : vector<8x384xf32> to vector<8x128xf32>
    %206 = arith.addf %204, %205 : vector<8x128xf32>
    %207 = arith.negf %206 : vector<8x128xf32>
    %208 = math.exp %207 : vector<8x128xf32>
    %cst_74 = arith.constant 1.000000e+00 : f32
    %209 = vector.broadcast %cst_74 : f32 to vector<8x128xf32>
    %210 = arith.addf %209, %208 : vector<8x128xf32>
    %211 = arith.divf %209, %210 : vector<8x128xf32>
    %212 = vector.extract_strided_slice %193 {offsets = [0, 256], sizes = [8, 128], strides = [1, 1]} : vector<8x384xf32> to vector<8x128xf32>
    %213 = vector.extract_strided_slice %195 {offsets = [0, 256], sizes = [8, 128], strides = [1, 1]} : vector<8x384xf32> to vector<8x128xf32>
    %214 = arith.addf %213, %22 : vector<8x128xf32>
    %215 = arith.mulf %203, %214 : vector<8x128xf32>
    %216 = arith.addf %212, %215 : vector<8x128xf32>
    %217 = math.tanh %216 : vector<8x128xf32>
    %cst_75 = arith.constant 1.000000e+00 : f32
    %218 = vector.broadcast %cst_75 : f32 to vector<8x128xf32>
    %219 = arith.subf %218, %211 : vector<8x128xf32>
    %220 = arith.mulf %219, %217 : vector<8x128xf32>
    %221 = arith.mulf %211, %157 : vector<8x128xf32>
    %222 = arith.addf %220, %221 : vector<8x128xf32>
    %c3_i32 = arith.constant 3 : i32
    %c8_i32_76 = arith.constant 8 : i32
    %223 = arith.muli %c3_i32, %c8_i32_76 : i32
    %224 = tpu.assume_multiple %223, 8 : i32
    %225 = arith.index_cast %224 : i32 to index
    %c0_77 = arith.constant 0 : index
    %226 = vector.load %arg17[%225, %c0_77] : memref<64x384xf32, #tpu.memory_space<vmem>>, vector<8x384xf32>
    %c0_78 = arith.constant 0 : index
    %c0_79 = arith.constant 0 : index
    %227 = vector.load %arg5[%c0_78, %c0_79] : memref<128x384xf32, #tpu.memory_space<vmem>>, vector<128x384xf32>
    %cst_80 = arith.constant dense<0.000000e+00> : vector<8x384xf32>
    %228 = tpu.matmul %190, %227, %cst_80 {dimension_numbers = #tpu.dot_dimension_numbers<[1], [0], [0], [1], [0, 0, 1, 1], [], []>} : vector<8x128xf32>, vector<128x384xf32>, vector<8x384xf32> -> vector<8x384xf32>
    %229 = vector.extract_strided_slice %226 {offsets = [0, 0], sizes = [8, 128], strides = [1, 1]} : vector<8x384xf32> to vector<8x128xf32>
    %230 = vector.extract_strided_slice %228 {offsets = [0, 0], sizes = [8, 128], strides = [1, 1]} : vector<8x384xf32> to vector<8x128xf32>
    %231 = arith.addf %229, %230 : vector<8x128xf32>
    %232 = arith.negf %231 : vector<8x128xf32>
    %233 = math.exp %232 : vector<8x128xf32>
    %cst_81 = arith.constant 1.000000e+00 : f32
    %234 = vector.broadcast %cst_81 : f32 to vector<8x128xf32>
    %235 = arith.addf %234, %233 : vector<8x128xf32>
    %236 = arith.divf %234, %235 : vector<8x128xf32>
    %237 = vector.extract_strided_slice %226 {offsets = [0, 128], sizes = [8, 128], strides = [1, 1]} : vector<8x384xf32> to vector<8x128xf32>
    %238 = vector.extract_strided_slice %228 {offsets = [0, 128], sizes = [8, 128], strides = [1, 1]} : vector<8x384xf32> to vector<8x128xf32>
    %239 = arith.addf %237, %238 : vector<8x128xf32>
    %240 = arith.negf %239 : vector<8x128xf32>
    %241 = math.exp %240 : vector<8x128xf32>
    %cst_82 = arith.constant 1.000000e+00 : f32
    %242 = vector.broadcast %cst_82 : f32 to vector<8x128xf32>
    %243 = arith.addf %242, %241 : vector<8x128xf32>
    %244 = arith.divf %242, %243 : vector<8x128xf32>
    %245 = vector.extract_strided_slice %226 {offsets = [0, 256], sizes = [8, 128], strides = [1, 1]} : vector<8x384xf32> to vector<8x128xf32>
    %246 = vector.extract_strided_slice %228 {offsets = [0, 256], sizes = [8, 128], strides = [1, 1]} : vector<8x384xf32> to vector<8x128xf32>
    %247 = arith.addf %246, %16 : vector<8x128xf32>
    %248 = arith.mulf %236, %247 : vector<8x128xf32>
    %249 = arith.addf %245, %248 : vector<8x128xf32>
    %250 = math.tanh %249 : vector<8x128xf32>
    %cst_83 = arith.constant 1.000000e+00 : f32
    %251 = vector.broadcast %cst_83 : f32 to vector<8x128xf32>
    %252 = arith.subf %251, %244 : vector<8x128xf32>
    %253 = arith.mulf %252, %250 : vector<8x128xf32>
    %254 = arith.mulf %244, %190 : vector<8x128xf32>
    %255 = arith.addf %253, %254 : vector<8x128xf32>
    %c0_84 = arith.constant 0 : index
    %c0_85 = arith.constant 0 : index
    %256 = vector.load %arg10[%c0_84, %c0_85] : memref<128x384xf32, #tpu.memory_space<vmem>>, vector<128x384xf32>
    %cst_86 = arith.constant dense<0.000000e+00> : vector<8x384xf32>
    %257 = tpu.matmul %255, %256, %cst_86 {dimension_numbers = #tpu.dot_dimension_numbers<[1], [0], [0], [1], [0, 0, 1, 1], [], []>} : vector<8x128xf32>, vector<128x384xf32>, vector<8x384xf32> -> vector<8x384xf32>
    %258 = arith.addf %257, %19 : vector<8x384xf32>
    %c0_87 = arith.constant 0 : index
    %c0_88 = arith.constant 0 : index
    %259 = vector.load %arg12[%c0_87, %c0_88] : memref<128x384xf32, #tpu.memory_space<vmem>>, vector<128x384xf32>
    %cst_89 = arith.constant dense<0.000000e+00> : vector<8x384xf32>
    %260 = tpu.matmul %222, %259, %cst_89 {dimension_numbers = #tpu.dot_dimension_numbers<[1], [0], [0], [1], [0, 0, 1, 1], [], []>} : vector<8x128xf32>, vector<128x384xf32>, vector<8x384xf32> -> vector<8x384xf32>
    %261 = vector.extract_strided_slice %258 {offsets = [0, 0], sizes = [8, 128], strides = [1, 1]} : vector<8x384xf32> to vector<8x128xf32>
    %262 = vector.extract_strided_slice %260 {offsets = [0, 0], sizes = [8, 128], strides = [1, 1]} : vector<8x384xf32> to vector<8x128xf32>
    %263 = arith.addf %261, %262 : vector<8x128xf32>
    %264 = arith.negf %263 : vector<8x128xf32>
    %265 = math.exp %264 : vector<8x128xf32>
    %cst_90 = arith.constant 1.000000e+00 : f32
    %266 = vector.broadcast %cst_90 : f32 to vector<8x128xf32>
    %267 = arith.addf %266, %265 : vector<8x128xf32>
    %268 = arith.divf %266, %267 : vector<8x128xf32>
    %269 = vector.extract_strided_slice %258 {offsets = [0, 128], sizes = [8, 128], strides = [1, 1]} : vector<8x384xf32> to vector<8x128xf32>
    %270 = vector.extract_strided_slice %260 {offsets = [0, 128], sizes = [8, 128], strides = [1, 1]} : vector<8x384xf32> to vector<8x128xf32>
    %271 = arith.addf %269, %270 : vector<8x128xf32>
    %272 = arith.negf %271 : vector<8x128xf32>
    %273 = math.exp %272 : vector<8x128xf32>
    %cst_91 = arith.constant 1.000000e+00 : f32
    %274 = vector.broadcast %cst_91 : f32 to vector<8x128xf32>
    %275 = arith.addf %274, %273 : vector<8x128xf32>
    %276 = arith.divf %274, %275 : vector<8x128xf32>
    %277 = vector.extract_strided_slice %258 {offsets = [0, 256], sizes = [8, 128], strides = [1, 1]} : vector<8x384xf32> to vector<8x128xf32>
    %278 = vector.extract_strided_slice %260 {offsets = [0, 256], sizes = [8, 128], strides = [1, 1]} : vector<8x384xf32> to vector<8x128xf32>
    %279 = arith.addf %278, %22 : vector<8x128xf32>
    %280 = arith.mulf %268, %279 : vector<8x128xf32>
    %281 = arith.addf %277, %280 : vector<8x128xf32>
    %282 = math.tanh %281 : vector<8x128xf32>
    %cst_92 = arith.constant 1.000000e+00 : f32
    %283 = vector.broadcast %cst_92 : f32 to vector<8x128xf32>
    %284 = arith.subf %283, %276 : vector<8x128xf32>
    %285 = arith.mulf %284, %282 : vector<8x128xf32>
    %286 = arith.mulf %276, %222 : vector<8x128xf32>
    %287 = arith.addf %285, %286 : vector<8x128xf32>
    %c4_i32 = arith.constant 4 : i32
    %c8_i32_93 = arith.constant 8 : i32
    %288 = arith.muli %c4_i32, %c8_i32_93 : i32
    %289 = tpu.assume_multiple %288, 8 : i32
    %290 = arith.index_cast %289 : i32 to index
    %c0_94 = arith.constant 0 : index
    %291 = vector.load %arg17[%290, %c0_94] : memref<64x384xf32, #tpu.memory_space<vmem>>, vector<8x384xf32>
    %c0_95 = arith.constant 0 : index
    %c0_96 = arith.constant 0 : index
    %292 = vector.load %arg5[%c0_95, %c0_96] : memref<128x384xf32, #tpu.memory_space<vmem>>, vector<128x384xf32>
    %cst_97 = arith.constant dense<0.000000e+00> : vector<8x384xf32>
    %293 = tpu.matmul %255, %292, %cst_97 {dimension_numbers = #tpu.dot_dimension_numbers<[1], [0], [0], [1], [0, 0, 1, 1], [], []>} : vector<8x128xf32>, vector<128x384xf32>, vector<8x384xf32> -> vector<8x384xf32>
    %294 = vector.extract_strided_slice %291 {offsets = [0, 0], sizes = [8, 128], strides = [1, 1]} : vector<8x384xf32> to vector<8x128xf32>
    %295 = vector.extract_strided_slice %293 {offsets = [0, 0], sizes = [8, 128], strides = [1, 1]} : vector<8x384xf32> to vector<8x128xf32>
    %296 = arith.addf %294, %295 : vector<8x128xf32>
    %297 = arith.negf %296 : vector<8x128xf32>
    %298 = math.exp %297 : vector<8x128xf32>
    %cst_98 = arith.constant 1.000000e+00 : f32
    %299 = vector.broadcast %cst_98 : f32 to vector<8x128xf32>
    %300 = arith.addf %299, %298 : vector<8x128xf32>
    %301 = arith.divf %299, %300 : vector<8x128xf32>
    %302 = vector.extract_strided_slice %291 {offsets = [0, 128], sizes = [8, 128], strides = [1, 1]} : vector<8x384xf32> to vector<8x128xf32>
    %303 = vector.extract_strided_slice %293 {offsets = [0, 128], sizes = [8, 128], strides = [1, 1]} : vector<8x384xf32> to vector<8x128xf32>
    %304 = arith.addf %302, %303 : vector<8x128xf32>
    %305 = arith.negf %304 : vector<8x128xf32>
    %306 = math.exp %305 : vector<8x128xf32>
    %cst_99 = arith.constant 1.000000e+00 : f32
    %307 = vector.broadcast %cst_99 : f32 to vector<8x128xf32>
    %308 = arith.addf %307, %306 : vector<8x128xf32>
    %309 = arith.divf %307, %308 : vector<8x128xf32>
    %310 = vector.extract_strided_slice %291 {offsets = [0, 256], sizes = [8, 128], strides = [1, 1]} : vector<8x384xf32> to vector<8x128xf32>
    %311 = vector.extract_strided_slice %293 {offsets = [0, 256], sizes = [8, 128], strides = [1, 1]} : vector<8x384xf32> to vector<8x128xf32>
    %312 = arith.addf %311, %16 : vector<8x128xf32>
    %313 = arith.mulf %301, %312 : vector<8x128xf32>
    %314 = arith.addf %310, %313 : vector<8x128xf32>
    %315 = math.tanh %314 : vector<8x128xf32>
    %cst_100 = arith.constant 1.000000e+00 : f32
    %316 = vector.broadcast %cst_100 : f32 to vector<8x128xf32>
    %317 = arith.subf %316, %309 : vector<8x128xf32>
    %318 = arith.mulf %317, %315 : vector<8x128xf32>
    %319 = arith.mulf %309, %255 : vector<8x128xf32>
    %320 = arith.addf %318, %319 : vector<8x128xf32>
    %c0_101 = arith.constant 0 : index
    %c0_102 = arith.constant 0 : index
    %321 = vector.load %arg10[%c0_101, %c0_102] : memref<128x384xf32, #tpu.memory_space<vmem>>, vector<128x384xf32>
    %cst_103 = arith.constant dense<0.000000e+00> : vector<8x384xf32>
    %322 = tpu.matmul %320, %321, %cst_103 {dimension_numbers = #tpu.dot_dimension_numbers<[1], [0], [0], [1], [0, 0, 1, 1], [], []>} : vector<8x128xf32>, vector<128x384xf32>, vector<8x384xf32> -> vector<8x384xf32>
    %323 = arith.addf %322, %19 : vector<8x384xf32>
    %c0_104 = arith.constant 0 : index
    %c0_105 = arith.constant 0 : index
    %324 = vector.load %arg12[%c0_104, %c0_105] : memref<128x384xf32, #tpu.memory_space<vmem>>, vector<128x384xf32>
    %cst_106 = arith.constant dense<0.000000e+00> : vector<8x384xf32>
    %325 = tpu.matmul %287, %324, %cst_106 {dimension_numbers = #tpu.dot_dimension_numbers<[1], [0], [0], [1], [0, 0, 1, 1], [], []>} : vector<8x128xf32>, vector<128x384xf32>, vector<8x384xf32> -> vector<8x384xf32>
    %326 = vector.extract_strided_slice %323 {offsets = [0, 0], sizes = [8, 128], strides = [1, 1]} : vector<8x384xf32> to vector<8x128xf32>
    %327 = vector.extract_strided_slice %325 {offsets = [0, 0], sizes = [8, 128], strides = [1, 1]} : vector<8x384xf32> to vector<8x128xf32>
    %328 = arith.addf %326, %327 : vector<8x128xf32>
    %329 = arith.negf %328 : vector<8x128xf32>
    %330 = math.exp %329 : vector<8x128xf32>
    %cst_107 = arith.constant 1.000000e+00 : f32
    %331 = vector.broadcast %cst_107 : f32 to vector<8x128xf32>
    %332 = arith.addf %331, %330 : vector<8x128xf32>
    %333 = arith.divf %331, %332 : vector<8x128xf32>
    %334 = vector.extract_strided_slice %323 {offsets = [0, 128], sizes = [8, 128], strides = [1, 1]} : vector<8x384xf32> to vector<8x128xf32>
    %335 = vector.extract_strided_slice %325 {offsets = [0, 128], sizes = [8, 128], strides = [1, 1]} : vector<8x384xf32> to vector<8x128xf32>
    %336 = arith.addf %334, %335 : vector<8x128xf32>
    %337 = arith.negf %336 : vector<8x128xf32>
    %338 = math.exp %337 : vector<8x128xf32>
    %cst_108 = arith.constant 1.000000e+00 : f32
    %339 = vector.broadcast %cst_108 : f32 to vector<8x128xf32>
    %340 = arith.addf %339, %338 : vector<8x128xf32>
    %341 = arith.divf %339, %340 : vector<8x128xf32>
    %342 = vector.extract_strided_slice %323 {offsets = [0, 256], sizes = [8, 128], strides = [1, 1]} : vector<8x384xf32> to vector<8x128xf32>
    %343 = vector.extract_strided_slice %325 {offsets = [0, 256], sizes = [8, 128], strides = [1, 1]} : vector<8x384xf32> to vector<8x128xf32>
    %344 = arith.addf %343, %22 : vector<8x128xf32>
    %345 = arith.mulf %333, %344 : vector<8x128xf32>
    %346 = arith.addf %342, %345 : vector<8x128xf32>
    %347 = math.tanh %346 : vector<8x128xf32>
    %cst_109 = arith.constant 1.000000e+00 : f32
    %348 = vector.broadcast %cst_109 : f32 to vector<8x128xf32>
    %349 = arith.subf %348, %341 : vector<8x128xf32>
    %350 = arith.mulf %349, %347 : vector<8x128xf32>
    %351 = arith.mulf %341, %287 : vector<8x128xf32>
    %352 = arith.addf %350, %351 : vector<8x128xf32>
    %c5_i32 = arith.constant 5 : i32
    %c8_i32_110 = arith.constant 8 : i32
    %353 = arith.muli %c5_i32, %c8_i32_110 : i32
    %354 = tpu.assume_multiple %353, 8 : i32
    %355 = arith.index_cast %354 : i32 to index
    %c0_111 = arith.constant 0 : index
    %356 = vector.load %arg17[%355, %c0_111] : memref<64x384xf32, #tpu.memory_space<vmem>>, vector<8x384xf32>
    %c0_112 = arith.constant 0 : index
    %c0_113 = arith.constant 0 : index
    %357 = vector.load %arg5[%c0_112, %c0_113] : memref<128x384xf32, #tpu.memory_space<vmem>>, vector<128x384xf32>
    %cst_114 = arith.constant dense<0.000000e+00> : vector<8x384xf32>
    %358 = tpu.matmul %320, %357, %cst_114 {dimension_numbers = #tpu.dot_dimension_numbers<[1], [0], [0], [1], [0, 0, 1, 1], [], []>} : vector<8x128xf32>, vector<128x384xf32>, vector<8x384xf32> -> vector<8x384xf32>
    %359 = vector.extract_strided_slice %356 {offsets = [0, 0], sizes = [8, 128], strides = [1, 1]} : vector<8x384xf32> to vector<8x128xf32>
    %360 = vector.extract_strided_slice %358 {offsets = [0, 0], sizes = [8, 128], strides = [1, 1]} : vector<8x384xf32> to vector<8x128xf32>
    %361 = arith.addf %359, %360 : vector<8x128xf32>
    %362 = arith.negf %361 : vector<8x128xf32>
    %363 = math.exp %362 : vector<8x128xf32>
    %cst_115 = arith.constant 1.000000e+00 : f32
    %364 = vector.broadcast %cst_115 : f32 to vector<8x128xf32>
    %365 = arith.addf %364, %363 : vector<8x128xf32>
    %366 = arith.divf %364, %365 : vector<8x128xf32>
    %367 = vector.extract_strided_slice %356 {offsets = [0, 128], sizes = [8, 128], strides = [1, 1]} : vector<8x384xf32> to vector<8x128xf32>
    %368 = vector.extract_strided_slice %358 {offsets = [0, 128], sizes = [8, 128], strides = [1, 1]} : vector<8x384xf32> to vector<8x128xf32>
    %369 = arith.addf %367, %368 : vector<8x128xf32>
    %370 = arith.negf %369 : vector<8x128xf32>
    %371 = math.exp %370 : vector<8x128xf32>
    %cst_116 = arith.constant 1.000000e+00 : f32
    %372 = vector.broadcast %cst_116 : f32 to vector<8x128xf32>
    %373 = arith.addf %372, %371 : vector<8x128xf32>
    %374 = arith.divf %372, %373 : vector<8x128xf32>
    %375 = vector.extract_strided_slice %356 {offsets = [0, 256], sizes = [8, 128], strides = [1, 1]} : vector<8x384xf32> to vector<8x128xf32>
    %376 = vector.extract_strided_slice %358 {offsets = [0, 256], sizes = [8, 128], strides = [1, 1]} : vector<8x384xf32> to vector<8x128xf32>
    %377 = arith.addf %376, %16 : vector<8x128xf32>
    %378 = arith.mulf %366, %377 : vector<8x128xf32>
    %379 = arith.addf %375, %378 : vector<8x128xf32>
    %380 = math.tanh %379 : vector<8x128xf32>
    %cst_117 = arith.constant 1.000000e+00 : f32
    %381 = vector.broadcast %cst_117 : f32 to vector<8x128xf32>
    %382 = arith.subf %381, %374 : vector<8x128xf32>
    %383 = arith.mulf %382, %380 : vector<8x128xf32>
    %384 = arith.mulf %374, %320 : vector<8x128xf32>
    %385 = arith.addf %383, %384 : vector<8x128xf32>
    %c0_118 = arith.constant 0 : index
    %c0_119 = arith.constant 0 : index
    %386 = vector.load %arg10[%c0_118, %c0_119] : memref<128x384xf32, #tpu.memory_space<vmem>>, vector<128x384xf32>
    %cst_120 = arith.constant dense<0.000000e+00> : vector<8x384xf32>
    %387 = tpu.matmul %385, %386, %cst_120 {dimension_numbers = #tpu.dot_dimension_numbers<[1], [0], [0], [1], [0, 0, 1, 1], [], []>} : vector<8x128xf32>, vector<128x384xf32>, vector<8x384xf32> -> vector<8x384xf32>
    %388 = arith.addf %387, %19 : vector<8x384xf32>
    %c0_121 = arith.constant 0 : index
    %c0_122 = arith.constant 0 : index
    %389 = vector.load %arg12[%c0_121, %c0_122] : memref<128x384xf32, #tpu.memory_space<vmem>>, vector<128x384xf32>
    %cst_123 = arith.constant dense<0.000000e+00> : vector<8x384xf32>
    %390 = tpu.matmul %352, %389, %cst_123 {dimension_numbers = #tpu.dot_dimension_numbers<[1], [0], [0], [1], [0, 0, 1, 1], [], []>} : vector<8x128xf32>, vector<128x384xf32>, vector<8x384xf32> -> vector<8x384xf32>
    %391 = vector.extract_strided_slice %388 {offsets = [0, 0], sizes = [8, 128], strides = [1, 1]} : vector<8x384xf32> to vector<8x128xf32>
    %392 = vector.extract_strided_slice %390 {offsets = [0, 0], sizes = [8, 128], strides = [1, 1]} : vector<8x384xf32> to vector<8x128xf32>
    %393 = arith.addf %391, %392 : vector<8x128xf32>
    %394 = arith.negf %393 : vector<8x128xf32>
    %395 = math.exp %394 : vector<8x128xf32>
    %cst_124 = arith.constant 1.000000e+00 : f32
    %396 = vector.broadcast %cst_124 : f32 to vector<8x128xf32>
    %397 = arith.addf %396, %395 : vector<8x128xf32>
    %398 = arith.divf %396, %397 : vector<8x128xf32>
    %399 = vector.extract_strided_slice %388 {offsets = [0, 128], sizes = [8, 128], strides = [1, 1]} : vector<8x384xf32> to vector<8x128xf32>
    %400 = vector.extract_strided_slice %390 {offsets = [0, 128], sizes = [8, 128], strides = [1, 1]} : vector<8x384xf32> to vector<8x128xf32>
    %401 = arith.addf %399, %400 : vector<8x128xf32>
    %402 = arith.negf %401 : vector<8x128xf32>
    %403 = math.exp %402 : vector<8x128xf32>
    %cst_125 = arith.constant 1.000000e+00 : f32
    %404 = vector.broadcast %cst_125 : f32 to vector<8x128xf32>
    %405 = arith.addf %404, %403 : vector<8x128xf32>
    %406 = arith.divf %404, %405 : vector<8x128xf32>
    %407 = vector.extract_strided_slice %388 {offsets = [0, 256], sizes = [8, 128], strides = [1, 1]} : vector<8x384xf32> to vector<8x128xf32>
    %408 = vector.extract_strided_slice %390 {offsets = [0, 256], sizes = [8, 128], strides = [1, 1]} : vector<8x384xf32> to vector<8x128xf32>
    %409 = arith.addf %408, %22 : vector<8x128xf32>
    %410 = arith.mulf %398, %409 : vector<8x128xf32>
    %411 = arith.addf %407, %410 : vector<8x128xf32>
    %412 = math.tanh %411 : vector<8x128xf32>
    %cst_126 = arith.constant 1.000000e+00 : f32
    %413 = vector.broadcast %cst_126 : f32 to vector<8x128xf32>
    %414 = arith.subf %413, %406 : vector<8x128xf32>
    %415 = arith.mulf %414, %412 : vector<8x128xf32>
    %416 = arith.mulf %406, %352 : vector<8x128xf32>
    %417 = arith.addf %415, %416 : vector<8x128xf32>
    %c6_i32 = arith.constant 6 : i32
    %c8_i32_127 = arith.constant 8 : i32
    %418 = arith.muli %c6_i32, %c8_i32_127 : i32
    %419 = tpu.assume_multiple %418, 8 : i32
    %420 = arith.index_cast %419 : i32 to index
    %c0_128 = arith.constant 0 : index
    %421 = vector.load %arg17[%420, %c0_128] : memref<64x384xf32, #tpu.memory_space<vmem>>, vector<8x384xf32>
    %c0_129 = arith.constant 0 : index
    %c0_130 = arith.constant 0 : index
    %422 = vector.load %arg5[%c0_129, %c0_130] : memref<128x384xf32, #tpu.memory_space<vmem>>, vector<128x384xf32>
    %cst_131 = arith.constant dense<0.000000e+00> : vector<8x384xf32>
    %423 = tpu.matmul %385, %422, %cst_131 {dimension_numbers = #tpu.dot_dimension_numbers<[1], [0], [0], [1], [0, 0, 1, 1], [], []>} : vector<8x128xf32>, vector<128x384xf32>, vector<8x384xf32> -> vector<8x384xf32>
    %424 = vector.extract_strided_slice %421 {offsets = [0, 0], sizes = [8, 128], strides = [1, 1]} : vector<8x384xf32> to vector<8x128xf32>
    %425 = vector.extract_strided_slice %423 {offsets = [0, 0], sizes = [8, 128], strides = [1, 1]} : vector<8x384xf32> to vector<8x128xf32>
    %426 = arith.addf %424, %425 : vector<8x128xf32>
    %427 = arith.negf %426 : vector<8x128xf32>
    %428 = math.exp %427 : vector<8x128xf32>
    %cst_132 = arith.constant 1.000000e+00 : f32
    %429 = vector.broadcast %cst_132 : f32 to vector<8x128xf32>
    %430 = arith.addf %429, %428 : vector<8x128xf32>
    %431 = arith.divf %429, %430 : vector<8x128xf32>
    %432 = vector.extract_strided_slice %421 {offsets = [0, 128], sizes = [8, 128], strides = [1, 1]} : vector<8x384xf32> to vector<8x128xf32>
    %433 = vector.extract_strided_slice %423 {offsets = [0, 128], sizes = [8, 128], strides = [1, 1]} : vector<8x384xf32> to vector<8x128xf32>
    %434 = arith.addf %432, %433 : vector<8x128xf32>
    %435 = arith.negf %434 : vector<8x128xf32>
    %436 = math.exp %435 : vector<8x128xf32>
    %cst_133 = arith.constant 1.000000e+00 : f32
    %437 = vector.broadcast %cst_133 : f32 to vector<8x128xf32>
    %438 = arith.addf %437, %436 : vector<8x128xf32>
    %439 = arith.divf %437, %438 : vector<8x128xf32>
    %440 = vector.extract_strided_slice %421 {offsets = [0, 256], sizes = [8, 128], strides = [1, 1]} : vector<8x384xf32> to vector<8x128xf32>
    %441 = vector.extract_strided_slice %423 {offsets = [0, 256], sizes = [8, 128], strides = [1, 1]} : vector<8x384xf32> to vector<8x128xf32>
    %442 = arith.addf %441, %16 : vector<8x128xf32>
    %443 = arith.mulf %431, %442 : vector<8x128xf32>
    %444 = arith.addf %440, %443 : vector<8x128xf32>
    %445 = math.tanh %444 : vector<8x128xf32>
    %cst_134 = arith.constant 1.000000e+00 : f32
    %446 = vector.broadcast %cst_134 : f32 to vector<8x128xf32>
    %447 = arith.subf %446, %439 : vector<8x128xf32>
    %448 = arith.mulf %447, %445 : vector<8x128xf32>
    %449 = arith.mulf %439, %385 : vector<8x128xf32>
    %450 = arith.addf %448, %449 : vector<8x128xf32>
    %c0_135 = arith.constant 0 : index
    %c0_136 = arith.constant 0 : index
    %451 = vector.load %arg10[%c0_135, %c0_136] : memref<128x384xf32, #tpu.memory_space<vmem>>, vector<128x384xf32>
    %cst_137 = arith.constant dense<0.000000e+00> : vector<8x384xf32>
    %452 = tpu.matmul %450, %451, %cst_137 {dimension_numbers = #tpu.dot_dimension_numbers<[1], [0], [0], [1], [0, 0, 1, 1], [], []>} : vector<8x128xf32>, vector<128x384xf32>, vector<8x384xf32> -> vector<8x384xf32>
    %453 = arith.addf %452, %19 : vector<8x384xf32>
    %c0_138 = arith.constant 0 : index
    %c0_139 = arith.constant 0 : index
    %454 = vector.load %arg12[%c0_138, %c0_139] : memref<128x384xf32, #tpu.memory_space<vmem>>, vector<128x384xf32>
    %cst_140 = arith.constant dense<0.000000e+00> : vector<8x384xf32>
    %455 = tpu.matmul %417, %454, %cst_140 {dimension_numbers = #tpu.dot_dimension_numbers<[1], [0], [0], [1], [0, 0, 1, 1], [], []>} : vector<8x128xf32>, vector<128x384xf32>, vector<8x384xf32> -> vector<8x384xf32>
    %456 = vector.extract_strided_slice %453 {offsets = [0, 0], sizes = [8, 128], strides = [1, 1]} : vector<8x384xf32> to vector<8x128xf32>
    %457 = vector.extract_strided_slice %455 {offsets = [0, 0], sizes = [8, 128], strides = [1, 1]} : vector<8x384xf32> to vector<8x128xf32>
    %458 = arith.addf %456, %457 : vector<8x128xf32>
    %459 = arith.negf %458 : vector<8x128xf32>
    %460 = math.exp %459 : vector<8x128xf32>
    %cst_141 = arith.constant 1.000000e+00 : f32
    %461 = vector.broadcast %cst_141 : f32 to vector<8x128xf32>
    %462 = arith.addf %461, %460 : vector<8x128xf32>
    %463 = arith.divf %461, %462 : vector<8x128xf32>
    %464 = vector.extract_strided_slice %453 {offsets = [0, 128], sizes = [8, 128], strides = [1, 1]} : vector<8x384xf32> to vector<8x128xf32>
    %465 = vector.extract_strided_slice %455 {offsets = [0, 128], sizes = [8, 128], strides = [1, 1]} : vector<8x384xf32> to vector<8x128xf32>
    %466 = arith.addf %464, %465 : vector<8x128xf32>
    %467 = arith.negf %466 : vector<8x128xf32>
    %468 = math.exp %467 : vector<8x128xf32>
    %cst_142 = arith.constant 1.000000e+00 : f32
    %469 = vector.broadcast %cst_142 : f32 to vector<8x128xf32>
    %470 = arith.addf %469, %468 : vector<8x128xf32>
    %471 = arith.divf %469, %470 : vector<8x128xf32>
    %472 = vector.extract_strided_slice %453 {offsets = [0, 256], sizes = [8, 128], strides = [1, 1]} : vector<8x384xf32> to vector<8x128xf32>
    %473 = vector.extract_strided_slice %455 {offsets = [0, 256], sizes = [8, 128], strides = [1, 1]} : vector<8x384xf32> to vector<8x128xf32>
    %474 = arith.addf %473, %22 : vector<8x128xf32>
    %475 = arith.mulf %463, %474 : vector<8x128xf32>
    %476 = arith.addf %472, %475 : vector<8x128xf32>
    %477 = math.tanh %476 : vector<8x128xf32>
    %cst_143 = arith.constant 1.000000e+00 : f32
    %478 = vector.broadcast %cst_143 : f32 to vector<8x128xf32>
    %479 = arith.subf %478, %471 : vector<8x128xf32>
    %480 = arith.mulf %479, %477 : vector<8x128xf32>
    %481 = arith.mulf %471, %417 : vector<8x128xf32>
    %482 = arith.addf %480, %481 : vector<8x128xf32>
    %c7_i32 = arith.constant 7 : i32
    %c8_i32_144 = arith.constant 8 : i32
    %483 = arith.muli %c7_i32, %c8_i32_144 : i32
    %484 = tpu.assume_multiple %483, 8 : i32
    %485 = arith.index_cast %484 : i32 to index
    %c0_145 = arith.constant 0 : index
    %486 = vector.load %arg17[%485, %c0_145] : memref<64x384xf32, #tpu.memory_space<vmem>>, vector<8x384xf32>
    %c0_146 = arith.constant 0 : index
    %c0_147 = arith.constant 0 : index
    %487 = vector.load %arg5[%c0_146, %c0_147] : memref<128x384xf32, #tpu.memory_space<vmem>>, vector<128x384xf32>
    %cst_148 = arith.constant dense<0.000000e+00> : vector<8x384xf32>
    %488 = tpu.matmul %450, %487, %cst_148 {dimension_numbers = #tpu.dot_dimension_numbers<[1], [0], [0], [1], [0, 0, 1, 1], [], []>} : vector<8x128xf32>, vector<128x384xf32>, vector<8x384xf32> -> vector<8x384xf32>
    %489 = vector.extract_strided_slice %486 {offsets = [0, 0], sizes = [8, 128], strides = [1, 1]} : vector<8x384xf32> to vector<8x128xf32>
    %490 = vector.extract_strided_slice %488 {offsets = [0, 0], sizes = [8, 128], strides = [1, 1]} : vector<8x384xf32> to vector<8x128xf32>
    %491 = arith.addf %489, %490 : vector<8x128xf32>
    %492 = arith.negf %491 : vector<8x128xf32>
    %493 = math.exp %492 : vector<8x128xf32>
    %cst_149 = arith.constant 1.000000e+00 : f32
    %494 = vector.broadcast %cst_149 : f32 to vector<8x128xf32>
    %495 = arith.addf %494, %493 : vector<8x128xf32>
    %496 = arith.divf %494, %495 : vector<8x128xf32>
    %497 = vector.extract_strided_slice %486 {offsets = [0, 128], sizes = [8, 128], strides = [1, 1]} : vector<8x384xf32> to vector<8x128xf32>
    %498 = vector.extract_strided_slice %488 {offsets = [0, 128], sizes = [8, 128], strides = [1, 1]} : vector<8x384xf32> to vector<8x128xf32>
    %499 = arith.addf %497, %498 : vector<8x128xf32>
    %500 = arith.negf %499 : vector<8x128xf32>
    %501 = math.exp %500 : vector<8x128xf32>
    %cst_150 = arith.constant 1.000000e+00 : f32
    %502 = vector.broadcast %cst_150 : f32 to vector<8x128xf32>
    %503 = arith.addf %502, %501 : vector<8x128xf32>
    %504 = arith.divf %502, %503 : vector<8x128xf32>
    %505 = vector.extract_strided_slice %486 {offsets = [0, 256], sizes = [8, 128], strides = [1, 1]} : vector<8x384xf32> to vector<8x128xf32>
    %506 = vector.extract_strided_slice %488 {offsets = [0, 256], sizes = [8, 128], strides = [1, 1]} : vector<8x384xf32> to vector<8x128xf32>
    %507 = arith.addf %506, %16 : vector<8x128xf32>
    %508 = arith.mulf %496, %507 : vector<8x128xf32>
    %509 = arith.addf %505, %508 : vector<8x128xf32>
    %510 = math.tanh %509 : vector<8x128xf32>
    %cst_151 = arith.constant 1.000000e+00 : f32
    %511 = vector.broadcast %cst_151 : f32 to vector<8x128xf32>
    %512 = arith.subf %511, %504 : vector<8x128xf32>
    %513 = arith.mulf %512, %510 : vector<8x128xf32>
    %514 = arith.mulf %504, %450 : vector<8x128xf32>
    %515 = arith.addf %513, %514 : vector<8x128xf32>
    %c0_152 = arith.constant 0 : index
    %c0_153 = arith.constant 0 : index
    %516 = vector.load %arg10[%c0_152, %c0_153] : memref<128x384xf32, #tpu.memory_space<vmem>>, vector<128x384xf32>
    %cst_154 = arith.constant dense<0.000000e+00> : vector<8x384xf32>
    %517 = tpu.matmul %515, %516, %cst_154 {dimension_numbers = #tpu.dot_dimension_numbers<[1], [0], [0], [1], [0, 0, 1, 1], [], []>} : vector<8x128xf32>, vector<128x384xf32>, vector<8x384xf32> -> vector<8x384xf32>
    %518 = arith.addf %517, %19 : vector<8x384xf32>
    %c0_155 = arith.constant 0 : index
    %c0_156 = arith.constant 0 : index
    %519 = vector.load %arg12[%c0_155, %c0_156] : memref<128x384xf32, #tpu.memory_space<vmem>>, vector<128x384xf32>
    %cst_157 = arith.constant dense<0.000000e+00> : vector<8x384xf32>
    %520 = tpu.matmul %482, %519, %cst_157 {dimension_numbers = #tpu.dot_dimension_numbers<[1], [0], [0], [1], [0, 0, 1, 1], [], []>} : vector<8x128xf32>, vector<128x384xf32>, vector<8x384xf32> -> vector<8x384xf32>
    %521 = vector.extract_strided_slice %518 {offsets = [0, 0], sizes = [8, 128], strides = [1, 1]} : vector<8x384xf32> to vector<8x128xf32>
    %522 = vector.extract_strided_slice %520 {offsets = [0, 0], sizes = [8, 128], strides = [1, 1]} : vector<8x384xf32> to vector<8x128xf32>
    %523 = arith.addf %521, %522 : vector<8x128xf32>
    %524 = arith.negf %523 : vector<8x128xf32>
    %525 = math.exp %524 : vector<8x128xf32>
    %cst_158 = arith.constant 1.000000e+00 : f32
    %526 = vector.broadcast %cst_158 : f32 to vector<8x128xf32>
    %527 = arith.addf %526, %525 : vector<8x128xf32>
    %528 = arith.divf %526, %527 : vector<8x128xf32>
    %529 = vector.extract_strided_slice %518 {offsets = [0, 128], sizes = [8, 128], strides = [1, 1]} : vector<8x384xf32> to vector<8x128xf32>
    %530 = vector.extract_strided_slice %520 {offsets = [0, 128], sizes = [8, 128], strides = [1, 1]} : vector<8x384xf32> to vector<8x128xf32>
    %531 = arith.addf %529, %530 : vector<8x128xf32>
    %532 = arith.negf %531 : vector<8x128xf32>
    %533 = math.exp %532 : vector<8x128xf32>
    %cst_159 = arith.constant 1.000000e+00 : f32
    %534 = vector.broadcast %cst_159 : f32 to vector<8x128xf32>
    %535 = arith.addf %534, %533 : vector<8x128xf32>
    %536 = arith.divf %534, %535 : vector<8x128xf32>
    %537 = vector.extract_strided_slice %518 {offsets = [0, 256], sizes = [8, 128], strides = [1, 1]} : vector<8x384xf32> to vector<8x128xf32>
    %538 = vector.extract_strided_slice %520 {offsets = [0, 256], sizes = [8, 128], strides = [1, 1]} : vector<8x384xf32> to vector<8x128xf32>
    %539 = arith.addf %538, %22 : vector<8x128xf32>
    %540 = arith.mulf %528, %539 : vector<8x128xf32>
    %541 = arith.addf %537, %540 : vector<8x128xf32>
    %542 = math.tanh %541 : vector<8x128xf32>
    %cst_160 = arith.constant 1.000000e+00 : f32
    %543 = vector.broadcast %cst_160 : f32 to vector<8x128xf32>
    %544 = arith.subf %543, %536 : vector<8x128xf32>
    %545 = arith.mulf %544, %542 : vector<8x128xf32>
    %546 = arith.mulf %536, %482 : vector<8x128xf32>
    %547 = arith.addf %545, %546 : vector<8x128xf32>
    %c8_i32_161 = arith.constant 8 : i32
    %c0_162 = arith.constant 0 : index
    %c0_163 = arith.constant 0 : index
    %548 = vector.load %arg2[%c0_162, %c0_163] : memref<8x128xf32, #tpu.memory_space<vmem>>, vector<8x128xf32>
    %c0_164 = arith.constant 0 : index
    %c0_165 = arith.constant 0 : index
    %549 = vector.load %arg7[%c0_164, %c0_165] : memref<128x384xf32, #tpu.memory_space<vmem>>, vector<128x384xf32>
    %cst_166 = arith.constant dense<0.000000e+00> : vector<8x384xf32>
    %550 = tpu.matmul %548, %549, %cst_166 {dimension_numbers = #tpu.dot_dimension_numbers<[1], [0], [0], [1], [0, 0, 1, 1], [], []>} : vector<8x128xf32>, vector<128x384xf32>, vector<8x384xf32> -> vector<8x384xf32>
    %c0_i32_167 = arith.constant 0 : i32
    %c8_i32_168 = arith.constant 8 : i32
    %551 = arith.muli %c0_i32_167, %c8_i32_168 : i32
    %552 = tpu.assume_multiple %551, 8 : i32
    %553 = arith.index_cast %552 : i32 to index
    %c0_169 = arith.constant 0 : index
    %554 = vector.load %arg18[%553, %c0_169] : memref<32x384xf32, #tpu.memory_space<vmem>>, vector<8x384xf32>
    %555 = arith.addf %554, %550 : vector<8x384xf32>
    %c0_170 = arith.constant 0 : index
    %c0_171 = arith.constant 0 : index
    %556 = vector.load %arg5[%c0_170, %c0_171] : memref<128x384xf32, #tpu.memory_space<vmem>>, vector<128x384xf32>
    %cst_172 = arith.constant dense<0.000000e+00> : vector<8x384xf32>
    %557 = tpu.matmul %515, %556, %cst_172 {dimension_numbers = #tpu.dot_dimension_numbers<[1], [0], [0], [1], [0, 0, 1, 1], [], []>} : vector<8x128xf32>, vector<128x384xf32>, vector<8x384xf32> -> vector<8x384xf32>
    %558 = vector.extract_strided_slice %555 {offsets = [0, 0], sizes = [8, 128], strides = [1, 1]} : vector<8x384xf32> to vector<8x128xf32>
    %559 = vector.extract_strided_slice %557 {offsets = [0, 0], sizes = [8, 128], strides = [1, 1]} : vector<8x384xf32> to vector<8x128xf32>
    %560 = arith.addf %558, %559 : vector<8x128xf32>
    %561 = arith.negf %560 : vector<8x128xf32>
    %562 = math.exp %561 : vector<8x128xf32>
    %cst_173 = arith.constant 1.000000e+00 : f32
    %563 = vector.broadcast %cst_173 : f32 to vector<8x128xf32>
    %564 = arith.addf %563, %562 : vector<8x128xf32>
    %565 = arith.divf %563, %564 : vector<8x128xf32>
    %566 = vector.extract_strided_slice %555 {offsets = [0, 128], sizes = [8, 128], strides = [1, 1]} : vector<8x384xf32> to vector<8x128xf32>
    %567 = vector.extract_strided_slice %557 {offsets = [0, 128], sizes = [8, 128], strides = [1, 1]} : vector<8x384xf32> to vector<8x128xf32>
    %568 = arith.addf %566, %567 : vector<8x128xf32>
    %569 = arith.negf %568 : vector<8x128xf32>
    %570 = math.exp %569 : vector<8x128xf32>
    %cst_174 = arith.constant 1.000000e+00 : f32
    %571 = vector.broadcast %cst_174 : f32 to vector<8x128xf32>
    %572 = arith.addf %571, %570 : vector<8x128xf32>
    %573 = arith.divf %571, %572 : vector<8x128xf32>
    %574 = vector.extract_strided_slice %555 {offsets = [0, 256], sizes = [8, 128], strides = [1, 1]} : vector<8x384xf32> to vector<8x128xf32>
    %575 = vector.extract_strided_slice %557 {offsets = [0, 256], sizes = [8, 128], strides = [1, 1]} : vector<8x384xf32> to vector<8x128xf32>
    %576 = arith.addf %575, %16 : vector<8x128xf32>
    %577 = arith.mulf %565, %576 : vector<8x128xf32>
    %578 = arith.addf %574, %577 : vector<8x128xf32>
    %579 = math.tanh %578 : vector<8x128xf32>
    %cst_175 = arith.constant 1.000000e+00 : f32
    %580 = vector.broadcast %cst_175 : f32 to vector<8x128xf32>
    %581 = arith.subf %580, %573 : vector<8x128xf32>
    %582 = arith.mulf %581, %579 : vector<8x128xf32>
    %583 = arith.mulf %573, %515 : vector<8x128xf32>
    %584 = arith.addf %582, %583 : vector<8x128xf32>
    %c0_176 = arith.constant 0 : index
    %c0_177 = arith.constant 0 : index
    %585 = vector.load %arg10[%c0_176, %c0_177] : memref<128x384xf32, #tpu.memory_space<vmem>>, vector<128x384xf32>
    %cst_178 = arith.constant dense<0.000000e+00> : vector<8x384xf32>
    %586 = tpu.matmul %584, %585, %cst_178 {dimension_numbers = #tpu.dot_dimension_numbers<[1], [0], [0], [1], [0, 0, 1, 1], [], []>} : vector<8x128xf32>, vector<128x384xf32>, vector<8x384xf32> -> vector<8x384xf32>
    %587 = arith.addf %586, %19 : vector<8x384xf32>
    %c0_179 = arith.constant 0 : index
    %c0_180 = arith.constant 0 : index
    %588 = vector.load %arg12[%c0_179, %c0_180] : memref<128x384xf32, #tpu.memory_space<vmem>>, vector<128x384xf32>
    %cst_181 = arith.constant dense<0.000000e+00> : vector<8x384xf32>
    %589 = tpu.matmul %547, %588, %cst_181 {dimension_numbers = #tpu.dot_dimension_numbers<[1], [0], [0], [1], [0, 0, 1, 1], [], []>} : vector<8x128xf32>, vector<128x384xf32>, vector<8x384xf32> -> vector<8x384xf32>
    %590 = vector.extract_strided_slice %587 {offsets = [0, 0], sizes = [8, 128], strides = [1, 1]} : vector<8x384xf32> to vector<8x128xf32>
    %591 = vector.extract_strided_slice %589 {offsets = [0, 0], sizes = [8, 128], strides = [1, 1]} : vector<8x384xf32> to vector<8x128xf32>
    %592 = arith.addf %590, %591 : vector<8x128xf32>
    %593 = arith.negf %592 : vector<8x128xf32>
    %594 = math.exp %593 : vector<8x128xf32>
    %cst_182 = arith.constant 1.000000e+00 : f32
    %595 = vector.broadcast %cst_182 : f32 to vector<8x128xf32>
    %596 = arith.addf %595, %594 : vector<8x128xf32>
    %597 = arith.divf %595, %596 : vector<8x128xf32>
    %598 = vector.extract_strided_slice %587 {offsets = [0, 128], sizes = [8, 128], strides = [1, 1]} : vector<8x384xf32> to vector<8x128xf32>
    %599 = vector.extract_strided_slice %589 {offsets = [0, 128], sizes = [8, 128], strides = [1, 1]} : vector<8x384xf32> to vector<8x128xf32>
    %600 = arith.addf %598, %599 : vector<8x128xf32>
    %601 = arith.negf %600 : vector<8x128xf32>
    %602 = math.exp %601 : vector<8x128xf32>
    %cst_183 = arith.constant 1.000000e+00 : f32
    %603 = vector.broadcast %cst_183 : f32 to vector<8x128xf32>
    %604 = arith.addf %603, %602 : vector<8x128xf32>
    %605 = arith.divf %603, %604 : vector<8x128xf32>
    %606 = vector.extract_strided_slice %587 {offsets = [0, 256], sizes = [8, 128], strides = [1, 1]} : vector<8x384xf32> to vector<8x128xf32>
    %607 = vector.extract_strided_slice %589 {offsets = [0, 256], sizes = [8, 128], strides = [1, 1]} : vector<8x384xf32> to vector<8x128xf32>
    %608 = arith.addf %607, %22 : vector<8x128xf32>
    %609 = arith.mulf %597, %608 : vector<8x128xf32>
    %610 = arith.addf %606, %609 : vector<8x128xf32>
    %611 = math.tanh %610 : vector<8x128xf32>
    %cst_184 = arith.constant 1.000000e+00 : f32
    %612 = vector.broadcast %cst_184 : f32 to vector<8x128xf32>
    %613 = arith.subf %612, %605 : vector<8x128xf32>
    %614 = arith.mulf %613, %611 : vector<8x128xf32>
    %615 = arith.mulf %605, %547 : vector<8x128xf32>
    %616 = arith.addf %614, %615 : vector<8x128xf32>
    %617 = arith.index_cast %552 : i32 to index
    %c0_185 = arith.constant 0 : index
    %618 = vector.load %arg19[%617, %c0_185] : memref<32x128xf32, #tpu.memory_space<vmem>>, vector<8x128xf32>
    tpu.vector_store %arg19[%617, %c0_185], %616 {strides = array<i32>} : memref<32x128xf32, #tpu.memory_space<vmem>>, vector<8x128xf32>,
    %c0_186 = arith.constant 0 : index
    %c0_187 = arith.constant 0 : index
    %619 = vector.load %arg8[%c0_186, %c0_187] : memref<128x384xf32, #tpu.memory_space<vmem>>, vector<128x384xf32>
    %cst_188 = arith.constant dense<0.000000e+00> : vector<8x384xf32>
    %620 = tpu.matmul %616, %619, %cst_188 {dimension_numbers = #tpu.dot_dimension_numbers<[1], [0], [0], [1], [0, 0, 1, 1], [], []>} : vector<8x128xf32>, vector<128x384xf32>, vector<8x384xf32> -> vector<8x384xf32>
    %621 = arith.addf %620, %25 : vector<8x384xf32>
    %c1_i32_189 = arith.constant 1 : i32
    %c8_i32_190 = arith.constant 8 : i32
    %622 = arith.muli %c1_i32_189, %c8_i32_190 : i32
    %623 = tpu.assume_multiple %622, 8 : i32
    %624 = arith.index_cast %623 : i32 to index
    %c0_191 = arith.constant 0 : index
    %625 = vector.load %arg18[%624, %c0_191] : memref<32x384xf32, #tpu.memory_space<vmem>>, vector<8x384xf32>
    %626 = arith.addf %625, %621 : vector<8x384xf32>
    %c0_192 = arith.constant 0 : index
    %c0_193 = arith.constant 0 : index
    %627 = vector.load %arg5[%c0_192, %c0_193] : memref<128x384xf32, #tpu.memory_space<vmem>>, vector<128x384xf32>
    %cst_194 = arith.constant dense<0.000000e+00> : vector<8x384xf32>
    %628 = tpu.matmul %584, %627, %cst_194 {dimension_numbers = #tpu.dot_dimension_numbers<[1], [0], [0], [1], [0, 0, 1, 1], [], []>} : vector<8x128xf32>, vector<128x384xf32>, vector<8x384xf32> -> vector<8x384xf32>
    %629 = vector.extract_strided_slice %626 {offsets = [0, 0], sizes = [8, 128], strides = [1, 1]} : vector<8x384xf32> to vector<8x128xf32>
    %630 = vector.extract_strided_slice %628 {offsets = [0, 0], sizes = [8, 128], strides = [1, 1]} : vector<8x384xf32> to vector<8x128xf32>
    %631 = arith.addf %629, %630 : vector<8x128xf32>
    %632 = arith.negf %631 : vector<8x128xf32>
    %633 = math.exp %632 : vector<8x128xf32>
    %cst_195 = arith.constant 1.000000e+00 : f32
    %634 = vector.broadcast %cst_195 : f32 to vector<8x128xf32>
    %635 = arith.addf %634, %633 : vector<8x128xf32>
    %636 = arith.divf %634, %635 : vector<8x128xf32>
    %637 = vector.extract_strided_slice %626 {offsets = [0, 128], sizes = [8, 128], strides = [1, 1]} : vector<8x384xf32> to vector<8x128xf32>
    %638 = vector.extract_strided_slice %628 {offsets = [0, 128], sizes = [8, 128], strides = [1, 1]} : vector<8x384xf32> to vector<8x128xf32>
    %639 = arith.addf %637, %638 : vector<8x128xf32>
    %640 = arith.negf %639 : vector<8x128xf32>
    %641 = math.exp %640 : vector<8x128xf32>
    %cst_196 = arith.constant 1.000000e+00 : f32
    %642 = vector.broadcast %cst_196 : f32 to vector<8x128xf32>
    %643 = arith.addf %642, %641 : vector<8x128xf32>
    %644 = arith.divf %642, %643 : vector<8x128xf32>
    %645 = vector.extract_strided_slice %626 {offsets = [0, 256], sizes = [8, 128], strides = [1, 1]} : vector<8x384xf32> to vector<8x128xf32>
    %646 = vector.extract_strided_slice %628 {offsets = [0, 256], sizes = [8, 128], strides = [1, 1]} : vector<8x384xf32> to vector<8x128xf32>
    %647 = arith.addf %646, %16 : vector<8x128xf32>
    %648 = arith.mulf %636, %647 : vector<8x128xf32>
    %649 = arith.addf %645, %648 : vector<8x128xf32>
    %650 = math.tanh %649 : vector<8x128xf32>
    %cst_197 = arith.constant 1.000000e+00 : f32
    %651 = vector.broadcast %cst_197 : f32 to vector<8x128xf32>
    %652 = arith.subf %651, %644 : vector<8x128xf32>
    %653 = arith.mulf %652, %650 : vector<8x128xf32>
    %654 = arith.mulf %644, %584 : vector<8x128xf32>
    %655 = arith.addf %653, %654 : vector<8x128xf32>
    %c0_198 = arith.constant 0 : index
    %c0_199 = arith.constant 0 : index
    %656 = vector.load %arg10[%c0_198, %c0_199] : memref<128x384xf32, #tpu.memory_space<vmem>>, vector<128x384xf32>
    %cst_200 = arith.constant dense<0.000000e+00> : vector<8x384xf32>
    %657 = tpu.matmul %655, %656, %cst_200 {dimension_numbers = #tpu.dot_dimension_numbers<[1], [0], [0], [1], [0, 0, 1, 1], [], []>} : vector<8x128xf32>, vector<128x384xf32>, vector<8x384xf32> -> vector<8x384xf32>
    %658 = arith.addf %657, %19 : vector<8x384xf32>
    %c0_201 = arith.constant 0 : index
    %c0_202 = arith.constant 0 : index
    %659 = vector.load %arg12[%c0_201, %c0_202] : memref<128x384xf32, #tpu.memory_space<vmem>>, vector<128x384xf32>
    %cst_203 = arith.constant dense<0.000000e+00> : vector<8x384xf32>
    %660 = tpu.matmul %616, %659, %cst_203 {dimension_numbers = #tpu.dot_dimension_numbers<[1], [0], [0], [1], [0, 0, 1, 1], [], []>} : vector<8x128xf32>, vector<128x384xf32>, vector<8x384xf32> -> vector<8x384xf32>
    %661 = vector.extract_strided_slice %658 {offsets = [0, 0], sizes = [8, 128], strides = [1, 1]} : vector<8x384xf32> to vector<8x128xf32>
    %662 = vector.extract_strided_slice %660 {offsets = [0, 0], sizes = [8, 128], strides = [1, 1]} : vector<8x384xf32> to vector<8x128xf32>
    %663 = arith.addf %661, %662 : vector<8x128xf32>
    %664 = arith.negf %663 : vector<8x128xf32>
    %665 = math.exp %664 : vector<8x128xf32>
    %cst_204 = arith.constant 1.000000e+00 : f32
    %666 = vector.broadcast %cst_204 : f32 to vector<8x128xf32>
    %667 = arith.addf %666, %665 : vector<8x128xf32>
    %668 = arith.divf %666, %667 : vector<8x128xf32>
    %669 = vector.extract_strided_slice %658 {offsets = [0, 128], sizes = [8, 128], strides = [1, 1]} : vector<8x384xf32> to vector<8x128xf32>
    %670 = vector.extract_strided_slice %660 {offsets = [0, 128], sizes = [8, 128], strides = [1, 1]} : vector<8x384xf32> to vector<8x128xf32>
    %671 = arith.addf %669, %670 : vector<8x128xf32>
    %672 = arith.negf %671 : vector<8x128xf32>
    %673 = math.exp %672 : vector<8x128xf32>
    %cst_205 = arith.constant 1.000000e+00 : f32
    %674 = vector.broadcast %cst_205 : f32 to vector<8x128xf32>
    %675 = arith.addf %674, %673 : vector<8x128xf32>
    %676 = arith.divf %674, %675 : vector<8x128xf32>
    %677 = vector.extract_strided_slice %658 {offsets = [0, 256], sizes = [8, 128], strides = [1, 1]} : vector<8x384xf32> to vector<8x128xf32>
    %678 = vector.extract_strided_slice %660 {offsets = [0, 256], sizes = [8, 128], strides = [1, 1]} : vector<8x384xf32> to vector<8x128xf32>
    %679 = arith.addf %678, %22 : vector<8x128xf32>
    %680 = arith.mulf %668, %679 : vector<8x128xf32>
    %681 = arith.addf %677, %680 : vector<8x128xf32>
    %682 = math.tanh %681 : vector<8x128xf32>
    %cst_206 = arith.constant 1.000000e+00 : f32
    %683 = vector.broadcast %cst_206 : f32 to vector<8x128xf32>
    %684 = arith.subf %683, %676 : vector<8x128xf32>
    %685 = arith.mulf %684, %682 : vector<8x128xf32>
    %686 = arith.mulf %676, %616 : vector<8x128xf32>
    %687 = arith.addf %685, %686 : vector<8x128xf32>
    %688 = arith.index_cast %623 : i32 to index
    %c0_207 = arith.constant 0 : index
    %689 = vector.load %arg19[%688, %c0_207] : memref<32x128xf32, #tpu.memory_space<vmem>>, vector<8x128xf32>
    tpu.vector_store %arg19[%688, %c0_207], %687 {strides = array<i32>} : memref<32x128xf32, #tpu.memory_space<vmem>>, vector<8x128xf32>,
    %c0_208 = arith.constant 0 : index
    %c0_209 = arith.constant 0 : index
    %690 = vector.load %arg8[%c0_208, %c0_209] : memref<128x384xf32, #tpu.memory_space<vmem>>, vector<128x384xf32>
    %cst_210 = arith.constant dense<0.000000e+00> : vector<8x384xf32>
    %691 = tpu.matmul %687, %690, %cst_210 {dimension_numbers = #tpu.dot_dimension_numbers<[1], [0], [0], [1], [0, 0, 1, 1], [], []>} : vector<8x128xf32>, vector<128x384xf32>, vector<8x384xf32> -> vector<8x384xf32>
    %692 = arith.addf %691, %25 : vector<8x384xf32>
    %c2_i32_211 = arith.constant 2 : i32
    %c8_i32_212 = arith.constant 8 : i32
    %693 = arith.muli %c2_i32_211, %c8_i32_212 : i32
    %694 = tpu.assume_multiple %693, 8 : i32
    %695 = arith.index_cast %694 : i32 to index
    %c0_213 = arith.constant 0 : index
    %696 = vector.load %arg18[%695, %c0_213] : memref<32x384xf32, #tpu.memory_space<vmem>>, vector<8x384xf32>
    %697 = arith.addf %696, %692 : vector<8x384xf32>
    %c0_214 = arith.constant 0 : index
    %c0_215 = arith.constant 0 : index
    %698 = vector.load %arg5[%c0_214, %c0_215] : memref<128x384xf32, #tpu.memory_space<vmem>>, vector<128x384xf32>
    %cst_216 = arith.constant dense<0.000000e+00> : vector<8x384xf32>
    %699 = tpu.matmul %655, %698, %cst_216 {dimension_numbers = #tpu.dot_dimension_numbers<[1], [0], [0], [1], [0, 0, 1, 1], [], []>} : vector<8x128xf32>, vector<128x384xf32>, vector<8x384xf32> -> vector<8x384xf32>
    %700 = vector.extract_strided_slice %697 {offsets = [0, 0], sizes = [8, 128], strides = [1, 1]} : vector<8x384xf32> to vector<8x128xf32>
    %701 = vector.extract_strided_slice %699 {offsets = [0, 0], sizes = [8, 128], strides = [1, 1]} : vector<8x384xf32> to vector<8x128xf32>
    %702 = arith.addf %700, %701 : vector<8x128xf32>
    %703 = arith.negf %702 : vector<8x128xf32>
    %704 = math.exp %703 : vector<8x128xf32>
    %cst_217 = arith.constant 1.000000e+00 : f32
    %705 = vector.broadcast %cst_217 : f32 to vector<8x128xf32>
    %706 = arith.addf %705, %704 : vector<8x128xf32>
    %707 = arith.divf %705, %706 : vector<8x128xf32>
    %708 = vector.extract_strided_slice %697 {offsets = [0, 128], sizes = [8, 128], strides = [1, 1]} : vector<8x384xf32> to vector<8x128xf32>
    %709 = vector.extract_strided_slice %699 {offsets = [0, 128], sizes = [8, 128], strides = [1, 1]} : vector<8x384xf32> to vector<8x128xf32>
    %710 = arith.addf %708, %709 : vector<8x128xf32>
    %711 = arith.negf %710 : vector<8x128xf32>
    %712 = math.exp %711 : vector<8x128xf32>
    %cst_218 = arith.constant 1.000000e+00 : f32
    %713 = vector.broadcast %cst_218 : f32 to vector<8x128xf32>
    %714 = arith.addf %713, %712 : vector<8x128xf32>
    %715 = arith.divf %713, %714 : vector<8x128xf32>
    %716 = vector.extract_strided_slice %697 {offsets = [0, 256], sizes = [8, 128], strides = [1, 1]} : vector<8x384xf32> to vector<8x128xf32>
    %717 = vector.extract_strided_slice %699 {offsets = [0, 256], sizes = [8, 128], strides = [1, 1]} : vector<8x384xf32> to vector<8x128xf32>
    %718 = arith.addf %717, %16 : vector<8x128xf32>
    %719 = arith.mulf %707, %718 : vector<8x128xf32>
    %720 = arith.addf %716, %719 : vector<8x128xf32>
    %721 = math.tanh %720 : vector<8x128xf32>
    %cst_219 = arith.constant 1.000000e+00 : f32
    %722 = vector.broadcast %cst_219 : f32 to vector<8x128xf32>
    %723 = arith.subf %722, %715 : vector<8x128xf32>
    %724 = arith.mulf %723, %721 : vector<8x128xf32>
    %725 = arith.mulf %715, %655 : vector<8x128xf32>
    %726 = arith.addf %724, %725 : vector<8x128xf32>
    %c0_220 = arith.constant 0 : index
    %c0_221 = arith.constant 0 : index
    %727 = vector.load %arg10[%c0_220, %c0_221] : memref<128x384xf32, #tpu.memory_space<vmem>>, vector<128x384xf32>
    %cst_222 = arith.constant dense<0.000000e+00> : vector<8x384xf32>
    %728 = tpu.matmul %726, %727, %cst_222 {dimension_numbers = #tpu.dot_dimension_numbers<[1], [0], [0], [1], [0, 0, 1, 1], [], []>} : vector<8x128xf32>, vector<128x384xf32>, vector<8x384xf32> -> vector<8x384xf32>
    %729 = arith.addf %728, %19 : vector<8x384xf32>
    %c0_223 = arith.constant 0 : index
    %c0_224 = arith.constant 0 : index
    %730 = vector.load %arg12[%c0_223, %c0_224] : memref<128x384xf32, #tpu.memory_space<vmem>>, vector<128x384xf32>
    %cst_225 = arith.constant dense<0.000000e+00> : vector<8x384xf32>
    %731 = tpu.matmul %687, %730, %cst_225 {dimension_numbers = #tpu.dot_dimension_numbers<[1], [0], [0], [1], [0, 0, 1, 1], [], []>} : vector<8x128xf32>, vector<128x384xf32>, vector<8x384xf32> -> vector<8x384xf32>
    %732 = vector.extract_strided_slice %729 {offsets = [0, 0], sizes = [8, 128], strides = [1, 1]} : vector<8x384xf32> to vector<8x128xf32>
    %733 = vector.extract_strided_slice %731 {offsets = [0, 0], sizes = [8, 128], strides = [1, 1]} : vector<8x384xf32> to vector<8x128xf32>
    %734 = arith.addf %732, %733 : vector<8x128xf32>
    %735 = arith.negf %734 : vector<8x128xf32>
    %736 = math.exp %735 : vector<8x128xf32>
    %cst_226 = arith.constant 1.000000e+00 : f32
    %737 = vector.broadcast %cst_226 : f32 to vector<8x128xf32>
    %738 = arith.addf %737, %736 : vector<8x128xf32>
    %739 = arith.divf %737, %738 : vector<8x128xf32>
    %740 = vector.extract_strided_slice %729 {offsets = [0, 128], sizes = [8, 128], strides = [1, 1]} : vector<8x384xf32> to vector<8x128xf32>
    %741 = vector.extract_strided_slice %731 {offsets = [0, 128], sizes = [8, 128], strides = [1, 1]} : vector<8x384xf32> to vector<8x128xf32>
    %742 = arith.addf %740, %741 : vector<8x128xf32>
    %743 = arith.negf %742 : vector<8x128xf32>
    %744 = math.exp %743 : vector<8x128xf32>
    %cst_227 = arith.constant 1.000000e+00 : f32
    %745 = vector.broadcast %cst_227 : f32 to vector<8x128xf32>
    %746 = arith.addf %745, %744 : vector<8x128xf32>
    %747 = arith.divf %745, %746 : vector<8x128xf32>
    %748 = vector.extract_strided_slice %729 {offsets = [0, 256], sizes = [8, 128], strides = [1, 1]} : vector<8x384xf32> to vector<8x128xf32>
    %749 = vector.extract_strided_slice %731 {offsets = [0, 256], sizes = [8, 128], strides = [1, 1]} : vector<8x384xf32> to vector<8x128xf32>
    %750 = arith.addf %749, %22 : vector<8x128xf32>
    %751 = arith.mulf %739, %750 : vector<8x128xf32>
    %752 = arith.addf %748, %751 : vector<8x128xf32>
    %753 = math.tanh %752 : vector<8x128xf32>
    %cst_228 = arith.constant 1.000000e+00 : f32
    %754 = vector.broadcast %cst_228 : f32 to vector<8x128xf32>
    %755 = arith.subf %754, %747 : vector<8x128xf32>
    %756 = arith.mulf %755, %753 : vector<8x128xf32>
    %757 = arith.mulf %747, %687 : vector<8x128xf32>
    %758 = arith.addf %756, %757 : vector<8x128xf32>
    %759 = arith.index_cast %694 : i32 to index
    %c0_229 = arith.constant 0 : index
    %760 = vector.load %arg19[%759, %c0_229] : memref<32x128xf32, #tpu.memory_space<vmem>>, vector<8x128xf32>
    tpu.vector_store %arg19[%759, %c0_229], %758 {strides = array<i32>} : memref<32x128xf32, #tpu.memory_space<vmem>>, vector<8x128xf32>,
    %c0_230 = arith.constant 0 : index
    %c0_231 = arith.constant 0 : index
    %761 = vector.load %arg8[%c0_230, %c0_231] : memref<128x384xf32, #tpu.memory_space<vmem>>, vector<128x384xf32>
    %cst_232 = arith.constant dense<0.000000e+00> : vector<8x384xf32>
    %762 = tpu.matmul %758, %761, %cst_232 {dimension_numbers = #tpu.dot_dimension_numbers<[1], [0], [0], [1], [0, 0, 1, 1], [], []>} : vector<8x128xf32>, vector<128x384xf32>, vector<8x384xf32> -> vector<8x384xf32>
    %763 = arith.addf %762, %25 : vector<8x384xf32>
    %c3_i32_233 = arith.constant 3 : i32
    %c8_i32_234 = arith.constant 8 : i32
    %764 = arith.muli %c3_i32_233, %c8_i32_234 : i32
    %765 = tpu.assume_multiple %764, 8 : i32
    %766 = arith.index_cast %765 : i32 to index
    %c0_235 = arith.constant 0 : index
    %767 = vector.load %arg18[%766, %c0_235] : memref<32x384xf32, #tpu.memory_space<vmem>>, vector<8x384xf32>
    %768 = arith.addf %767, %763 : vector<8x384xf32>
    %c0_236 = arith.constant 0 : index
    %c0_237 = arith.constant 0 : index
    %769 = vector.load %arg5[%c0_236, %c0_237] : memref<128x384xf32, #tpu.memory_space<vmem>>, vector<128x384xf32>
    %cst_238 = arith.constant dense<0.000000e+00> : vector<8x384xf32>
    %770 = tpu.matmul %726, %769, %cst_238 {dimension_numbers = #tpu.dot_dimension_numbers<[1], [0], [0], [1], [0, 0, 1, 1], [], []>} : vector<8x128xf32>, vector<128x384xf32>, vector<8x384xf32> -> vector<8x384xf32>
    %771 = vector.extract_strided_slice %768 {offsets = [0, 0], sizes = [8, 128], strides = [1, 1]} : vector<8x384xf32> to vector<8x128xf32>
    %772 = vector.extract_strided_slice %770 {offsets = [0, 0], sizes = [8, 128], strides = [1, 1]} : vector<8x384xf32> to vector<8x128xf32>
    %773 = arith.addf %771, %772 : vector<8x128xf32>
    %774 = arith.negf %773 : vector<8x128xf32>
    %775 = math.exp %774 : vector<8x128xf32>
    %cst_239 = arith.constant 1.000000e+00 : f32
    %776 = vector.broadcast %cst_239 : f32 to vector<8x128xf32>
    %777 = arith.addf %776, %775 : vector<8x128xf32>
    %778 = arith.divf %776, %777 : vector<8x128xf32>
    %779 = vector.extract_strided_slice %768 {offsets = [0, 128], sizes = [8, 128], strides = [1, 1]} : vector<8x384xf32> to vector<8x128xf32>
    %780 = vector.extract_strided_slice %770 {offsets = [0, 128], sizes = [8, 128], strides = [1, 1]} : vector<8x384xf32> to vector<8x128xf32>
    %781 = arith.addf %779, %780 : vector<8x128xf32>
    %782 = arith.negf %781 : vector<8x128xf32>
    %783 = math.exp %782 : vector<8x128xf32>
    %cst_240 = arith.constant 1.000000e+00 : f32
    %784 = vector.broadcast %cst_240 : f32 to vector<8x128xf32>
    %785 = arith.addf %784, %783 : vector<8x128xf32>
    %786 = arith.divf %784, %785 : vector<8x128xf32>
    %787 = vector.extract_strided_slice %768 {offsets = [0, 256], sizes = [8, 128], strides = [1, 1]} : vector<8x384xf32> to vector<8x128xf32>
    %788 = vector.extract_strided_slice %770 {offsets = [0, 256], sizes = [8, 128], strides = [1, 1]} : vector<8x384xf32> to vector<8x128xf32>
    %789 = arith.addf %788, %16 : vector<8x128xf32>
    %790 = arith.mulf %778, %789 : vector<8x128xf32>
    %791 = arith.addf %787, %790 : vector<8x128xf32>
    %792 = math.tanh %791 : vector<8x128xf32>
    %cst_241 = arith.constant 1.000000e+00 : f32
    %793 = vector.broadcast %cst_241 : f32 to vector<8x128xf32>
    %794 = arith.subf %793, %786 : vector<8x128xf32>
    %795 = arith.mulf %794, %792 : vector<8x128xf32>
    %796 = arith.mulf %786, %726 : vector<8x128xf32>
    %797 = arith.addf %795, %796 : vector<8x128xf32>
    %c0_242 = arith.constant 0 : index
    %c0_243 = arith.constant 0 : index
    %798 = vector.load %arg10[%c0_242, %c0_243] : memref<128x384xf32, #tpu.memory_space<vmem>>, vector<128x384xf32>
    %cst_244 = arith.constant dense<0.000000e+00> : vector<8x384xf32>
    %799 = tpu.matmul %797, %798, %cst_244 {dimension_numbers = #tpu.dot_dimension_numbers<[1], [0], [0], [1], [0, 0, 1, 1], [], []>} : vector<8x128xf32>, vector<128x384xf32>, vector<8x384xf32> -> vector<8x384xf32>
    %800 = arith.addf %799, %19 : vector<8x384xf32>
    %c0_245 = arith.constant 0 : index
    %c0_246 = arith.constant 0 : index
    %801 = vector.load %arg12[%c0_245, %c0_246] : memref<128x384xf32, #tpu.memory_space<vmem>>, vector<128x384xf32>
    %cst_247 = arith.constant dense<0.000000e+00> : vector<8x384xf32>
    %802 = tpu.matmul %758, %801, %cst_247 {dimension_numbers = #tpu.dot_dimension_numbers<[1], [0], [0], [1], [0, 0, 1, 1], [], []>} : vector<8x128xf32>, vector<128x384xf32>, vector<8x384xf32> -> vector<8x384xf32>
    %803 = vector.extract_strided_slice %800 {offsets = [0, 0], sizes = [8, 128], strides = [1, 1]} : vector<8x384xf32> to vector<8x128xf32>
    %804 = vector.extract_strided_slice %802 {offsets = [0, 0], sizes = [8, 128], strides = [1, 1]} : vector<8x384xf32> to vector<8x128xf32>
    %805 = arith.addf %803, %804 : vector<8x128xf32>
    %806 = arith.negf %805 : vector<8x128xf32>
    %807 = math.exp %806 : vector<8x128xf32>
    %cst_248 = arith.constant 1.000000e+00 : f32
    %808 = vector.broadcast %cst_248 : f32 to vector<8x128xf32>
    %809 = arith.addf %808, %807 : vector<8x128xf32>
    %810 = arith.divf %808, %809 : vector<8x128xf32>
    %811 = vector.extract_strided_slice %800 {offsets = [0, 128], sizes = [8, 128], strides = [1, 1]} : vector<8x384xf32> to vector<8x128xf32>
    %812 = vector.extract_strided_slice %802 {offsets = [0, 128], sizes = [8, 128], strides = [1, 1]} : vector<8x384xf32> to vector<8x128xf32>
    %813 = arith.addf %811, %812 : vector<8x128xf32>
    %814 = arith.negf %813 : vector<8x128xf32>
    %815 = math.exp %814 : vector<8x128xf32>
    %cst_249 = arith.constant 1.000000e+00 : f32
    %816 = vector.broadcast %cst_249 : f32 to vector<8x128xf32>
    %817 = arith.addf %816, %815 : vector<8x128xf32>
    %818 = arith.divf %816, %817 : vector<8x128xf32>
    %819 = vector.extract_strided_slice %800 {offsets = [0, 256], sizes = [8, 128], strides = [1, 1]} : vector<8x384xf32> to vector<8x128xf32>
    %820 = vector.extract_strided_slice %802 {offsets = [0, 256], sizes = [8, 128], strides = [1, 1]} : vector<8x384xf32> to vector<8x128xf32>
    %821 = arith.addf %820, %22 : vector<8x128xf32>
    %822 = arith.mulf %810, %821 : vector<8x128xf32>
    %823 = arith.addf %819, %822 : vector<8x128xf32>
    %824 = math.tanh %823 : vector<8x128xf32>
    %cst_250 = arith.constant 1.000000e+00 : f32
    %825 = vector.broadcast %cst_250 : f32 to vector<8x128xf32>
    %826 = arith.subf %825, %818 : vector<8x128xf32>
    %827 = arith.mulf %826, %824 : vector<8x128xf32>
    %828 = arith.mulf %818, %758 : vector<8x128xf32>
    %829 = arith.addf %827, %828 : vector<8x128xf32>
    %830 = arith.index_cast %765 : i32 to index
    %c0_251 = arith.constant 0 : index
    %831 = vector.load %arg19[%830, %c0_251] : memref<32x128xf32, #tpu.memory_space<vmem>>, vector<8x128xf32>
    tpu.vector_store %arg19[%830, %c0_251], %829 {strides = array<i32>} : memref<32x128xf32, #tpu.memory_space<vmem>>, vector<8x128xf32>,
    %c0_252 = arith.constant 0 : index
    %c0_253 = arith.constant 0 : index
    %832 = vector.load %arg8[%c0_252, %c0_253] : memref<128x384xf32, #tpu.memory_space<vmem>>, vector<128x384xf32>
    %cst_254 = arith.constant dense<0.000000e+00> : vector<8x384xf32>
    %833 = tpu.matmul %829, %832, %cst_254 {dimension_numbers = #tpu.dot_dimension_numbers<[1], [0], [0], [1], [0, 0, 1, 1], [], []>} : vector<8x128xf32>, vector<128x384xf32>, vector<8x384xf32> -> vector<8x384xf32>
    %834 = arith.addf %833, %25 : vector<8x384xf32>
    %c4_i32_255 = arith.constant 4 : i32
    %c0_256 = arith.constant 0 : index
    %c0_257 = arith.constant 0 : index
    %835 = vector.load %arg15[%c0_256, %c0_257] : memref<1x128xf32, #tpu.memory_space<vmem>>, vector<1x128xf32>
    %836 = vector.shape_cast %835 : vector<1x128xf32> to vector<1x128xf32>
    %837 = vector.broadcast %836 : vector<1x128xf32> to vector<32x128xf32>
    %c0_258 = arith.constant 0 : index
    %c0_259 = arith.constant 0 : index
    %838 = vector.load %arg19[%c0_258, %c0_259] : memref<32x128xf32, #tpu.memory_space<vmem>>, vector<32x128xf32>
    %c0_260 = arith.constant 0 : index
    %c0_261 = arith.constant 0 : index
    %839 = vector.load %arg14[%c0_260, %c0_261] : memref<128x128xf32, #tpu.memory_space<vmem>>, vector<128x128xf32>
    %cst_262 = arith.constant dense<0.000000e+00> : vector<32x128xf32>
    %840 = tpu.matmul %838, %839, %cst_262 {dimension_numbers = #tpu.dot_dimension_numbers<[1], [0], [0], [1], [0, 0, 1, 1], [], []>} : vector<32x128xf32>, vector<128x128xf32>, vector<32x128xf32> -> vector<32x128xf32>
    %841 = arith.addf %840, %837 : vector<32x128xf32>
    %c0_263 = arith.constant 0 : index
    %c0_264 = arith.constant 0 : index
    %842 = vector.load %arg16[%c0_263, %c0_264] : memref<32x128xf32, #tpu.memory_space<vmem>>, vector<32x128xf32>
    tpu.vector_store %arg16[%c0_263, %c0_264], %841 {strides = array<i32>} : memref<32x128xf32, #tpu.memory_space<vmem>>, vector<32x128xf32>,
    return
  }
}

</mosaic_0001>

<bundles_post_ra>
// kernel: rnn_forward.1
= control target key start
LH: loop header
LB: loop body
LE: loop exit
PB: predicated region body
PF: predicated region fallthrough
CT: control target
= control target key end

     0   :  { %s15212_s0 = inlined_call_operand.vmem [shape: f32[64,8], index: 0, kind: input, shape index: {}]   ;;  %s15213_s1 = inlined_call_operand.vmem [shape: f32[32,8], index: 1, kind: input, shape index: {}]   ;;  %s15214_s2 = inlined_call_operand.vmem [shape: f32[8,128], index: 2, kind: input, shape index: {}]   ;;  %s15215_s3 = inlined_call_operand.vmem [shape: f32[8,384], index: 3, kind: input, shape index: {}]   ;;  %s15216_s4 = inlined_call_operand.vmem [shape: f32[1,384], index: 4, kind: input, shape index: {}]   ;;  %s15217_s5 = inlined_call_operand.hbm [shape: f32[128,384], index: 5, kind: input, shape index: {}]   ;;  %s15218_s6 = inlined_call_operand.vmem [shape: f32[1,128], index: 6, kind: input, shape index: {}]   ;;  %s15219_s7 = inlined_call_operand.hbm [shape: f32[128,384], index: 7, kind: input, shape index: {}]   ;;  %s15220_s8 = inlined_call_operand.hbm [shape: f32[128,384], index: 8, kind: input, shape index: {}]   ;;  %s15221_s9 = inlined_call_operand.vmem [shape: f32[1,384], index: 9, kind: input, shape index: {}]   ;;  %s15222_s10 = inlined_call_operand.hbm [shape: f32[128,384], index: 10, kind: input, shape index: {}]   ;;  %s15223_s11 = inlined_call_operand.vmem [shape: f32[1,384], index: 11, kind: input, shape index: {}]   ;;  %s15224_s12 = inlined_call_operand.hbm [shape: f32[128,384], index: 12, kind: input, shape index: {}]   ;;  %s15225_s13 = inlined_call_operand.vmem [shape: f32[1,128], index: 13, kind: input, shape index: {}]   ;;  %s15226_s14 = inlined_call_operand.vmem [shape: f32[128,128], index: 14, kind: input, shape index: {}]   ;;  %s15227_s15 = inlined_call_operand.vmem [shape: f32[1,128], index: 15, kind: input, shape index: {}]   ;;  %s15228_s16 = inlined_call_operand.vmem [shape: f32[32,128], index: 16, kind: output, shape index: {}]  }
   0x1   :  { %15414 = sst [smem:[#allocation88_spill]] %s15212_s0 }
   0x2   :  { %21 = vsyncpa [#allocation6], 0 }
   0x3   :  { %22 = vsyncpa [#allocation8], 0 }
   0x4   :  { %23 = vsyncpa [#allocation11], 0  ;;  %s12851_s21 = smov [#allocation7]   ;;  %s12852_s23 = smov [#allocation10]  }
   0x5   :  { %s53_s22 = sshll.u32 %s12851_s21, 4  ;;  %s79_s24 = sshll.u32 %s12852_s23, 4  ;;  %s54_s22 = int_to_ptr.vmem [resolvable:$true] %s53_s22  ;;  %s12946_s24 = int_to_ptr.vmem [resolvable:$true] %s79_s24 }
   0x6   :  { %s12735_s27 = scalar_lea.hbm %s15219_s7, 6144 }
   0x7   :  { %p12736_p0 = scmp.ne.s32.totalorder %s15219_s7, %s12735_s27  ;;  %p12739_p1 = scmp.lt.u32.totalorder %s12735_s27, %s15219_s7 }
   0x9   :  { %p12741_p2 = pnand %p12739_p1, %p12736_p0 }
   0xb   :  { %12744 = shalt.err (!%p12741_p2)
}
   0xc   :  { %s12745_s17 = scalar_lea.vmem %s54_s22, 6144  ;;  %p12750_p4 = scmp.lt.s32.totalorder %s54_s22, %s54_s22 }
   0xd   :  { %p12746_p3 = scmp.ne.s32.totalorder %s54_s22, %s12745_s17  ;;  %p12751_p5 = scmp.lt.s32.totalorder %s12745_s17, %s12745_s17 }
   0xf   :  { %p12752_p6 = por %p12751_p5, %p12750_p4 }
  0x11   :  { %p12753_p7 = pnand %p12752_p6, %p12746_p3 }
  0x13   :  { %12756 = shalt.err (!%p12753_p7)
}
  0x14   :  { %s12853_s18 = smov 384   ;;  %s12854_s19 = smov 24  }
  0x15   :  { %59 = dma.hbm_to_vmem [thread:$0]  %s15219_s7, 6144, %s54_s22, [#allocation8], %s12853_s18, %s12853_s18, %s12854_s19  }
  0x16   :  { %s12757_s26 = scalar_lea.hbm %s15222_s10, 6144 }
  0x17   :  { %p12758_p8 = scmp.ne.s32.totalorder %s15222_s10, %s12757_s26  ;;  %p12761_p9 = scmp.lt.u32.totalorder %s12757_s26, %s15222_s10 }
  0x19   :  { %p12763_p10 = pnand %p12761_p9, %p12758_p8 }
  0x1b   :  { %12766 = shalt.err (!%p12763_p10)
}
  0x1c   :  { %s12767_s0 = scalar_lea.vmem %s12946_s24, 6144  ;;  %p12772_p12 = scmp.lt.s32.totalorder %s12946_s24, %s12946_s24 }
  0x1d   :  { %p12768_p11 = scmp.ne.s32.totalorder %s12946_s24, %s12767_s0  ;;  %p12773_p13 = scmp.lt.s32.totalorder %s12767_s0, %s12767_s0 }
  0x1f   :  { %p12774_p0 = por %p12773_p13, %p12772_p12 }
  0x21   :  { %p12775_p1 = pnand %p12774_p0, %p12768_p11 }
  0x23   :  { %12778 = shalt.err (!%p12775_p1)
}
  0x24   :  { %85 = dma.hbm_to_vmem [thread:$0]  %s15222_s10, 6144, %s12946_s24, [#allocation11], %s12853_s18, %s12853_s18, %s12854_s19  }
  0x25   :  { %s12855_s17 = smov [#allocation5]   ;;  %s12856_s21 = smov [#allocation9]  }
  0x26   :  { %s39_s20 = sshll.u32 %s12855_s17, 4  ;;  %s65_s23 = sshll.u32 %s12856_s21, 4  ;;  %s40_s20 = int_to_ptr.vmem [resolvable:$true] %s39_s20  ;;  %s12983_s23 = int_to_ptr.vmem [resolvable:$true] %s65_s23 }
  0x27   :  { %s12779_s27 = scalar_lea.hbm %s15217_s5, 6144 }
  0x28   :  { %p12780_p2 = scmp.ne.s32.totalorder %s15217_s5, %s12779_s27  ;;  %p12783_p3 = scmp.lt.u32.totalorder %s12779_s27, %s15217_s5 }
  0x2a   :  { %p12785_p4 = pnand %p12783_p3, %p12780_p2 }
  0x2c   :  { %12788 = shalt.err (!%p12785_p4)
}
  0x2d   :  { %s12789_s10 = scalar_lea.vmem %s40_s20, 6144  ;;  %p12794_p6 = scmp.lt.s32.totalorder %s40_s20, %s40_s20 }
  0x2e   :  { %p12790_p5 = scmp.ne.s32.totalorder %s40_s20, %s12789_s10  ;;  %p12795_p7 = scmp.lt.s32.totalorder %s12789_s10, %s12789_s10 }
  0x30   :  { %p12796_p8 = por %p12795_p7, %p12794_p6 }
  0x32   :  { %p12797_p9 = pnand %p12796_p8, %p12790_p5 }
  0x34   :  { %12800 = shalt.err (!%p12797_p9)
}
  0x35   :  { %45 = dma.hbm_to_vmem [thread:$0]  %s15217_s5, 6144, %s40_s20, [#allocation6], %s12853_s18, %s12853_s18, %s12854_s19  }
  0x36   :  { %s12801_s21 = scalar_lea.hbm %s15220_s8, 6144 }
  0x37   :  { %p12802_p10 = scmp.ne.s32.totalorder %s15220_s8, %s12801_s21  ;;  %p12805_p11 = scmp.lt.u32.totalorder %s12801_s21, %s15220_s8 }
  0x39   :  { %p12807_p12 = pnand %p12805_p11, %p12802_p10 }
  0x3b   :  { %12810 = shalt.err (!%p12807_p12)
}
  0x3c   :  { %s12811_s29 = scalar_lea.vmem %s12983_s23, 6144  ;;  %p12816_p0 = scmp.lt.s32.totalorder %s12983_s23, %s12983_s23 }
  0x3d   :  { %p12812_p13 = scmp.ne.s32.totalorder %s12983_s23, %s12811_s29  ;;  %p12817_p1 = scmp.lt.s32.totalorder %s12811_s29, %s12811_s29 }
  0x3f   :  { %p12818_p2 = por %p12817_p1, %p12816_p0 }
  0x41   :  { %p12819_p3 = pnand %p12818_p2, %p12812_p13 }
  0x43   :  { %12822 = shalt.err (!%p12819_p3)
}
  0x44   :  { %71 = dma.hbm_to_vmem [thread:$0]  %s15220_s8, 6144, %s12983_s23, [#allocation8], %s12853_s18, %s12853_s18, %s12854_s19  }
  0x45   :  { %s12857_s30 = smov [#allocation12]   ;;  %s12823_s7 = scalar_lea.hbm %s15224_s12, 6144 }
  0x46   :  { %s93_s0 = sshll.u32 %s12857_s30, 4  ;;  %p12824_p4 = scmp.ne.s32.totalorder %s15224_s12, %s12823_s7  ;;  %s94_s0 = int_to_ptr.vmem [resolvable:$true] %s93_s0 }
  0x47   :  { %p12827_p5 = scmp.lt.u32.totalorder %s12823_s7, %s15224_s12 }
  0x49   :  { %p12829_p6 = pnand %p12827_p5, %p12824_p4 }
  0x4b   :  { %12832 = shalt.err (!%p12829_p6)
}
  0x4c   :  { %s12833_s26 = scalar_lea.vmem %s94_s0, 6144  ;;  %p12838_p8 = scmp.lt.s32.totalorder %s94_s0, %s94_s0 }
  0x4d   :  { %p12834_p7 = scmp.ne.s32.totalorder %s94_s0, %s12833_s26  ;;  %p12839_p9 = scmp.lt.s32.totalorder %s12833_s26, %s12833_s26 }
  0x4f   :  { %p12840_p10 = por %p12839_p9, %p12838_p8 }
  0x51   :  { %p12841_p11 = pnand %p12840_p10, %p12834_p7 }
  0x53   :  { %12844 = shalt.err (!%p12841_p11)
}
  0x54   :  { %99 = dma.hbm_to_vmem [thread:$0]  %s15224_s12, 6144, %s94_s0, [#allocation11], %s12853_s18, %s12853_s18, %s12854_s19  }
  0x55   :  { %12845 = dma.done.wait [#allocation6], 6144  }
  0x56   :  { %12846 = vsyncadd [#allocation6], 4294961152 }
  0x57   :  { %12847 = dma.done.wait [#allocation8], 12288  }
  0x58   :  { %12848 = vsyncadd [#allocation8], 4294955008 }
  0x59   :  { %12849 = dma.done.wait [#allocation11], 12288  }
  0x5a   :  { %12850 = vsyncadd [#allocation11], 4294955008  ;;  %v15230_v0 = vmov 0.0   ;;  %v130_v1 = vld [vmem:[%s15215_s3 + $0x8] sm:$0xff]  ;;  %v129_v2 = vld [vmem:[%s15215_s3] sm:$0xff]  ;;  %s15415_s12 = sld [smem:[#allocation88_spill]] }
  0x5b   :  { %238 = vmatprep.mubr.f32.mxu0 %v15230_v0  ;;  %vm149_vm0 = vcmask 64512   ;;  %174 = vmatprep.subr.mxu0 %v130_v1  ;;  %v13050_v4 = vld [vmem:[%s15215_s3 + $0x10] sm:$0xff]  ;;  %v15232_v9 = vmov 0.0|0.0   ;;  %v13089_v10 = vld [vmem:[%s15213_s1] sm:$0xff]  ;;  %v13105_v12 = vld [vmem:[%s15213_s1 + $0x8] sm:$0xff]  ;;  %vm12860_vm1 = vmmov 0  }
  0x5c   :  { %175 = vmatpush1.msra.mxu0 %v129_v2  ;;  %12364 = vmatprep.subr.mxu1 %v13050_v4  ;;  %v694_v13 = vld [vmem:[#allocation5 + $0x10] sm:$0xff]  ;;  %v697_v14 = vld [vmem:[#allocation5 + $0x28] sm:$0xff]  ;;  %v700_v17 = vld [vmem:[#allocation5 + $0x40] sm:$0xff] }
  0x5d   :  { %8632 = vmatprep.subr.mxu0 %v13050_v4  ;;  %12365 = vmatpush3.msra.mxu1 %v13050_v4  ;;  %v13109_v15 = vpack.c.bf16 %v697_v14, %v694_v13  ;;  %v703_v18 = vld [vmem:[#allocation5 + $0x58] sm:$0xff]  ;;  %v13124_v20 = vld [vmem:[%s15213_s1 + $0x10] sm:$0xff]  ;;  %v709_v22 = vld [vmem:[#allocation5 + $0x88] sm:$0xff] }
  0x5e   :  { %452 = vmatprep.subr.mxu1 %v130_v1  ;;  %v13119_v19 = vpack.c.bf16 %v703_v18, %v700_v17  ;;  %v706_v21 = vld [vmem:[#allocation5 + $0x70] sm:$0xff]  ;;  %v13141_v25 = vld [vmem:[%s15213_s1 + $0x18] sm:$0xff]  ;;  %v712_v26 = vld [vmem:[#allocation5 + $0xa0] sm:$0xff] }
  0x5f   :  { %v13136_v24 = vpack.c.bf16 %v709_v22, %v706_v21  ;;  %v715_v27 = vld [vmem:[#allocation5 + $0xb8] sm:$0xff]  ;;  %v718_v29 = vld [vmem:[#allocation5 + $0xd0] sm:$0xff]  ;;  %v721_v30 = vld [vmem:[#allocation5 + $0xe8] sm:$0xff] }
  0x60   :  { %v13045_v3 = vld [vmem:[%s15415_s12] sm:$0xff]  ;;  %v13061_v5 = vld [vmem:[%s15415_s12 + $0x8] sm:$0xff]  ;;  %v127_v6 = vld [vmem:[%s15415_s12 + $0x30] sm:$0xff]  ;;  %v13151_v28 = vpack.c.bf16 %v715_v27, %v712_v26  ;;  %v13157_v32 = vpack.c.bf16 %v721_v30, %v718_v29 }
  0x61   :  { %7843 = vmatmul.mubr.msk.f32.vlgmr.msra.gmra.mrb[0].mxu0 %vm149_vm0, %v13045_v3  ;;  %v13071_v7 = vld [vmem:[%s15415_s12 + $0x38] sm:$0xff]  ;;  %8643 = vmatprep.mubr.msk.f32.mxu1 %vm149_vm0, %v127_v6  ;;  %v13082_v8 = vld [vmem:[%s15415_s12 + $0x10] sm:$0xff]  ;;  %v125_v16 = vld [vmem:[%s15415_s12 + $0x20] sm:$0xff] }
  0x62   :  { %8633 = vmatpush3.msra.mxu0 %v13050_v4  ;;  %244 = vmatprep.mubr.f32.mxu0 %v15230_v0  ;;  %v13099_v11 = vld [vmem:[%s15415_s12 + $0x18] sm:$0xff]  ;;  %v126_v23 = vld [vmem:[%s15415_s12 + $0x28] sm:$0xff]  ;;  %15416 = vst [vmem:[#allocation16_spill] sm:$0xff] %v13157_v32  ;;  %v696_v33 = vld [vmem:[#allocation5 + $0x20] sm:$0xff] }
  0x63   :  { %8646 = vmatprep.subr.mxu0 %v13050_v4  ;;  %8644 = vmatmul.mubr.msk.f32.vlgmr.msra.gmra.mrb[0].mxu1 %vm149_vm0, %v13071_v7  ;;  %v693_v31 = vld [vmem:[#allocation5 + $0x8] sm:$0xff]  ;;  %v724_v34 = vld [vmem:[#allocation5 + $0x100] sm:$0xff]  ;;  %v727_v35 = vld [vmem:[#allocation5 + $0x118] sm:$0xff] }
  0x64   :  { %453 = vmatpush1.msra.mxu1 %v129_v2  ;;  %516 = vmatprep.mubr.f32.mxu1 %v15230_v0  ;;  %v13164_v36 = vpack.c.bf16 %v696_v33, %v693_v31  ;;  %v13167_v37 = vpack.c.bf16 %v727_v35, %v724_v34  ;;  %v730_v38 = vld [vmem:[#allocation5 + $0x130] sm:$0xff]  ;;  %v733_v39 = vld [vmem:[#allocation5 + $0x148] sm:$0xff]  ;;  %v736_v41 = vld [vmem:[#allocation5 + $0x160] sm:$0xff] }
  0x65   :  { %7844 = vmatmul.mubr.msk.f32.gmra.mrb[2].mxu0 %vm149_vm0, %v13061_v5  ;;  %10124 = vmatprep.subr.bf16.mxu1 %v15232_v9  ;;  %v13177_v40 = vpack.c.bf16 %v733_v39, %v730_v38  ;;  %v739_v42 = vld [vmem:[#allocation5 + $0x178] sm:$0xff]  ;;  %v692_v43 = vld [vmem:[#allocation5] sm:$0xff]  ;;  %v702_v47 = vld [vmem:[#allocation5 + $0x50] sm:$0xff] }
  0x66   :  { %250 = vmatprep.mubr.f32.mxu0 %v15230_v0  ;;  %15417 = vst [vmem:[#allocation17_spill] sm:$0xff] %v13167_v37  ;;  %v695_v44 = vld [vmem:[#allocation5 + $0x18] sm:$0xff]  ;;  %v13184_v45 = vpack.c.bf16 %v739_v42, %v736_v41  ;;  %v698_v50 = vld [vmem:[#allocation5 + $0x30] sm:$0xff]  ;;  %v701_v51 = vld [vmem:[#allocation5 + $0x48] sm:$0xff] }
  0x67   :  { %7859 = vmatmul.mubr.msk.f32.vlgmr.msra.gmra.mrb[2].mxu1 %vm149_vm0, %v13089_v10  ;;  %15418 = vst [vmem:[#allocation18_spill] sm:$0xff] %v13177_v40  ;;  %v699_v46 = vld [vmem:[#allocation5 + $0x38] sm:$0xff]  ;;  %v13190_v48 = vpack.c.bf16 %v695_v44, %v692_v43  ;;  %v705_v52 = vld [vmem:[#allocation5 + $0x68] sm:$0xff]  ;;  %v708_v53 = vld [vmem:[#allocation5 + $0x80] sm:$0xff]  ;;  %v13198_v54 = vpack.c.bf16 %v701_v51, %v698_v50 }
  0x68   :  { %522 = vmatprep.mubr.f32.mxu1 %v15230_v0  ;;  %10126 = vmatpush3.bf16.msra.mxu1 %v13109_v15  ;;  %15419 = vst [vmem:[#allocation19_spill] sm:$0xff] %v13184_v45  ;;  %v13192_v49 = vpack.c.bf16 %v702_v47, %v699_v46  ;;  %v13203_v55 = vpack.c.bf16 %v708_v53, %v705_v52  ;;  %v704_v56 = vld [vmem:[#allocation5 + $0x60] sm:$0xff]  ;;  %v707_v57 = vld [vmem:[#allocation5 + $0x78] sm:$0xff]  ;;  %v714_v59 = vld [vmem:[#allocation5 + $0xb0] sm:$0xff] }
  0x69   :  { %7845 = vmatmul.mubr.msk.f32.gmra.mrb[4].mxu0 %vm149_vm0, %v13082_v8  ;;  %10127 = vmatprep.subr.bf16.mxu1 %v15232_v9  ;;  %v711_v58 = vld [vmem:[#allocation5 + $0x98] sm:$0xff]  ;;  %v13210_v60 = vpack.c.bf16 %v707_v57, %v704_v56  ;;  %v710_v62 = vld [vmem:[#allocation5 + $0x90] sm:$0xff]  ;;  %v713_v63 = vld [vmem:[#allocation5 + $0xa8] sm:$0xff] }
  0x6a   :  { %256 = vmatprep.mubr.f32.mxu0 %v15230_v0  ;;  %v13214_v61 = vpack.c.bf16 %v714_v59, %v711_v58  ;;  %v717_v1 = vld [vmem:[#allocation5 + $0xc8] sm:$0xff]  ;;  %v720_v2 = vld [vmem:[#allocation5 + $0xe0] sm:$0xff]  ;;  %v731_v21 = vld [vmem:[#allocation5 + $0x138] sm:$0xff] }
  0x6b   :  { %7860 = vmatmul.mubr.msk.f32.gmra.mrb[4].mxu1 %vm149_vm0, %v13105_v12  ;;  %v725_v13 = vld [vmem:[#allocation5 + $0x108] sm:$0xff]  ;;  %v735_v22 = vld [vmem:[#allocation5 + $0x158] sm:$0xff]  ;;  %v734_v27 = vld [vmem:[#allocation5 + $0x150] sm:$0xff] }
  0x6c   :  { %528 = vmatprep.mubr.f32.mxu1 %v15230_v0  ;;  %10129 = vmatpush3.bf16.msra.mxu1 %v13119_v19  ;;  %v729_v14 = vld [vmem:[#allocation5 + $0x128] sm:$0xff]  ;;  %v907_v33 = vld [vmem:[#allocation10 + $0x20] sm:$0xff]  ;;  %v906_v38 = vld [vmem:[#allocation10 + $0x18] sm:$0xff] }
  0x6d   :  { %7846 = vmatmul.mubr.msk.f32.gmra.mrb[6].mxu0 %vm149_vm0, %v13099_v11  ;;  %10130 = vmatprep.subr.bf16.mxu1 %v15232_v9  ;;  %v737_v29 = vld [vmem:[#allocation5 + $0x168] sm:$0xff]  ;;  %v903_v35 = vld [vmem:[#allocation10] sm:$0xff]  ;;  %v905_v39 = vld [vmem:[#allocation10 + $0x10] sm:$0xff] }
  0x6e   :  { %262 = vmatprep.mubr.f32.mxu0 %v15230_v0  ;;  %v13241_v30 = vpack.c.bf16 %v737_v29, %v734_v27  ;;  %v904_v31 = vld [vmem:[#allocation10 + $0x8] sm:$0xff]  ;;  %v13251_v41 = vpack.c.bf16 %v906_v38, %v903_v35  ;;  %v910_v44 = vld [vmem:[#allocation10 + $0x38] sm:$0xff]  ;;  %v913_v46 = vld [vmem:[#allocation10 + $0x50] sm:$0xff] }
  0x6f   :  { %7861 = vmatmul.mubr.msk.f32.gmra.mrb[6].mxu1 %vm149_vm0, %v13124_v20  ;;  %v13249_v34 = vpack.c.bf16 %v907_v33, %v904_v31  ;;  %v908_v42 = vld [vmem:[#allocation10 + $0x28] sm:$0xff]  ;;  %v13258_v47 = vpack.c.bf16 %v913_v46, %v910_v44  ;;  %v909_v50 = vld [vmem:[#allocation10 + $0x30] sm:$0xff]  ;;  %v911_v52 = vld [vmem:[#allocation10 + $0x40] sm:$0xff] }
  0x70   :  { %534 = vmatprep.mubr.f32.mxu1 %v15230_v0  ;;  %10132 = vmatpush3.bf16.msra.mxu1 %v13136_v24  ;;  %15426 = vst [vmem:[#allocation26_spill] sm:$0xff] %v13241_v30  ;;  %15428 = vst [vmem:[#allocation28_spill] sm:$0xff] %v13251_v41  ;;  %v13254_v43 = vpack.c.bf16 %v908_v42, %v905_v39  ;;  %v912_v51 = vld [vmem:[#allocation10 + $0x48] sm:$0xff]  ;;  %v914_v56 = vld [vmem:[#allocation10 + $0x58] sm:$0xff] }
  0x71   :  { %7847 = vmatmul.mubr.msk.f32.gmra.mrb[8].mxu0 %vm149_vm0, %v125_v16  ;;  %10133 = vmatprep.subr.bf16.mxu1 %v15232_v9  ;;  %15427 = vst [vmem:[#allocation27_spill] sm:$0xff] %v13249_v34  ;;  %15430 = vst [vmem:[#allocation30_spill] sm:$0xff] %v13258_v47  ;;  %v13261_v53 = vpack.c.bf16 %v912_v51, %v909_v50  ;;  %v13264_v57 = vpack.c.bf16 %v914_v56, %v911_v52  ;;  %v916_v58 = vld [vmem:[#allocation10 + $0x68] sm:$0xff]  ;;  %v919_v59 = vld [vmem:[#allocation10 + $0x80] sm:$0xff] }
  0x72   :  { %268 = vmatprep.mubr.f32.mxu0 %v15230_v0  ;;  %15429 = vst [vmem:[#allocation29_spill] sm:$0xff] %v13254_v43  ;;  %v928_v27 = vld [vmem:[#allocation10 + $0xc8] sm:$0xff]  ;;  %v931_v29 = vld [vmem:[#allocation10 + $0xe0] sm:$0xff]  ;;  %v930_v35 = vld [vmem:[#allocation10 + $0xd8] sm:$0xff] }
  0x73   :  { %7862 = vmatmul.mubr.msk.f32.gmra.mrb[8].mxu1 %vm149_vm0, %v13141_v25  ;;  %15431 = vst [vmem:[#allocation31_spill] sm:$0xff] %v13261_v53  ;;  %15432 = vst [vmem:[#allocation32_spill] sm:$0xff] %v13264_v57  ;;  %v13288_v31 = vpack.c.bf16 %v931_v29, %v928_v27  ;;  %v927_v33 = vld [vmem:[#allocation10 + $0xc0] sm:$0xff]  ;;  %v929_v38 = vld [vmem:[#allocation10 + $0xd0] sm:$0xff] }
  0x74   :  { %8686 = vmatprep.mubr.msk.f32.mxu1 %vm12860_vm1, %v15230_v0  ;;  %10135 = vmatpush3.bf16.msra.mxu1 %v13151_v28  ;;  %v13291_v39 = vpack.c.bf16 %v930_v35, %v927_v33  ;;  %v932_v42 = vld [vmem:[#allocation10 + $0xe8] sm:$0xff]  ;;  %v934_v46 = vld [vmem:[#allocation10 + $0xf8] sm:$0xff]  ;;  %v937_v50 = vld [vmem:[#allocation10 + $0x110] sm:$0xff] }
  0x75   :  { %7848 = vmatmul.mubr.msk.f32.gmra.mrb[10].mxu0 %vm149_vm0, %v126_v23  ;;  %10136 = vmatprep.subr.bf16.mxu1 %v15232_v9  ;;  %15439 = vst [vmem:[#allocation39_spill] sm:$0xff] %v13288_v31  ;;  %v13294_v44 = vpack.c.bf16 %v932_v42, %v929_v38  ;;  %v13298_v51 = vpack.c.bf16 %v937_v50, %v934_v46  ;;  %v933_v52 = vld [vmem:[#allocation10 + $0xf0] sm:$0xff]  ;;  %v936_v56 = vld [vmem:[#allocation10 + $0x108] sm:$0xff]  ;;  %v946_v27 = vld [vmem:[#allocation10 + $0x158] sm:$0xff] }
  0x76   :  { %274 = vmatprep.mubr.f32.mxu0 %v15230_v0  ;;  %15440 = vst [vmem:[#allocation40_spill] sm:$0xff] %v13291_v39  ;;  %v949_v29 = vld [vmem:[#allocation10 + $0x170] sm:$0xff]  ;;  %v948_v42 = vld [vmem:[#allocation10 + $0x168] sm:$0xff]  ;;  %v947_v46 = vld [vmem:[#allocation10 + $0x160] sm:$0xff] }
  0x77   :  { %15441 = vst [vmem:[#allocation41_spill] sm:$0xff] %v13294_v44  ;;  %15442 = vst [vmem:[#allocation42_spill] sm:$0xff] %v13298_v51  ;;  %v13315_v35 = vpack.c.bf16 %v949_v29, %v946_v27  ;;  %v945_v38 = vld [vmem:[#allocation10 + $0x150] sm:$0xff]  ;;  %v950_v50 = vld [vmem:[#allocation10 + $0x178] sm:$0xff] }
  0x78   :  { %10138 = vmatpush3.bf16.msra.mxu1 %v13157_v32 }
  0x79   :  { %7849 = vmatmul.mubr.msk.f32.gmra.mrb[12].mxu0 %vm149_vm0, %v127_v6  ;;  %10139 = vmatprep.subr.bf16.mxu1 %v15232_v9  ;;  %v719_v6 = vld [vmem:[#allocation5 + $0xd8] sm:$0xff]  ;;  %15448 = vst [vmem:[#allocation48_spill] sm:$0xff] %v13315_v35 }
  0x7a   :  { %280 = vmatprep.mubr.f32.mxu0 %v15230_v0 }
  0x7c   :  { %10141 = vmatpush3.bf16.msra.mxu1 %v13167_v37 }
  0x7d   :  { %7850 = vmatmul.mubr.msk.f32.gmra.mrb[14].mxu0 %vm149_vm0, %v13071_v7  ;;  %10142 = vmatprep.subr.bf16.mxu1 %v15232_v9  ;;  %v723_v7 = vld [vmem:[#allocation5 + $0xf8] sm:$0xff] }
  0x7e   :  { %8634 = vmatprep.mubr.msk.f32.mxu0 %vm149_vm0, %v13045_v3  ;;  %v13217_v3 = vpack.c.bf16 %v713_v63, %v710_v62  ;;  %v13268_v62 = vpack.c.bf16 %v919_v59, %v916_v58  ;;  %v915_v63 = vld [vmem:[#allocation10 + $0x60] sm:$0xff]  ;;  %v13301_v59 = vpack.c.bf16 %v936_v56, %v933_v52  ;;  %v1093_v52 = vld [vmem:[#allocation12 + $0x8] sm:$0xff] }
  0x7f   :  { %v935_v58 = vld [vmem:[#allocation10 + $0x100] sm:$0xff] }
  0x80   :  { %10144 = vmatpush3.bf16.msra.mxu1 %v13177_v40  ;;  %15433 = vst [vmem:[#allocation33_spill] sm:$0xff] %v13268_v62  ;;  %15443 = vst [vmem:[#allocation43_spill] sm:$0xff] %v13301_v59  ;;  %v1096_v56 = vld [vmem:[#allocation12 + $0x20] sm:$0xff] }
  0x81   :  { %8635 = vmatmul.mubr.msk.f32.vlgmr.msra.gmra.mrb[16].mxu0 %vm149_vm0, %v13061_v5  ;;  %10145 = vmatprep.subr.bf16.mxu1 %v15232_v9  ;;  %v716_v5 = vld [vmem:[#allocation5 + $0xc0] sm:$0xff] }
  0x82   :  { %8647 = vmatpush3.msra.mxu0 %v13050_v4  ;;  %8637 = vmatprep.mubr.msk.f32.mxu0 %vm149_vm0, %v13082_v8  ;;  %v13220_v4 = vpack.c.bf16 %v720_v2, %v717_v1  ;;  %v726_v8 = vld [vmem:[#allocation5 + $0x110] sm:$0xff]  ;;  %v918_v1 = vld [vmem:[#allocation10 + $0x78] sm:$0xff] }
  0x83   :  { %10093 = vmatprep.subr.bf16.mxu0 %v13164_v36  ;;  %v917_v2 = vld [vmem:[#allocation10 + $0x70] sm:$0xff] }
  0x84   :  { %10147 = vmatpush3.bf16.msra.mxu1 %v13184_v45 }
  0x85   :  { %8638 = vmatmul.mubr.msk.f32.gmra.mrb[18].mxu0 %vm149_vm0, %v13099_v11  ;;  %v13226_v11 = vpack.c.bf16 %v726_v8, %v723_v7  ;;  %10149 = vmatprep.subr.bf16.mxu1 %v13249_v34  ;;  %v922_v8 = vld [vmem:[#allocation10 + $0x98] sm:$0xff] }
  0x86   :  { %8640 = vmatprep.mubr.msk.f32.mxu0 %vm149_vm0, %v125_v16  ;;  %v732_v16 = vld [vmem:[#allocation5 + $0x140] sm:$0xff] }
  0x87   :  { %8687 = vmatmul.mubr.f32.vlgmr.msra.gmra.mrb[10].mxu1 %v15230_v0  ;;  %15421 = vst [vmem:[#allocation21_spill] sm:$0xff] %v13226_v11  ;;  %v13232_v18 = vpack.c.bf16 %v732_v16, %v729_v14  ;;  %v921_v14 = vld [vmem:[#allocation10 + $0x90] sm:$0xff]  ;;  %v924_v16 = vld [vmem:[#allocation10 + $0xa8] sm:$0xff] }
  0x88   :  { %1015 = vmatprep.mubr.f32.mxu1 %v15230_v0  ;;  %10151 = vmatpush1.bf16.msra.mxu1 %v13251_v41 }
  0x89   :  { %8641 = vmatmul.mubr.msk.f32.gmra.mrb[20].mxu0 %vm149_vm0, %v126_v23  ;;  %15423 = vst [vmem:[#allocation23_spill] sm:$0xff] %v13232_v18  ;;  %v738_v23 = vld [vmem:[#allocation5 + $0x170] sm:$0xff]  ;;  %10153 = vmatprep.subr.bf16.mxu1 %v13258_v47 }
  0x8a   :  { %8648 = vmatprep.mubr.msk.f32.mxu0 %vm149_vm0, %v13089_v10  ;;  %v13223_v10 = vpack.c.bf16 %v719_v6, %v716_v5  ;;  %v13238_v26 = vpack.c.bf16 %v738_v23, %v735_v22  ;;  %v13271_v5 = vpack.c.bf16 %v918_v1, %v915_v63  ;;  %v920_v6 = vld [vmem:[#allocation10 + $0x88] sm:$0xff]  ;;  %v926_v22 = vld [vmem:[#allocation10 + $0xb8] sm:$0xff] }
  0x8b   :  { %v13274_v7 = vpack.c.bf16 %v920_v6, %v917_v2  ;;  %v938_v63 = vld [vmem:[#allocation10 + $0x118] sm:$0xff]  ;;  %v940_v1 = vld [vmem:[#allocation10 + $0x128] sm:$0xff]  ;;  %v943_v2 = vld [vmem:[#allocation10 + $0x140] sm:$0xff] }
  0x8c   :  { %15420 = vst [vmem:[#allocation20_spill] sm:$0xff] %v13223_v10  ;;  %15425 = vst [vmem:[#allocation25_spill] sm:$0xff] %v13238_v26  ;;  %10155 = vmatpush1.bf16.msra.mxu1 %v13261_v53  ;;  %v13304_v6 = vpack.c.bf16 %v938_v63, %v935_v58  ;;  %v13319_v58 = vpack.c.bf16 %v948_v42, %v945_v38  ;;  %v13323_v63 = vpack.c.bf16 %v950_v50, %v947_v46 }
  0x8d   :  { %8649 = vmatmul.mubr.msk.f32.vlgmr.msra.gmra.mrb[22].mxu0 %vm149_vm0, %v13105_v12  ;;  %v722_v12 = vld [vmem:[#allocation5 + $0xf0] sm:$0xff]  ;;  %15434 = vst [vmem:[#allocation34_spill] sm:$0xff] %v13271_v5  ;;  %10157 = vmatprep.subr.bf16.mxu1 %v13268_v62  ;;  %15435 = vst [vmem:[#allocation35_spill] sm:$0xff] %v13274_v7 }
  0x8e   :  { %10095 = vmatpush1.bf16.msra.mxu0 %v13190_v48  ;;  %8651 = vmatprep.mubr.msk.f32.mxu0 %vm149_vm0, %v13124_v20  ;;  %v13229_v17 = vpack.c.bf16 %v725_v13, %v722_v12  ;;  %v728_v20 = vld [vmem:[#allocation5 + $0x120] sm:$0xff]  ;;  %v925_v12 = vld [vmem:[#allocation10 + $0xb0] sm:$0xff]  ;;  %15444 = vst [vmem:[#allocation44_spill] sm:$0xff] %v13304_v6  ;;  %15449 = vst [vmem:[#allocation49_spill] sm:$0xff] %v13319_v58 }
  0x8f   :  { %10097 = vmatprep.subr.bf16.mxu0 %v13192_v49  ;;  %v13278_v13 = vpack.c.bf16 %v925_v12, %v922_v8  ;;  %v13306_v8 = vpack.c.bf16 %v943_v2, %v940_v1  ;;  %v939_v12 = vld [vmem:[#allocation10 + $0x120] sm:$0xff]  ;;  %15450 = vst [vmem:[#allocation50_spill] sm:$0xff] %v13323_v63  ;;  %v13325_v1 = vpack.c.bf16 %v1096_v56, %v1093_v52  ;;  %v134_v2 = vlaneseq }
  0x90   :  { %15422 = vst [vmem:[#allocation22_spill] sm:$0xff] %v13229_v17  ;;  %10159 = vmatpush1.bf16.msra.mxu1 %v13271_v5 }
  0x91   :  { %8652 = vmatmul.mubr.msk.f32.gmra.mrb[24].mxu0 %vm149_vm0, %v13141_v25  ;;  %v13235_v25 = vpack.c.bf16 %v731_v21, %v728_v20  ;;  %15436 = vst [vmem:[#allocation36_spill] sm:$0xff] %v13278_v13  ;;  %v923_v20 = vld [vmem:[#allocation10 + $0xa0] sm:$0xff]  ;;  %v13281_v21 = vpack.c.bf16 %v924_v16, %v921_v14  ;;  %10161 = vmatprep.subr.bf16.mxu1 %v13278_v13  ;;  %15445 = vst [vmem:[#allocation45_spill] sm:$0xff] %v13306_v8  ;;  %v942_v14 = vld [vmem:[#allocation10 + $0x138] sm:$0xff] }
  0x92   :  { %10099 = vmatpush1.bf16.msra.mxu0 %v13198_v54  ;;  %804 = vmatprep.mubr.f32.mxu0 %v15230_v0  ;;  %v13284_v23 = vpack.c.bf16 %v926_v22, %v923_v20  ;;  %v941_v16 = vld [vmem:[#allocation10 + $0x130] sm:$0xff]  ;;  %v13309_v20 = vpack.c.bf16 %v942_v14, %v939_v12  ;;  %v944_v22 = vld [vmem:[#allocation10 + $0x148] sm:$0xff]  ;;  %15451 = vst [vmem:[#allocation51_spill] sm:$0xff] %v13325_v1  ;;  %v135_v12 = vshrl.u32 %v134_v2, 7 }
  0x93   :  { %10101 = vmatprep.subr.bf16.mxu0 %v13203_v55  ;;  %15424 = vst [vmem:[#allocation24_spill] sm:$0xff] %v13235_v25  ;;  %15437 = vst [vmem:[#allocation37_spill] sm:$0xff] %v13281_v21  ;;  %v13313_v33 = vpack.c.bf16 %v944_v22, %v941_v16  ;;  %v132_v16 = vld [vmem:[%s15216_s4] sm:$0x7] }
  0x94   :  { %15438 = vst [vmem:[#allocation38_spill] sm:$0xff] %v13284_v23  ;;  %10163 = vmatpush1.bf16.msra.mxu1 %v13281_v21  ;;  %15446 = vst [vmem:[#allocation46_spill] sm:$0xff] %v13309_v20  ;;  %v13332_v14 = vsub.s32 2, %v135_v12 }
  0x95   :  { %10165 = vmatprep.subr.bf16.mxu1 %v13288_v31  ;;  %15447 = vst [vmem:[#allocation47_spill] sm:$0xff] %v13313_v33 }
  0x96   :  { %10103 = vmatpush1.bf16.msra.mxu0 %v13210_v60  ;;  %15452 = vst [vmem:[#allocation52_spill] sm:$0xff] %v13332_v14  ;;  %v145_v22 = vrot.slane %v132_v16, %v13332_v14 }
  0x97   :  { %10105 = vmatprep.subr.bf16.mxu0 %v13214_v61 }
  0x98   :  { %10167 = vmatpush1.bf16.msra.mxu1 %v13291_v39 }
  0x99   :  { %10169 = vmatprep.subr.bf16.mxu1 %v13298_v51 }
  0x9a   :  { %10107 = vmatpush1.bf16.msra.mxu0 %v13217_v3 }
  0x9b   :  { %10109 = vmatprep.subr.bf16.mxu0 %v13220_v4 }
  0x9c   :  { %10171 = vmatpush1.bf16.msra.mxu1 %v13301_v59 }
  0x9d   :  { %10173 = vmatprep.subr.bf16.mxu1 %v13306_v8 }
  0x9e   :  { %10111 = vmatpush1.bf16.msra.mxu0 %v13223_v10 }
  0x9f   :  { %10113 = vmatprep.subr.bf16.mxu0 %v13226_v11 }
  0xa0   :  { %10175 = vmatpush1.bf16.msra.mxu1 %v13309_v20 }
  0xa1   :  { %10177 = vmatprep.subr.bf16.mxu1 %v13315_v35  ;;  %v1099_v35 = vld [vmem:[#allocation12 + $0x38] sm:$0xff] }
  0xa2   :  { %10115 = vmatpush1.bf16.msra.mxu0 %v13229_v17 }
  0xa3   :  { %10117 = vmatprep.subr.bf16.mxu0 %v13232_v18 }
  0xa4   :  { %10179 = vmatpush1.bf16.msra.mxu1 %v13319_v58 }
  0xa5   :  { %10205 = vmatprep.subr.bf16.mxu1 %v13325_v1  ;;  %v423_v1 = vld [vmem:[%s15216_s4] sm:$0x7] }
  0xa6   :  { %10119 = vmatpush1.bf16.msra.mxu0 %v13235_v25 }
  0xa7   :  { %10121 = vmatprep.subr.bf16.mxu0 %v13238_v26 }
  0xaa   :  { %10123 = vmatpush1.bf16.msra.mxu0 %v13241_v30 }
  0xab   :  { %10180 = vmatprep.subr.bf16.mxu0 %v15232_v9 }
  0xad   :  { %805 = vmatmul.mubr.f32.vlgmr.msra.gmra.mrb[0].mxu0 %v15230_v0 }
  0xae   :  { %8721 = vmatprep.mubr.msk.f32.mxu0 %vm12860_vm1, %v15230_v0  ;;  %10182 = vmatpush3.bf16.msra.mxu0 %v13254_v43 }
  0xaf   :  { %10183 = vmatprep.subr.bf16.mxu0 %v15232_v9 }
  0xb2   :  { %10185 = vmatpush3.bf16.msra.mxu0 %v13264_v57 }
  0xb3   :  { %10186 = vmatprep.subr.bf16.mxu0 %v15232_v9 }
  0xb6   :  { %10188 = vmatpush3.bf16.msra.mxu0 %v13274_v7 }
  0xb7   :  { %10189 = vmatprep.subr.bf16.mxu0 %v15232_v9 }
  0xba   :  { %10191 = vmatpush3.bf16.msra.mxu0 %v13284_v23 }
  0xbb   :  { %10192 = vmatprep.subr.bf16.mxu0 %v15232_v9 }
  0xbe   :  { %10194 = vmatpush3.bf16.msra.mxu0 %v13294_v44 }
  0xbf   :  { %10195 = vmatprep.subr.bf16.mxu0 %v15232_v9 }
  0xc2   :  { %10197 = vmatpush3.bf16.msra.mxu0 %v13304_v6 }
  0xc3   :  { %10198 = vmatprep.subr.bf16.mxu0 %v15232_v9 }
  0xc6   :  { %10200 = vmatpush3.bf16.msra.mxu0 %v13313_v33  ;;  %v1102_v33 = vld [vmem:[#allocation12 + $0x50] sm:$0xff] }
  0xc7   :  { %10201 = vmatprep.subr.bf16.mxu0 %v15232_v9 }
  0xca   :  { %10203 = vmatpush3.bf16.msra.mxu0 %v13323_v63 }
  0xcb   :  { %10236 = vmatprep.subr.bf16.mxu0 %v15232_v9 }
 0x136   :  { %v8645_v27 = vpop.f32.mrb[0].mxu1 }
 0x137   :  { %v13338_v29 = vadd.f32 %v8645_v27, %v145_v22  ;;  %v383_v38 = vpop.f32.mrb[1].mxu1 }
 0x138   :  { %v13340_v42 = vadd.f32 %v383_v38, %v145_v22  ;;  %v13354_v38 = vrot.slane %v423_v1, %v13332_v14  ;;  %v13369_v1 = vsub.s32 0, %v135_v12  ;;  %v13384_v14 = vld [vmem:[%s15218_s6] ss:$0 sm:$0xff] }
 0x139   :  { %15453 = vst [vmem:[#allocation53_spill] sm:$0xff] %v13338_v29 }
 0x13a   :  { %15454 = vst [vmem:[#allocation54_spill] sm:$0xff] %v13340_v42  ;;  %15459 = vst [vmem:[#allocation59_spill] sm:$0xff] %v13354_v38 }
 0x13b   :  { %15465 = vst [vmem:[#allocation65_spill] sm:$0xff] %v13369_v1 }
 0x154   :  { %v8636_v46 = vpop.f32.mrb[16].mxu0 }
 0x155   :  { %v13342_v50 = vadd.f32 %v8636_v46, %v145_v22  ;;  %v353_v52 = vpop.f32.mrb[17].mxu0 }
 0x157   :  { %15455 = vst [vmem:[#allocation55_spill] sm:$0xff] %v13342_v50 }
 0x158   :  { %v8639_v56 = vpop.f32.mrb[18].mxu0 }
 0x159   :  { %v13344_v2 = vadd.f32 %v8639_v56, %v145_v22  ;;  %v363_v0 = vpop.f32.mrb[19].mxu0 }
 0x15a   :  { %v13346_v9 = vadd.f32 %v363_v0, %v145_v22  ;;  %v877_v0 = vpop.f32.mrb[10].mxu1 }
 0x15b   :  { %15456 = vst [vmem:[#allocation56_spill] sm:$0xff] %v13344_v2 }
 0x15c   :  { %15457 = vst [vmem:[#allocation57_spill] sm:$0xff] %v13346_v9  ;;  %v8642_v63 = vpop.f32.mrb[20].mxu0  ;;  %v8688_v9 = vpop.f32.mrb[11].mxu1 }
 0x15d   :  { %v13351_v27 = vadd.f32 %v8642_v63, %v145_v22  ;;  %v373_v29 = vpop.f32.mrb[21].mxu0 }
 0x15e   :  { %v13356_v46 = vadd.f32 %v373_v29, %v145_v22  ;;  %v13371_v29 = vsub.s32 1, %v135_v12 }
 0x15f   :  { %15458 = vst [vmem:[#allocation58_spill] sm:$0xff] %v13351_v27 }
 0x160   :  { %15460 = vst [vmem:[#allocation60_spill] sm:$0xff] %v13356_v46  ;;  %v8650_v42 = vpop.f32.mrb[22].mxu0  ;;  %15466 = vst [vmem:[#allocation66_spill] sm:$0xff] %v13371_v29  ;;  %v13374_v46 = vrot.slane %v132_v16, %v13369_v1 }
 0x161   :  { %v13359_v56 = vadd.f32 %v8650_v42, %v13354_v38  ;;  %v13361_v2 = vpop.f32.mrb[23].mxu0 }
 0x162   :  { %15462 = vst [vmem:[#allocation62_spill] sm:$0xff] %v13361_v2  ;;  %15467 = vst [vmem:[#allocation67_spill] sm:$0xff] %v13374_v46 }
 0x163   :  { %15461 = vst [vmem:[#allocation61_spill] sm:$0xff] %v13359_v56  ;;  %v13377_v56 = vrot.slane %v132_v16, %v13371_v29  ;;  %v895_v29 = vadd.f32 %v13384_v14, %v877_v0 }
 0x164   :  { %v8653_v50 = vpop.f32.mrb[24].mxu0 }
 0x165   :  { %v13364_v58 = vadd.f32 %v8653_v50, %v13354_v38  ;;  %v617_v63 = vpop.f32.mrb[25].mxu0  ;;  %15468 = vst [vmem:[#allocation68_spill] sm:$0xff] %v13377_v56 }
 0x166   :  { %v13367_v27 = vadd.f32 %v617_v63, %v13354_v38 }
 0x167   :  { %15463 = vst [vmem:[#allocation63_spill] sm:$0xff] %v13364_v58 }
 0x168   :  { %15464 = vst [vmem:[#allocation64_spill] sm:$0xff] %v13367_v27 }
 0x180   :  { %v806_v42 = vpop.f32.mrb[0].mxu0 }
 0x181   :  { %v12366_v9 = vadd.f32 %v806_v42, %v13374_v46  ;;  %v808_v2 = vpop.f32.mrb[1].mxu0  ;;  %v354_v46 = vadd.f32 %v353_v52, %v145_v22  ;;  %v1098_v22 = vld [vmem:[#allocation12 + $0x30] sm:$0xff] }
 0x182   :  { %v12367_v58 = vadd.f32 %v808_v2, %v13377_v56  ;;  %v1097_v56 = vld [vmem:[#allocation12 + $0x28] sm:$0xff] }
 0x183   :  { %v7869_v50 = vmul.f32 -1.442695, %v12366_v9 }
 0x184   :  { %v7870_v63 = vmul.f32 -1.442695, %v12367_v58 }
 0x185   :  { %12486 = vpow2.f32 %v7869_v50  ;;  %v1092_v50 = vld [vmem:[#allocation12] sm:$0xff] }
 0x186   :  { %12488 = vpow2.f32 %v7870_v63 }
 0x18f   :  { %v12487_v27 = vpop.eup %12486 }
 0x190   :  { %v885_v38 = vadd.f32 1.0, %v12487_v27  ;;  %v12489_v12 = vpop.eup %12488  ;;  %v1095_v27 = vld [vmem:[#allocation12 + $0x18] sm:$0xff] }
 0x191   :  { %v892_v16 = vadd.f32 1.0, %v12489_v12  ;;  %v13387_v12 = vpack.c.bf16 %v1095_v27, %v1092_v50  ;;  %v1109_v50 = vld [vmem:[#allocation12 + $0x88] sm:$0xff]  ;;  %v1114_v27 = vld [vmem:[#allocation12 + $0xb0] sm:$0xff] }
 0x192   :  { %12490 = vrcp.f32 %v885_v38  ;;  %v1094_v38 = vld [vmem:[#allocation12 + $0x10] sm:$0xff] }
 0x193   :  { %12492 = vrcp.f32 %v892_v16  ;;  %15469 = vst [vmem:[#allocation69_spill] sm:$0xff] %v13387_v12  ;;  %v13389_v0 = vpack.c.bf16 %v1097_v56, %v1094_v38  ;;  %v1100_v16 = vld [vmem:[#allocation12 + $0x40] sm:$0xff]  ;;  %v15476_v38 = vmov 0.0  }
 0x195   :  { %15470 = vst [vmem:[#allocation70_spill] sm:$0xff] %v13389_v0 }
 0x19c   :  { %v12491_v42 = vpop.eup %12490 }
 0x19d   :  { %v896_v9 = vmul.f32 %v12491_v42, %v895_v29  ;;  %v12493_v58 = vpop.eup %12492  ;;  %v1101_v29 = vld [vmem:[#allocation12 + $0x48] sm:$0xff]  ;;  %v1103_v42 = vld [vmem:[#allocation12 + $0x58] sm:$0xff] }
 0x19e   :  { %v899_v63 = vsub.f32 1.0, %v12493_v58  ;;  %v901_v8 = vmul.f32 0.0, %v12493_v58  ;;  %v13399_v56 = vpack.c.bf16 %v1101_v29, %v1098_v22  ;;  %v1106_v58 = vld [vmem:[#allocation12 + $0x70] sm:$0xff] }
 0x19f   :  { %v897_v2 = vadd.f32 %v896_v9, %v354_v46  ;;  %v13393_v46 = vpack.c.bf16 %v1102_v33, %v1099_v35  ;;  %v1105_v9 = vld [vmem:[#allocation12 + $0x68] sm:$0xff]  ;;  %v1107_v35 = vld [vmem:[#allocation12 + $0x78] sm:$0xff]  ;;  %v13414_v29 = vpack.c.bf16 %v1109_v50, %v1106_v58  ;;  %v1116_v58 = vld [vmem:[#allocation12 + $0xc0] sm:$0xff] }
 0x1a0   :  { %15472 = vst [vmem:[#allocation72_spill] sm:$0xff] %v13399_v56 }
 0x1a1   :  { %12494 = vtanh.f32 %v897_v2  ;;  %15471 = vst [vmem:[#allocation71_spill] sm:$0xff] %v13393_v46  ;;  %v1108_v2 = vld [vmem:[#allocation12 + $0x80] sm:$0xff]  ;;  %15478 = vst [vmem:[#allocation76_spill] sm:$0xff] %v13414_v29 }
 0x1a2   :  { %v13405_v33 = vpack.c.bf16 %v1108_v2, %v1105_v9  ;;  %v1113_v9 = vld [vmem:[#allocation12 + $0xa8] sm:$0xff]  ;;  %v1112_v2 = vld [vmem:[#allocation12 + $0xa0] sm:$0xff] }
 0x1a4   :  { %15475 = vst [vmem:[#allocation74_spill] sm:$0xff] %v13405_v33 }
 0x1ab   :  { %v12495_v1 = vpop.eup %12494 }
 0x1ac   :  { %v900_v20 = vmul.f32 %v12495_v1, %v899_v63  ;;  %v13401_v1 = vpack.c.bf16 %v1103_v42, %v1100_v16  ;;  %v1111_v63 = vld [vmem:[#allocation12 + $0x98] sm:$0xff]  ;;  %v1110_v16 = vld [vmem:[#allocation12 + $0x90] sm:$0xff] }
 0x1ad   :  { %v13418_v42 = vpack.c.bf16 %v1114_v27, %v1111_v63  ;;  %v1119_v63 = vld [vmem:[#allocation12 + $0xd8] sm:$0xff]  ;;  %v1118_v27 = vld [vmem:[#allocation12 + $0xd0] sm:$0xff] }
 0x1ae   :  { %v13391_v52 = vadd.f32 %v901_v8, %v900_v20  ;;  %15473 = vst [vmem:[#allocation73_spill] sm:$0xff] %v13401_v1  ;;  %v1104_v8 = vld [vmem:[#allocation12 + $0x60] sm:$0xff]  ;;  %v15474_v20 = vmov 0.0|0.0  }
 0x1af   :  { %v13412_v22 = vpack.c.bf16 %v1107_v35, %v1104_v8  ;;  %15479 = vst [vmem:[#allocation77_spill] sm:$0xff] %v13418_v42  ;;  %v13422_v8 = vpack.c.bf16 %v1113_v9, %v1110_v16  ;;  %v13432_v16 = vpack.c.bf16 %v1119_v63, %v1116_v58  ;;  %v1122_v9 = vld [vmem:[#allocation12 + $0xf0] sm:$0xff]  ;;  %v1128_v63 = vld [vmem:[#allocation12 + $0x120] sm:$0xff] }
 0x1b0   :  { %1016 = vmatmul.mubr.f32.vlgmr.msra.gmra.mrb[12].mxu1 %v13391_v52  ;;  %8722 = vmatmul.mubr.f32.vlgmr.msra.gmra.mrb[26].mxu0 %v13391_v52 }
 0x1b1   :  { %10207 = vmatpush1.bf16.msra.mxu1 %v13387_v12  ;;  %10238 = vmatpush3.bf16.msra.mxu0 %v13389_v0  ;;  %15477 = vst [vmem:[#allocation75_spill] sm:$0xff] %v13412_v22  ;;  %v1117_v0 = vld [vmem:[#allocation12 + $0xc8] sm:$0xff]  ;;  %v1120_v12 = vld [vmem:[#allocation12 + $0xe0] sm:$0xff]  ;;  %15480 = vst [vmem:[#allocation78_spill] sm:$0xff] %v13422_v8 }
 0x1b2   :  { %10209 = vmatprep.subr.bf16.mxu1 %v13393_v46  ;;  %10239 = vmatprep.subr.bf16.mxu0 %v15474_v20  ;;  %v1115_v46 = vld [vmem:[#allocation12 + $0xb8] sm:$0xff]  ;;  %v13428_v50 = vpack.c.bf16 %v1120_v12, %v1117_v0  ;;  %v1125_v0 = vld [vmem:[#allocation12 + $0x108] sm:$0xff] }
 0x1b3   :  { %1204 = vmatprep.mubr.f32.mxu1 %v15476_v38  ;;  %8756 = vmatprep.mubr.msk.f32.mxu0 %vm12860_vm1, %v15476_v38  ;;  %v13424_v35 = vpack.c.bf16 %v1115_v46, %v1112_v2  ;;  %v1124_v2 = vld [vmem:[#allocation12 + $0x100] sm:$0xff]  ;;  %v13442_v58 = vpack.c.bf16 %v1125_v0, %v1122_v9  ;;  %v1134_v0 = vld [vmem:[#allocation12 + $0x150] sm:$0xff] }
 0x1b4   :  { %15482 = vst [vmem:[#allocation80_spill] sm:$0xff] %v13428_v50 }
 0x1b5   :  { %10211 = vmatpush1.bf16.msra.mxu1 %v13399_v56  ;;  %10241 = vmatpush3.bf16.msra.mxu0 %v13401_v1  ;;  %15481 = vst [vmem:[#allocation79_spill] sm:$0xff] %v13424_v35  ;;  %v1123_v1 = vld [vmem:[#allocation12 + $0xf8] sm:$0xff]  ;;  %v1126_v56 = vld [vmem:[#allocation12 + $0x110] sm:$0xff]  ;;  %15484 = vst [vmem:[#allocation82_spill] sm:$0xff] %v13442_v58 }
 0x1b6   :  { %10213 = vmatprep.subr.bf16.mxu1 %v13405_v33  ;;  %10242 = vmatprep.subr.bf16.mxu0 %v15474_v20  ;;  %v1121_v33 = vld [vmem:[#allocation12 + $0xe8] sm:$0xff]  ;;  %v13438_v12 = vpack.c.bf16 %v1126_v56, %v1123_v1  ;;  %v1131_v1 = vld [vmem:[#allocation12 + $0x138] sm:$0xff] }
 0x1b7   :  { %v13434_v46 = vpack.c.bf16 %v1121_v33, %v1118_v27  ;;  %v1130_v27 = vld [vmem:[#allocation12 + $0x130] sm:$0xff]  ;;  %v13452_v9 = vpack.c.bf16 %v1131_v1, %v1128_v63  ;;  %v15491_v1 = vld [vmem:[#allocation49_spill] sm:$0xff] }
 0x1b8   :  { %15483 = vst [vmem:[#allocation81_spill] sm:$0xff] %v13438_v12 }
 0x1b9   :  { %10215 = vmatpush1.bf16.msra.mxu1 %v13412_v22  ;;  %10244 = vmatpush3.bf16.msra.mxu0 %v13414_v29  ;;  %v1129_v29 = vld [vmem:[#allocation12 + $0x128] sm:$0xff]  ;;  %v1132_v22 = vld [vmem:[#allocation12 + $0x140] sm:$0xff] }
 0x1ba   :  { %10217 = vmatprep.subr.bf16.mxu1 %v13418_v42  ;;  %10245 = vmatprep.subr.bf16.mxu0 %v15474_v20  ;;  %v1127_v42 = vld [vmem:[#allocation12 + $0x118] sm:$0xff]  ;;  %v13448_v56 = vpack.c.bf16 %v1132_v22, %v1129_v29  ;;  %v1137_v29 = vld [vmem:[#allocation12 + $0x168] sm:$0xff] }
 0x1bb   :  { %v13444_v33 = vpack.c.bf16 %v1127_v42, %v1124_v2  ;;  %v1136_v2 = vld [vmem:[#allocation12 + $0x160] sm:$0xff] }
 0x1bd   :  { %10219 = vmatpush1.bf16.msra.mxu1 %v13422_v8  ;;  %10247 = vmatpush3.bf16.msra.mxu0 %v13424_v35  ;;  %v1135_v35 = vld [vmem:[#allocation12 + $0x158] sm:$0xff]  ;;  %v1138_v8 = vld [vmem:[#allocation12 + $0x170] sm:$0xff] }
 0x1be   :  { %10221 = vmatprep.subr.bf16.mxu1 %v13428_v50  ;;  %10248 = vmatprep.subr.bf16.mxu0 %v15474_v20  ;;  %v1133_v50 = vld [vmem:[#allocation12 + $0x148] sm:$0xff]  ;;  %v13458_v22 = vpack.c.bf16 %v1138_v8, %v1135_v35  ;;  %v15488_v35 = vld [vmem:[#allocation46_spill] sm:$0xff] }
 0x1bf   :  { %v13454_v42 = vpack.c.bf16 %v1133_v50, %v1130_v27  ;;  %v15487_v8 = vld [vmem:[#allocation45_spill] sm:$0xff]  ;;  %v15489_v50 = vld [vmem:[#allocation47_spill] sm:$0xff]  ;;  %v15492_v27 = vld [vmem:[#allocation50_spill] sm:$0xff] }
 0x1c1   :  { %10223 = vmatpush1.bf16.msra.mxu1 %v13432_v16  ;;  %10250 = vmatpush3.bf16.msra.mxu0 %v13434_v46 }
 0x1c2   :  { %10225 = vmatprep.subr.bf16.mxu1 %v13438_v12  ;;  %10251 = vmatprep.subr.bf16.mxu0 %v15474_v20  ;;  %v1139_v12 = vld [vmem:[#allocation12 + $0x178] sm:$0xff] }
 0x1c3   :  { %v13464_v63 = vpack.c.bf16 %v1139_v12, %v1136_v2  ;;  %v15490_v12 = vld [vmem:[#allocation48_spill] sm:$0xff] }
 0x1c5   :  { %10227 = vmatpush1.bf16.msra.mxu1 %v13442_v58  ;;  %10253 = vmatpush3.bf16.msra.mxu0 %v13444_v33  ;;  %v13462_v58 = vpack.c.bf16 %v1137_v29, %v1134_v0  ;;  %15486 = vst [vmem:[#allocation84_spill] sm:$0xff] %v13464_v63  ;;  %v15493_v0 = vld [vmem:[#allocation51_spill] sm:$0xff] }
 0x1c6   :  { %10229 = vmatprep.subr.bf16.mxu1 %v13448_v56  ;;  %10254 = vmatprep.subr.bf16.mxu0 %v15474_v20 }
 0x1c7   :  { %15485 = vst [vmem:[#allocation83_spill] sm:$0xff] %v13462_v58 }
 0x1c9   :  { %10231 = vmatpush1.bf16.msra.mxu1 %v13452_v9  ;;  %10256 = vmatpush3.bf16.msra.mxu0 %v13454_v42 }
 0x1ca   :  { %10233 = vmatprep.subr.bf16.mxu1 %v13458_v22  ;;  %10257 = vmatprep.subr.bf16.mxu0 %v15474_v20 }
 0x1cd   :  { %10235 = vmatpush1.bf16.msra.mxu1 %v13462_v58  ;;  %10259 = vmatpush3.bf16.msra.mxu0 %v13464_v63 }
 0x1ce   :  { %10261 = vmatprep.subr.bf16.mxu0 %v13164_v36  ;;  %10292 = vmatprep.subr.bf16.mxu1 %v15474_v20 }
 0x1d0   :  { %1205 = vmatmul.mubr.f32.vlgmr.msra.gmra.mrb[12].mxu1 %v15476_v38  ;;  %8757 = vmatmul.mubr.f32.vlgmr.msra.gmra.mrb[28].mxu0 %v15476_v38 }
 0x1d1   :  { %10263 = vmatpush1.bf16.msra.mxu0 %v13190_v48  ;;  %10294 = vmatpush3.bf16.msra.mxu1 %v13109_v15 }
 0x1d2   :  { %10265 = vmatprep.subr.bf16.mxu0 %v13192_v49  ;;  %10295 = vmatprep.subr.bf16.mxu1 %v15474_v20 }
 0x1d3   :  { %1373 = vmatprep.mubr.f32.mxu0 %v15476_v38  ;;  %8791 = vmatprep.mubr.msk.f32.mxu1 %vm12860_vm1, %v15476_v38 }
 0x1d5   :  { %10267 = vmatpush1.bf16.msra.mxu0 %v13198_v54  ;;  %10297 = vmatpush3.bf16.msra.mxu1 %v13119_v19 }
 0x1d6   :  { %10269 = vmatprep.subr.bf16.mxu0 %v13203_v55  ;;  %10298 = vmatprep.subr.bf16.mxu1 %v15474_v20 }
 0x1d9   :  { %10271 = vmatpush1.bf16.msra.mxu0 %v13210_v60  ;;  %10300 = vmatpush3.bf16.msra.mxu1 %v13136_v24 }
 0x1da   :  { %10273 = vmatprep.subr.bf16.mxu0 %v13214_v61  ;;  %10301 = vmatprep.subr.bf16.mxu1 %v15474_v20 }
 0x1dd   :  { %10275 = vmatpush1.bf16.msra.mxu0 %v13217_v3  ;;  %10303 = vmatpush3.bf16.msra.mxu1 %v13151_v28 }
 0x1de   :  { %10277 = vmatprep.subr.bf16.mxu0 %v13220_v4  ;;  %10304 = vmatprep.subr.bf16.mxu1 %v15474_v20 }
 0x1e1   :  { %10279 = vmatpush1.bf16.msra.mxu0 %v13223_v10  ;;  %10306 = vmatpush3.bf16.msra.mxu1 %v13157_v32 }
 0x1e2   :  { %10281 = vmatprep.subr.bf16.mxu0 %v13226_v11  ;;  %10307 = vmatprep.subr.bf16.mxu1 %v15474_v20 }
 0x1e5   :  { %10283 = vmatpush1.bf16.msra.mxu0 %v13229_v17  ;;  %10309 = vmatpush3.bf16.msra.mxu1 %v13167_v37 }
 0x1e6   :  { %10285 = vmatprep.subr.bf16.mxu0 %v13232_v18  ;;  %10310 = vmatprep.subr.bf16.mxu1 %v15474_v20 }
 0x1e9   :  { %10287 = vmatpush1.bf16.msra.mxu0 %v13235_v25  ;;  %10312 = vmatpush3.bf16.msra.mxu1 %v13177_v40 }
 0x1ea   :  { %10289 = vmatprep.subr.bf16.mxu0 %v13238_v26  ;;  %10313 = vmatprep.subr.bf16.mxu1 %v15474_v20 }
 0x1ed   :  { %10291 = vmatpush1.bf16.msra.mxu0 %v13241_v30  ;;  %10315 = vmatpush3.bf16.msra.mxu1 %v13184_v45 }
 0x1ee   :  { %10317 = vmatprep.subr.bf16.mxu1 %v13249_v34  ;;  %10348 = vmatprep.subr.bf16.mxu0 %v15474_v20 }
 0x1f0   :  { %1374 = vmatmul.mubr.f32.vlgmr.msra.gmra.mrb[2].mxu0 %v13391_v52  ;;  %8792 = vmatmul.mubr.f32.vlgmr.msra.gmra.mrb[14].mxu1 %v13391_v52 }
 0x1f1   :  { %10319 = vmatpush1.bf16.msra.mxu1 %v13251_v41  ;;  %10350 = vmatpush3.bf16.msra.mxu0 %v13254_v43 }
 0x1f2   :  { %10321 = vmatprep.subr.bf16.mxu1 %v13258_v47  ;;  %10351 = vmatprep.subr.bf16.mxu0 %v15474_v20 }
 0x1f3   :  { %1536 = vmatprep.mubr.f32.mxu1 %v15476_v38  ;;  %8826 = vmatprep.mubr.msk.f32.mxu0 %vm12860_vm1, %v15476_v38 }
 0x1f5   :  { %10323 = vmatpush1.bf16.msra.mxu1 %v13261_v53  ;;  %10353 = vmatpush3.bf16.msra.mxu0 %v13264_v57 }
 0x1f6   :  { %10325 = vmatprep.subr.bf16.mxu1 %v13268_v62  ;;  %10354 = vmatprep.subr.bf16.mxu0 %v15474_v20  ;;  %v15501_v62 = vld [vmem:[#allocation68_spill] sm:$0xff] }
 0x1f9   :  { %10327 = vmatpush1.bf16.msra.mxu1 %v13271_v5  ;;  %10356 = vmatpush3.bf16.msra.mxu0 %v13274_v7 }
 0x1fa   :  { %10329 = vmatprep.subr.bf16.mxu1 %v13278_v13  ;;  %10357 = vmatprep.subr.bf16.mxu0 %v15474_v20 }
 0x1fd   :  { %10331 = vmatpush1.bf16.msra.mxu1 %v13281_v21  ;;  %10359 = vmatpush3.bf16.msra.mxu0 %v13284_v23  ;;  %v15499_v21 = vld [vmem:[#allocation52_spill] sm:$0xff] }
 0x1fe   :  { %10333 = vmatprep.subr.bf16.mxu1 %v13288_v31  ;;  %10360 = vmatprep.subr.bf16.mxu0 %v15474_v20 }
 0x201   :  { %10335 = vmatpush1.bf16.msra.mxu1 %v13291_v39  ;;  %10362 = vmatpush3.bf16.msra.mxu0 %v13294_v44 }
 0x202   :  { %10337 = vmatprep.subr.bf16.mxu1 %v13298_v51  ;;  %10363 = vmatprep.subr.bf16.mxu0 %v15474_v20 }
 0x205   :  { %10339 = vmatpush1.bf16.msra.mxu1 %v13301_v59  ;;  %10365 = vmatpush3.bf16.msra.mxu0 %v13304_v6 }
 0x206   :  { %10341 = vmatprep.subr.bf16.mxu1 %v15487_v8  ;;  %10366 = vmatprep.subr.bf16.mxu0 %v15474_v20  ;;  %v15494_v8 = vld [vmem:[#allocation65_spill] sm:$0xff] }
 0x209   :  { %10343 = vmatpush1.bf16.msra.mxu1 %v15488_v35  ;;  %10368 = vmatpush3.bf16.msra.mxu0 %v15489_v50  ;;  %v645_v35 = vld [vmem:[%s15223_s11] sm:$0x7] }
 0x20a   :  { %10345 = vmatprep.subr.bf16.mxu1 %v15490_v12  ;;  %10369 = vmatprep.subr.bf16.mxu0 %v15474_v20  ;;  %v13550_v50 = vrot.slane %v645_v35, %v15494_v8  ;;  %v15496_v12 = vld [vmem:[#allocation66_spill] sm:$0xff]  ;;  %v13563_v13 = vrot.slane %v645_v35, %v15499_v21 }
 0x20b   :  { %v13553_v6 = vrot.slane %v645_v35, %v15496_v12  ;;  %v13560_v12 = vld [vmem:[%s15225_s13] ss:$0 sm:$0xff] }
 0x20c   :  { %15495 = vst [vmem:[#allocation85_spill] sm:$0xff] %v13550_v50  ;;  %15498 = vst [vmem:[#allocation87_spill] sm:$0xff] %v13560_v12 }
 0x20d   :  { %10347 = vmatpush1.bf16.msra.mxu1 %v15491_v1  ;;  %10371 = vmatpush3.bf16.msra.mxu0 %v15492_v27  ;;  %15497 = vst [vmem:[#allocation86_spill] sm:$0xff] %v13553_v6 }
 0x20e   :  { %10373 = vmatprep.subr.bf16.mxu1 %v15493_v0  ;;  %10404 = vmatprep.subr.bf16.mxu0 %v15474_v20 }
 0x283   :  { %v1088_v29 = vpop.f32.mrb[26].mxu0 }
 0x284   :  { %v8723_v2 = vpop.f32.mrb[27].mxu0 }
 0x2a3   :  { %v1206_v59 = vpop.f32.mrb[12].mxu1  ;;  %v1277_v1 = vpop.f32.mrb[28].mxu0 }
 0x2a4   :  { %v12396_v27 = vadd.f32 %v1206_v59, %v13550_v50  ;;  %v1208_v51 = vpop.f32.mrb[13].mxu1  ;;  %v8758_v0 = vpop.f32.mrb[29].mxu0 }
 0x2a5   :  { %v12397_v39 = vadd.f32 %v1208_v51, %v13553_v6 }
 0x2a6   :  { %v7871_v44 = vmul.f32 -1.442695, %v12396_v27  ;;  %v1295_v27 = vadd.f32 %v13560_v12, %v1277_v1 }
 0x2a7   :  { %v7872_v2 = vmul.f32 -1.442695, %v12397_v39 }
 0x2a8   :  { %12496 = vpow2.f32 %v7871_v44  ;;  %v1089_v44 = vadd.f32 %v1088_v29, %v13563_v13 }
 0x2a9   :  { %12498 = vpow2.f32 %v7872_v2  ;;  %v15500_v2 = vld [vmem:[#allocation67_spill] sm:$0xff] }
 0x2b2   :  { %v12497_v31 = vpop.eup %12496 }
 0x2b3   :  { %v1285_v23 = vadd.f32 1.0, %v12497_v31  ;;  %v12499_v8 = vpop.eup %12498 }
 0x2b4   :  { %v1292_v59 = vadd.f32 1.0, %v12499_v8 }
 0x2b5   :  { %12500 = vrcp.f32 %v1285_v23 }
 0x2b6   :  { %12502 = vrcp.f32 %v1292_v59 }
 0x2bf   :  { %v12501_v0 = vpop.eup %12500 }
 0x2c0   :  { %v1296_v39 = vmul.f32 %v12501_v0, %v1295_v27  ;;  %v12503_v8 = vpop.eup %12502 }
 0x2c1   :  { %v1299_v1 = vsub.f32 1.0, %v12503_v8  ;;  %v1301_v59 = vmul.f32 0.0, %v12503_v8 }
 0x2c2   :  { %v1297_v51 = vadd.f32 %v1296_v39, %v1089_v44 }
 0x2c3   :  { %v1375_v31 = vpop.f32.mrb[2].mxu0  ;;  %v1446_v23 = vpop.f32.mrb[14].mxu1 }
 0x2c4   :  { %12504 = vtanh.f32 %v1297_v51  ;;  %v12368_v6 = vadd.f32 %v1375_v31, %v15500_v2  ;;  %v1377_v50 = vpop.f32.mrb[3].mxu0  ;;  %v8793_v7 = vpop.f32.mrb[15].mxu1 }
 0x2c5   :  { %v12369_v35 = vadd.f32 %v1377_v50, %v15501_v62  ;;  %v1464_v7 = vadd.f32 %v13384_v14, %v1446_v23  ;;  %v15504_v23 = vld [vmem:[#allocation70_spill] sm:$0xff] }
 0x2c6   :  { %v7873_v5 = vmul.f32 -1.442695, %v12368_v6 }
 0x2c7   :  { %v7874_v21 = vmul.f32 -1.442695, %v12369_v35 }
 0x2c8   :  { %12506 = vpow2.f32 %v7873_v5  ;;  %v15502_v5 = vld [vmem:[#allocation55_spill] sm:$0xff] }
 0x2c9   :  { %12508 = vpow2.f32 %v7874_v21 }
 0x2ce   :  { %v12505_v12 = vpop.eup %12504 }
 0x2cf   :  { %v1300_v29 = vmul.f32 %v12505_v12, %v1299_v1 }
 0x2d1   :  { %v13569_v27 = vadd.f32 %v1301_v59, %v1300_v29  ;;  %v15503_v29 = vld [vmem:[#allocation69_spill] sm:$0xff]  ;;  %v15505_v59 = vld [vmem:[#allocation71_spill] sm:$0xff] }
 0x2d2   :  { %v12507_v0 = vpop.eup %12506 }
 0x2d3   :  { %v1454_v44 = vadd.f32 1.0, %v12507_v0  ;;  %v12509_v39 = vpop.eup %12508  ;;  %v15508_v0 = vld [vmem:[#allocation74_spill] sm:$0xff] }
 0x2d4   :  { %v1461_v51 = vadd.f32 1.0, %v12509_v39  ;;  %v15510_v39 = vld [vmem:[#allocation76_spill] sm:$0xff] }
 0x2d5   :  { %12510 = vrcp.f32 %v1454_v44  ;;  %v15509_v44 = vld [vmem:[#allocation75_spill] sm:$0xff] }
 0x2d6   :  { %12512 = vrcp.f32 %v1461_v51  ;;  %v15511_v51 = vld [vmem:[#allocation77_spill] sm:$0xff] }
 0x2df   :  { %v12511_v6 = vpop.eup %12510 }
 0x2e0   :  { %v1465_v31 = vmul.f32 %v12511_v6, %v1464_v7  ;;  %v12513_v35 = vpop.eup %12512  ;;  %v15512_v7 = vld [vmem:[#allocation78_spill] sm:$0xff]  ;;  %v15513_v6 = vld [vmem:[#allocation79_spill] sm:$0xff] }
 0x2e1   :  { %v1468_v62 = vsub.f32 1.0, %v12513_v35  ;;  %v1470_v8 = vmul.f32 %v12513_v35, %v13391_v52  ;;  %v15507_v52 = vld [vmem:[#allocation73_spill] sm:$0xff] }
 0x2e2   :  { %v1466_v50 = vadd.f32 %v1465_v31, %v15502_v5  ;;  %v15514_v31 = vld [vmem:[#allocation80_spill] sm:$0xff]  ;;  %v15515_v5 = vld [vmem:[#allocation81_spill] sm:$0xff] }
 0x2e3   :  { %v15517_v35 = vld [vmem:[#allocation33_spill] sm:$0xff] }
 0x2e4   :  { %12514 = vtanh.f32 %v1466_v50  ;;  %v15516_v50 = vld [vmem:[#allocation82_spill] sm:$0xff] }
 0x2ee   :  { %v12515_v21 = vpop.eup %12514 }
 0x2ef   :  { %v1469_v12 = vmul.f32 %v12515_v21, %v1468_v62  ;;  %v15506_v62 = vld [vmem:[#allocation72_spill] sm:$0xff]  ;;  %v15518_v21 = vld [vmem:[#allocation34_spill] sm:$0xff] }
 0x2f1   :  { %v13574_v1 = vadd.f32 %v1470_v8, %v1469_v12  ;;  %v15519_v12 = vld [vmem:[#allocation35_spill] sm:$0xff]  ;;  %v15520_v8 = vld [vmem:[#allocation36_spill] sm:$0xff] }
 0x2f3   :  { %1537 = vmatmul.mubr.f32.vlgmr.msra.gmra.mrb[16].mxu1 %v13574_v1  ;;  %8827 = vmatmul.mubr.f32.vlgmr.msra.gmra.mrb[30].mxu0 %v13574_v1 }
 0x2f4   :  { %10375 = vmatpush1.bf16.msra.mxu1 %v15503_v29  ;;  %10406 = vmatpush3.bf16.msra.mxu0 %v15504_v23 }
 0x2f5   :  { %10377 = vmatprep.subr.bf16.mxu1 %v15505_v59  ;;  %10407 = vmatprep.subr.bf16.mxu0 %v15474_v20 }
 0x2f6   :  { %1677 = vmatprep.mubr.f32.mxu1 %v15476_v38  ;;  %8861 = vmatprep.mubr.msk.f32.mxu0 %vm12860_vm1, %v15476_v38 }
 0x2f8   :  { %10379 = vmatpush1.bf16.msra.mxu1 %v15506_v62  ;;  %10409 = vmatpush3.bf16.msra.mxu0 %v15507_v52 }
 0x2f9   :  { %10381 = vmatprep.subr.bf16.mxu1 %v15508_v0  ;;  %10410 = vmatprep.subr.bf16.mxu0 %v15474_v20 }
 0x2fc   :  { %10383 = vmatpush1.bf16.msra.mxu1 %v15509_v44  ;;  %10412 = vmatpush3.bf16.msra.mxu0 %v15510_v39 }
 0x2fd   :  { %10385 = vmatprep.subr.bf16.mxu1 %v15511_v51  ;;  %10413 = vmatprep.subr.bf16.mxu0 %v15474_v20 }
 0x300   :  { %10387 = vmatpush1.bf16.msra.mxu1 %v15512_v7  ;;  %10415 = vmatpush3.bf16.msra.mxu0 %v15513_v6 }
 0x301   :  { %10389 = vmatprep.subr.bf16.mxu1 %v15514_v31  ;;  %10416 = vmatprep.subr.bf16.mxu0 %v15474_v20 }
 0x304   :  { %10391 = vmatpush1.bf16.msra.mxu1 %v13432_v16  ;;  %10418 = vmatpush3.bf16.msra.mxu0 %v13434_v46 }
 0x305   :  { %10393 = vmatprep.subr.bf16.mxu1 %v15515_v5  ;;  %10419 = vmatprep.subr.bf16.mxu0 %v15474_v20 }
 0x308   :  { %10395 = vmatpush1.bf16.msra.mxu1 %v15516_v50  ;;  %10421 = vmatpush3.bf16.msra.mxu0 %v13444_v33 }
 0x309   :  { %10397 = vmatprep.subr.bf16.mxu1 %v13448_v56  ;;  %10422 = vmatprep.subr.bf16.mxu0 %v15474_v20 }
 0x30c   :  { %10399 = vmatpush1.bf16.msra.mxu1 %v13452_v9  ;;  %10424 = vmatpush3.bf16.msra.mxu0 %v13454_v42 }
 0x30d   :  { %10401 = vmatprep.subr.bf16.mxu1 %v13458_v22  ;;  %10425 = vmatprep.subr.bf16.mxu0 %v15474_v20 }
 0x310   :  { %10403 = vmatpush1.bf16.msra.mxu1 %v13462_v58  ;;  %10427 = vmatpush3.bf16.msra.mxu0 %v13464_v63 }
 0x311   :  { %10429 = vmatprep.subr.bf16.mxu0 %v13164_v36  ;;  %10460 = vmatprep.subr.bf16.mxu1 %v15474_v20 }
 0x313   :  { %1678 = vmatmul.mubr.f32.vlgmr.msra.gmra.mrb[16].mxu1 %v13569_v27  ;;  %8862 = vmatmul.mubr.f32.vlgmr.msra.gmra.mrb[32].mxu0 %v13569_v27 }
 0x314   :  { %10431 = vmatpush1.bf16.msra.mxu0 %v13190_v48  ;;  %10462 = vmatpush3.bf16.msra.mxu1 %v13109_v15 }
 0x315   :  { %10433 = vmatprep.subr.bf16.mxu0 %v13192_v49  ;;  %10463 = vmatprep.subr.bf16.mxu1 %v15474_v20 }
 0x316   :  { %1846 = vmatprep.mubr.f32.mxu0 %v15476_v38  ;;  %8896 = vmatprep.mubr.msk.f32.mxu1 %vm12860_vm1, %v15476_v38 }
 0x318   :  { %10435 = vmatpush1.bf16.msra.mxu0 %v13198_v54  ;;  %10465 = vmatpush3.bf16.msra.mxu1 %v13119_v19 }
 0x319   :  { %10437 = vmatprep.subr.bf16.mxu0 %v13203_v55  ;;  %10466 = vmatprep.subr.bf16.mxu1 %v15474_v20 }
 0x31c   :  { %10439 = vmatpush1.bf16.msra.mxu0 %v13210_v60  ;;  %10468 = vmatpush3.bf16.msra.mxu1 %v13136_v24 }
 0x31d   :  { %10441 = vmatprep.subr.bf16.mxu0 %v13214_v61  ;;  %10469 = vmatprep.subr.bf16.mxu1 %v15474_v20 }
 0x320   :  { %10443 = vmatpush1.bf16.msra.mxu0 %v13217_v3  ;;  %10471 = vmatpush3.bf16.msra.mxu1 %v13151_v28 }
 0x321   :  { %10445 = vmatprep.subr.bf16.mxu0 %v13220_v4  ;;  %10472 = vmatprep.subr.bf16.mxu1 %v15474_v20 }
 0x324   :  { %10447 = vmatpush1.bf16.msra.mxu0 %v13223_v10  ;;  %10474 = vmatpush3.bf16.msra.mxu1 %v13157_v32 }
 0x325   :  { %10449 = vmatprep.subr.bf16.mxu0 %v13226_v11  ;;  %10475 = vmatprep.subr.bf16.mxu1 %v15474_v20 }
 0x328   :  { %10451 = vmatpush1.bf16.msra.mxu0 %v13229_v17  ;;  %10477 = vmatpush3.bf16.msra.mxu1 %v13167_v37  ;;  %v15538_v37 = vld [vmem:[#allocation87_spill] sm:$0xff] }
 0x329   :  { %10453 = vmatprep.subr.bf16.mxu0 %v13232_v18  ;;  %10478 = vmatprep.subr.bf16.mxu1 %v15474_v20 }
 0x32c   :  { %10455 = vmatpush1.bf16.msra.mxu0 %v13235_v25  ;;  %10480 = vmatpush3.bf16.msra.mxu1 %v13177_v40 }
 0x32d   :  { %10457 = vmatprep.subr.bf16.mxu0 %v13238_v26  ;;  %10481 = vmatprep.subr.bf16.mxu1 %v15474_v20 }
 0x330   :  { %10459 = vmatpush1.bf16.msra.mxu0 %v13241_v30  ;;  %10483 = vmatpush3.bf16.msra.mxu1 %v13184_v45  ;;  %v15536_v45 = vld [vmem:[#allocation85_spill] sm:$0xff] }
 0x331   :  { %10485 = vmatprep.subr.bf16.mxu1 %v13249_v34  ;;  %10516 = vmatprep.subr.bf16.mxu0 %v15474_v20 }
 0x333   :  { %1847 = vmatmul.mubr.f32.vlgmr.msra.gmra.mrb[4].mxu0 %v13574_v1  ;;  %8897 = vmatmul.mubr.f32.vlgmr.msra.gmra.mrb[18].mxu1 %v13574_v1 }
 0x334   :  { %10487 = vmatpush1.bf16.msra.mxu1 %v13251_v41  ;;  %10518 = vmatpush3.bf16.msra.mxu0 %v13254_v43  ;;  %v15522_v43 = vld [vmem:[#allocation38_spill] sm:$0xff]  ;;  %v15523_v41 = vld [vmem:[#allocation39_spill] sm:$0xff] }
 0x335   :  { %10489 = vmatprep.subr.bf16.mxu1 %v13258_v47  ;;  %10519 = vmatprep.subr.bf16.mxu0 %v15474_v20  ;;  %v15521_v47 = vld [vmem:[#allocation37_spill] sm:$0xff] }
 0x336   :  { %2009 = vmatprep.mubr.f32.mxu1 %v15476_v38  ;;  %8931 = vmatprep.mubr.msk.f32.mxu0 %vm12860_vm1, %v15476_v38 }
 0x338   :  { %10491 = vmatpush1.bf16.msra.mxu1 %v13261_v53  ;;  %10521 = vmatpush3.bf16.msra.mxu0 %v13264_v57  ;;  %v15524_v57 = vld [vmem:[#allocation40_spill] sm:$0xff]  ;;  %v15526_v53 = vld [vmem:[#allocation42_spill] sm:$0xff] }
 0x339   :  { %10493 = vmatprep.subr.bf16.mxu1 %v15517_v35  ;;  %10522 = vmatprep.subr.bf16.mxu0 %v15474_v20  ;;  %v15525_v35 = vld [vmem:[#allocation41_spill] sm:$0xff] }
 0x33c   :  { %10495 = vmatpush1.bf16.msra.mxu1 %v15518_v21  ;;  %10524 = vmatpush3.bf16.msra.mxu0 %v15519_v12  ;;  %v15527_v12 = vld [vmem:[#allocation43_spill] sm:$0xff]  ;;  %v15529_v21 = vld [vmem:[#allocation45_spill] sm:$0xff] }
 0x33d   :  { %10497 = vmatprep.subr.bf16.mxu1 %v15520_v8  ;;  %10525 = vmatprep.subr.bf16.mxu0 %v15474_v20  ;;  %v15528_v8 = vld [vmem:[#allocation44_spill] sm:$0xff] }
 0x340   :  { %10499 = vmatpush1.bf16.msra.mxu1 %v15521_v47  ;;  %10527 = vmatpush3.bf16.msra.mxu0 %v15522_v43  ;;  %v15530_v43 = vld [vmem:[#allocation46_spill] sm:$0xff]  ;;  %v15532_v47 = vld [vmem:[#allocation48_spill] sm:$0xff] }
 0x341   :  { %10501 = vmatprep.subr.bf16.mxu1 %v15523_v41  ;;  %10528 = vmatprep.subr.bf16.mxu0 %v15474_v20  ;;  %v15531_v41 = vld [vmem:[#allocation47_spill] sm:$0xff] }
 0x344   :  { %10503 = vmatpush1.bf16.msra.mxu1 %v15524_v57  ;;  %10530 = vmatpush3.bf16.msra.mxu0 %v15525_v35  ;;  %v15533_v35 = vld [vmem:[#allocation49_spill] sm:$0xff]  ;;  %v15535_v57 = vld [vmem:[#allocation51_spill] sm:$0xff] }
 0x345   :  { %10505 = vmatprep.subr.bf16.mxu1 %v15526_v53  ;;  %10531 = vmatprep.subr.bf16.mxu0 %v15474_v20  ;;  %v15534_v53 = vld [vmem:[#allocation50_spill] sm:$0xff] }
 0x348   :  { %10507 = vmatpush1.bf16.msra.mxu1 %v15527_v12  ;;  %10533 = vmatpush3.bf16.msra.mxu0 %v15528_v8 }
 0x349   :  { %10509 = vmatprep.subr.bf16.mxu1 %v15529_v21  ;;  %10534 = vmatprep.subr.bf16.mxu0 %v15474_v20 }
 0x34c   :  { %10511 = vmatpush1.bf16.msra.mxu1 %v15530_v43  ;;  %10536 = vmatpush3.bf16.msra.mxu0 %v15531_v41 }
 0x34d   :  { %10513 = vmatprep.subr.bf16.mxu1 %v15532_v47  ;;  %10537 = vmatprep.subr.bf16.mxu0 %v15474_v20  ;;  %v15537_v47 = vld [vmem:[#allocation86_spill] sm:$0xff] }
 0x350   :  { %10515 = vmatpush1.bf16.msra.mxu1 %v15533_v35  ;;  %10539 = vmatpush3.bf16.msra.mxu0 %v15534_v53 }
 0x351   :  { %10541 = vmatprep.subr.bf16.mxu1 %v15535_v57  ;;  %10572 = vmatprep.subr.bf16.mxu0 %v15474_v20 }
 0x3c6   :  { %v1609_v8 = vpop.f32.mrb[30].mxu0 }
 0x3c7   :  { %v8828_v21 = vpop.f32.mrb[31].mxu0  ;;  %v1610_v11 = vadd.f32 %v1609_v8, %v13563_v13 }
 0x3e6   :  { %v1679_v12 = vpop.f32.mrb[16].mxu1  ;;  %v1750_v34 = vpop.f32.mrb[32].mxu0 }
 0x3e7   :  { %v12398_v43 = vadd.f32 %v1679_v12, %v15536_v45  ;;  %v1681_v30 = vpop.f32.mrb[17].mxu1  ;;  %v8863_v41 = vpop.f32.mrb[33].mxu0  ;;  %v1768_v17 = vadd.f32 %v15538_v37, %v1750_v34 }
 0x3e8   :  { %v12399_v40 = vadd.f32 %v1681_v30, %v15537_v47 }
 0x3e9   :  { %v7875_v26 = vmul.f32 -1.442695, %v12398_v43 }
 0x3ea   :  { %v7876_v25 = vmul.f32 -1.442695, %v12399_v40 }
 0x3eb   :  { %12516 = vpow2.f32 %v7875_v26 }
 0x3ec   :  { %12518 = vpow2.f32 %v7876_v25 }
 0x3f5   :  { %v12517_v35 = vpop.eup %12516 }
 0x3f6   :  { %v1758_v53 = vadd.f32 1.0, %v12517_v35  ;;  %v12519_v57 = vpop.eup %12518  ;;  %v15539_v35 = vld [vmem:[#allocation68_spill] sm:$0xff] }
 0x3f7   :  { %v1765_v18 = vadd.f32 1.0, %v12519_v57 }
 0x3f8   :  { %12520 = vrcp.f32 %v1758_v53 }
 0x3f9   :  { %12522 = vrcp.f32 %v1765_v18 }
 0x402   :  { %v12521_v21 = vpop.eup %12520 }
 0x403   :  { %v1769_v32 = vmul.f32 %v12521_v21, %v1768_v17  ;;  %v12523_v57 = vpop.eup %12522 }
 0x404   :  { %v1772_v34 = vsub.f32 1.0, %v12523_v57  ;;  %v1774_v17 = vmul.f32 %v12523_v57, %v13569_v27 }
 0x405   :  { %v1770_v12 = vadd.f32 %v1769_v32, %v1610_v11 }
 0x406   :  { %v1848_v41 = vpop.f32.mrb[4].mxu0  ;;  %v1919_v43 = vpop.f32.mrb[18].mxu1 }
 0x407   :  { %12524 = vtanh.f32 %v1770_v12  ;;  %v12370_v26 = vadd.f32 %v1848_v41, %v15500_v2  ;;  %v1850_v40 = vpop.f32.mrb[5].mxu0  ;;  %v8898_v25 = vpop.f32.mrb[19].mxu1  ;;  %v1937_v41 = vadd.f32 %v13384_v14, %v1919_v43  ;;  %v15541_v14 = vld [vmem:[#allocation16_spill] sm:$0xff]  ;;  %v15543_v43 = vld [vmem:[#allocation22_spill] sm:$0xff] }
 0x408   :  { %v12371_v53 = vadd.f32 %v1850_v40, %v15539_v35  ;;  %v15540_v25 = vld [vmem:[#allocation57_spill] sm:$0xff] }
 0x409   :  { %v7877_v30 = vmul.f32 -1.442695, %v12370_v26 }
 0x40a   :  { %v7878_v47 = vmul.f32 -1.442695, %v12371_v53 }
 0x40b   :  { %12526 = vpow2.f32 %v7877_v30 }
 0x40c   :  { %12528 = vpow2.f32 %v7878_v47 }
 0x411   :  { %v12525_v37 = vpop.eup %12524 }
 0x412   :  { %v1773_v8 = vmul.f32 %v12525_v37, %v1772_v34 }
 0x414   :  { %v13694_v32 = vadd.f32 %v1774_v17, %v1773_v8  ;;  %v15544_v8 = vld [vmem:[#allocation17_spill] sm:$0xff]  ;;  %v15545_v17 = vld [vmem:[#allocation23_spill] sm:$0xff] }
 0x415   :  { %v12527_v11 = vpop.eup %12526 }
 0x416   :  { %v1927_v18 = vadd.f32 1.0, %v12527_v11  ;;  %v12529_v21 = vpop.eup %12528  ;;  %v15546_v11 = vld [vmem:[#allocation24_spill] sm:$0xff] }
 0x417   :  { %v1934_v12 = vadd.f32 1.0, %v12529_v21  ;;  %v15548_v21 = vld [vmem:[#allocation25_spill] sm:$0xff] }
 0x418   :  { %12530 = vrcp.f32 %v1927_v18  ;;  %v15547_v18 = vld [vmem:[#allocation18_spill] sm:$0xff] }
 0x419   :  { %12532 = vrcp.f32 %v1934_v12  ;;  %v15549_v12 = vld [vmem:[#allocation26_spill] sm:$0xff] }
 0x422   :  { %v12531_v26 = vpop.eup %12530 }
 0x423   :  { %v1938_v40 = vmul.f32 %v12531_v26, %v1937_v41  ;;  %v12533_v53 = vpop.eup %12532  ;;  %v15550_v41 = vld [vmem:[#allocation19_spill] sm:$0xff] }
 0x424   :  { %v1941_v47 = vsub.f32 1.0, %v12533_v53  ;;  %v1943_v27 = vmul.f32 %v12533_v53, %v13574_v1  ;;  %v15542_v1 = vld [vmem:[#allocation21_spill] sm:$0xff]  ;;  %v15551_v26 = vld [vmem:[#allocation27_spill] sm:$0xff] }
 0x425   :  { %v1939_v30 = vadd.f32 %v1938_v40, %v15540_v25  ;;  %v15552_v40 = vld [vmem:[#allocation28_spill] sm:$0xff]  ;;  %v15553_v25 = vld [vmem:[#allocation29_spill] sm:$0xff]  ;;  %v15555_v53 = vld [vmem:[#allocation31_spill] sm:$0xff] }
 0x427   :  { %12534 = vtanh.f32 %v1939_v30  ;;  %v15554_v30 = vld [vmem:[#allocation30_spill] sm:$0xff] }
 0x431   :  { %v12535_v37 = vpop.eup %12534 }
 0x432   :  { %v1942_v34 = vmul.f32 %v12535_v37, %v1941_v47  ;;  %v15556_v47 = vld [vmem:[#allocation32_spill] sm:$0xff]  ;;  %v15557_v37 = vld [vmem:[#allocation33_spill] sm:$0xff] }
 0x434   :  { %v13699_v57 = vadd.f32 %v1943_v27, %v1942_v34  ;;  %v15558_v34 = vld [vmem:[#allocation34_spill] sm:$0xff]  ;;  %v15559_v27 = vld [vmem:[#allocation35_spill] sm:$0xff] }
 0x436   :  { %2010 = vmatmul.mubr.f32.vlgmr.msra.gmra.mrb[20].mxu1 %v13699_v57  ;;  %8932 = vmatmul.mubr.f32.vlgmr.msra.gmra.mrb[34].mxu0 %v13699_v57 }
 0x437   :  { %10543 = vmatpush1.bf16.msra.mxu1 %v15503_v29  ;;  %10574 = vmatpush3.bf16.msra.mxu0 %v15504_v23 }
 0x438   :  { %10545 = vmatprep.subr.bf16.mxu1 %v15505_v59  ;;  %10575 = vmatprep.subr.bf16.mxu0 %v15474_v20 }
 0x439   :  { %2150 = vmatprep.mubr.f32.mxu1 %v15476_v38  ;;  %8966 = vmatprep.mubr.msk.f32.mxu0 %vm12860_vm1, %v15476_v38 }
 0x43b   :  { %10547 = vmatpush1.bf16.msra.mxu1 %v15506_v62  ;;  %10577 = vmatpush3.bf16.msra.mxu0 %v15507_v52 }
 0x43c   :  { %10549 = vmatprep.subr.bf16.mxu1 %v15508_v0  ;;  %10578 = vmatprep.subr.bf16.mxu0 %v15474_v20 }
 0x43f   :  { %10551 = vmatpush1.bf16.msra.mxu1 %v15509_v44  ;;  %10580 = vmatpush3.bf16.msra.mxu0 %v15510_v39 }
 0x440   :  { %10553 = vmatprep.subr.bf16.mxu1 %v15511_v51  ;;  %10581 = vmatprep.subr.bf16.mxu0 %v15474_v20 }
 0x443   :  { %10555 = vmatpush1.bf16.msra.mxu1 %v15512_v7  ;;  %10583 = vmatpush3.bf16.msra.mxu0 %v15513_v6 }
 0x444   :  { %10557 = vmatprep.subr.bf16.mxu1 %v15514_v31  ;;  %10584 = vmatprep.subr.bf16.mxu0 %v15474_v20 }
 0x447   :  { %10559 = vmatpush1.bf16.msra.mxu1 %v13432_v16  ;;  %10586 = vmatpush3.bf16.msra.mxu0 %v13434_v46 }
 0x448   :  { %10561 = vmatprep.subr.bf16.mxu1 %v15515_v5  ;;  %10587 = vmatprep.subr.bf16.mxu0 %v15474_v20 }
 0x44b   :  { %10563 = vmatpush1.bf16.msra.mxu1 %v15516_v50  ;;  %10589 = vmatpush3.bf16.msra.mxu0 %v13444_v33 }
 0x44c   :  { %10565 = vmatprep.subr.bf16.mxu1 %v13448_v56  ;;  %10590 = vmatprep.subr.bf16.mxu0 %v15474_v20 }
 0x44f   :  { %10567 = vmatpush1.bf16.msra.mxu1 %v13452_v9  ;;  %10592 = vmatpush3.bf16.msra.mxu0 %v13454_v42 }
 0x450   :  { %10569 = vmatprep.subr.bf16.mxu1 %v13458_v22  ;;  %10593 = vmatprep.subr.bf16.mxu0 %v15474_v20 }
 0x453   :  { %10571 = vmatpush1.bf16.msra.mxu1 %v13462_v58  ;;  %10595 = vmatpush3.bf16.msra.mxu0 %v13464_v63 }
 0x454   :  { %10597 = vmatprep.subr.bf16.mxu0 %v13164_v36  ;;  %10628 = vmatprep.subr.bf16.mxu1 %v15474_v20 }
 0x456   :  { %2151 = vmatmul.mubr.f32.vlgmr.msra.gmra.mrb[20].mxu1 %v13694_v32  ;;  %8967 = vmatmul.mubr.f32.vlgmr.msra.gmra.mrb[36].mxu0 %v13694_v32 }
 0x457   :  { %10599 = vmatpush1.bf16.msra.mxu0 %v13190_v48  ;;  %10630 = vmatpush3.bf16.msra.mxu1 %v13109_v15 }
 0x458   :  { %10601 = vmatprep.subr.bf16.mxu0 %v13192_v49  ;;  %10631 = vmatprep.subr.bf16.mxu1 %v15474_v20 }
 0x459   :  { %2319 = vmatprep.mubr.f32.mxu0 %v15476_v38  ;;  %9001 = vmatprep.mubr.msk.f32.mxu1 %vm12860_vm1, %v15476_v38 }
 0x45b   :  { %10603 = vmatpush1.bf16.msra.mxu0 %v13198_v54  ;;  %10633 = vmatpush3.bf16.msra.mxu1 %v13119_v19 }
 0x45c   :  { %10605 = vmatprep.subr.bf16.mxu0 %v13203_v55  ;;  %10634 = vmatprep.subr.bf16.mxu1 %v15474_v20 }
 0x45f   :  { %10607 = vmatpush1.bf16.msra.mxu0 %v13210_v60  ;;  %10636 = vmatpush3.bf16.msra.mxu1 %v13136_v24 }
 0x460   :  { %10609 = vmatprep.subr.bf16.mxu0 %v13214_v61  ;;  %10637 = vmatprep.subr.bf16.mxu1 %v15474_v20 }
 0x463   :  { %10611 = vmatpush1.bf16.msra.mxu0 %v13217_v3  ;;  %10639 = vmatpush3.bf16.msra.mxu1 %v13151_v28 }
 0x464   :  { %10613 = vmatprep.subr.bf16.mxu0 %v13220_v4  ;;  %10640 = vmatprep.subr.bf16.mxu1 %v15474_v20 }
 0x467   :  { %10615 = vmatpush1.bf16.msra.mxu0 %v13223_v10  ;;  %10642 = vmatpush3.bf16.msra.mxu1 %v15541_v14 }
 0x468   :  { %10617 = vmatprep.subr.bf16.mxu0 %v15542_v1  ;;  %10643 = vmatprep.subr.bf16.mxu1 %v15474_v20 }
 0x46b   :  { %10619 = vmatpush1.bf16.msra.mxu0 %v15543_v43  ;;  %10645 = vmatpush3.bf16.msra.mxu1 %v15544_v8  ;;  %v15577_v8 = vld [vmem:[#allocation87_spill] sm:$0xff] }
 0x46c   :  { %10621 = vmatprep.subr.bf16.mxu0 %v15545_v17  ;;  %10646 = vmatprep.subr.bf16.mxu1 %v15474_v20 }
 0x46f   :  { %10623 = vmatpush1.bf16.msra.mxu0 %v15546_v11  ;;  %10648 = vmatpush3.bf16.msra.mxu1 %v15547_v18 }
 0x470   :  { %10625 = vmatprep.subr.bf16.mxu0 %v15548_v21  ;;  %10649 = vmatprep.subr.bf16.mxu1 %v15474_v20 }
 0x473   :  { %10627 = vmatpush1.bf16.msra.mxu0 %v15549_v12  ;;  %10651 = vmatpush3.bf16.msra.mxu1 %v15550_v41 }
 0x474   :  { %10653 = vmatprep.subr.bf16.mxu1 %v15551_v26  ;;  %10684 = vmatprep.subr.bf16.mxu0 %v15474_v20  ;;  %v15563_v26 = vld [vmem:[#allocation39_spill] sm:$0xff] }
 0x476   :  { %2320 = vmatmul.mubr.f32.vlgmr.msra.gmra.mrb[6].mxu0 %v13699_v57  ;;  %9002 = vmatmul.mubr.f32.vlgmr.msra.gmra.mrb[22].mxu1 %v13699_v57 }
 0x477   :  { %10655 = vmatpush1.bf16.msra.mxu1 %v15552_v40  ;;  %10686 = vmatpush3.bf16.msra.mxu0 %v15553_v25  ;;  %v15561_v25 = vld [vmem:[#allocation37_spill] sm:$0xff]  ;;  %v15562_v40 = vld [vmem:[#allocation38_spill] sm:$0xff] }
 0x478   :  { %10657 = vmatprep.subr.bf16.mxu1 %v15554_v30  ;;  %10687 = vmatprep.subr.bf16.mxu0 %v15474_v20  ;;  %v15560_v30 = vld [vmem:[#allocation36_spill] sm:$0xff] }
 0x479   :  { %2482 = vmatprep.mubr.f32.mxu1 %v15476_v38  ;;  %9036 = vmatprep.mubr.msk.f32.mxu0 %vm12860_vm1, %v15476_v38 }
 0x47b   :  { %10659 = vmatpush1.bf16.msra.mxu1 %v15555_v53  ;;  %10689 = vmatpush3.bf16.msra.mxu0 %v15556_v47  ;;  %v15564_v47 = vld [vmem:[#allocation40_spill] sm:$0xff]  ;;  %v15566_v53 = vld [vmem:[#allocation42_spill] sm:$0xff] }
 0x47c   :  { %10661 = vmatprep.subr.bf16.mxu1 %v15557_v37  ;;  %10690 = vmatprep.subr.bf16.mxu0 %v15474_v20  ;;  %v15565_v37 = vld [vmem:[#allocation41_spill] sm:$0xff] }
 0x47f   :  { %10663 = vmatpush1.bf16.msra.mxu1 %v15558_v34  ;;  %10692 = vmatpush3.bf16.msra.mxu0 %v15559_v27  ;;  %v15567_v27 = vld [vmem:[#allocation43_spill] sm:$0xff]  ;;  %v15569_v34 = vld [vmem:[#allocation45_spill] sm:$0xff] }
 0x480   :  { %10665 = vmatprep.subr.bf16.mxu1 %v15560_v30  ;;  %10693 = vmatprep.subr.bf16.mxu0 %v15474_v20  ;;  %v15568_v30 = vld [vmem:[#allocation44_spill] sm:$0xff] }
 0x483   :  { %10667 = vmatpush1.bf16.msra.mxu1 %v15561_v25  ;;  %10695 = vmatpush3.bf16.msra.mxu0 %v15562_v40  ;;  %v15570_v40 = vld [vmem:[#allocation46_spill] sm:$0xff]  ;;  %v15572_v25 = vld [vmem:[#allocation48_spill] sm:$0xff] }
 0x484   :  { %10669 = vmatprep.subr.bf16.mxu1 %v15563_v26  ;;  %10696 = vmatprep.subr.bf16.mxu0 %v15474_v20  ;;  %v15571_v26 = vld [vmem:[#allocation47_spill] sm:$0xff] }
 0x487   :  { %10671 = vmatpush1.bf16.msra.mxu1 %v15564_v47  ;;  %10698 = vmatpush3.bf16.msra.mxu0 %v15565_v37  ;;  %v15573_v37 = vld [vmem:[#allocation49_spill] sm:$0xff]  ;;  %v15575_v47 = vld [vmem:[#allocation51_spill] sm:$0xff] }
 0x488   :  { %10673 = vmatprep.subr.bf16.mxu1 %v15566_v53  ;;  %10699 = vmatprep.subr.bf16.mxu0 %v15474_v20  ;;  %v15574_v53 = vld [vmem:[#allocation50_spill] sm:$0xff] }
 0x48b   :  { %10675 = vmatpush1.bf16.msra.mxu1 %v15567_v27  ;;  %10701 = vmatpush3.bf16.msra.mxu0 %v15568_v30 }
 0x48c   :  { %10677 = vmatprep.subr.bf16.mxu1 %v15569_v34  ;;  %10702 = vmatprep.subr.bf16.mxu0 %v15474_v20 }
 0x48f   :  { %10679 = vmatpush1.bf16.msra.mxu1 %v15570_v40  ;;  %10704 = vmatpush3.bf16.msra.mxu0 %v15571_v26 }
 0x490   :  { %10681 = vmatprep.subr.bf16.mxu1 %v15572_v25  ;;  %10705 = vmatprep.subr.bf16.mxu0 %v15474_v20  ;;  %v15576_v25 = vld [vmem:[#allocation86_spill] sm:$0xff] }
 0x493   :  { %10683 = vmatpush1.bf16.msra.mxu1 %v15573_v37  ;;  %10707 = vmatpush3.bf16.msra.mxu0 %v15574_v53 }
 0x494   :  { %10709 = vmatprep.subr.bf16.mxu1 %v15575_v47  ;;  %10740 = vmatprep.subr.bf16.mxu0 %v15474_v20 }
 0x509   :  { %v2082_v30 = vpop.f32.mrb[34].mxu0 }
 0x50a   :  { %v8933_v34 = vpop.f32.mrb[35].mxu0  ;;  %v2083_v1 = vadd.f32 %v2082_v30, %v13563_v13 }
 0x529   :  { %v2152_v27 = vpop.f32.mrb[20].mxu1  ;;  %v2223_v41 = vpop.f32.mrb[36].mxu0 }
 0x52a   :  { %v12400_v40 = vadd.f32 %v2152_v27, %v15536_v45  ;;  %v2154_v12 = vpop.f32.mrb[21].mxu1  ;;  %v8968_v26 = vpop.f32.mrb[37].mxu0  ;;  %v2241_v43 = vadd.f32 %v15577_v8, %v2223_v41 }
 0x52b   :  { %v12401_v18 = vadd.f32 %v2154_v12, %v15576_v25 }
 0x52c   :  { %v7879_v21 = vmul.f32 -1.442695, %v12400_v40 }
 0x52d   :  { %v7880_v11 = vmul.f32 -1.442695, %v12401_v18 }
 0x52e   :  { %12536 = vpow2.f32 %v7879_v21 }
 0x52f   :  { %12538 = vpow2.f32 %v7880_v11 }
 0x538   :  { %v12537_v37 = vpop.eup %12536 }
 0x539   :  { %v2231_v53 = vadd.f32 1.0, %v12537_v37  ;;  %v12539_v47 = vpop.eup %12538 }
 0x53a   :  { %v2238_v17 = vadd.f32 1.0, %v12539_v47 }
 0x53b   :  { %12540 = vrcp.f32 %v2231_v53 }
 0x53c   :  { %12542 = vrcp.f32 %v2238_v17 }
 0x545   :  { %v12541_v34 = vpop.eup %12540 }
 0x546   :  { %v2242_v14 = vmul.f32 %v12541_v34, %v2241_v43  ;;  %v12543_v47 = vpop.eup %12542 }
 0x547   :  { %v2245_v41 = vsub.f32 1.0, %v12543_v47  ;;  %v2247_v43 = vmul.f32 %v12543_v47, %v13694_v32 }
 0x548   :  { %v2243_v27 = vadd.f32 %v2242_v14, %v2083_v1 }
 0x549   :  { %v2321_v26 = vpop.f32.mrb[6].mxu0  ;;  %v2392_v40 = vpop.f32.mrb[22].mxu1 }
 0x54a   :  { %12544 = vtanh.f32 %v2243_v27  ;;  %v12372_v21 = vadd.f32 %v2321_v26, %v15500_v2  ;;  %v2323_v18 = vpop.f32.mrb[7].mxu0  ;;  %v9003_v11 = vpop.f32.mrb[23].mxu1  ;;  %v13824_v26 = vld [vmem:[%s15218_s6] ss:$0 sm:$0xff] }
 0x54b   :  { %v12373_v53 = vadd.f32 %v2323_v18, %v15539_v35 }
 0x54c   :  { %v7881_v12 = vmul.f32 -1.442695, %v12372_v21  ;;  %v2410_v21 = vadd.f32 %v13824_v26, %v2392_v40  ;;  %v15580_v40 = vld [vmem:[#allocation21_spill] sm:$0xff] }
 0x54d   :  { %v7882_v37 = vmul.f32 -1.442695, %v12373_v53 }
 0x54e   :  { %12546 = vpow2.f32 %v7881_v12 }
 0x54f   :  { %12548 = vpow2.f32 %v7882_v37 }
 0x554   :  { %v12545_v8 = vpop.eup %12544 }
 0x555   :  { %v2246_v30 = vmul.f32 %v12545_v8, %v2245_v41  ;;  %v15578_v8 = vld [vmem:[#allocation56_spill] sm:$0xff] }
 0x557   :  { %v13819_v14 = vadd.f32 %v2247_v43, %v2246_v30  ;;  %v15581_v43 = vld [vmem:[#allocation22_spill] sm:$0xff] }
 0x558   :  { %v12547_v1 = vpop.eup %12546 }
 0x559   :  { %v2400_v17 = vadd.f32 1.0, %v12547_v1  ;;  %v12549_v34 = vpop.eup %12548  ;;  %v15582_v1 = vld [vmem:[#allocation17_spill] sm:$0xff] }
 0x55a   :  { %v2407_v27 = vadd.f32 1.0, %v12549_v34  ;;  %v15584_v34 = vld [vmem:[#allocation24_spill] sm:$0xff] }
 0x55b   :  { %12550 = vrcp.f32 %v2400_v17  ;;  %v15583_v17 = vld [vmem:[#allocation23_spill] sm:$0xff] }
 0x55c   :  { %12552 = vrcp.f32 %v2407_v27  ;;  %v15585_v27 = vld [vmem:[#allocation18_spill] sm:$0xff] }
 0x565   :  { %v12551_v18 = vpop.eup %12550 }
 0x566   :  { %v2411_v11 = vmul.f32 %v12551_v18, %v2410_v21  ;;  %v12553_v32 = vpop.eup %12552  ;;  %v15586_v21 = vld [vmem:[#allocation25_spill] sm:$0xff]  ;;  %v15587_v18 = vld [vmem:[#allocation26_spill] sm:$0xff] }
 0x567   :  { %v2414_v53 = vsub.f32 1.0, %v12553_v32  ;;  %v2416_v41 = vmul.f32 %v12553_v32, %v13699_v57  ;;  %v15579_v57 = vld [vmem:[#allocation16_spill] sm:$0xff]  ;;  %v15591_v32 = vld [vmem:[#allocation29_spill] sm:$0xff] }
 0x568   :  { %v2412_v12 = vadd.f32 %v2411_v11, %v15578_v8  ;;  %v15588_v11 = vld [vmem:[#allocation19_spill] sm:$0xff] }
 0x569   :  { %v15589_v8 = vld [vmem:[#allocation27_spill] sm:$0xff] }
 0x56a   :  { %12554 = vtanh.f32 %v2412_v12  ;;  %v15590_v12 = vld [vmem:[#allocation28_spill] sm:$0xff] }
 0x574   :  { %v12555_v47 = vpop.eup %12554 }
 0x575   :  { %v2415_v37 = vmul.f32 %v12555_v47, %v2414_v53  ;;  %v15592_v53 = vld [vmem:[#allocation30_spill] sm:$0xff]  ;;  %v15593_v47 = vld [vmem:[#allocation31_spill] sm:$0xff] }
 0x577   :  { %v13829_v30 = vadd.f32 %v2416_v41, %v2415_v37  ;;  %v15594_v37 = vld [vmem:[#allocation32_spill] sm:$0xff]  ;;  %v15595_v41 = vld [vmem:[#allocation33_spill] sm:$0xff] }
 0x579   :  { %2483 = vmatmul.mubr.f32.vlgmr.msra.gmra.mrb[24].mxu1 %v13829_v30  ;;  %9037 = vmatmul.mubr.f32.vlgmr.msra.gmra.mrb[38].mxu0 %v13829_v30 }
 0x57a   :  { %10711 = vmatpush1.bf16.msra.mxu1 %v15503_v29  ;;  %10742 = vmatpush3.bf16.msra.mxu0 %v15504_v23 }
 0x57b   :  { %10713 = vmatprep.subr.bf16.mxu1 %v15505_v59  ;;  %10743 = vmatprep.subr.bf16.mxu0 %v15474_v20 }
 0x57c   :  { %2623 = vmatprep.mubr.f32.mxu1 %v15476_v38  ;;  %9071 = vmatprep.mubr.msk.f32.mxu0 %vm12860_vm1, %v15476_v38 }
 0x57e   :  { %10715 = vmatpush1.bf16.msra.mxu1 %v15506_v62  ;;  %10745 = vmatpush3.bf16.msra.mxu0 %v15507_v52 }
 0x57f   :  { %10717 = vmatprep.subr.bf16.mxu1 %v15508_v0  ;;  %10746 = vmatprep.subr.bf16.mxu0 %v15474_v20 }
 0x582   :  { %10719 = vmatpush1.bf16.msra.mxu1 %v15509_v44  ;;  %10748 = vmatpush3.bf16.msra.mxu0 %v15510_v39 }
 0x583   :  { %10721 = vmatprep.subr.bf16.mxu1 %v15511_v51  ;;  %10749 = vmatprep.subr.bf16.mxu0 %v15474_v20 }
 0x586   :  { %10723 = vmatpush1.bf16.msra.mxu1 %v15512_v7  ;;  %10751 = vmatpush3.bf16.msra.mxu0 %v15513_v6 }
 0x587   :  { %10725 = vmatprep.subr.bf16.mxu1 %v15514_v31  ;;  %10752 = vmatprep.subr.bf16.mxu0 %v15474_v20 }
 0x58a   :  { %10727 = vmatpush1.bf16.msra.mxu1 %v13432_v16  ;;  %10754 = vmatpush3.bf16.msra.mxu0 %v13434_v46 }
 0x58b   :  { %10729 = vmatprep.subr.bf16.mxu1 %v15515_v5  ;;  %10755 = vmatprep.subr.bf16.mxu0 %v15474_v20 }
 0x58e   :  { %10731 = vmatpush1.bf16.msra.mxu1 %v15516_v50  ;;  %10757 = vmatpush3.bf16.msra.mxu0 %v13444_v33 }
 0x58f   :  { %10733 = vmatprep.subr.bf16.mxu1 %v13448_v56  ;;  %10758 = vmatprep.subr.bf16.mxu0 %v15474_v20 }
 0x592   :  { %10735 = vmatpush1.bf16.msra.mxu1 %v13452_v9  ;;  %10760 = vmatpush3.bf16.msra.mxu0 %v13454_v42 }
 0x593   :  { %10737 = vmatprep.subr.bf16.mxu1 %v13458_v22  ;;  %10761 = vmatprep.subr.bf16.mxu0 %v15474_v20 }
 0x596   :  { %10739 = vmatpush1.bf16.msra.mxu1 %v13462_v58  ;;  %10763 = vmatpush3.bf16.msra.mxu0 %v13464_v63 }
 0x597   :  { %10765 = vmatprep.subr.bf16.mxu0 %v13164_v36  ;;  %10796 = vmatprep.subr.bf16.mxu1 %v15474_v20 }
 0x599   :  { %2624 = vmatmul.mubr.f32.vlgmr.msra.gmra.mrb[24].mxu1 %v13819_v14  ;;  %9072 = vmatmul.mubr.f32.vlgmr.msra.gmra.mrb[40].mxu0 %v13819_v14 }
 0x59a   :  { %10767 = vmatpush1.bf16.msra.mxu0 %v13190_v48  ;;  %10798 = vmatpush3.bf16.msra.mxu1 %v13109_v15 }
 0x59b   :  { %10769 = vmatprep.subr.bf16.mxu0 %v13192_v49  ;;  %10799 = vmatprep.subr.bf16.mxu1 %v15474_v20 }
 0x59c   :  { %2792 = vmatprep.mubr.f32.mxu0 %v15476_v38  ;;  %9106 = vmatprep.mubr.msk.f32.mxu1 %vm12860_vm1, %v15476_v38 }
 0x59e   :  { %10771 = vmatpush1.bf16.msra.mxu0 %v13198_v54  ;;  %10801 = vmatpush3.bf16.msra.mxu1 %v13119_v19 }
 0x59f   :  { %10773 = vmatprep.subr.bf16.mxu0 %v13203_v55  ;;  %10802 = vmatprep.subr.bf16.mxu1 %v15474_v20 }
 0x5a2   :  { %10775 = vmatpush1.bf16.msra.mxu0 %v13210_v60  ;;  %10804 = vmatpush3.bf16.msra.mxu1 %v13136_v24 }
 0x5a3   :  { %10777 = vmatprep.subr.bf16.mxu0 %v13214_v61  ;;  %10805 = vmatprep.subr.bf16.mxu1 %v15474_v20 }
 0x5a6   :  { %10779 = vmatpush1.bf16.msra.mxu0 %v13217_v3  ;;  %10807 = vmatpush3.bf16.msra.mxu1 %v13151_v28 }
 0x5a7   :  { %10781 = vmatprep.subr.bf16.mxu0 %v13220_v4  ;;  %10808 = vmatprep.subr.bf16.mxu1 %v15474_v20 }
 0x5aa   :  { %10783 = vmatpush1.bf16.msra.mxu0 %v13223_v10  ;;  %10810 = vmatpush3.bf16.msra.mxu1 %v15579_v57 }
 0x5ab   :  { %10785 = vmatprep.subr.bf16.mxu0 %v15580_v40  ;;  %10811 = vmatprep.subr.bf16.mxu1 %v15474_v20 }
 0x5ae   :  { %10787 = vmatpush1.bf16.msra.mxu0 %v15581_v43  ;;  %10813 = vmatpush3.bf16.msra.mxu1 %v15582_v1  ;;  %v15614_v43 = vld [vmem:[#allocation87_spill] sm:$0xff] }
 0x5af   :  { %10789 = vmatprep.subr.bf16.mxu0 %v15583_v17  ;;  %10814 = vmatprep.subr.bf16.mxu1 %v15474_v20 }
 0x5b2   :  { %10791 = vmatpush1.bf16.msra.mxu0 %v15584_v34  ;;  %10816 = vmatpush3.bf16.msra.mxu1 %v15585_v27 }
 0x5b3   :  { %10793 = vmatprep.subr.bf16.mxu0 %v15586_v21  ;;  %10817 = vmatprep.subr.bf16.mxu1 %v15474_v20 }
 0x5b6   :  { %10795 = vmatpush1.bf16.msra.mxu0 %v15587_v18  ;;  %10819 = vmatpush3.bf16.msra.mxu1 %v15588_v11  ;;  %v15600_v11 = vld [vmem:[#allocation38_spill] sm:$0xff]  ;;  %v15601_v18 = vld [vmem:[#allocation39_spill] sm:$0xff] }
 0x5b7   :  { %10821 = vmatprep.subr.bf16.mxu1 %v15589_v8  ;;  %10852 = vmatprep.subr.bf16.mxu0 %v15474_v20  ;;  %v15599_v8 = vld [vmem:[#allocation37_spill] sm:$0xff] }
 0x5b9   :  { %2793 = vmatmul.mubr.f32.vlgmr.msra.gmra.mrb[8].mxu0 %v13829_v30  ;;  %9107 = vmatmul.mubr.f32.vlgmr.msra.gmra.mrb[26].mxu1 %v13829_v30 }
 0x5ba   :  { %10823 = vmatpush1.bf16.msra.mxu1 %v15590_v12  ;;  %10854 = vmatpush3.bf16.msra.mxu0 %v15591_v32  ;;  %v15596_v12 = vld [vmem:[#allocation34_spill] sm:$0xff]  ;;  %v15597_v32 = vld [vmem:[#allocation35_spill] sm:$0xff] }
 0x5bb   :  { %10825 = vmatprep.subr.bf16.mxu1 %v15592_v53  ;;  %10855 = vmatprep.subr.bf16.mxu0 %v15474_v20  ;;  %v15598_v53 = vld [vmem:[#allocation36_spill] sm:$0xff] }
 0x5bc   :  { %2955 = vmatprep.mubr.f32.mxu1 %v15476_v38  ;;  %9141 = vmatprep.mubr.msk.f32.mxu0 %vm12860_vm1, %v15476_v38 }
 0x5be   :  { %10827 = vmatpush1.bf16.msra.mxu1 %v15593_v47  ;;  %10857 = vmatpush3.bf16.msra.mxu0 %v15594_v37  ;;  %v15602_v37 = vld [vmem:[#allocation40_spill] sm:$0xff]  ;;  %v15604_v47 = vld [vmem:[#allocation42_spill] sm:$0xff] }
 0x5bf   :  { %10829 = vmatprep.subr.bf16.mxu1 %v15595_v41  ;;  %10858 = vmatprep.subr.bf16.mxu0 %v15474_v20  ;;  %v15603_v41 = vld [vmem:[#allocation41_spill] sm:$0xff] }
 0x5c2   :  { %10831 = vmatpush1.bf16.msra.mxu1 %v15596_v12  ;;  %10860 = vmatpush3.bf16.msra.mxu0 %v15597_v32  ;;  %v15605_v32 = vld [vmem:[#allocation43_spill] sm:$0xff]  ;;  %v15607_v12 = vld [vmem:[#allocation45_spill] sm:$0xff] }
 0x5c3   :  { %10833 = vmatprep.subr.bf16.mxu1 %v15598_v53  ;;  %10861 = vmatprep.subr.bf16.mxu0 %v15474_v20  ;;  %v15606_v53 = vld [vmem:[#allocation44_spill] sm:$0xff] }
 0x5c6   :  { %10835 = vmatpush1.bf16.msra.mxu1 %v15599_v8  ;;  %10863 = vmatpush3.bf16.msra.mxu0 %v15600_v11  ;;  %v15608_v11 = vld [vmem:[#allocation46_spill] sm:$0xff]  ;;  %v15610_v8 = vld [vmem:[#allocation48_spill] sm:$0xff] }
 0x5c7   :  { %10837 = vmatprep.subr.bf16.mxu1 %v15601_v18  ;;  %10864 = vmatprep.subr.bf16.mxu0 %v15474_v20  ;;  %v15609_v18 = vld [vmem:[#allocation47_spill] sm:$0xff] }
 0x5ca   :  { %10839 = vmatpush1.bf16.msra.mxu1 %v15602_v37  ;;  %10866 = vmatpush3.bf16.msra.mxu0 %v15603_v41  ;;  %v15611_v41 = vld [vmem:[#allocation49_spill] sm:$0xff]  ;;  %v15613_v37 = vld [vmem:[#allocation51_spill] sm:$0xff] }
 0x5cb   :  { %10841 = vmatprep.subr.bf16.mxu1 %v15604_v47  ;;  %10867 = vmatprep.subr.bf16.mxu0 %v15474_v20  ;;  %v15612_v47 = vld [vmem:[#allocation50_spill] sm:$0xff] }
 0x5ce   :  { %10843 = vmatpush1.bf16.msra.mxu1 %v15605_v32  ;;  %10869 = vmatpush3.bf16.msra.mxu0 %v15606_v53 }
 0x5cf   :  { %10845 = vmatprep.subr.bf16.mxu1 %v15607_v12  ;;  %10870 = vmatprep.subr.bf16.mxu0 %v15474_v20 }
 0x5d2   :  { %10847 = vmatpush1.bf16.msra.mxu1 %v15608_v11  ;;  %10872 = vmatpush3.bf16.msra.mxu0 %v15609_v18 }
 0x5d3   :  { %10849 = vmatprep.subr.bf16.mxu1 %v15610_v8  ;;  %10873 = vmatprep.subr.bf16.mxu0 %v15474_v20 }
 0x5d6   :  { %10851 = vmatpush1.bf16.msra.mxu1 %v15611_v41  ;;  %10875 = vmatpush3.bf16.msra.mxu0 %v15612_v47 }
 0x5d7   :  { %10877 = vmatprep.subr.bf16.mxu1 %v15613_v37  ;;  %10908 = vmatprep.subr.bf16.mxu0 %v15474_v20 }
 0x64c   :  { %v2555_v53 = vpop.f32.mrb[38].mxu0 }
 0x64d   :  { %v9038_v12 = vpop.f32.mrb[39].mxu0  ;;  %v2556_v57 = vadd.f32 %v2555_v53, %v13563_v13 }
 0x66c   :  { %v2625_v32 = vpop.f32.mrb[24].mxu1  ;;  %v2696_v21 = vpop.f32.mrb[40].mxu0 }
 0x66d   :  { %v12402_v11 = vadd.f32 %v2625_v32, %v15536_v45  ;;  %v2627_v27 = vpop.f32.mrb[25].mxu1  ;;  %v9073_v18 = vpop.f32.mrb[41].mxu0  ;;  %v2714_v40 = vadd.f32 %v15614_v43, %v2696_v21 }
 0x66e   :  { %v12403_v8 = vadd.f32 %v2627_v27, %v15576_v25 }
 0x66f   :  { %v7883_v34 = vmul.f32 -1.442695, %v12402_v11 }
 0x670   :  { %v7884_v17 = vmul.f32 -1.442695, %v12403_v8 }
 0x671   :  { %12556 = vpow2.f32 %v7883_v34 }
 0x672   :  { %12558 = vpow2.f32 %v7884_v17 }
 0x67b   :  { %v12557_v41 = vpop.eup %12556 }
 0x67c   :  { %v2704_v47 = vadd.f32 1.0, %v12557_v41  ;;  %v12559_v37 = vpop.eup %12558 }
 0x67d   :  { %v2711_v1 = vadd.f32 1.0, %v12559_v37 }
 0x67e   :  { %12560 = vrcp.f32 %v2704_v47 }
 0x67f   :  { %12562 = vrcp.f32 %v2711_v1 }
 0x688   :  { %v12561_v12 = vpop.eup %12560 }
 0x689   :  { %v2715_v10 = vmul.f32 %v12561_v12, %v2714_v40  ;;  %v12563_v37 = vpop.eup %12562 }
 0x68a   :  { %v2718_v43 = vsub.f32 1.0, %v12563_v37  ;;  %v2720_v40 = vmul.f32 %v12563_v37, %v13819_v14 }
 0x68b   :  { %v2716_v32 = vadd.f32 %v2715_v10, %v2556_v57 }
 0x68c   :  { %v2794_v18 = vpop.f32.mrb[8].mxu0  ;;  %v2865_v11 = vpop.f32.mrb[26].mxu1 }
 0x68d   :  { %12564 = vtanh.f32 %v2716_v32  ;;  %v12374_v34 = vadd.f32 %v2794_v18, %v15500_v2  ;;  %v2796_v27 = vpop.f32.mrb[9].mxu0  ;;  %v9108_v17 = vpop.f32.mrb[27].mxu1  ;;  %v2883_v18 = vadd.f32 %v13824_v26, %v2865_v11  ;;  %v15617_v11 = vld [vmem:[#allocation16_spill] sm:$0xff] }
 0x68e   :  { %v12375_v47 = vadd.f32 %v2796_v27, %v15539_v35  ;;  %v15615_v17 = vld [vmem:[#allocation60_spill] sm:$0xff] }
 0x68f   :  { %v7885_v8 = vmul.f32 -1.442695, %v12374_v34 }
 0x690   :  { %v7886_v41 = vmul.f32 -1.442695, %v12375_v47 }
 0x691   :  { %12566 = vpow2.f32 %v7885_v8 }
 0x692   :  { %12568 = vpow2.f32 %v7886_v41 }
 0x697   :  { %v12565_v21 = vpop.eup %12564 }
 0x698   :  { %v2719_v53 = vmul.f32 %v12565_v21, %v2718_v43 }
 0x69a   :  { %v13949_v10 = vadd.f32 %v2720_v40, %v2719_v53  ;;  %v15618_v53 = vld [vmem:[#allocation21_spill] sm:$0xff]  ;;  %v15619_v40 = vld [vmem:[#allocation22_spill] sm:$0xff] }
 0x69b   :  { %v12567_v57 = vpop.eup %12566 }
 0x69c   :  { %v2873_v1 = vadd.f32 1.0, %v12567_v57  ;;  %v12569_v12 = vpop.eup %12568  ;;  %v15620_v57 = vld [vmem:[#allocation17_spill] sm:$0xff] }
 0x69d   :  { %v2880_v32 = vadd.f32 1.0, %v12569_v12  ;;  %v15622_v12 = vld [vmem:[#allocation24_spill] sm:$0xff] }
 0x69e   :  { %12570 = vrcp.f32 %v2873_v1  ;;  %v15621_v1 = vld [vmem:[#allocation23_spill] sm:$0xff] }
 0x69f   :  { %12572 = vrcp.f32 %v2880_v32  ;;  %v15623_v32 = vld [vmem:[#allocation18_spill] sm:$0xff] }
 0x6a8   :  { %v12571_v34 = vpop.eup %12570 }
 0x6a9   :  { %v2884_v27 = vmul.f32 %v12571_v34, %v2883_v18  ;;  %v12573_v47 = vpop.eup %12572  ;;  %v15624_v18 = vld [vmem:[#allocation25_spill] sm:$0xff]  ;;  %v15625_v34 = vld [vmem:[#allocation26_spill] sm:$0xff] }
 0x6aa   :  { %v2887_v41 = vsub.f32 1.0, %v12573_v47  ;;  %v2889_v14 = vmul.f32 %v12573_v47, %v13829_v30  ;;  %v15616_v30 = vld [vmem:[#allocation20_spill] sm:$0xff]  ;;  %v15629_v47 = vld [vmem:[#allocation29_spill] sm:$0xff] }
 0x6ab   :  { %v2885_v8 = vadd.f32 %v2884_v27, %v15615_v17  ;;  %v15626_v27 = vld [vmem:[#allocation19_spill] sm:$0xff] }
 0x6ac   :  { %v15627_v17 = vld [vmem:[#allocation27_spill] sm:$0xff] }
 0x6ad   :  { %12574 = vtanh.f32 %v2885_v8  ;;  %v15628_v8 = vld [vmem:[#allocation28_spill] sm:$0xff] }
 0x6b7   :  { %v12575_v43 = vpop.eup %12574 }
 0x6b8   :  { %v2888_v21 = vmul.f32 %v12575_v43, %v2887_v41  ;;  %v15630_v41 = vld [vmem:[#allocation30_spill] sm:$0xff]  ;;  %v15631_v43 = vld [vmem:[#allocation31_spill] sm:$0xff] }
 0x6ba   :  { %v13954_v37 = vadd.f32 %v2889_v14, %v2888_v21  ;;  %v15632_v21 = vld [vmem:[#allocation32_spill] sm:$0xff]  ;;  %v15633_v14 = vld [vmem:[#allocation33_spill] sm:$0xff] }
 0x6bc   :  { %2956 = vmatmul.mubr.f32.vlgmr.msra.gmra.mrb[28].mxu1 %v13954_v37  ;;  %9142 = vmatmul.mubr.f32.vlgmr.msra.gmra.mrb[42].mxu0 %v13954_v37 }
 0x6bd   :  { %10879 = vmatpush1.bf16.msra.mxu1 %v15503_v29  ;;  %10910 = vmatpush3.bf16.msra.mxu0 %v15504_v23 }
 0x6be   :  { %10881 = vmatprep.subr.bf16.mxu1 %v15505_v59  ;;  %10911 = vmatprep.subr.bf16.mxu0 %v15474_v20 }
 0x6bf   :  { %3096 = vmatprep.mubr.f32.mxu1 %v15476_v38  ;;  %9176 = vmatprep.mubr.msk.f32.mxu0 %vm12860_vm1, %v15476_v38 }
 0x6c1   :  { %10883 = vmatpush1.bf16.msra.mxu1 %v15506_v62  ;;  %10913 = vmatpush3.bf16.msra.mxu0 %v15507_v52 }
 0x6c2   :  { %10885 = vmatprep.subr.bf16.mxu1 %v15508_v0  ;;  %10914 = vmatprep.subr.bf16.mxu0 %v15474_v20 }
 0x6c5   :  { %10887 = vmatpush1.bf16.msra.mxu1 %v15509_v44  ;;  %10916 = vmatpush3.bf16.msra.mxu0 %v15510_v39 }
 0x6c6   :  { %10889 = vmatprep.subr.bf16.mxu1 %v15511_v51  ;;  %10917 = vmatprep.subr.bf16.mxu0 %v15474_v20 }
 0x6c9   :  { %10891 = vmatpush1.bf16.msra.mxu1 %v15512_v7  ;;  %10919 = vmatpush3.bf16.msra.mxu0 %v15513_v6 }
 0x6ca   :  { %10893 = vmatprep.subr.bf16.mxu1 %v15514_v31  ;;  %10920 = vmatprep.subr.bf16.mxu0 %v15474_v20 }
 0x6cd   :  { %10895 = vmatpush1.bf16.msra.mxu1 %v13432_v16  ;;  %10922 = vmatpush3.bf16.msra.mxu0 %v13434_v46 }
 0x6ce   :  { %10897 = vmatprep.subr.bf16.mxu1 %v15515_v5  ;;  %10923 = vmatprep.subr.bf16.mxu0 %v15474_v20 }
 0x6d1   :  { %10899 = vmatpush1.bf16.msra.mxu1 %v15516_v50  ;;  %10925 = vmatpush3.bf16.msra.mxu0 %v13444_v33 }
 0x6d2   :  { %10901 = vmatprep.subr.bf16.mxu1 %v13448_v56  ;;  %10926 = vmatprep.subr.bf16.mxu0 %v15474_v20 }
 0x6d5   :  { %10903 = vmatpush1.bf16.msra.mxu1 %v13452_v9  ;;  %10928 = vmatpush3.bf16.msra.mxu0 %v13454_v42 }
 0x6d6   :  { %10905 = vmatprep.subr.bf16.mxu1 %v13458_v22  ;;  %10929 = vmatprep.subr.bf16.mxu0 %v15474_v20 }
 0x6d9   :  { %10907 = vmatpush1.bf16.msra.mxu1 %v13462_v58  ;;  %10931 = vmatpush3.bf16.msra.mxu0 %v13464_v63 }
 0x6da   :  { %10933 = vmatprep.subr.bf16.mxu0 %v13164_v36  ;;  %10964 = vmatprep.subr.bf16.mxu1 %v15474_v20 }
 0x6dc   :  { %3097 = vmatmul.mubr.f32.vlgmr.msra.gmra.mrb[28].mxu1 %v13949_v10  ;;  %9177 = vmatmul.mubr.f32.vlgmr.msra.gmra.mrb[44].mxu0 %v13949_v10 }
 0x6dd   :  { %10935 = vmatpush1.bf16.msra.mxu0 %v13190_v48  ;;  %10966 = vmatpush3.bf16.msra.mxu1 %v13109_v15 }
 0x6de   :  { %10937 = vmatprep.subr.bf16.mxu0 %v13192_v49  ;;  %10967 = vmatprep.subr.bf16.mxu1 %v15474_v20 }
 0x6df   :  { %3265 = vmatprep.mubr.f32.mxu0 %v15476_v38  ;;  %9211 = vmatprep.mubr.msk.f32.mxu1 %vm12860_vm1, %v15476_v38 }
 0x6e1   :  { %10939 = vmatpush1.bf16.msra.mxu0 %v13198_v54  ;;  %10969 = vmatpush3.bf16.msra.mxu1 %v13119_v19 }
 0x6e2   :  { %10941 = vmatprep.subr.bf16.mxu0 %v13203_v55  ;;  %10970 = vmatprep.subr.bf16.mxu1 %v15474_v20 }
 0x6e5   :  { %10943 = vmatpush1.bf16.msra.mxu0 %v13210_v60  ;;  %10972 = vmatpush3.bf16.msra.mxu1 %v13136_v24 }
 0x6e6   :  { %10945 = vmatprep.subr.bf16.mxu0 %v13214_v61  ;;  %10973 = vmatprep.subr.bf16.mxu1 %v15474_v20 }
 0x6e9   :  { %10947 = vmatpush1.bf16.msra.mxu0 %v13217_v3  ;;  %10975 = vmatpush3.bf16.msra.mxu1 %v13151_v28 }
 0x6ea   :  { %10949 = vmatprep.subr.bf16.mxu0 %v13220_v4  ;;  %10976 = vmatprep.subr.bf16.mxu1 %v15474_v20 }
 0x6ed   :  { %10951 = vmatpush1.bf16.msra.mxu0 %v15616_v30  ;;  %10978 = vmatpush3.bf16.msra.mxu1 %v15617_v11 }
 0x6ee   :  { %10953 = vmatprep.subr.bf16.mxu0 %v15618_v53  ;;  %10979 = vmatprep.subr.bf16.mxu1 %v15474_v20 }
 0x6f1   :  { %10955 = vmatpush1.bf16.msra.mxu0 %v15619_v40  ;;  %10981 = vmatpush3.bf16.msra.mxu1 %v15620_v57 }
 0x6f2   :  { %10957 = vmatprep.subr.bf16.mxu0 %v15621_v1  ;;  %10982 = vmatprep.subr.bf16.mxu1 %v15474_v20 }
 0x6f5   :  { %10959 = vmatpush1.bf16.msra.mxu0 %v15622_v12  ;;  %10984 = vmatpush3.bf16.msra.mxu1 %v15623_v32 }
 0x6f6   :  { %10961 = vmatprep.subr.bf16.mxu0 %v15624_v18  ;;  %10985 = vmatprep.subr.bf16.mxu1 %v15474_v20 }
 0x6f9   :  { %10963 = vmatpush1.bf16.msra.mxu0 %v15625_v34  ;;  %10987 = vmatpush3.bf16.msra.mxu1 %v15626_v27  ;;  %v15638_v27 = vld [vmem:[#allocation38_spill] sm:$0xff]  ;;  %v15639_v34 = vld [vmem:[#allocation39_spill] sm:$0xff] }
 0x6fa   :  { %10989 = vmatprep.subr.bf16.mxu1 %v15627_v17  ;;  %11020 = vmatprep.subr.bf16.mxu0 %v15474_v20  ;;  %v15637_v17 = vld [vmem:[#allocation37_spill] sm:$0xff] }
 0x6fc   :  { %3266 = vmatmul.mubr.f32.vlgmr.msra.gmra.mrb[10].mxu0 %v13954_v37  ;;  %9212 = vmatmul.mubr.f32.vlgmr.msra.gmra.mrb[30].mxu1 %v13954_v37 }
 0x6fd   :  { %10991 = vmatpush1.bf16.msra.mxu1 %v15628_v8  ;;  %11022 = vmatpush3.bf16.msra.mxu0 %v15629_v47  ;;  %v15634_v8 = vld [vmem:[#allocation34_spill] sm:$0xff]  ;;  %v15635_v47 = vld [vmem:[#allocation35_spill] sm:$0xff] }
 0x6fe   :  { %10993 = vmatprep.subr.bf16.mxu1 %v15630_v41  ;;  %11023 = vmatprep.subr.bf16.mxu0 %v15474_v20  ;;  %v15636_v41 = vld [vmem:[#allocation36_spill] sm:$0xff] }
 0x6ff   :  { %3428 = vmatprep.mubr.f32.mxu1 %v15476_v38  ;;  %9246 = vmatprep.mubr.msk.f32.mxu0 %vm12860_vm1, %v15476_v38 }
 0x701   :  { %10995 = vmatpush1.bf16.msra.mxu1 %v15631_v43  ;;  %11025 = vmatpush3.bf16.msra.mxu0 %v15632_v21  ;;  %v15640_v21 = vld [vmem:[#allocation40_spill] sm:$0xff]  ;;  %v15642_v43 = vld [vmem:[#allocation42_spill] sm:$0xff] }
 0x702   :  { %10997 = vmatprep.subr.bf16.mxu1 %v15633_v14  ;;  %11026 = vmatprep.subr.bf16.mxu0 %v15474_v20  ;;  %v15641_v14 = vld [vmem:[#allocation41_spill] sm:$0xff] }
 0x705   :  { %10999 = vmatpush1.bf16.msra.mxu1 %v15634_v8  ;;  %11028 = vmatpush3.bf16.msra.mxu0 %v15635_v47  ;;  %v15643_v47 = vld [vmem:[#allocation43_spill] sm:$0xff]  ;;  %v15645_v8 = vld [vmem:[#allocation45_spill] sm:$0xff] }
 0x706   :  { %11001 = vmatprep.subr.bf16.mxu1 %v15636_v41  ;;  %11029 = vmatprep.subr.bf16.mxu0 %v15474_v20  ;;  %v15644_v41 = vld [vmem:[#allocation44_spill] sm:$0xff] }
 0x709   :  { %11003 = vmatpush1.bf16.msra.mxu1 %v15637_v17  ;;  %11031 = vmatpush3.bf16.msra.mxu0 %v15638_v27  ;;  %v15646_v27 = vld [vmem:[#allocation46_spill] sm:$0xff]  ;;  %v15648_v17 = vld [vmem:[#allocation48_spill] sm:$0xff] }
 0x70a   :  { %11005 = vmatprep.subr.bf16.mxu1 %v15639_v34  ;;  %11032 = vmatprep.subr.bf16.mxu0 %v15474_v20  ;;  %v15647_v34 = vld [vmem:[#allocation47_spill] sm:$0xff] }
 0x70d   :  { %11007 = vmatpush1.bf16.msra.mxu1 %v15640_v21  ;;  %11034 = vmatpush3.bf16.msra.mxu0 %v15641_v14  ;;  %v15649_v14 = vld [vmem:[#allocation49_spill] sm:$0xff]  ;;  %v15651_v21 = vld [vmem:[#allocation51_spill] sm:$0xff] }
 0x70e   :  { %11009 = vmatprep.subr.bf16.mxu1 %v15642_v43  ;;  %11035 = vmatprep.subr.bf16.mxu0 %v15474_v20  ;;  %v15650_v43 = vld [vmem:[#allocation50_spill] sm:$0xff] }
 0x711   :  { %11011 = vmatpush1.bf16.msra.mxu1 %v15643_v47  ;;  %11037 = vmatpush3.bf16.msra.mxu0 %v15644_v41 }
 0x712   :  { %11013 = vmatprep.subr.bf16.mxu1 %v15645_v8  ;;  %11038 = vmatprep.subr.bf16.mxu0 %v15474_v20 }
 0x715   :  { %11015 = vmatpush1.bf16.msra.mxu1 %v15646_v27  ;;  %11040 = vmatpush3.bf16.msra.mxu0 %v15647_v34 }
 0x716   :  { %11017 = vmatprep.subr.bf16.mxu1 %v15648_v17  ;;  %11041 = vmatprep.subr.bf16.mxu0 %v15474_v20 }
 0x719   :  { %11019 = vmatpush1.bf16.msra.mxu1 %v15649_v14  ;;  %11043 = vmatpush3.bf16.msra.mxu0 %v15650_v43 }
 0x71a   :  { %11045 = vmatprep.subr.bf16.mxu1 %v15651_v21  ;;  %11076 = vmatprep.subr.bf16.mxu0 %v15474_v20 }
 0x78f   :  { %v3028_v41 = vpop.f32.mrb[42].mxu0 }
 0x790   :  { %v9143_v8 = vpop.f32.mrb[43].mxu0 }
 0x791   :  { %v14072_v8 = vld [vmem:[%s15225_s13] ss:$0 sm:$0xff] }
 0x792   :  { %15652 = vst [vmem:[#allocation67_spill] sm:$0xff] %v14072_v8 }
 0x7af   :  { %v3098_v47 = vpop.f32.mrb[28].mxu1  ;;  %v3169_v18 = vpop.f32.mrb[44].mxu0 }
 0x7b0   :  { %v12404_v27 = vadd.f32 %v3098_v47, %v15536_v45  ;;  %v3100_v32 = vpop.f32.mrb[29].mxu1  ;;  %v9178_v34 = vpop.f32.mrb[45].mxu0  ;;  %v3187_v47 = vadd.f32 %v14072_v8, %v3169_v18 }
 0x7b1   :  { %v12405_v17 = vadd.f32 %v3100_v32, %v15576_v25  ;;  %v3029_v34 = vadd.f32 %v3028_v41, %v13563_v13 }
 0x7b2   :  { %v7887_v12 = vmul.f32 -1.442695, %v12404_v27 }
 0x7b3   :  { %v7888_v1 = vmul.f32 -1.442695, %v12405_v17 }
 0x7b4   :  { %12576 = vpow2.f32 %v7887_v12 }
 0x7b5   :  { %12578 = vpow2.f32 %v7888_v1 }
 0x7be   :  { %v12577_v14 = vpop.eup %12576 }
 0x7bf   :  { %v3177_v43 = vadd.f32 1.0, %v12577_v14  ;;  %v12579_v21 = vpop.eup %12578 }
 0x7c0   :  { %v3184_v57 = vadd.f32 1.0, %v12579_v21 }
 0x7c1   :  { %12580 = vrcp.f32 %v3177_v43 }
 0x7c2   :  { %12582 = vrcp.f32 %v3184_v57 }
 0x7cb   :  { %v12581_v45 = vpop.eup %12580 }
 0x7cc   :  { %v3188_v27 = vmul.f32 %v12581_v45, %v3187_v47  ;;  %v12583_v40 = vpop.eup %12582 }
 0x7cd   :  { %v3191_v18 = vsub.f32 1.0, %v12583_v40  ;;  %v3193_v45 = vmul.f32 %v12583_v40, %v13949_v10 }
 0x7ce   :  { %v3189_v12 = vadd.f32 %v3188_v27, %v3029_v34 }
 0x7cf   :  { %v3267_v32 = vpop.f32.mrb[10].mxu0  ;;  %v3338_v1 = vpop.f32.mrb[30].mxu1 }
 0x7d0   :  { %12584 = vtanh.f32 %v3189_v12  ;;  %v12376_v17 = vadd.f32 %v3267_v32, %v15500_v2  ;;  %v3269_v43 = vpop.f32.mrb[11].mxu0  ;;  %v9213_v21 = vpop.f32.mrb[31].mxu1  ;;  %v3356_v32 = vadd.f32 %v13824_v26, %v3338_v1  ;;  %v15655_v1 = vld [vmem:[#allocation22_spill] sm:$0xff] }
 0x7d1   :  { %v12377_v25 = vadd.f32 %v3269_v43, %v15539_v35  ;;  %v15653_v21 = vld [vmem:[#allocation58_spill] sm:$0xff] }
 0x7d2   :  { %v7889_v14 = vmul.f32 -1.442695, %v12376_v17 }
 0x7d3   :  { %v7890_v53 = vmul.f32 -1.442695, %v12377_v25 }
 0x7d4   :  { %12586 = vpow2.f32 %v7889_v14 }
 0x7d5   :  { %12588 = vpow2.f32 %v7890_v53 }
 0x7da   :  { %v12585_v8 = vpop.eup %12584 }
 0x7db   :  { %v3192_v41 = vmul.f32 %v12585_v8, %v3191_v18 }
 0x7dd   :  { %v14079_v57 = vadd.f32 %v3193_v45, %v3192_v41  ;;  %v15656_v41 = vld [vmem:[#allocation17_spill] sm:$0xff]  ;;  %v15657_v45 = vld [vmem:[#allocation23_spill] sm:$0xff] }
 0x7de   :  { %v12587_v47 = vpop.eup %12586 }
 0x7df   :  { %v3346_v34 = vadd.f32 1.0, %v12587_v47  ;;  %v12589_v27 = vpop.eup %12588  ;;  %v15658_v47 = vld [vmem:[#allocation24_spill] sm:$0xff] }
 0x7e0   :  { %v3353_v12 = vadd.f32 1.0, %v12589_v27  ;;  %v15660_v27 = vld [vmem:[#allocation25_spill] sm:$0xff] }
 0x7e1   :  { %12590 = vrcp.f32 %v3346_v34  ;;  %v15659_v34 = vld [vmem:[#allocation18_spill] sm:$0xff] }
 0x7e2   :  { %12592 = vrcp.f32 %v3353_v12  ;;  %v15661_v12 = vld [vmem:[#allocation26_spill] sm:$0xff] }
 0x7eb   :  { %v12591_v17 = vpop.eup %12590 }
 0x7ec   :  { %v3357_v43 = vmul.f32 %v12591_v17, %v3356_v32  ;;  %v12593_v14 = vpop.eup %12592  ;;  %v15662_v32 = vld [vmem:[#allocation19_spill] sm:$0xff] }
 0x7ed   :  { %v3360_v53 = vsub.f32 1.0, %v12593_v14  ;;  %v3362_v10 = vmul.f32 %v12593_v14, %v13954_v37  ;;  %v15654_v37 = vld [vmem:[#allocation21_spill] sm:$0xff]  ;;  %v15663_v17 = vld [vmem:[#allocation27_spill] sm:$0xff] }
 0x7ee   :  { %v3358_v25 = vadd.f32 %v3357_v43, %v15653_v21  ;;  %v15664_v43 = vld [vmem:[#allocation28_spill] sm:$0xff]  ;;  %v15665_v21 = vld [vmem:[#allocation29_spill] sm:$0xff]  ;;  %v15667_v14 = vld [vmem:[#allocation31_spill] sm:$0xff] }
 0x7f0   :  { %12594 = vtanh.f32 %v3358_v25  ;;  %v15666_v25 = vld [vmem:[#allocation30_spill] sm:$0xff] }
 0x7fa   :  { %v12595_v8 = vpop.eup %12594 }
 0x7fb   :  { %v3361_v18 = vmul.f32 %v12595_v8, %v3360_v53  ;;  %v15668_v53 = vld [vmem:[#allocation32_spill] sm:$0xff]  ;;  %v15669_v8 = vld [vmem:[#allocation33_spill] sm:$0xff] }
 0x7fd   :  { %v14084_v40 = vadd.f32 %v3362_v10, %v3361_v18  ;;  %v15670_v18 = vld [vmem:[#allocation34_spill] sm:$0xff]  ;;  %v15671_v10 = vld [vmem:[#allocation35_spill] sm:$0xff] }
 0x7ff   :  { %3429 = vmatmul.mubr.f32.vlgmr.msra.gmra.mrb[32].mxu1 %v14084_v40  ;;  %9247 = vmatmul.mubr.f32.vlgmr.msra.gmra.mrb[46].mxu0 %v14084_v40 }
 0x800   :  { %11047 = vmatpush1.bf16.msra.mxu1 %v15503_v29  ;;  %11078 = vmatpush3.bf16.msra.mxu0 %v15504_v23 }
 0x801   :  { %11049 = vmatprep.subr.bf16.mxu1 %v15505_v59  ;;  %11079 = vmatprep.subr.bf16.mxu0 %v15474_v20 }
 0x802   :  { %3569 = vmatprep.mubr.f32.mxu1 %v15476_v38  ;;  %9281 = vmatprep.mubr.msk.f32.mxu0 %vm12860_vm1, %v15476_v38 }
 0x804   :  { %11051 = vmatpush1.bf16.msra.mxu1 %v15506_v62  ;;  %11081 = vmatpush3.bf16.msra.mxu0 %v15507_v52 }
 0x805   :  { %11053 = vmatprep.subr.bf16.mxu1 %v15508_v0  ;;  %11082 = vmatprep.subr.bf16.mxu0 %v15474_v20 }
 0x808   :  { %11055 = vmatpush1.bf16.msra.mxu1 %v15509_v44  ;;  %11084 = vmatpush3.bf16.msra.mxu0 %v15510_v39 }
 0x809   :  { %11057 = vmatprep.subr.bf16.mxu1 %v15511_v51  ;;  %11085 = vmatprep.subr.bf16.mxu0 %v15474_v20 }
 0x80c   :  { %11059 = vmatpush1.bf16.msra.mxu1 %v15512_v7  ;;  %11087 = vmatpush3.bf16.msra.mxu0 %v15513_v6 }
 0x80d   :  { %11061 = vmatprep.subr.bf16.mxu1 %v15514_v31  ;;  %11088 = vmatprep.subr.bf16.mxu0 %v15474_v20 }
 0x810   :  { %11063 = vmatpush1.bf16.msra.mxu1 %v13432_v16  ;;  %11090 = vmatpush3.bf16.msra.mxu0 %v13434_v46 }
 0x811   :  { %11065 = vmatprep.subr.bf16.mxu1 %v15515_v5  ;;  %11091 = vmatprep.subr.bf16.mxu0 %v15474_v20 }
 0x814   :  { %11067 = vmatpush1.bf16.msra.mxu1 %v15516_v50  ;;  %11093 = vmatpush3.bf16.msra.mxu0 %v13444_v33 }
 0x815   :  { %11069 = vmatprep.subr.bf16.mxu1 %v13448_v56  ;;  %11094 = vmatprep.subr.bf16.mxu0 %v15474_v20 }
 0x818   :  { %11071 = vmatpush1.bf16.msra.mxu1 %v13452_v9  ;;  %11096 = vmatpush3.bf16.msra.mxu0 %v13454_v42 }
 0x819   :  { %11073 = vmatprep.subr.bf16.mxu1 %v13458_v22  ;;  %11097 = vmatprep.subr.bf16.mxu0 %v15474_v20 }
 0x81c   :  { %11075 = vmatpush1.bf16.msra.mxu1 %v13462_v58  ;;  %11099 = vmatpush3.bf16.msra.mxu0 %v13464_v63 }
 0x81d   :  { %11101 = vmatprep.subr.bf16.mxu0 %v13164_v36  ;;  %11132 = vmatprep.subr.bf16.mxu1 %v15474_v20 }
 0x81f   :  { %3570 = vmatmul.mubr.f32.vlgmr.msra.gmra.mrb[32].mxu1 %v14079_v57  ;;  %9282 = vmatmul.mubr.f32.vlgmr.msra.gmra.mrb[48].mxu0 %v14079_v57 }
 0x820   :  { %11103 = vmatpush1.bf16.msra.mxu0 %v13190_v48  ;;  %11134 = vmatpush3.bf16.msra.mxu1 %v13109_v15 }
 0x821   :  { %11105 = vmatprep.subr.bf16.mxu0 %v13192_v49  ;;  %11135 = vmatprep.subr.bf16.mxu1 %v15474_v20 }
 0x822   :  { %3738 = vmatprep.mubr.f32.mxu0 %v15476_v38  ;;  %9316 = vmatprep.mubr.msk.f32.mxu1 %vm12860_vm1, %v15476_v38 }
 0x824   :  { %11107 = vmatpush1.bf16.msra.mxu0 %v13198_v54  ;;  %11137 = vmatpush3.bf16.msra.mxu1 %v13119_v19 }
 0x825   :  { %11109 = vmatprep.subr.bf16.mxu0 %v13203_v55  ;;  %11138 = vmatprep.subr.bf16.mxu1 %v15474_v20 }
 0x828   :  { %11111 = vmatpush1.bf16.msra.mxu0 %v13210_v60  ;;  %11140 = vmatpush3.bf16.msra.mxu1 %v13136_v24 }
 0x829   :  { %11113 = vmatprep.subr.bf16.mxu0 %v13214_v61  ;;  %11141 = vmatprep.subr.bf16.mxu1 %v15474_v20 }
 0x82c   :  { %11115 = vmatpush1.bf16.msra.mxu0 %v13217_v3  ;;  %11143 = vmatpush3.bf16.msra.mxu1 %v13151_v28 }
 0x82d   :  { %11117 = vmatprep.subr.bf16.mxu0 %v13220_v4  ;;  %11144 = vmatprep.subr.bf16.mxu1 %v15474_v20 }
 0x830   :  { %11119 = vmatpush1.bf16.msra.mxu0 %v15616_v30  ;;  %11146 = vmatpush3.bf16.msra.mxu1 %v15617_v11 }
 0x831   :  { %11121 = vmatprep.subr.bf16.mxu0 %v15654_v37  ;;  %11147 = vmatprep.subr.bf16.mxu1 %v15474_v20 }
 0x834   :  { %11123 = vmatpush1.bf16.msra.mxu0 %v15655_v1  ;;  %11149 = vmatpush3.bf16.msra.mxu1 %v15656_v41  ;;  %v15690_v1 = vld [vmem:[#allocation67_spill] sm:$0xff] }
 0x835   :  { %11125 = vmatprep.subr.bf16.mxu0 %v15657_v45  ;;  %11150 = vmatprep.subr.bf16.mxu1 %v15474_v20 }
 0x838   :  { %11127 = vmatpush1.bf16.msra.mxu0 %v15658_v47  ;;  %11152 = vmatpush3.bf16.msra.mxu1 %v15659_v34 }
 0x839   :  { %11129 = vmatprep.subr.bf16.mxu0 %v15660_v27  ;;  %11153 = vmatprep.subr.bf16.mxu1 %v15474_v20 }
 0x83c   :  { %11131 = vmatpush1.bf16.msra.mxu0 %v15661_v12  ;;  %11155 = vmatpush3.bf16.msra.mxu1 %v15662_v32  ;;  %v15688_v12 = vld [vmem:[#allocation85_spill] sm:$0xff] }
 0x83d   :  { %11157 = vmatprep.subr.bf16.mxu1 %v15663_v17  ;;  %11188 = vmatprep.subr.bf16.mxu0 %v15474_v20  ;;  %v15675_v17 = vld [vmem:[#allocation39_spill] sm:$0xff] }
 0x83f   :  { %3739 = vmatmul.mubr.f32.vlgmr.msra.gmra.mrb[12].mxu0 %v14084_v40  ;;  %9317 = vmatmul.mubr.f32.vlgmr.msra.gmra.mrb[34].mxu1 %v14084_v40 }
 0x840   :  { %11159 = vmatpush1.bf16.msra.mxu1 %v15664_v43  ;;  %11190 = vmatpush3.bf16.msra.mxu0 %v15665_v21  ;;  %v15673_v21 = vld [vmem:[#allocation37_spill] sm:$0xff]  ;;  %v15674_v43 = vld [vmem:[#allocation38_spill] sm:$0xff] }
 0x841   :  { %11161 = vmatprep.subr.bf16.mxu1 %v15666_v25  ;;  %11191 = vmatprep.subr.bf16.mxu0 %v15474_v20  ;;  %v15672_v25 = vld [vmem:[#allocation36_spill] sm:$0xff] }
 0x842   :  { %3901 = vmatprep.mubr.f32.mxu1 %v15476_v38  ;;  %9351 = vmatprep.mubr.msk.f32.mxu0 %vm12860_vm1, %v15476_v38 }
 0x844   :  { %11163 = vmatpush1.bf16.msra.mxu1 %v15667_v14  ;;  %11193 = vmatpush3.bf16.msra.mxu0 %v15668_v53  ;;  %v15676_v53 = vld [vmem:[#allocation40_spill] sm:$0xff]  ;;  %v15678_v14 = vld [vmem:[#allocation42_spill] sm:$0xff] }
 0x845   :  { %11165 = vmatprep.subr.bf16.mxu1 %v15669_v8  ;;  %11194 = vmatprep.subr.bf16.mxu0 %v15474_v20  ;;  %v15677_v8 = vld [vmem:[#allocation41_spill] sm:$0xff] }
 0x848   :  { %11167 = vmatpush1.bf16.msra.mxu1 %v15670_v18  ;;  %11196 = vmatpush3.bf16.msra.mxu0 %v15671_v10  ;;  %v15679_v10 = vld [vmem:[#allocation43_spill] sm:$0xff]  ;;  %v15681_v18 = vld [vmem:[#allocation45_spill] sm:$0xff] }
 0x849   :  { %11169 = vmatprep.subr.bf16.mxu1 %v15672_v25  ;;  %11197 = vmatprep.subr.bf16.mxu0 %v15474_v20  ;;  %v15680_v25 = vld [vmem:[#allocation44_spill] sm:$0xff] }
 0x84c   :  { %11171 = vmatpush1.bf16.msra.mxu1 %v15673_v21  ;;  %11199 = vmatpush3.bf16.msra.mxu0 %v15674_v43  ;;  %v15682_v43 = vld [vmem:[#allocation46_spill] sm:$0xff]  ;;  %v15684_v21 = vld [vmem:[#allocation48_spill] sm:$0xff] }
 0x84d   :  { %11173 = vmatprep.subr.bf16.mxu1 %v15675_v17  ;;  %11200 = vmatprep.subr.bf16.mxu0 %v15474_v20  ;;  %v15683_v17 = vld [vmem:[#allocation47_spill] sm:$0xff] }
 0x850   :  { %11175 = vmatpush1.bf16.msra.mxu1 %v15676_v53  ;;  %11202 = vmatpush3.bf16.msra.mxu0 %v15677_v8  ;;  %v15685_v8 = vld [vmem:[#allocation49_spill] sm:$0xff]  ;;  %v15687_v53 = vld [vmem:[#allocation51_spill] sm:$0xff] }
 0x851   :  { %11177 = vmatprep.subr.bf16.mxu1 %v15678_v14  ;;  %11203 = vmatprep.subr.bf16.mxu0 %v15474_v20  ;;  %v15686_v14 = vld [vmem:[#allocation50_spill] sm:$0xff] }
 0x854   :  { %11179 = vmatpush1.bf16.msra.mxu1 %v15679_v10  ;;  %11205 = vmatpush3.bf16.msra.mxu0 %v15680_v25 }
 0x855   :  { %11181 = vmatprep.subr.bf16.mxu1 %v15681_v18  ;;  %11206 = vmatprep.subr.bf16.mxu0 %v15474_v20 }
 0x858   :  { %11183 = vmatpush1.bf16.msra.mxu1 %v15682_v43  ;;  %11208 = vmatpush3.bf16.msra.mxu0 %v15683_v17 }
 0x859   :  { %11185 = vmatprep.subr.bf16.mxu1 %v15684_v21  ;;  %11209 = vmatprep.subr.bf16.mxu0 %v15474_v20  ;;  %v15689_v21 = vld [vmem:[#allocation86_spill] sm:$0xff] }
 0x85c   :  { %11187 = vmatpush1.bf16.msra.mxu1 %v15685_v8  ;;  %11211 = vmatpush3.bf16.msra.mxu0 %v15686_v14 }
 0x85d   :  { %11213 = vmatprep.subr.bf16.mxu1 %v15687_v53  ;;  %11244 = vmatprep.subr.bf16.mxu0 %v15474_v20 }
 0x8d2   :  { %v3501_v25 = vpop.f32.mrb[46].mxu0 }
 0x8d3   :  { %v9248_v18 = vpop.f32.mrb[47].mxu0  ;;  %v3502_v11 = vadd.f32 %v3501_v25, %v13563_v13 }
 0x8f2   :  { %v3571_v10 = vpop.f32.mrb[32].mxu1  ;;  %v3642_v32 = vpop.f32.mrb[48].mxu0 }
 0x8f3   :  { %v12406_v43 = vadd.f32 %v3571_v10, %v15688_v12  ;;  %v3573_v27 = vpop.f32.mrb[33].mxu1  ;;  %v9283_v17 = vpop.f32.mrb[49].mxu0  ;;  %v3660_v37 = vadd.f32 %v15690_v1, %v3642_v32 }
 0x8f4   :  { %v12407_v47 = vadd.f32 %v3573_v27, %v15689_v21 }
 0x8f5   :  { %v7891_v34 = vmul.f32 -1.442695, %v12406_v43 }
 0x8f6   :  { %v7892_v45 = vmul.f32 -1.442695, %v12407_v47 }
 0x8f7   :  { %12596 = vpow2.f32 %v7891_v34 }
 0x8f8   :  { %12598 = vpow2.f32 %v7892_v45 }
 0x901   :  { %v12597_v8 = vpop.eup %12596 }
 0x902   :  { %v3650_v14 = vadd.f32 1.0, %v12597_v8  ;;  %v12599_v53 = vpop.eup %12598 }
 0x903   :  { %v3657_v41 = vadd.f32 1.0, %v12599_v53 }
 0x904   :  { %12600 = vrcp.f32 %v3650_v14 }
 0x905   :  { %12602 = vrcp.f32 %v3657_v41 }
 0x90e   :  { %v12601_v18 = vpop.eup %12600 }
 0x90f   :  { %v3661_v30 = vmul.f32 %v12601_v18, %v3660_v37  ;;  %v12603_v53 = vpop.eup %12602 }
 0x910   :  { %v3664_v32 = vsub.f32 1.0, %v12603_v53  ;;  %v3666_v37 = vmul.f32 %v12603_v53, %v14079_v57 }
 0x911   :  { %v3662_v10 = vadd.f32 %v3661_v30, %v3502_v11 }
 0x912   :  { %v3740_v17 = vpop.f32.mrb[12].mxu0  ;;  %v3811_v43 = vpop.f32.mrb[34].mxu1 }
 0x913   :  { %12604 = vtanh.f32 %v3662_v10  ;;  %v12378_v34 = vadd.f32 %v3740_v17, %v15500_v2  ;;  %v3742_v47 = vpop.f32.mrb[13].mxu0  ;;  %v9318_v45 = vpop.f32.mrb[35].mxu1  ;;  %v3829_v17 = vadd.f32 %v13824_v26, %v3811_v43  ;;  %v15692_v26 = vld [vmem:[#allocation20_spill] sm:$0xff]  ;;  %v15694_v43 = vld [vmem:[#allocation21_spill] sm:$0xff] }
 0x914   :  { %v12379_v14 = vadd.f32 %v3742_v47, %v15539_v35  ;;  %v15691_v45 = vld [vmem:[#allocation54_spill] sm:$0xff] }
 0x915   :  { %v7893_v27 = vmul.f32 -1.442695, %v12378_v34 }
 0x916   :  { %v7894_v8 = vmul.f32 -1.442695, %v12379_v14 }
 0x917   :  { %12606 = vpow2.f32 %v7893_v27 }
 0x918   :  { %12608 = vpow2.f32 %v7894_v8 }
 0x91d   :  { %v12605_v1 = vpop.eup %12604 }
 0x91e   :  { %v3665_v25 = vmul.f32 %v12605_v1, %v3664_v32 }
 0x920   :  { %v14204_v30 = vadd.f32 %v3666_v37, %v3665_v25  ;;  %v15695_v25 = vld [vmem:[#allocation22_spill] sm:$0xff]  ;;  %v15696_v37 = vld [vmem:[#allocation17_spill] sm:$0xff] }
 0x921   :  { %v12607_v11 = vpop.eup %12606 }
 0x922   :  { %v3819_v41 = vadd.f32 1.0, %v12607_v11  ;;  %v12609_v18 = vpop.eup %12608  ;;  %v15697_v11 = vld [vmem:[#allocation23_spill] sm:$0xff] }
 0x923   :  { %v3826_v10 = vadd.f32 1.0, %v12609_v18  ;;  %v15699_v18 = vld [vmem:[#allocation18_spill] sm:$0xff] }
 0x924   :  { %12610 = vrcp.f32 %v3819_v41  ;;  %v15698_v41 = vld [vmem:[#allocation24_spill] sm:$0xff] }
 0x925   :  { %12612 = vrcp.f32 %v3826_v10  ;;  %v15700_v10 = vld [vmem:[#allocation25_spill] sm:$0xff] }
 0x92e   :  { %v12611_v34 = vpop.eup %12610 }
 0x92f   :  { %v3830_v47 = vmul.f32 %v12611_v34, %v3829_v17  ;;  %v12613_v14 = vpop.eup %12612  ;;  %v15701_v17 = vld [vmem:[#allocation26_spill] sm:$0xff]  ;;  %v15702_v34 = vld [vmem:[#allocation19_spill] sm:$0xff] }
 0x930   :  { %v3833_v8 = vsub.f32 1.0, %v12613_v14  ;;  %v3835_v57 = vmul.f32 %v12613_v14, %v14084_v40  ;;  %v15693_v40 = vld [vmem:[#allocation16_spill] sm:$0xff]  ;;  %v15706_v14 = vld [vmem:[#allocation30_spill] sm:$0xff] }
 0x931   :  { %v3831_v27 = vadd.f32 %v3830_v47, %v15691_v45  ;;  %v15703_v47 = vld [vmem:[#allocation27_spill] sm:$0xff]  ;;  %v15704_v45 = vld [vmem:[#allocation28_spill] sm:$0xff] }
 0x933   :  { %12614 = vtanh.f32 %v3831_v27  ;;  %v15705_v27 = vld [vmem:[#allocation29_spill] sm:$0xff] }
 0x93d   :  { %v12615_v1 = vpop.eup %12614 }
 0x93e   :  { %v3834_v32 = vmul.f32 %v12615_v1, %v3833_v8  ;;  %v15707_v8 = vld [vmem:[#allocation31_spill] sm:$0xff]  ;;  %v15708_v1 = vld [vmem:[#allocation32_spill] sm:$0xff] }
 0x940   :  { %v14209_v53 = vadd.f32 %v3835_v57, %v3834_v32  ;;  %v15709_v32 = vld [vmem:[#allocation33_spill] sm:$0xff]  ;;  %v15710_v57 = vld [vmem:[#allocation34_spill] sm:$0xff] }
 0x942   :  { %3902 = vmatmul.mubr.f32.vlgmr.msra.gmra.mrb[36].mxu1 %v14209_v53  ;;  %9352 = vmatmul.mubr.f32.vlgmr.msra.gmra.mrb[50].mxu0 %v14209_v53 }
 0x943   :  { %11215 = vmatpush1.bf16.msra.mxu1 %v15503_v29  ;;  %11246 = vmatpush3.bf16.msra.mxu0 %v15504_v23 }
 0x944   :  { %11217 = vmatprep.subr.bf16.mxu1 %v15505_v59  ;;  %11247 = vmatprep.subr.bf16.mxu0 %v15474_v20 }
 0x945   :  { %4042 = vmatprep.mubr.f32.mxu1 %v15476_v38  ;;  %9386 = vmatprep.mubr.msk.f32.mxu0 %vm12860_vm1, %v15476_v38 }
 0x947   :  { %11219 = vmatpush1.bf16.msra.mxu1 %v15506_v62  ;;  %11249 = vmatpush3.bf16.msra.mxu0 %v15507_v52 }
 0x948   :  { %11221 = vmatprep.subr.bf16.mxu1 %v15508_v0  ;;  %11250 = vmatprep.subr.bf16.mxu0 %v15474_v20 }
 0x94b   :  { %11223 = vmatpush1.bf16.msra.mxu1 %v15509_v44  ;;  %11252 = vmatpush3.bf16.msra.mxu0 %v15510_v39 }
 0x94c   :  { %11225 = vmatprep.subr.bf16.mxu1 %v15511_v51  ;;  %11253 = vmatprep.subr.bf16.mxu0 %v15474_v20 }
 0x94f   :  { %11227 = vmatpush1.bf16.msra.mxu1 %v15512_v7  ;;  %11255 = vmatpush3.bf16.msra.mxu0 %v15513_v6 }
 0x950   :  { %11229 = vmatprep.subr.bf16.mxu1 %v15514_v31  ;;  %11256 = vmatprep.subr.bf16.mxu0 %v15474_v20 }
 0x953   :  { %11231 = vmatpush1.bf16.msra.mxu1 %v13432_v16  ;;  %11258 = vmatpush3.bf16.msra.mxu0 %v13434_v46 }
 0x954   :  { %11233 = vmatprep.subr.bf16.mxu1 %v15515_v5  ;;  %11259 = vmatprep.subr.bf16.mxu0 %v15474_v20 }
 0x957   :  { %11235 = vmatpush1.bf16.msra.mxu1 %v15516_v50  ;;  %11261 = vmatpush3.bf16.msra.mxu0 %v13444_v33 }
 0x958   :  { %11237 = vmatprep.subr.bf16.mxu1 %v13448_v56  ;;  %11262 = vmatprep.subr.bf16.mxu0 %v15474_v20 }
 0x95b   :  { %11239 = vmatpush1.bf16.msra.mxu1 %v13452_v9  ;;  %11264 = vmatpush3.bf16.msra.mxu0 %v13454_v42 }
 0x95c   :  { %11241 = vmatprep.subr.bf16.mxu1 %v13458_v22  ;;  %11265 = vmatprep.subr.bf16.mxu0 %v15474_v20 }
 0x95f   :  { %11243 = vmatpush1.bf16.msra.mxu1 %v13462_v58  ;;  %11267 = vmatpush3.bf16.msra.mxu0 %v13464_v63 }
 0x960   :  { %11269 = vmatprep.subr.bf16.mxu0 %v13164_v36  ;;  %11300 = vmatprep.subr.bf16.mxu1 %v15474_v20 }
 0x962   :  { %4043 = vmatmul.mubr.f32.vlgmr.msra.gmra.mrb[36].mxu1 %v14204_v30  ;;  %9387 = vmatmul.mubr.f32.vlgmr.msra.gmra.mrb[52].mxu0 %v14204_v30 }
 0x963   :  { %11271 = vmatpush1.bf16.msra.mxu0 %v13190_v48  ;;  %11302 = vmatpush3.bf16.msra.mxu1 %v13109_v15 }
 0x964   :  { %11273 = vmatprep.subr.bf16.mxu0 %v13192_v49  ;;  %11303 = vmatprep.subr.bf16.mxu1 %v15474_v20 }
 0x965   :  { %4211 = vmatprep.mubr.f32.mxu0 %v15476_v38  ;;  %9421 = vmatprep.mubr.msk.f32.mxu1 %vm12860_vm1, %v15476_v38 }
 0x967   :  { %11275 = vmatpush1.bf16.msra.mxu0 %v13198_v54  ;;  %11305 = vmatpush3.bf16.msra.mxu1 %v13119_v19 }
 0x968   :  { %11277 = vmatprep.subr.bf16.mxu0 %v13203_v55  ;;  %11306 = vmatprep.subr.bf16.mxu1 %v15474_v20 }
 0x96b   :  { %11279 = vmatpush1.bf16.msra.mxu0 %v13210_v60  ;;  %11308 = vmatpush3.bf16.msra.mxu1 %v13136_v24 }
 0x96c   :  { %11281 = vmatprep.subr.bf16.mxu0 %v13214_v61  ;;  %11309 = vmatprep.subr.bf16.mxu1 %v15474_v20 }
 0x96f   :  { %11283 = vmatpush1.bf16.msra.mxu0 %v13217_v3  ;;  %11311 = vmatpush3.bf16.msra.mxu1 %v13151_v28 }
 0x970   :  { %11285 = vmatprep.subr.bf16.mxu0 %v13220_v4  ;;  %11312 = vmatprep.subr.bf16.mxu1 %v15474_v20 }
 0x973   :  { %11287 = vmatpush1.bf16.msra.mxu0 %v15692_v26  ;;  %11314 = vmatpush3.bf16.msra.mxu1 %v15693_v40 }
 0x974   :  { %11289 = vmatprep.subr.bf16.mxu0 %v15694_v43  ;;  %11315 = vmatprep.subr.bf16.mxu1 %v15474_v20 }
 0x977   :  { %11291 = vmatpush1.bf16.msra.mxu0 %v15695_v25  ;;  %11317 = vmatpush3.bf16.msra.mxu1 %v15696_v37  ;;  %v15728_v37 = vld [vmem:[#allocation67_spill] sm:$0xff] }
 0x978   :  { %11293 = vmatprep.subr.bf16.mxu0 %v15697_v11  ;;  %11318 = vmatprep.subr.bf16.mxu1 %v15474_v20 }
 0x97b   :  { %11295 = vmatpush1.bf16.msra.mxu0 %v15698_v41  ;;  %11320 = vmatpush3.bf16.msra.mxu1 %v15699_v18 }
 0x97c   :  { %11297 = vmatprep.subr.bf16.mxu0 %v15700_v10  ;;  %11321 = vmatprep.subr.bf16.mxu1 %v15474_v20 }
 0x97f   :  { %11299 = vmatpush1.bf16.msra.mxu0 %v15701_v17  ;;  %11323 = vmatpush3.bf16.msra.mxu1 %v15702_v34  ;;  %v15715_v34 = vld [vmem:[#allocation39_spill] sm:$0xff] }
 0x980   :  { %11325 = vmatprep.subr.bf16.mxu1 %v15703_v47  ;;  %11356 = vmatprep.subr.bf16.mxu0 %v15474_v20  ;;  %v15714_v47 = vld [vmem:[#allocation38_spill] sm:$0xff] }
 0x982   :  { %4212 = vmatmul.mubr.f32.vlgmr.msra.gmra.mrb[14].mxu0 %v14209_v53  ;;  %9422 = vmatmul.mubr.f32.vlgmr.msra.gmra.mrb[38].mxu1 %v14209_v53 }
 0x983   :  { %11327 = vmatpush1.bf16.msra.mxu1 %v15704_v45  ;;  %11358 = vmatpush3.bf16.msra.mxu0 %v15705_v27  ;;  %v15711_v27 = vld [vmem:[#allocation35_spill] sm:$0xff]  ;;  %v15713_v45 = vld [vmem:[#allocation37_spill] sm:$0xff] }
 0x984   :  { %11329 = vmatprep.subr.bf16.mxu1 %v15706_v14  ;;  %11359 = vmatprep.subr.bf16.mxu0 %v15474_v20  ;;  %v15712_v14 = vld [vmem:[#allocation36_spill] sm:$0xff] }
 0x985   :  { %4374 = vmatprep.mubr.f32.mxu1 %v15476_v38  ;;  %9456 = vmatprep.mubr.msk.f32.mxu0 %vm12860_vm1, %v15476_v38 }
 0x987   :  { %11331 = vmatpush1.bf16.msra.mxu1 %v15707_v8  ;;  %11361 = vmatpush3.bf16.msra.mxu0 %v15708_v1  ;;  %v15716_v1 = vld [vmem:[#allocation40_spill] sm:$0xff]  ;;  %v15718_v8 = vld [vmem:[#allocation42_spill] sm:$0xff] }
 0x988   :  { %11333 = vmatprep.subr.bf16.mxu1 %v15709_v32  ;;  %11362 = vmatprep.subr.bf16.mxu0 %v15474_v20  ;;  %v15717_v32 = vld [vmem:[#allocation41_spill] sm:$0xff] }
 0x98b   :  { %11335 = vmatpush1.bf16.msra.mxu1 %v15710_v57  ;;  %11364 = vmatpush3.bf16.msra.mxu0 %v15711_v27  ;;  %v15719_v27 = vld [vmem:[#allocation43_spill] sm:$0xff]  ;;  %v15721_v57 = vld [vmem:[#allocation45_spill] sm:$0xff] }
 0x98c   :  { %11337 = vmatprep.subr.bf16.mxu1 %v15712_v14  ;;  %11365 = vmatprep.subr.bf16.mxu0 %v15474_v20  ;;  %v15720_v14 = vld [vmem:[#allocation44_spill] sm:$0xff] }
 0x98f   :  { %11339 = vmatpush1.bf16.msra.mxu1 %v15713_v45  ;;  %11367 = vmatpush3.bf16.msra.mxu0 %v15714_v47  ;;  %v15722_v47 = vld [vmem:[#allocation46_spill] sm:$0xff]  ;;  %v15724_v45 = vld [vmem:[#allocation48_spill] sm:$0xff] }
 0x990   :  { %11341 = vmatprep.subr.bf16.mxu1 %v15715_v34  ;;  %11368 = vmatprep.subr.bf16.mxu0 %v15474_v20  ;;  %v15723_v34 = vld [vmem:[#allocation47_spill] sm:$0xff] }
 0x993   :  { %11343 = vmatpush1.bf16.msra.mxu1 %v15716_v1  ;;  %11370 = vmatpush3.bf16.msra.mxu0 %v15717_v32  ;;  %v15725_v32 = vld [vmem:[#allocation49_spill] sm:$0xff]  ;;  %v15727_v1 = vld [vmem:[#allocation51_spill] sm:$0xff] }
 0x994   :  { %11345 = vmatprep.subr.bf16.mxu1 %v15718_v8  ;;  %11371 = vmatprep.subr.bf16.mxu0 %v15474_v20  ;;  %v15726_v8 = vld [vmem:[#allocation50_spill] sm:$0xff] }
 0x997   :  { %11347 = vmatpush1.bf16.msra.mxu1 %v15719_v27  ;;  %11373 = vmatpush3.bf16.msra.mxu0 %v15720_v14 }
 0x998   :  { %11349 = vmatprep.subr.bf16.mxu1 %v15721_v57  ;;  %11374 = vmatprep.subr.bf16.mxu0 %v15474_v20 }
 0x99b   :  { %11351 = vmatpush1.bf16.msra.mxu1 %v15722_v47  ;;  %11376 = vmatpush3.bf16.msra.mxu0 %v15723_v34 }
 0x99c   :  { %11353 = vmatprep.subr.bf16.mxu1 %v15724_v45  ;;  %11377 = vmatprep.subr.bf16.mxu0 %v15474_v20 }
 0x99f   :  { %11355 = vmatpush1.bf16.msra.mxu1 %v15725_v32  ;;  %11379 = vmatpush3.bf16.msra.mxu0 %v15726_v8 }
 0x9a0   :  { %11381 = vmatprep.subr.bf16.mxu1 %v15727_v1  ;;  %11412 = vmatprep.subr.bf16.mxu0 %v15474_v20 }
 0xa15   :  { %v3974_v14 = vpop.f32.mrb[50].mxu0 }
 0xa16   :  { %v9353_v57 = vpop.f32.mrb[51].mxu0  ;;  %v3975_v43 = vadd.f32 %v3974_v14, %v13563_v13 }
 0xa35   :  { %v4044_v27 = vpop.f32.mrb[36].mxu1  ;;  %v4115_v17 = vpop.f32.mrb[52].mxu0 }
 0xa36   :  { %v12408_v47 = vadd.f32 %v4044_v27, %v15688_v12  ;;  %v4046_v10 = vpop.f32.mrb[37].mxu1  ;;  %v9388_v34 = vpop.f32.mrb[53].mxu0  ;;  %v4133_v25 = vadd.f32 %v15728_v37, %v4115_v17 }
 0xa37   :  { %v12409_v45 = vadd.f32 %v4046_v10, %v15689_v21 }
 0xa38   :  { %v7895_v18 = vmul.f32 -1.442695, %v12408_v47 }
 0xa39   :  { %v7896_v41 = vmul.f32 -1.442695, %v12409_v45 }
 0xa3a   :  { %12616 = vpow2.f32 %v7895_v18 }
 0xa3b   :  { %12618 = vpow2.f32 %v7896_v41 }
 0xa44   :  { %v12617_v32 = vpop.eup %12616 }
 0xa45   :  { %v4123_v8 = vadd.f32 1.0, %v12617_v32  ;;  %v12619_v1 = vpop.eup %12618 }
 0xa46   :  { %v4130_v11 = vadd.f32 1.0, %v12619_v1 }
 0xa47   :  { %12620 = vrcp.f32 %v4123_v8 }
 0xa48   :  { %12622 = vrcp.f32 %v4130_v11 }
 0xa51   :  { %v12621_v57 = vpop.eup %12620 }
 0xa52   :  { %v4134_v40 = vmul.f32 %v12621_v57, %v4133_v25  ;;  %v12623_v1 = vpop.eup %12622 }
 0xa53   :  { %v4137_v37 = vsub.f32 1.0, %v12623_v1  ;;  %v4139_v25 = vmul.f32 %v12623_v1, %v14204_v30 }
 0xa54   :  { %v4135_v27 = vadd.f32 %v4134_v40, %v3975_v43 }
 0xa55   :  { %v4213_v34 = vpop.f32.mrb[14].mxu0  ;;  %v4284_v47 = vpop.f32.mrb[38].mxu1 }
 0xa56   :  { %12624 = vtanh.f32 %v4135_v27  ;;  %v12380_v18 = vadd.f32 %v4213_v34, %v15500_v2  ;;  %v4215_v10 = vpop.f32.mrb[15].mxu0  ;;  %v9423_v41 = vpop.f32.mrb[39].mxu1 }
 0xa57   :  { %v12381_v8 = vadd.f32 %v4215_v10, %v15539_v35  ;;  %v14334_v35 = vld [vmem:[%s15218_s6] ss:$0 sm:$0xff]  ;;  %v15729_v10 = vld [vmem:[#allocation53_spill] sm:$0xff] }
 0xa58   :  { %v7897_v45 = vmul.f32 -1.442695, %v12380_v18  ;;  %v4302_v27 = vadd.f32 %v14334_v35, %v4284_v47  ;;  %v4619_v47 = vld [vmem:[#allocation7 + $0x20] sm:$0xff] }
 0xa59   :  { %v7898_v32 = vmul.f32 -1.442695, %v12381_v8 }
 0xa5a   :  { %12626 = vpow2.f32 %v7897_v45 }
 0xa5b   :  { %12628 = vpow2.f32 %v7898_v32 }
 0xa60   :  { %v12625_v17 = vpop.eup %12624 }
 0xa61   :  { %v4138_v14 = vmul.f32 %v12625_v17, %v4137_v37  ;;  %v4615_v17 = vld [vmem:[#allocation7] sm:$0xff] }
 0xa63   :  { %v14329_v40 = vadd.f32 %v4139_v25, %v4138_v14  ;;  %v4618_v25 = vld [vmem:[#allocation7 + $0x18] sm:$0xff] }
 0xa64   :  { %v12627_v43 = vpop.eup %12626 }
 0xa65   :  { %v4292_v11 = vadd.f32 1.0, %v12627_v43  ;;  %v12629_v2 = vpop.eup %12628  ;;  %v4617_v43 = vld [vmem:[#allocation7 + $0x10] sm:$0xff] }
 0xa66   :  { %v4299_v57 = vadd.f32 1.0, %v12629_v2  ;;  %v4622_v2 = vld [vmem:[#allocation7 + $0x38] sm:$0xff] }
 0xa67   :  { %12630 = vrcp.f32 %v4292_v11  ;;  %v4620_v11 = vld [vmem:[#allocation7 + $0x28] sm:$0xff] }
 0xa68   :  { %12632 = vrcp.f32 %v4299_v57  ;;  %v4625_v57 = vld [vmem:[#allocation7 + $0x50] sm:$0xff] }
 0xa71   :  { %v12631_v34 = vpop.eup %12630 }
 0xa72   :  { %v4303_v18 = vmul.f32 %v12631_v34, %v4302_v27  ;;  %v12633_v30 = vpop.eup %12632  ;;  %v11438_v27 = vpack.c.bf16 %v4618_v25, %v4615_v17  ;;  %v11469_v34 = vpack.c.bf16 %v4620_v11, %v4617_v43  ;;  %v4629_v25 = vld [vmem:[#allocation7 + $0x70] sm:$0xff]  ;;  %v4632_v43 = vld [vmem:[#allocation7 + $0x88] sm:$0xff]  ;;  %v4634_v11 = vld [vmem:[#allocation7 + $0x98] sm:$0xff] }
 0xa73   :  { %v4306_v45 = vsub.f32 1.0, %v12633_v30  ;;  %v4308_v32 = vmul.f32 %v12633_v30, %v14209_v53  ;;  %v4616_v53 = vld [vmem:[#allocation7 + $0x8] sm:$0xff]  ;;  %v4623_v30 = vld [vmem:[#allocation7 + $0x40] sm:$0xff] }
 0xa74   :  { %v4304_v41 = vadd.f32 %v4303_v18, %v15729_v10  ;;  %v11436_v14 = vpack.c.bf16 %v4619_v47, %v4616_v53  ;;  %v4621_v18 = vld [vmem:[#allocation7 + $0x30] sm:$0xff]  ;;  %v11440_v10 = vpack.c.bf16 %v4625_v57, %v4622_v2  ;;  %v4627_v47 = vld [vmem:[#allocation7 + $0x60] sm:$0xff] }
 0xa75   :  { %v4637_v2 = vld [vmem:[#allocation7 + $0xb0] sm:$0xff] }
 0xa76   :  { %12634 = vtanh.f32 %v4304_v41  ;;  %v4624_v41 = vld [vmem:[#allocation7 + $0x48] sm:$0xff] }
 0xa80   :  { %v12635_v8 = vpop.eup %12634 }
 0xa81   :  { %v4307_v1 = vmul.f32 %v12635_v8, %v4306_v45  ;;  %v4626_v45 = vld [vmem:[#allocation7 + $0x58] sm:$0xff]  ;;  %v4628_v8 = vld [vmem:[#allocation7 + $0x68] sm:$0xff] }
 0xa82   :  { %v11472_v53 = vpack.c.bf16 %v4626_v45, %v4623_v30  ;;  %v4638_v30 = vld [vmem:[#allocation7 + $0xb8] sm:$0xff]  ;;  %v4640_v45 = vld [vmem:[#allocation7 + $0xc8] sm:$0xff] }
 0xa83   :  { %v14339_v37 = vadd.f32 %v4308_v32, %v4307_v1  ;;  %v4631_v1 = vld [vmem:[#allocation7 + $0x80] sm:$0xff]  ;;  %v11442_v32 = vpack.c.bf16 %v4624_v41, %v4621_v18  ;;  %v11448_v18 = vpack.c.bf16 %v4637_v2, %v4634_v11  ;;  %v4645_v2 = vld [vmem:[#allocation7 + $0xf0] sm:$0xff] }
 0xa84   :  { %v11444_v17 = vpack.c.bf16 %v4631_v1, %v4628_v8  ;;  %v4635_v41 = vld [vmem:[#allocation7 + $0xa0] sm:$0xff] }
 0xa85   :  { %4375 = vmatmul.mubr.f32.vlgmr.msra.gmra.mrb[40].mxu1 %v14339_v37  ;;  %9457 = vmatmul.mubr.f32.vlgmr.msra.gmra.mrb[54].mxu0 %v14339_v37  ;;  %v4643_v8 = vld [vmem:[#allocation7 + $0xe0] sm:$0xff] }
 0xa86   :  { %11383 = vmatpush1.bf16.msra.mxu1 %v15503_v29  ;;  %11414 = vmatpush3.bf16.msra.mxu0 %v15504_v23 }
 0xa87   :  { %11385 = vmatprep.subr.bf16.mxu1 %v15505_v59  ;;  %11415 = vmatprep.subr.bf16.mxu0 %v15474_v20 }
 0xa88   :  { %4515 = vmatprep.mubr.f32.mxu1 %v15476_v38  ;;  %9491 = vmatprep.mubr.msk.f32.mxu0 %vm12860_vm1, %v15476_v38 }
 0xa8a   :  { %11387 = vmatpush1.bf16.msra.mxu1 %v15506_v62  ;;  %11417 = vmatpush3.bf16.msra.mxu0 %v15507_v52 }
 0xa8b   :  { %11389 = vmatprep.subr.bf16.mxu1 %v15508_v0  ;;  %11418 = vmatprep.subr.bf16.mxu0 %v15474_v20 }
 0xa8e   :  { %11391 = vmatpush1.bf16.msra.mxu1 %v15509_v44  ;;  %11420 = vmatpush3.bf16.msra.mxu0 %v15510_v39 }
 0xa8f   :  { %11393 = vmatprep.subr.bf16.mxu1 %v15511_v51  ;;  %11421 = vmatprep.subr.bf16.mxu0 %v15474_v20 }
 0xa92   :  { %11395 = vmatpush1.bf16.msra.mxu1 %v15512_v7  ;;  %11423 = vmatpush3.bf16.msra.mxu0 %v15513_v6 }
 0xa93   :  { %11397 = vmatprep.subr.bf16.mxu1 %v15514_v31  ;;  %11424 = vmatprep.subr.bf16.mxu0 %v15474_v20 }
 0xa96   :  { %11399 = vmatpush1.bf16.msra.mxu1 %v13432_v16  ;;  %11426 = vmatpush3.bf16.msra.mxu0 %v13434_v46 }
 0xa97   :  { %11401 = vmatprep.subr.bf16.mxu1 %v15515_v5  ;;  %11427 = vmatprep.subr.bf16.mxu0 %v15474_v20 }
 0xa9a   :  { %11403 = vmatpush1.bf16.msra.mxu1 %v15516_v50  ;;  %11429 = vmatpush3.bf16.msra.mxu0 %v13444_v33 }
 0xa9b   :  { %11405 = vmatprep.subr.bf16.mxu1 %v13448_v56  ;;  %11430 = vmatprep.subr.bf16.mxu0 %v15474_v20 }
 0xa9e   :  { %11407 = vmatpush1.bf16.msra.mxu1 %v13452_v9  ;;  %11432 = vmatpush3.bf16.msra.mxu0 %v13454_v42 }
 0xa9f   :  { %11409 = vmatprep.subr.bf16.mxu1 %v13458_v22  ;;  %11433 = vmatprep.subr.bf16.mxu0 %v15474_v20 }
 0xaa2   :  { %11411 = vmatpush1.bf16.msra.mxu1 %v13462_v58  ;;  %11435 = vmatpush3.bf16.msra.mxu0 %v13464_v63  ;;  %v11478_v63 = vpack.c.bf16 %v4638_v30, %v4635_v41  ;;  %v4639_v58 = vld [vmem:[#allocation7 + $0xc0] sm:$0xff] }
 0xaa3   :  { %11437 = vmatprep.subr.bf16.mxu1 %v11436_v14  ;;  %11468 = vmatprep.subr.bf16.mxu0 %v15474_v20  ;;  %v4630_v14 = vld [vmem:[#allocation7 + $0x78] sm:$0xff]  ;;  %v4655_v41 = vld [vmem:[#allocation7 + $0x140] sm:$0xff] }
 0xaa4   :  { %v11446_v57 = vpack.c.bf16 %v4630_v14, %v4627_v47  ;;  %v4641_v47 = vld [vmem:[#allocation7 + $0xd0] sm:$0xff]  ;;  %v4646_v14 = vld [vmem:[#allocation7 + $0xf8] sm:$0xff] }
 0xaa5   :  { %4516 = vmatmul.mubr.f32.vlgmr.msra.gmra.mrb[40].mxu1 %v14329_v40  ;;  %9492 = vmatmul.mubr.f32.vlgmr.msra.gmra.mrb[56].mxu0 %v14329_v40 }
 0xaa6   :  { %11439 = vmatpush1.bf16.msra.mxu1 %v11438_v27  ;;  %11470 = vmatpush3.bf16.msra.mxu0 %v11469_v34  ;;  %v11475_v27 = vpack.c.bf16 %v4632_v43, %v4629_v25  ;;  %v4633_v34 = vld [vmem:[#allocation7 + $0x90] sm:$0xff] }
 0xaa7   :  { %11441 = vmatprep.subr.bf16.mxu1 %v11440_v10  ;;  %11471 = vmatprep.subr.bf16.mxu0 %v15474_v20  ;;  %v4636_v10 = vld [vmem:[#allocation7 + $0xa8] sm:$0xff]  ;;  %v4649_v25 = vld [vmem:[#allocation7 + $0x110] sm:$0xff] }
 0xaa8   :  { %9526 = vmatprep.mubr.msk.f32.mxu0 %vm12860_vm1, %v15476_v38  ;;  %4727 = vmatprep.mubr.f32.mxu1 %v15476_v38  ;;  %v11450_v1 = vpack.c.bf16 %v4636_v10, %v4633_v34  ;;  %v4647_v34 = vld [vmem:[#allocation7 + $0x100] sm:$0xff]  ;;  %v4652_v10 = vld [vmem:[#allocation7 + $0x128] sm:$0xff] }
 0xaaa   :  { %11443 = vmatpush1.bf16.msra.mxu1 %v11442_v32  ;;  %11473 = vmatpush3.bf16.msra.mxu0 %v11472_v53  ;;  %v11452_v32 = vpack.c.bf16 %v4643_v8, %v4640_v45  ;;  %v4642_v53 = vld [vmem:[#allocation7 + $0xd8] sm:$0xff]  ;;  %v4651_v8 = vld [vmem:[#allocation7 + $0x120] sm:$0xff] }
 0xaab   :  { %11445 = vmatprep.subr.bf16.mxu1 %v11444_v17  ;;  %11474 = vmatprep.subr.bf16.mxu0 %v15474_v20  ;;  %v4644_v17 = vld [vmem:[#allocation7 + $0xe8] sm:$0xff]  ;;  %v11454_v43 = vpack.c.bf16 %v4642_v53, %v4639_v58  ;;  %v11460_v58 = vpack.c.bf16 %v4655_v41, %v4652_v10  ;;  %v4658_v53 = vld [vmem:[#allocation7 + $0x158] sm:$0xff]  ;;  %v15745_v41 = vld [vmem:[#allocation32_spill] sm:$0xff] }
 0xaac   :  { %v11481_v11 = vpack.c.bf16 %v4644_v17, %v4641_v47  ;;  %v4661_v47 = vld [vmem:[#allocation7 + $0x170] sm:$0xff]  ;;  %v15744_v10 = vld [vmem:[#allocation31_spill] sm:$0xff] }
 0xaae   :  { %11447 = vmatpush1.bf16.msra.mxu1 %v11446_v57  ;;  %11476 = vmatpush3.bf16.msra.mxu0 %v11475_v27  ;;  %v11456_v57 = vpack.c.bf16 %v4649_v25, %v4646_v14  ;;  %v4648_v27 = vld [vmem:[#allocation7 + $0x108] sm:$0xff]  ;;  %v4657_v25 = vld [vmem:[#allocation7 + $0x150] sm:$0xff] }
 0xaaf   :  { %11449 = vmatprep.subr.bf16.mxu1 %v11448_v18  ;;  %11477 = vmatprep.subr.bf16.mxu0 %v15474_v20  ;;  %v4650_v18 = vld [vmem:[#allocation7 + $0x118] sm:$0xff]  ;;  %v11458_v30 = vpack.c.bf16 %v4648_v27, %v4645_v2  ;;  %v4659_v2 = vld [vmem:[#allocation7 + $0x160] sm:$0xff] }
 0xab0   :  { %v11484_v45 = vpack.c.bf16 %v4650_v18, %v4647_v34  ;;  %v4614_v18 = vld [vmem:[%s15214_s2] sm:$0xff] }
 0xab2   :  { %11451 = vmatpush1.bf16.msra.mxu1 %v11450_v1  ;;  %11479 = vmatpush3.bf16.msra.mxu0 %v11478_v63  ;;  %v4654_v63 = vld [vmem:[#allocation7 + $0x138] sm:$0xff]  ;;  %v4653_v1 = vld [vmem:[#allocation7 + $0x130] sm:$0xff] }
 0xab3   :  { %11453 = vmatprep.subr.bf16.mxu1 %v11452_v32  ;;  %11480 = vmatprep.subr.bf16.mxu0 %v15474_v20  ;;  %v4656_v32 = vld [vmem:[#allocation7 + $0x148] sm:$0xff]  ;;  %v11462_v17 = vpack.c.bf16 %v4654_v63, %v4651_v8  ;;  %v15748_v8 = vld [vmem:[#allocation35_spill] sm:$0xff] }
 0xab4   :  { %v11487_v14 = vpack.c.bf16 %v4656_v32, %v4653_v1  ;;  %v15750_v63 = vld [vmem:[#allocation37_spill] sm:$0xff]  ;;  %v15751_v1 = vld [vmem:[#allocation38_spill] sm:$0xff]  ;;  %v15752_v32 = vld [vmem:[#allocation39_spill] sm:$0xff] }
 0xab6   :  { %11455 = vmatpush1.bf16.msra.mxu1 %v11454_v43  ;;  %11482 = vmatpush3.bf16.msra.mxu0 %v11481_v11  ;;  %v11464_v43 = vpack.c.bf16 %v4661_v47, %v4658_v53  ;;  %v4660_v11 = vld [vmem:[#allocation7 + $0x168] sm:$0xff]  ;;  %v15753_v53 = vld [vmem:[#allocation40_spill] sm:$0xff] }
 0xab7   :  { %11457 = vmatprep.subr.bf16.mxu1 %v11456_v57  ;;  %11483 = vmatprep.subr.bf16.mxu0 %v15474_v20  ;;  %v4662_v57 = vld [vmem:[#allocation7 + $0x178] sm:$0xff]  ;;  %v11466_v27 = vpack.c.bf16 %v4660_v11, %v4657_v25  ;;  %v15754_v47 = vld [vmem:[#allocation41_spill] sm:$0xff]  ;;  %v15757_v25 = vld [vmem:[#allocation44_spill] sm:$0xff] }
 0xab8   :  { %v11490_v34 = vpack.c.bf16 %v4662_v57, %v4659_v2  ;;  %v15759_v11 = vld [vmem:[#allocation46_spill] sm:$0xff]  ;;  %v15760_v2 = vld [vmem:[#allocation47_spill] sm:$0xff]  ;;  %v15761_v57 = vld [vmem:[#allocation48_spill] sm:$0xff] }
 0xaba   :  { %11459 = vmatpush1.bf16.msra.mxu1 %v11458_v30  ;;  %11485 = vmatpush3.bf16.msra.mxu0 %v11484_v45  ;;  %v15746_v30 = vld [vmem:[#allocation33_spill] sm:$0xff]  ;;  %v15747_v45 = vld [vmem:[#allocation34_spill] sm:$0xff] }
 0xabb   :  { %11461 = vmatprep.subr.bf16.mxu1 %v11460_v58  ;;  %11486 = vmatprep.subr.bf16.mxu0 %v15474_v20  ;;  %v15749_v58 = vld [vmem:[#allocation36_spill] sm:$0xff] }
 0xabe   :  { %11463 = vmatpush1.bf16.msra.mxu1 %v11462_v17  ;;  %11488 = vmatpush3.bf16.msra.mxu0 %v11487_v14  ;;  %v15755_v17 = vld [vmem:[#allocation42_spill] sm:$0xff]  ;;  %v15756_v14 = vld [vmem:[#allocation43_spill] sm:$0xff] }
 0xabf   :  { %11465 = vmatprep.subr.bf16.mxu1 %v11464_v43  ;;  %11489 = vmatprep.subr.bf16.mxu0 %v15474_v20  ;;  %v15758_v43 = vld [vmem:[#allocation45_spill] sm:$0xff] }
 0xac2   :  { %11467 = vmatpush1.bf16.msra.mxu1 %v11466_v27  ;;  %11491 = vmatpush3.bf16.msra.mxu0 %v11490_v34  ;;  %v15762_v27 = vld [vmem:[#allocation49_spill] sm:$0xff]  ;;  %v15763_v34 = vld [vmem:[#allocation50_spill] sm:$0xff] }
 0xac3   :  { %11493 = vmatprep.subr.bf16.mxu1 %v13164_v36  ;;  %11524 = vmatprep.subr.bf16.mxu0 %v15474_v20  ;;  %v15733_v36 = vld [vmem:[#allocation17_spill] sm:$0xff] }
 0xac5   :  { %9527 = vmatmul.mubr.f32.vlgmr.msra.gmra.mrb[58].mxu0 %v4614_v18  ;;  %4728 = vmatmul.mubr.f32.vlgmr.msra.gmra.mrb[2].mxu1 %v4614_v18  ;;  %v15764_v18 = vld [vmem:[#allocation51_spill] sm:$0xff] }
 0xac6   :  { %11495 = vmatpush1.bf16.msra.mxu1 %v13190_v48  ;;  %11526 = vmatpush3.bf16.msra.mxu0 %v13109_v15  ;;  %v15730_v15 = vld [vmem:[#allocation16_spill] sm:$0xff]  ;;  %v15734_v48 = vld [vmem:[#allocation23_spill] sm:$0xff] }
 0xac7   :  { %11497 = vmatprep.subr.bf16.mxu1 %v13192_v49  ;;  %11527 = vmatprep.subr.bf16.mxu0 %v15474_v20  ;;  %v15736_v49 = vld [vmem:[#allocation18_spill] sm:$0xff] }
 0xac8   :  { %4876 = vmatprep.mubr.f32.mxu1 %v15476_v38  ;;  %9561 = vmatprep.mubr.msk.f32.mxu0 %vm12860_vm1, %v15476_v38 }
 0xaca   :  { %11499 = vmatpush1.bf16.msra.mxu1 %v13198_v54  ;;  %11529 = vmatpush3.bf16.msra.mxu0 %v13119_v19  ;;  %v15731_v19 = vld [vmem:[#allocation21_spill] sm:$0xff] }
 0xacb   :  { %11501 = vmatprep.subr.bf16.mxu1 %v13203_v55  ;;  %11530 = vmatprep.subr.bf16.mxu0 %v15474_v20  ;;  %v15737_v54 = vld [vmem:[#allocation25_spill] sm:$0xff]  ;;  %v15738_v55 = vld [vmem:[#allocation26_spill] sm:$0xff] }
 0xace   :  { %11503 = vmatpush1.bf16.msra.mxu1 %v13210_v60  ;;  %11532 = vmatpush3.bf16.msra.mxu0 %v13136_v24  ;;  %v15732_v24 = vld [vmem:[#allocation22_spill] sm:$0xff]  ;;  %v15739_v60 = vld [vmem:[#allocation19_spill] sm:$0xff] }
 0xacf   :  { %11505 = vmatprep.subr.bf16.mxu1 %v13214_v61  ;;  %11533 = vmatprep.subr.bf16.mxu0 %v15474_v20  ;;  %v15740_v61 = vld [vmem:[#allocation27_spill] sm:$0xff] }
 0xad2   :  { %11507 = vmatpush1.bf16.msra.mxu1 %v13217_v3  ;;  %11535 = vmatpush3.bf16.msra.mxu0 %v13151_v28  ;;  %v15735_v28 = vld [vmem:[#allocation24_spill] sm:$0xff] }
 0xad3   :  { %11509 = vmatprep.subr.bf16.mxu1 %v13220_v4  ;;  %11536 = vmatprep.subr.bf16.mxu0 %v15474_v20  ;;  %v15741_v3 = vld [vmem:[#allocation28_spill] sm:$0xff]  ;;  %v15742_v4 = vld [vmem:[#allocation29_spill] sm:$0xff] }
 0xad6   :  { %11511 = vmatpush1.bf16.msra.mxu1 %v15692_v26  ;;  %11538 = vmatpush3.bf16.msra.mxu0 %v15730_v15  ;;  %v15743_v26 = vld [vmem:[#allocation30_spill] sm:$0xff] }
 0xad7   :  { %11513 = vmatprep.subr.bf16.mxu1 %v15731_v19  ;;  %11539 = vmatprep.subr.bf16.mxu0 %v15474_v20 }
 0xada   :  { %11515 = vmatpush1.bf16.msra.mxu1 %v15732_v24  ;;  %11541 = vmatpush3.bf16.msra.mxu0 %v15733_v36 }
 0xadb   :  { %11517 = vmatprep.subr.bf16.mxu1 %v15734_v48  ;;  %11542 = vmatprep.subr.bf16.mxu0 %v15474_v20 }
 0xade   :  { %11519 = vmatpush1.bf16.msra.mxu1 %v15735_v28  ;;  %11544 = vmatpush3.bf16.msra.mxu0 %v15736_v49 }
 0xadf   :  { %11521 = vmatprep.subr.bf16.mxu1 %v15737_v54  ;;  %11545 = vmatprep.subr.bf16.mxu0 %v15474_v20 }
 0xae2   :  { %11523 = vmatpush1.bf16.msra.mxu1 %v15738_v55  ;;  %11547 = vmatpush3.bf16.msra.mxu0 %v15739_v60 }
 0xae3   :  { %11549 = vmatprep.subr.bf16.mxu1 %v15740_v61  ;;  %11580 = vmatprep.subr.bf16.mxu0 %v15474_v20 }
 0xae5   :  { %4877 = vmatmul.mubr.f32.vlgmr.msra.gmra.mrb[2].mxu1 %v14339_v37  ;;  %9562 = vmatmul.mubr.f32.vlgmr.msra.gmra.mrb[60].mxu0 %v14339_v37 }
 0xae6   :  { %11551 = vmatpush1.bf16.msra.mxu1 %v15741_v3  ;;  %11582 = vmatpush3.bf16.msra.mxu0 %v15742_v4 }
 0xae7   :  { %11553 = vmatprep.subr.bf16.mxu1 %v15743_v26  ;;  %11583 = vmatprep.subr.bf16.mxu0 %v15474_v20 }
 0xae8   :  { %5039 = vmatprep.mubr.f32.mxu1 %v15476_v38  ;;  %9596 = vmatprep.mubr.msk.f32.mxu0 %vm12860_vm1, %v15476_v38 }
 0xaea   :  { %11555 = vmatpush1.bf16.msra.mxu1 %v15744_v10  ;;  %11585 = vmatpush3.bf16.msra.mxu0 %v15745_v41  ;;  %v14471_v10 = vld [vmem:[%s15225_s13] ss:$0 sm:$0xff] }
 0xaeb   :  { %11557 = vmatprep.subr.bf16.mxu1 %v15746_v30  ;;  %11586 = vmatprep.subr.bf16.mxu0 %v15474_v20 }
 0xaee   :  { %11559 = vmatpush1.bf16.msra.mxu1 %v15747_v45  ;;  %11588 = vmatpush3.bf16.msra.mxu0 %v15748_v8 }
 0xaef   :  { %11561 = vmatprep.subr.bf16.mxu1 %v15749_v58  ;;  %11589 = vmatprep.subr.bf16.mxu0 %v15474_v20  ;;  %v15765_v58 = vld [vmem:[#allocation59_spill] sm:$0xff] }
 0xaf2   :  { %11563 = vmatpush1.bf16.msra.mxu1 %v15750_v63  ;;  %11591 = vmatpush3.bf16.msra.mxu0 %v15751_v1  ;;  %v15766_v63 = vld [vmem:[#allocation62_spill] sm:$0xff] }
 0xaf3   :  { %11565 = vmatprep.subr.bf16.mxu1 %v15752_v32  ;;  %11592 = vmatprep.subr.bf16.mxu0 %v15474_v20  ;;  %v608_v1 = vadd.f32 %v15766_v63, %v15765_v58 }
 0xaf6   :  { %11567 = vmatpush1.bf16.msra.mxu1 %v15753_v53  ;;  %11594 = vmatpush3.bf16.msra.mxu0 %v15754_v47 }
 0xaf7   :  { %11569 = vmatprep.subr.bf16.mxu1 %v15755_v17  ;;  %11595 = vmatprep.subr.bf16.mxu0 %v15474_v20 }
 0xafa   :  { %11571 = vmatpush1.bf16.msra.mxu1 %v15756_v14  ;;  %11597 = vmatpush3.bf16.msra.mxu0 %v15757_v25 }
 0xafb   :  { %11573 = vmatprep.subr.bf16.mxu1 %v15758_v43  ;;  %11598 = vmatprep.subr.bf16.mxu0 %v15474_v20 }
 0xafe   :  { %11575 = vmatpush1.bf16.msra.mxu1 %v15759_v11  ;;  %11600 = vmatpush3.bf16.msra.mxu0 %v15760_v2 }
 0xaff   :  { %11577 = vmatprep.subr.bf16.mxu1 %v15761_v57  ;;  %11601 = vmatprep.subr.bf16.mxu0 %v15474_v20 }
 0xb02   :  { %11579 = vmatpush1.bf16.msra.mxu1 %v15762_v27  ;;  %11603 = vmatpush3.bf16.msra.mxu0 %v15763_v34  ;;  %v12730_v27 = vld [vmem:[%s15216_s4] sm:$0x7]  ;;  %v15767_v34 = vld [vmem:[#allocation65_spill] sm:$0xff] }
 0xb03   :  { %11605 = vmatprep.subr.bf16.mxu1 %v15764_v18  ;;  %11636 = vmatprep.subr.bf16.mxu0 %v15474_v20  ;;  %v14484_v18 = vrot.slane %v12730_v27, %v15767_v34 }
 0xb58   :  { %v4447_v15 = vpop.f32.mrb[54].mxu0 }
 0xb59   :  { %v9458_v19 = vpop.f32.mrb[55].mxu0  ;;  %v4448_v45 = vadd.f32 %v4447_v15, %v13563_v13 }
 0xb78   :  { %v4517_v24 = vpop.f32.mrb[40].mxu1  ;;  %v4588_v36 = vpop.f32.mrb[56].mxu0 }
 0xb79   :  { %v12410_v48 = vadd.f32 %v4517_v24, %v15688_v12  ;;  %v4519_v28 = vpop.f32.mrb[41].mxu1  ;;  %v9493_v49 = vpop.f32.mrb[57].mxu0  ;;  %v4606_v41 = vadd.f32 %v14471_v10, %v4588_v36  ;;  %v15768_v24 = vld [vmem:[#allocation66_spill] sm:$0xff] }
 0xb7a   :  { %v12411_v55 = vadd.f32 %v4519_v28, %v15689_v21  ;;  %v14487_v36 = vrot.slane %v12730_v27, %v15768_v24  ;;  %v5302_v27 = vld [vmem:[#allocation9 + $0xb0] sm:$0xff] }
 0xb7b   :  { %v7899_v54 = vmul.f32 -1.442695, %v12410_v48 }
 0xb7c   :  { %v7900_v60 = vmul.f32 -1.442695, %v12411_v55 }
 0xb7d   :  { %12636 = vpow2.f32 %v7899_v54 }
 0xb7e   :  { %12638 = vpow2.f32 %v7900_v60 }
 0xb87   :  { %v12637_v61 = vpop.eup %12636 }
 0xb88   :  { %v4596_v3 = vadd.f32 1.0, %v12637_v61  ;;  %v12639_v4 = vpop.eup %12638 }
 0xb89   :  { %v4603_v26 = vadd.f32 1.0, %v12639_v4 }
 0xb8a   :  { %12640 = vrcp.f32 %v4596_v3 }
 0xb8b   :  { %12642 = vrcp.f32 %v4603_v26 }
 0xb94   :  { %v12641_v30 = vpop.eup %12640 }
 0xb95   :  { %v4607_v8 = vmul.f32 %v12641_v30, %v4606_v41  ;;  %v12643_v14 = vpop.eup %12642 }
 0xb96   :  { %v4610_v25 = vsub.f32 1.0, %v12643_v14  ;;  %v4612_v2 = vmul.f32 %v12643_v14, %v14329_v40  ;;  %v5294_v14 = vld [vmem:[#allocation9 + $0x70] sm:$0xff] }
 0xb97   :  { %v4608_v32 = vadd.f32 %v4607_v8, %v4448_v45 }
 0xb98   :  { %v4800_v53 = vpop.f32.mrb[58].mxu0 }
 0xb99   :  { %12644 = vtanh.f32 %v4608_v32  ;;  %v4811_v47 = vadd.f32 %v4800_v53, %v608_v1  ;;  %v9528_v17 = vpop.f32.mrb[59].mxu0 }
 0xb9a   :  { %v5295_v17 = vld [vmem:[#allocation9 + $0x78] sm:$0xff] }
 0xba3   :  { %v12645_v43 = vpop.eup %12644 }
 0xba4   :  { %v4611_v11 = vmul.f32 %v12645_v43, %v4610_v25  ;;  %v5297_v43 = vld [vmem:[#allocation9 + $0x88] sm:$0xff] }
 0xba6   :  { %v14478_v57 = vadd.f32 %v4612_v2, %v4611_v11  ;;  %v14561_v11 = vpack.c.bf16 %v5297_v43, %v5294_v14  ;;  %v5299_v2 = vld [vmem:[#allocation9 + $0x98] sm:$0xff]  ;;  %v5324_v14 = vld [vmem:[#allocation9 + $0x160] sm:$0xff] }
 0xbb8   :  { %v4878_v15 = vpop.f32.mrb[2].mxu1  ;;  %v4949_v19 = vpop.f32.mrb[60].mxu0 }
 0xbb9   :  { %v12382_v48 = vadd.f32 %v4878_v15, %v14484_v18  ;;  %v4880_v28 = vpop.f32.mrb[3].mxu1  ;;  %v9563_v49 = vpop.f32.mrb[61].mxu0  ;;  %v4967_v26 = vadd.f32 %v14334_v35, %v4949_v19  ;;  %v5296_v35 = vld [vmem:[#allocation9 + $0x80] sm:$0xff]  ;;  %v14565_v15 = vpack.c.bf16 %v5302_v27, %v5299_v2  ;;  %v5298_v19 = vld [vmem:[#allocation9 + $0x90] sm:$0xff]  ;;  %v5327_v2 = vld [vmem:[#allocation9 + $0x178] sm:$0xff] }
 0xbba   :  { %v12383_v40 = vadd.f32 %v4880_v28, %v14487_v36  ;;  %v5300_v28 = vld [vmem:[#allocation9 + $0xa0] sm:$0xff]  ;;  %v14611_v27 = vpack.c.bf16 %v5327_v2, %v5324_v14  ;;  %v5479_v14 = vld [vmem:[#allocation5 + $0x10] sm:$0xff]  ;;  %v5482_v2 = vld [vmem:[#allocation5 + $0x28] sm:$0xff] }
 0xbbb   :  { %v7901_v54 = vmul.f32 -1.442695, %v12382_v48  ;;  %v5301_v48 = vld [vmem:[#allocation9 + $0xa8] sm:$0xff] }
 0xbbc   :  { %v7902_v55 = vmul.f32 -1.442695, %v12383_v40  ;;  %v14568_v49 = vpack.c.bf16 %v5301_v48, %v5298_v19  ;;  %v5478_v19 = vld [vmem:[#allocation5 + $0x8] sm:$0xff]  ;;  %v5481_v48 = vld [vmem:[#allocation5 + $0x20] sm:$0xff] }
 0xbbd   :  { %12646 = vpow2.f32 %v7901_v54  ;;  %v5303_v54 = vld [vmem:[#allocation9 + $0xb8] sm:$0xff] }
 0xbbe   :  { %12648 = vpow2.f32 %v7902_v55  ;;  %v14571_v40 = vpack.c.bf16 %v5303_v54, %v5300_v28  ;;  %v5305_v55 = vld [vmem:[#allocation9 + $0xc8] sm:$0xff]  ;;  %v14615_v28 = vpack.c.bf16 %v5481_v48, %v5478_v19  ;;  %v5484_v48 = vld [vmem:[#allocation5 + $0x38] sm:$0xff] }
 0xbc7   :  { %v12647_v60 = vpop.eup %12646 }
 0xbc8   :  { %v4957_v61 = vadd.f32 1.0, %v12647_v60  ;;  %v12649_v3 = vpop.eup %12648  ;;  %v5308_v60 = vld [vmem:[#allocation9 + $0xe0] sm:$0xff] }
 0xbc9   :  { %v4964_v4 = vadd.f32 1.0, %v12649_v3  ;;  %v5304_v3 = vld [vmem:[#allocation9 + $0xc0] sm:$0xff] }
 0xbca   :  { %12650 = vrcp.f32 %v4957_v61  ;;  %v14575_v61 = vpack.c.bf16 %v5308_v60, %v5305_v55 }
 0xbcb   :  { %12652 = vrcp.f32 %v4964_v4  ;;  %v5307_v4 = vld [vmem:[#allocation9 + $0xd8] sm:$0xff] }
 0xbd4   :  { %v12651_v41 = vpop.eup %12650 }
 0xbd5   :  { %v4968_v30 = vmul.f32 %v12651_v41, %v4967_v26  ;;  %v12653_v8 = vpop.eup %12652  ;;  %v5306_v26 = vld [vmem:[#allocation9 + $0xd0] sm:$0xff]  ;;  %v14578_v41 = vpack.c.bf16 %v5307_v4, %v5304_v3 }
 0xbd6   :  { %v4971_v58 = vsub.f32 1.0, %v12653_v8  ;;  %v4973_v32 = vmul.f32 %v12653_v8, %v14339_v37  ;;  %v5311_v8 = vld [vmem:[#allocation9 + $0xf8] sm:$0xff] }
 0xbd7   :  { %v4969_v45 = vadd.f32 %v4968_v30, %v4811_v47  ;;  %v5292_v47 = vld [vmem:[#allocation9 + $0x60] sm:$0xff]  ;;  %v5309_v30 = vld [vmem:[#allocation9 + $0xe8] sm:$0xff] }
 0xbd8   :  { %v14558_v25 = vpack.c.bf16 %v5295_v17, %v5292_v47  ;;  %v5322_v47 = vld [vmem:[#allocation9 + $0x150] sm:$0xff]  ;;  %v5325_v17 = vld [vmem:[#allocation9 + $0x168] sm:$0xff] }
 0xbd9   :  { %12654 = vtanh.f32 %v4969_v45  ;;  %v14581_v45 = vpack.c.bf16 %v5309_v30, %v5306_v26  ;;  %v14608_v43 = vpack.c.bf16 %v5325_v17, %v5322_v47  ;;  %v5480_v17 = vld [vmem:[#allocation5 + $0x18] sm:$0xff] }
 0xbe3   :  { %v12655_v63 = vpop.eup %12654 }
 0xbe4   :  { %v4972_v1 = vmul.f32 %v12655_v63, %v4971_v58  ;;  %v5314_v58 = vld [vmem:[#allocation9 + $0x110] sm:$0xff] }
 0xbe5   :  { %v14585_v63 = vpack.c.bf16 %v5314_v58, %v5311_v8 }
 0xbe6   :  { %v14493_v53 = vadd.f32 %v4973_v32, %v4972_v1  ;;  %v5310_v1 = vld [vmem:[#allocation9 + $0xf0] sm:$0xff]  ;;  %v5313_v32 = vld [vmem:[#allocation9 + $0x108] sm:$0xff] }
 0xbe8   :  { %5040 = vmatmul.mubr.f32.vlgmr.msra.gmra.mrb[42].mxu1 %v14493_v53  ;;  %9597 = vmatmul.mubr.f32.vlgmr.msra.gmra.mrb[62].mxu0 %v14493_v53 }
 0xbe9   :  { %11607 = vmatpush1.bf16.msra.mxu1 %v15503_v29  ;;  %11638 = vmatpush3.bf16.msra.mxu0 %v15504_v23  ;;  %v5282_v29 = vld [vmem:[#allocation9 + $0x10] sm:$0xff] }
 0xbea   :  { %11609 = vmatprep.subr.bf16.mxu1 %v15505_v59  ;;  %11639 = vmatprep.subr.bf16.mxu0 %v15474_v20  ;;  %v5285_v59 = vld [vmem:[#allocation9 + $0x28] sm:$0xff] }
 0xbeb   :  { %5180 = vmatprep.mubr.f32.mxu1 %v15476_v38  ;;  %9631 = vmatprep.mubr.msk.f32.mxu0 %vm12860_vm1, %v15476_v38 }
 0xbed   :  { %11611 = vmatpush1.bf16.msra.mxu1 %v15506_v62  ;;  %11641 = vmatpush3.bf16.msra.mxu0 %v15507_v52  ;;  %v14541_v62 = vpack.c.bf16 %v5285_v59, %v5282_v29  ;;  %v5287_v52 = vld [vmem:[#allocation9 + $0x38] sm:$0xff]  ;;  %v5316_v59 = vld [vmem:[#allocation9 + $0x120] sm:$0xff] }
 0xbee   :  { %11613 = vmatprep.subr.bf16.mxu1 %v15508_v0  ;;  %11642 = vmatprep.subr.bf16.mxu0 %v15474_v20  ;;  %v5290_v0 = vld [vmem:[#allocation9 + $0x50] sm:$0xff] }
 0xbf1   :  { %11615 = vmatpush1.bf16.msra.mxu1 %v15509_v44  ;;  %11644 = vmatpush3.bf16.msra.mxu0 %v15510_v39  ;;  %v14545_v44 = vpack.c.bf16 %v5290_v0, %v5287_v52  ;;  %v5286_v39 = vld [vmem:[#allocation9 + $0x30] sm:$0xff]  ;;  %v5319_v52 = vld [vmem:[#allocation9 + $0x138] sm:$0xff] }
 0xbf2   :  { %11617 = vmatprep.subr.bf16.mxu1 %v15511_v51  ;;  %11645 = vmatprep.subr.bf16.mxu0 %v15474_v20  ;;  %v5289_v51 = vld [vmem:[#allocation9 + $0x48] sm:$0xff]  ;;  %v5318_v0 = vld [vmem:[#allocation9 + $0x130] sm:$0xff] }
 0xbf5   :  { %11619 = vmatpush1.bf16.msra.mxu1 %v15512_v7  ;;  %11647 = vmatpush3.bf16.msra.mxu0 %v15513_v6  ;;  %v5288_v7 = vld [vmem:[#allocation9 + $0x40] sm:$0xff]  ;;  %v14548_v6 = vpack.c.bf16 %v5289_v51, %v5286_v39  ;;  %v14598_v39 = vpack.c.bf16 %v5319_v52, %v5316_v59  ;;  %v5321_v51 = vld [vmem:[#allocation9 + $0x148] sm:$0xff] }
 0xbf6   :  { %11621 = vmatprep.subr.bf16.mxu1 %v15514_v31  ;;  %11648 = vmatprep.subr.bf16.mxu0 %v15474_v20  ;;  %v5291_v31 = vld [vmem:[#allocation9 + $0x58] sm:$0xff] }
 0xbf9   :  { %11623 = vmatpush1.bf16.msra.mxu1 %v13432_v16  ;;  %11650 = vmatpush3.bf16.msra.mxu0 %v13434_v46  ;;  %v15769_v16 = vld [vmem:[#allocation83_spill] sm:$0xff]  ;;  %v15770_v46 = vld [vmem:[#allocation84_spill] sm:$0xff] }
 0xbfa   :  { %11625 = vmatprep.subr.bf16.mxu1 %v15515_v5  ;;  %11651 = vmatprep.subr.bf16.mxu0 %v15474_v20  ;;  %v14551_v5 = vpack.c.bf16 %v5291_v31, %v5288_v7  ;;  %v14601_v7 = vpack.c.bf16 %v5321_v51, %v5318_v0  ;;  %v5323_v31 = vld [vmem:[#allocation9 + $0x158] sm:$0xff] }
 0xbfd   :  { %11627 = vmatpush1.bf16.msra.mxu1 %v15516_v50  ;;  %11653 = vmatpush3.bf16.msra.mxu0 %v13444_v33  ;;  %v5281_v33 = vld [vmem:[#allocation9 + $0x8] sm:$0xff] }
 0xbfe   :  { %11629 = vmatprep.subr.bf16.mxu1 %v13448_v56  ;;  %11654 = vmatprep.subr.bf16.mxu0 %v15474_v20  ;;  %v5284_v56 = vld [vmem:[#allocation9 + $0x20] sm:$0xff]  ;;  %v5293_v50 = vld [vmem:[#allocation9 + $0x68] sm:$0xff] }
 0xbff   :  { %v14555_v37 = vpack.c.bf16 %v5296_v35, %v5293_v50  ;;  %v5326_v50 = vld [vmem:[#allocation9 + $0x170] sm:$0xff] }
 0xc00   :  { %v14605_v35 = vpack.c.bf16 %v5326_v50, %v5323_v31  ;;  %v5477_v50 = vld [vmem:[#allocation5] sm:$0xff] }
 0xc01   :  { %11631 = vmatpush1.bf16.msra.mxu1 %v13452_v9  ;;  %11656 = vmatpush3.bf16.msra.mxu0 %v13454_v42  ;;  %v14536_v9 = vpack.c.bf16 %v5284_v56, %v5281_v33  ;;  %v5280_v42 = vld [vmem:[#allocation9] sm:$0xff]  ;;  %v5315_v33 = vld [vmem:[#allocation9 + $0x118] sm:$0xff] }
 0xc02   :  { %11633 = vmatprep.subr.bf16.mxu1 %v13458_v22  ;;  %11657 = vmatprep.subr.bf16.mxu0 %v15474_v20  ;;  %v5283_v22 = vld [vmem:[#allocation9 + $0x18] sm:$0xff] }
 0xc03   :  { %v14538_v23 = vpack.c.bf16 %v5283_v22, %v5280_v42  ;;  %v5317_v42 = vld [vmem:[#allocation9 + $0x128] sm:$0xff]  ;;  %v5320_v22 = vld [vmem:[#allocation9 + $0x140] sm:$0xff] }
 0xc04   :  { %v14595_v29 = vpack.c.bf16 %v5320_v22, %v5317_v42 }
 0xc05   :  { %11635 = vmatpush1.bf16.msra.mxu1 %v15769_v16  ;;  %11659 = vmatpush3.bf16.msra.mxu0 %v15770_v46  ;;  %v5312_v16 = vld [vmem:[#allocation9 + $0x100] sm:$0xff]  ;;  %v14588_v46 = vpack.c.bf16 %v5313_v32, %v5310_v1 }
 0xc06   :  { %11692 = vmatprep.subr.bf16.mxu0 %v15474_v20  ;;  %11661 = vmatprep.subr.bf16.mxu1 %v14536_v9  ;;  %v14591_v56 = vpack.c.bf16 %v5315_v33, %v5312_v16 }
 0xc08   :  { %5181 = vmatmul.mubr.f32.vlgmr.msra.gmra.mrb[42].mxu1 %v14478_v57  ;;  %9632 = vmatmul.mubr.f32.vlgmr.msra.gmra.mrb[64].mxu0 %v14478_v57 }
 0xc09   :  { %5392 = vmatprep.mubr.f32.mxu1 %v15476_v38  ;;  %9666 = vmatprep.mubr.msk.f32.mxu0 %vm12860_vm1, %v15476_v38 }
 0xc0a   :  { %11663 = vmatpush1.bf16.msra.mxu1 %v14538_v23  ;;  %11694 = vmatpush3.bf16.msra.mxu0 %v14541_v62 }
 0xc0b   :  { %11695 = vmatprep.subr.bf16.mxu0 %v15474_v20  ;;  %11665 = vmatprep.subr.bf16.mxu1 %v14545_v44 }
 0xc0e   :  { %11667 = vmatpush1.bf16.msra.mxu1 %v14548_v6  ;;  %11697 = vmatpush3.bf16.msra.mxu0 %v14551_v5 }
 0xc0f   :  { %11698 = vmatprep.subr.bf16.mxu0 %v15474_v20  ;;  %11669 = vmatprep.subr.bf16.mxu1 %v14555_v37 }
 0xc12   :  { %11671 = vmatpush1.bf16.msra.mxu1 %v14558_v25  ;;  %11700 = vmatpush3.bf16.msra.mxu0 %v14561_v11 }
 0xc13   :  { %11701 = vmatprep.subr.bf16.mxu0 %v15474_v20  ;;  %11673 = vmatprep.subr.bf16.mxu1 %v14565_v15 }
 0xc16   :  { %11675 = vmatpush1.bf16.msra.mxu1 %v14568_v49  ;;  %11703 = vmatpush3.bf16.msra.mxu0 %v14571_v40 }
 0xc17   :  { %11704 = vmatprep.subr.bf16.mxu0 %v15474_v20  ;;  %11677 = vmatprep.subr.bf16.mxu1 %v14575_v61 }
 0xc1a   :  { %11679 = vmatpush1.bf16.msra.mxu1 %v14578_v41  ;;  %11706 = vmatpush3.bf16.msra.mxu0 %v14581_v45 }
 0xc1b   :  { %11707 = vmatprep.subr.bf16.mxu0 %v15474_v20  ;;  %11681 = vmatprep.subr.bf16.mxu1 %v14585_v63 }
 0xc1e   :  { %11683 = vmatpush1.bf16.msra.mxu1 %v14588_v46  ;;  %11709 = vmatpush3.bf16.msra.mxu0 %v14591_v56 }
 0xc1f   :  { %11710 = vmatprep.subr.bf16.mxu0 %v15474_v20  ;;  %11685 = vmatprep.subr.bf16.mxu1 %v14595_v29 }
 0xc22   :  { %11687 = vmatpush1.bf16.msra.mxu1 %v14598_v39  ;;  %11712 = vmatpush3.bf16.msra.mxu0 %v14601_v7 }
 0xc23   :  { %11713 = vmatprep.subr.bf16.mxu0 %v15474_v20  ;;  %11689 = vmatprep.subr.bf16.mxu1 %v14605_v35 }
 0xc26   :  { %11691 = vmatpush1.bf16.msra.mxu1 %v14608_v43  ;;  %11715 = vmatpush3.bf16.msra.mxu0 %v14611_v27 }
 0xc27   :  { %11748 = vmatprep.subr.bf16.mxu0 %v15474_v20  ;;  %11717 = vmatprep.subr.bf16.mxu1 %v14615_v28 }
 0xcbb   :  { %v5112_v54 = vpop.f32.mrb[62].mxu0 }
 0xcbc   :  { %v9598_v55 = vpop.f32.mrb[63].mxu0  ;;  %v5113_v52 = vadd.f32 %v5112_v54, %v13563_v13  ;;  %v5483_v54 = vld [vmem:[#allocation5 + $0x30] sm:$0xff] }
 0xcbd   :  { %v5487_v55 = vld [vmem:[#allocation5 + $0x50] sm:$0xff] }
 0xcdb   :  { %v5182_v60 = vpop.f32.mrb[42].mxu1  ;;  %v5253_v3 = vpop.f32.mrb[64].mxu0 }
 0xcdc   :  { %v12412_v4 = vadd.f32 %v5182_v60, %v15688_v12  ;;  %v5184_v26 = vpop.f32.mrb[43].mxu1  ;;  %v9633_v30 = vpop.f32.mrb[65].mxu0  ;;  %v5271_v22 = vadd.f32 %v14471_v10, %v5253_v3  ;;  %v14624_v10 = vpack.c.bf16 %v5480_v17, %v5477_v50  ;;  %v14626_v3 = vpack.c.bf16 %v5482_v2, %v5479_v14  ;;  %v5495_v17 = vld [vmem:[#allocation5 + $0x90] sm:$0xff]  ;;  %v5498_v2 = vld [vmem:[#allocation5 + $0xa8] sm:$0xff] }
 0xcdd   :  { %v12413_v58 = vadd.f32 %v5184_v26, %v15689_v21  ;;  %v14630_v30 = vpack.c.bf16 %v5487_v55, %v5484_v48  ;;  %v5500_v48 = vld [vmem:[#allocation5 + $0xb8] sm:$0xff]  ;;  %v5502_v55 = vld [vmem:[#allocation5 + $0xc8] sm:$0xff] }
 0xcde   :  { %v7903_v8 = vmul.f32 -1.442695, %v12412_v4 }
 0xcdf   :  { %v7904_v1 = vmul.f32 -1.442695, %v12413_v58  ;;  %v5485_v58 = vld [vmem:[#allocation5 + $0x40] sm:$0xff] }
 0xce0   :  { %12656 = vpow2.f32 %v7903_v8  ;;  %v5486_v8 = vld [vmem:[#allocation5 + $0x48] sm:$0xff] }
 0xce1   :  { %12658 = vpow2.f32 %v7904_v1  ;;  %v5488_v1 = vld [vmem:[#allocation5 + $0x58] sm:$0xff] }
 0xcea   :  { %v12657_v32 = vpop.eup %12656 }
 0xceb   :  { %v5261_v16 = vadd.f32 1.0, %v12657_v32  ;;  %v12659_v33 = vpop.eup %12658  ;;  %v5490_v32 = vld [vmem:[#allocation5 + $0x68] sm:$0xff] }
 0xcec   :  { %v5268_v42 = vadd.f32 1.0, %v12659_v33  ;;  %v14638_v33 = vpack.c.bf16 %v5488_v1, %v5485_v58  ;;  %v5504_v1 = vld [vmem:[#allocation5 + $0xd8] sm:$0xff] }
 0xced   :  { %12660 = vrcp.f32 %v5261_v16  ;;  %v5493_v16 = vld [vmem:[#allocation5 + $0x80] sm:$0xff] }
 0xcee   :  { %12662 = vrcp.f32 %v5268_v42  ;;  %v5489_v42 = vld [vmem:[#allocation5 + $0x60] sm:$0xff] }
 0xcf7   :  { %v12661_v59 = vpop.eup %12660 }
 0xcf8   :  { %v5272_v0 = vmul.f32 %v12661_v59, %v5271_v22  ;;  %v12663_v31 = vpop.eup %12662  ;;  %v14642_v22 = vpack.c.bf16 %v5493_v16, %v5490_v32  ;;  %v5492_v59 = vld [vmem:[#allocation5 + $0x78] sm:$0xff]  ;;  %v5503_v32 = vld [vmem:[#allocation5 + $0xd0] sm:$0xff]  ;;  %v5506_v16 = vld [vmem:[#allocation5 + $0xe8] sm:$0xff] }
 0xcf9   :  { %v5275_v47 = vsub.f32 1.0, %v12663_v31  ;;  %v5277_v4 = vmul.f32 %v12663_v31, %v14478_v57  ;;  %v14636_v57 = vpack.c.bf16 %v5486_v8, %v5483_v54  ;;  %v5499_v31 = vld [vmem:[#allocation5 + $0xb0] sm:$0xff]  ;;  %v14649_v50 = vpack.c.bf16 %v5492_v59, %v5489_v42  ;;  %v5501_v8 = vld [vmem:[#allocation5 + $0xc0] sm:$0xff]  ;;  %v5508_v42 = vld [vmem:[#allocation5 + $0xf8] sm:$0xff] }
 0xcfa   :  { %v5273_v51 = vadd.f32 %v5272_v0, %v5113_v52  ;;  %v5491_v52 = vld [vmem:[#allocation5 + $0x70] sm:$0xff]  ;;  %v5494_v0 = vld [vmem:[#allocation5 + $0x88] sm:$0xff] }
 0xcfb   :  { %v5511_v59 = vld [vmem:[#allocation5 + $0x110] sm:$0xff] }
 0xcfc   :  { %12664 = vtanh.f32 %v5273_v51  ;;  %v5496_v51 = vld [vmem:[#allocation5 + $0x98] sm:$0xff] }
 0xcfd   :  { %v14655_v14 = vpack.c.bf16 %v5499_v31, %v5496_v51  ;;  %v5507_v51 = vld [vmem:[#allocation5 + $0xf0] sm:$0xff]  ;;  %v14675_v31 = vpack.c.bf16 %v5511_v59, %v5508_v42  ;;  %v5518_v59 = vld [vmem:[#allocation5 + $0x148] sm:$0xff] }
 0xcfe   :  { %v5515_v42 = vld [vmem:[#allocation5 + $0x130] sm:$0xff] }
 0xcff   :  { %15774 = vst [vmem:[#allocation71_spill] sm:$0xff] %v14675_v31 }
 0xd06   :  { %v12665_v19 = vpop.eup %12664 }
 0xd07   :  { %v5276_v60 = vmul.f32 %v12665_v19, %v5275_v47  ;;  %v14651_v47 = vpack.c.bf16 %v5494_v0, %v5491_v52  ;;  %v5497_v19 = vld [vmem:[#allocation5 + $0xa0] sm:$0xff]  ;;  %v14669_v52 = vpack.c.bf16 %v5504_v1, %v5501_v8  ;;  %v14671_v0 = vpack.c.bf16 %v5506_v16, %v5503_v32  ;;  %v5516_v16 = vld [vmem:[#allocation5 + $0x138] sm:$0xff] }
 0xd08   :  { %v14661_v54 = vpack.c.bf16 %v5500_v48, %v5497_v19  ;;  %v5512_v19 = vld [vmem:[#allocation5 + $0x118] sm:$0xff]  ;;  %v5514_v48 = vld [vmem:[#allocation5 + $0x128] sm:$0xff]  ;;  %v5513_v1 = vld [vmem:[#allocation5 + $0x120] sm:$0xff] }
 0xd09   :  { %v14628_v26 = vadd.f32 %v5277_v4, %v5276_v60  ;;  %v5505_v60 = vld [vmem:[#allocation5 + $0xe0] sm:$0xff]  ;;  %v14659_v4 = vpack.c.bf16 %v5498_v2, %v5495_v17  ;;  %15773 = vst [vmem:[#allocation70_spill] sm:$0xff] %v14671_v0  ;;  %v5510_v17 = vld [vmem:[#allocation5 + $0x108] sm:$0xff] }
 0xd0a   :  { %15771 = vst [vmem:[#allocation55_spill] sm:$0xff] %v14661_v54  ;;  %v14665_v58 = vpack.c.bf16 %v5505_v60, %v5502_v55  ;;  %v5509_v2 = vld [vmem:[#allocation5 + $0x100] sm:$0xff]  ;;  %v14679_v60 = vpack.c.bf16 %v5510_v17, %v5507_v51  ;;  %v14689_v51 = vpack.c.bf16 %v5516_v16, %v5513_v1  ;;  %v14691_v17 = vpack.c.bf16 %v5518_v59, %v5515_v42  ;;  %v5691_v42 = vld [vmem:[#allocation10 + $0x18] sm:$0xff]  ;;  %v5690_v59 = vld [vmem:[#allocation10 + $0x10] sm:$0xff] }
 0xd0b   :  { %5393 = vmatmul.mubr.f32.vlgmr.msra.gmra.mrb[4].mxu1 %v14628_v26  ;;  %9667 = vmatmul.mubr.f32.vlgmr.msra.gmra.mrb[66].mxu0 %v14628_v26  ;;  %v5517_v55 = vld [vmem:[#allocation5 + $0x140] sm:$0xff]  ;;  %v14681_v8 = vpack.c.bf16 %v5512_v19, %v5509_v2  ;;  %v5519_v2 = vld [vmem:[#allocation5 + $0x150] sm:$0xff] }
 0xd0c   :  { %11719 = vmatpush1.bf16.msra.mxu1 %v14624_v10  ;;  %11750 = vmatpush3.bf16.msra.mxu0 %v14626_v3  ;;  %15772 = vst [vmem:[#allocation69_spill] sm:$0xff] %v14665_v58  ;;  %15775 = vst [vmem:[#allocation72_spill] sm:$0xff] %v14679_v60  ;;  %v14685_v32 = vpack.c.bf16 %v5517_v55, %v5514_v48  ;;  %v5522_v48 = vld [vmem:[#allocation5 + $0x168] sm:$0xff]  ;;  %v5521_v55 = vld [vmem:[#allocation5 + $0x160] sm:$0xff] }
 0xd0d   :  { %11721 = vmatprep.subr.bf16.mxu1 %v14630_v30  ;;  %11751 = vmatprep.subr.bf16.mxu0 %v15474_v20  ;;  %15776 = vst [vmem:[#allocation73_spill] sm:$0xff] %v14681_v8  ;;  %15778 = vst [vmem:[#allocation75_spill] sm:$0xff] %v14689_v51  ;;  %v5688_v16 = vld [vmem:[#allocation10] sm:$0xff] }
 0xd0e   :  { %5589 = vmatprep.mubr.f32.mxu1 %v15476_v38  ;;  %9701 = vmatprep.mubr.msk.f32.mxu0 %vm12860_vm1, %v15476_v38  ;;  %15777 = vst [vmem:[#allocation74_spill] sm:$0xff] %v14685_v32  ;;  %15779 = vst [vmem:[#allocation76_spill] sm:$0xff] %v14691_v17 }
 0xd10   :  { %11723 = vmatpush1.bf16.msra.mxu1 %v14636_v57  ;;  %11753 = vmatpush3.bf16.msra.mxu0 %v14638_v33 }
 0xd11   :  { %11725 = vmatprep.subr.bf16.mxu1 %v14642_v22  ;;  %11754 = vmatprep.subr.bf16.mxu0 %v15474_v20 }
 0xd14   :  { %11727 = vmatpush1.bf16.msra.mxu1 %v14649_v50  ;;  %11756 = vmatpush3.bf16.msra.mxu0 %v14651_v47 }
 0xd15   :  { %11729 = vmatprep.subr.bf16.mxu1 %v14655_v14  ;;  %11757 = vmatprep.subr.bf16.mxu0 %v15474_v20 }
 0xd18   :  { %11731 = vmatpush1.bf16.msra.mxu1 %v14659_v4  ;;  %11759 = vmatpush3.bf16.msra.mxu0 %v14661_v54  ;;  %v5523_v54 = vld [vmem:[#allocation5 + $0x170] sm:$0xff] }
 0xd19   :  { %11733 = vmatprep.subr.bf16.mxu1 %v14665_v58  ;;  %11760 = vmatprep.subr.bf16.mxu0 %v15474_v20  ;;  %v5520_v58 = vld [vmem:[#allocation5 + $0x158] sm:$0xff] }
 0xd1a   :  { %v14695_v19 = vpack.c.bf16 %v5523_v54, %v5520_v58  ;;  %v5689_v54 = vld [vmem:[#allocation10 + $0x8] sm:$0xff]  ;;  %v5692_v58 = vld [vmem:[#allocation10 + $0x20] sm:$0xff] }
 0xd1c   :  { %11735 = vmatpush1.bf16.msra.mxu1 %v14669_v52  ;;  %11762 = vmatpush3.bf16.msra.mxu0 %v14671_v0  ;;  %15780 = vst [vmem:[#allocation77_spill] sm:$0xff] %v14695_v19  ;;  %v5893_v0 = vld [vmem:[#allocation12 + $0x80] sm:$0xff] }
 0xd1d   :  { %11737 = vmatprep.subr.bf16.mxu1 %v14675_v31  ;;  %11763 = vmatprep.subr.bf16.mxu0 %v15474_v20  ;;  %v5524_v31 = vld [vmem:[#allocation5 + $0x178] sm:$0xff] }
 0xd1e   :  { %v14701_v1 = vpack.c.bf16 %v5524_v31, %v5521_v55  ;;  %v14713_v31 = vpack.c.bf16 %v5692_v58, %v5689_v54  ;;  %v5694_v54 = vld [vmem:[#allocation10 + $0x30] sm:$0xff]  ;;  %v5697_v58 = vld [vmem:[#allocation10 + $0x48] sm:$0xff] }
 0xd20   :  { %11739 = vmatpush1.bf16.msra.mxu1 %v14679_v60  ;;  %11765 = vmatpush3.bf16.msra.mxu0 %v14681_v8  ;;  %v14699_v60 = vpack.c.bf16 %v5522_v48, %v5519_v2  ;;  %15782 = vst [vmem:[#allocation79_spill] sm:$0xff] %v14701_v1  ;;  %15783 = vst [vmem:[#allocation80_spill] sm:$0xff] %v14713_v31  ;;  %v14715_v2 = vpack.c.bf16 %v5691_v42, %v5688_v16  ;;  %v5693_v48 = vld [vmem:[#allocation10 + $0x28] sm:$0xff]  ;;  %v5699_v42 = vld [vmem:[#allocation10 + $0x58] sm:$0xff] }
 0xd21   :  { %11741 = vmatprep.subr.bf16.mxu1 %v14685_v32  ;;  %11766 = vmatprep.subr.bf16.mxu0 %v15474_v20  ;;  %v14718_v55 = vpack.c.bf16 %v5693_v48, %v5690_v59  ;;  %v14725_v16 = vpack.c.bf16 %v5697_v58, %v5694_v54  ;;  %v5701_v48 = vld [vmem:[#allocation10 + $0x68] sm:$0xff]  ;;  %v5731_v8 = vld [vmem:[#allocation10 + $0x158] sm:$0xff] }
 0xd22   :  { %15781 = vst [vmem:[#allocation78_spill] sm:$0xff] %v14699_v60  ;;  %15784 = vst [vmem:[#allocation81_spill] sm:$0xff] %v14715_v2  ;;  %v5705_v58 = vld [vmem:[#allocation10 + $0x88] sm:$0xff] }
 0xd23   :  { %15785 = vst [vmem:[#allocation82_spill] sm:$0xff] %v14718_v55  ;;  %15787 = vst [vmem:[#allocation57_spill] sm:$0xff] %v14725_v16  ;;  %v5729_v32 = vld [vmem:[#allocation10 + $0x148] sm:$0xff] }
 0xd24   :  { %11743 = vmatpush1.bf16.msra.mxu1 %v14689_v51  ;;  %11768 = vmatpush3.bf16.msra.mxu0 %v14691_v17  ;;  %v5696_v17 = vld [vmem:[#allocation10 + $0x40] sm:$0xff]  ;;  %v5725_v51 = vld [vmem:[#allocation10 + $0x128] sm:$0xff] }
 0xd25   :  { %11745 = vmatprep.subr.bf16.mxu1 %v14695_v19  ;;  %11769 = vmatprep.subr.bf16.mxu0 %v15474_v20  ;;  %v14728_v59 = vpack.c.bf16 %v5699_v42, %v5696_v17  ;;  %v5707_v42 = vld [vmem:[#allocation10 + $0x98] sm:$0xff] }
 0xd27   :  { %15788 = vst [vmem:[#allocation56_spill] sm:$0xff] %v14728_v59 }
 0xd28   :  { %11747 = vmatpush1.bf16.msra.mxu1 %v14699_v60  ;;  %11771 = vmatpush3.bf16.msra.mxu0 %v14701_v1  ;;  %v5695_v1 = vld [vmem:[#allocation10 + $0x38] sm:$0xff]  ;;  %v5698_v60 = vld [vmem:[#allocation10 + $0x50] sm:$0xff] }
 0xd29   :  { %11804 = vmatprep.subr.bf16.mxu0 %v15474_v20  ;;  %11773 = vmatprep.subr.bf16.mxu1 %v14713_v31  ;;  %v14722_v19 = vpack.c.bf16 %v5698_v60, %v5695_v1  ;;  %v5700_v1 = vld [vmem:[#allocation10 + $0x60] sm:$0xff]  ;;  %v5702_v31 = vld [vmem:[#allocation10 + $0x70] sm:$0xff] }
 0xd2a   :  { %v14738_v17 = vpack.c.bf16 %v5705_v58, %v5702_v31  ;;  %v5713_v58 = vld [vmem:[#allocation10 + $0xc8] sm:$0xff] }
 0xd2b   :  { %5590 = vmatmul.mubr.f32.vlgmr.msra.gmra.mrb[4].mxu1 %v14493_v53  ;;  %9702 = vmatmul.mubr.f32.vlgmr.msra.gmra.mrb[68].mxu0 %v14493_v53  ;;  %15786 = vst [vmem:[#allocation68_spill] sm:$0xff] %v14722_v19 }
 0xd2c   :  { %5800 = vmatprep.mubr.f32.mxu1 %v15476_v38  ;;  %9736 = vmatprep.mubr.msk.f32.mxu0 %vm12860_vm1, %v15476_v38  ;;  %15791 = vst [vmem:[#allocation58_spill] sm:$0xff] %v14738_v17 }
 0xd2d   :  { %11775 = vmatpush1.bf16.msra.mxu1 %v14715_v2  ;;  %11806 = vmatpush3.bf16.msra.mxu0 %v14718_v55  ;;  %v5704_v2 = vld [vmem:[#allocation10 + $0x80] sm:$0xff]  ;;  %v5703_v55 = vld [vmem:[#allocation10 + $0x78] sm:$0xff] }
 0xd2e   :  { %11807 = vmatprep.subr.bf16.mxu0 %v15474_v20  ;;  %11777 = vmatprep.subr.bf16.mxu1 %v14722_v19  ;;  %v14732_v60 = vpack.c.bf16 %v5704_v2, %v5701_v48  ;;  %v14735_v54 = vpack.c.bf16 %v5703_v55, %v5700_v1  ;;  %v5706_v48 = vld [vmem:[#allocation10 + $0x90] sm:$0xff]  ;;  %v5708_v19 = vld [vmem:[#allocation10 + $0xa0] sm:$0xff]  ;;  %v5711_v1 = vld [vmem:[#allocation10 + $0xb8] sm:$0xff] }
 0xd2f   :  { %v14748_v31 = vpack.c.bf16 %v5711_v1, %v5708_v19  ;;  %v5719_v1 = vld [vmem:[#allocation10 + $0xf8] sm:$0xff] }
 0xd30   :  { %15789 = vst [vmem:[#allocation87_spill] sm:$0xff] %v14732_v60  ;;  %15790 = vst [vmem:[#allocation60_spill] sm:$0xff] %v14735_v54 }
 0xd31   :  { %11779 = vmatpush1.bf16.msra.mxu1 %v14725_v16  ;;  %11809 = vmatpush3.bf16.msra.mxu0 %v14728_v59  ;;  %v5710_v16 = vld [vmem:[#allocation10 + $0xb0] sm:$0xff]  ;;  %v5709_v59 = vld [vmem:[#allocation10 + $0xa8] sm:$0xff]  ;;  %15794 = vst [vmem:[#allocation54_spill] sm:$0xff] %v14748_v31 }
 0xd32   :  { %11810 = vmatprep.subr.bf16.mxu0 %v15474_v20  ;;  %11781 = vmatprep.subr.bf16.mxu1 %v14732_v60  ;;  %v14742_v2 = vpack.c.bf16 %v5710_v16, %v5707_v42  ;;  %v14745_v55 = vpack.c.bf16 %v5709_v59, %v5706_v48  ;;  %v5712_v42 = vld [vmem:[#allocation10 + $0xc0] sm:$0xff]  ;;  %v5714_v60 = vld [vmem:[#allocation10 + $0xd0] sm:$0xff]  ;;  %v5717_v48 = vld [vmem:[#allocation10 + $0xe8] sm:$0xff] }
 0xd33   :  { %v14758_v19 = vpack.c.bf16 %v5717_v48, %v5714_v60 }
 0xd34   :  { %15792 = vst [vmem:[#allocation85_spill] sm:$0xff] %v14742_v2  ;;  %15793 = vst [vmem:[#allocation86_spill] sm:$0xff] %v14745_v55 }
 0xd35   :  { %11783 = vmatpush1.bf16.msra.mxu1 %v14735_v54  ;;  %11812 = vmatpush3.bf16.msra.mxu0 %v14738_v17  ;;  %v5716_v54 = vld [vmem:[#allocation10 + $0xe0] sm:$0xff]  ;;  %v5715_v17 = vld [vmem:[#allocation10 + $0xd8] sm:$0xff]  ;;  %15797 = vst [vmem:[#allocation53_spill] sm:$0xff] %v14758_v19 }
 0xd36   :  { %11813 = vmatprep.subr.bf16.mxu0 %v15474_v20  ;;  %11785 = vmatprep.subr.bf16.mxu1 %v14742_v2  ;;  %v14752_v16 = vpack.c.bf16 %v5716_v54, %v5713_v58  ;;  %v14755_v59 = vpack.c.bf16 %v5715_v17, %v5712_v42  ;;  %v5718_v58 = vld [vmem:[#allocation10 + $0xf0] sm:$0xff]  ;;  %v5720_v2 = vld [vmem:[#allocation10 + $0x100] sm:$0xff]  ;;  %v5723_v42 = vld [vmem:[#allocation10 + $0x118] sm:$0xff] }
 0xd37   :  { %v14768_v60 = vpack.c.bf16 %v5723_v42, %v5720_v2  ;;  %v5732_v42 = vld [vmem:[#allocation10 + $0x160] sm:$0xff] }
 0xd38   :  { %15795 = vst [vmem:[#allocation20_spill] sm:$0xff] %v14752_v16  ;;  %15796 = vst [vmem:[#allocation67_spill] sm:$0xff] %v14755_v59 }
 0xd39   :  { %11787 = vmatpush1.bf16.msra.mxu1 %v14745_v55  ;;  %11815 = vmatpush3.bf16.msra.mxu0 %v14748_v31  ;;  %v5722_v55 = vld [vmem:[#allocation10 + $0x110] sm:$0xff]  ;;  %v5721_v31 = vld [vmem:[#allocation10 + $0x108] sm:$0xff]  ;;  %15800 = vst [vmem:[#allocation22_spill] sm:$0xff] %v14768_v60 }
 0xd3a   :  { %11816 = vmatprep.subr.bf16.mxu0 %v15474_v20  ;;  %11789 = vmatprep.subr.bf16.mxu1 %v14752_v16  ;;  %v14762_v54 = vpack.c.bf16 %v5722_v55, %v5719_v1  ;;  %v14765_v17 = vpack.c.bf16 %v5721_v31, %v5718_v58  ;;  %v5728_v16 = vld [vmem:[#allocation10 + $0x140] sm:$0xff]  ;;  %v5726_v55 = vld [vmem:[#allocation10 + $0x130] sm:$0xff] }
 0xd3b   :  { %v14770_v48 = vpack.c.bf16 %v5728_v16, %v5725_v51  ;;  %v5734_v31 = vld [vmem:[#allocation10 + $0x170] sm:$0xff]  ;;  %v14777_v58 = vpack.c.bf16 %v5729_v32, %v5726_v55  ;;  %v5733_v16 = vld [vmem:[#allocation10 + $0x168] sm:$0xff]  ;;  %v669_v55 = vld [vmem:[%s15221_s9] sm:$0x7] }
 0xd3c   :  { %15798 = vst [vmem:[#allocation16_spill] sm:$0xff] %v14762_v54  ;;  %15799 = vst [vmem:[#allocation21_spill] sm:$0xff] %v14765_v17  ;;  %v14779_v2 = vpack.c.bf16 %v5734_v31, %v5731_v8  ;;  %v5730_v51 = vld [vmem:[#allocation10 + $0x150] sm:$0xff]  ;;  %v15808_v31 = vld [vmem:[#allocation52_spill] sm:$0xff] }
 0xd3d   :  { %11791 = vmatpush1.bf16.msra.mxu1 %v14755_v59  ;;  %11818 = vmatpush3.bf16.msra.mxu0 %v14758_v19  ;;  %15801 = vst [vmem:[#allocation17_spill] sm:$0xff] %v14770_v48  ;;  %v5724_v59 = vld [vmem:[#allocation10 + $0x120] sm:$0xff]  ;;  %v5727_v19 = vld [vmem:[#allocation10 + $0x138] sm:$0xff]  ;;  %15803 = vst [vmem:[#allocation24_spill] sm:$0xff] %v14777_v58 }
 0xd3e   :  { %11819 = vmatprep.subr.bf16.mxu0 %v15474_v20  ;;  %11793 = vmatprep.subr.bf16.mxu1 %v14762_v54  ;;  %v14773_v1 = vpack.c.bf16 %v5727_v19, %v5724_v59  ;;  %15804 = vst [vmem:[#allocation18_spill] sm:$0xff] %v14779_v2  ;;  %v5735_v54 = vld [vmem:[#allocation10 + $0x178] sm:$0xff]  ;;  %v5881_v59 = vld [vmem:[#allocation12 + $0x20] sm:$0xff]  ;;  %v14783_v19 = vpack.c.bf16 %v5733_v16, %v5730_v51 }
 0xd3f   :  { %v14787_v32 = vpack.c.bf16 %v5735_v54, %v5732_v42  ;;  %v14800_v51 = vrot.slane %v669_v55, %v15808_v31  ;;  %v15810_v42 = vld [vmem:[#allocation61_spill] sm:$0xff] }
 0xd40   :  { %15802 = vst [vmem:[#allocation23_spill] sm:$0xff] %v14773_v1  ;;  %15805 = vst [vmem:[#allocation25_spill] sm:$0xff] %v14783_v19 }
 0xd41   :  { %11795 = vmatpush1.bf16.msra.mxu1 %v14765_v17  ;;  %11821 = vmatpush3.bf16.msra.mxu0 %v14768_v60  ;;  %v5878_v17 = vld [vmem:[#allocation12 + $0x8] sm:$0xff]  ;;  %15806 = vst [vmem:[#allocation26_spill] sm:$0xff] %v14787_v32  ;;  %15809 = vst [vmem:[#allocation27_spill] sm:$0xff] %v14800_v51 }
 0xd42   :  { %11797 = vmatprep.subr.bf16.mxu1 %v14770_v48  ;;  %11822 = vmatprep.subr.bf16.mxu0 %v15474_v20  ;;  %v14789_v8 = vpack.c.bf16 %v5881_v59, %v5878_v17 }
 0xd44   :  { %15807 = vst [vmem:[#allocation19_spill] sm:$0xff] %v14789_v8 }
 0xd45   :  { %11799 = vmatpush1.bf16.msra.mxu1 %v14773_v1  ;;  %11824 = vmatpush3.bf16.msra.mxu0 %v14777_v58 }
 0xd46   :  { %11801 = vmatprep.subr.bf16.mxu1 %v14779_v2  ;;  %11825 = vmatprep.subr.bf16.mxu0 %v15474_v20 }
 0xd49   :  { %11803 = vmatpush1.bf16.msra.mxu1 %v14783_v19  ;;  %11827 = vmatpush3.bf16.msra.mxu0 %v14787_v32  ;;  %v674_v19 = vrot.slane %v669_v55, %v15767_v34  ;;  %v678_v32 = vrot.slane %v669_v55, %v15768_v24 }
 0xd4a   :  { %11829 = vmatprep.subr.bf16.mxu1 %v14789_v8  ;;  %11860 = vmatprep.subr.bf16.mxu0 %v15474_v20 }
 0xd4b   :  { %v14807_v8 = vadd.f32 %v674_v19, %v14484_v18  ;;  %v14810_v2 = vadd.f32 %v678_v32, %v14487_v36  ;;  %v14817_v36 = vld [vmem:[%s15218_s6] ss:$0 sm:$0xff] }
 0xd4c   :  { %15813 = vst [vmem:[#allocation30_spill] sm:$0xff] %v14817_v36 }
 0xd4d   :  { %15811 = vst [vmem:[#allocation28_spill] sm:$0xff] %v14807_v8  ;;  %15812 = vst [vmem:[#allocation29_spill] sm:$0xff] %v14810_v2 }
 0xdde   :  { %v5465_v54 = vpop.f32.mrb[66].mxu0 }
 0xddf   :  { %v5466_v17 = vadd.f32 %v5465_v54, %v14800_v51  ;;  %v9668_v16 = vpop.f32.mrb[67].mxu0 }
 0xde1   :  { %v5476_v59 = vadd.f32 %v5466_v17, %v15810_v42  ;;  %v5877_v42 = vld [vmem:[#allocation12] sm:$0xff] }
 0xdfe   :  { %v5591_v58 = vpop.f32.mrb[4].mxu1  ;;  %v5662_v1 = vpop.f32.mrb[68].mxu0 }
 0xdff   :  { %v12385_v31 = vadd.f32 %v14807_v8, %v5591_v58  ;;  %v5593_v48 = vpop.f32.mrb[5].mxu1  ;;  %v9703_v60 = vpop.f32.mrb[69].mxu0  ;;  %v5680_v58 = vadd.f32 %v14817_v36, %v5662_v1  ;;  %v5890_v36 = vld [vmem:[#allocation12 + $0x68] sm:$0xff] }
 0xe00   :  { %v12387_v16 = vadd.f32 %v14810_v2, %v5593_v48 }
 0xe01   :  { %v7905_v54 = vmul.f32 -1.442695, %v12385_v31 }
 0xe02   :  { %v7906_v17 = vmul.f32 -1.442695, %v12387_v16  ;;  %v5879_v16 = vld [vmem:[#allocation12 + $0x10] sm:$0xff] }
 0xe03   :  { %12666 = vpow2.f32 %v7905_v54  ;;  %v5880_v54 = vld [vmem:[#allocation12 + $0x18] sm:$0xff] }
 0xe04   :  { %12668 = vpow2.f32 %v7906_v17  ;;  %v5882_v17 = vld [vmem:[#allocation12 + $0x28] sm:$0xff]  ;;  %v14821_v51 = vpack.c.bf16 %v5880_v54, %v5877_v42  ;;  %v5892_v42 = vld [vmem:[#allocation12 + $0x78] sm:$0xff] }
 0xe05   :  { %v14823_v1 = vpack.c.bf16 %v5882_v17, %v5879_v16  ;;  %v5894_v54 = vld [vmem:[#allocation12 + $0x88] sm:$0xff]  ;;  %v5896_v16 = vld [vmem:[#allocation12 + $0x98] sm:$0xff]  ;;  %v5899_v17 = vld [vmem:[#allocation12 + $0xb0] sm:$0xff] }
 0xe0d   :  { %v12667_v34 = vpop.eup %12666 }
 0xe0e   :  { %v5670_v24 = vadd.f32 1.0, %v12667_v34  ;;  %v12669_v18 = vpop.eup %12668 }
 0xe0f   :  { %v5677_v19 = vadd.f32 1.0, %v12669_v18  ;;  %v5887_v18 = vld [vmem:[#allocation12 + $0x50] sm:$0xff] }
 0xe10   :  { %12670 = vrcp.f32 %v5670_v24  ;;  %v5884_v24 = vld [vmem:[#allocation12 + $0x38] sm:$0xff] }
 0xe11   :  { %12672 = vrcp.f32 %v5677_v19 }
 0xe1a   :  { %v12671_v32 = vpop.eup %12670 }
 0xe1b   :  { %v5681_v60 = vmul.f32 %v12671_v32, %v5680_v58  ;;  %v12673_v48 = vpop.eup %12672  ;;  %v5883_v58 = vld [vmem:[#allocation12 + $0x30] sm:$0xff]  ;;  %v5886_v32 = vld [vmem:[#allocation12 + $0x48] sm:$0xff] }
 0xe1c   :  { %v5684_v31 = vsub.f32 1.0, %v12673_v48  ;;  %v5686_v8 = vmul.f32 %v12673_v48, %v14493_v53  ;;  %v14833_v53 = vpack.c.bf16 %v5886_v32, %v5883_v58  ;;  %v5897_v58 = vld [vmem:[#allocation12 + $0xa0] sm:$0xff]  ;;  %v5900_v32 = vld [vmem:[#allocation12 + $0xb8] sm:$0xff] }
 0xe1d   :  { %v5682_v55 = vadd.f32 %v5681_v60, %v5476_v59  ;;  %v14827_v59 = vpack.c.bf16 %v5887_v18, %v5884_v24  ;;  %v5885_v60 = vld [vmem:[#allocation12 + $0x40] sm:$0xff]  ;;  %v5898_v18 = vld [vmem:[#allocation12 + $0xa8] sm:$0xff] }
 0xe1e   :  { %15814 = vst [vmem:[#allocation31_spill] sm:$0xff] %v14833_v53 }
 0xe1f   :  { %12674 = vtanh.f32 %v5682_v55  ;;  %v5888_v55 = vld [vmem:[#allocation12 + $0x58] sm:$0xff] }
 0xe20   :  { %v14835_v48 = vpack.c.bf16 %v5888_v55, %v5885_v60  ;;  %v5902_v60 = vld [vmem:[#allocation12 + $0xc8] sm:$0xff]  ;;  %v5905_v55 = vld [vmem:[#allocation12 + $0xe0] sm:$0xff] }
 0xe22   :  { %15815 = vst [vmem:[#allocation32_spill] sm:$0xff] %v14835_v48 }
 0xe29   :  { %v12675_v34 = vpop.eup %12674 }
 0xe2a   :  { %v5685_v2 = vmul.f32 %v12675_v34, %v5684_v31  ;;  %v5891_v31 = vld [vmem:[#allocation12 + $0x70] sm:$0xff] }
 0xe2b   :  { %v14848_v24 = vpack.c.bf16 %v5894_v54, %v5891_v31  ;;  %v5901_v31 = vld [vmem:[#allocation12 + $0xc0] sm:$0xff]  ;;  %v14862_v54 = vpack.c.bf16 %v5905_v55, %v5902_v60  ;;  %v5910_v60 = vld [vmem:[#allocation12 + $0x108] sm:$0xff] }
 0xe2c   :  { %v14825_v19 = vadd.f32 %v5686_v8, %v5685_v2  ;;  %v5889_v2 = vld [vmem:[#allocation12 + $0x60] sm:$0xff]  ;;  %v14839_v8 = vpack.c.bf16 %v5893_v0, %v5890_v36  ;;  %v5895_v0 = vld [vmem:[#allocation12 + $0x90] sm:$0xff]  ;;  %v14852_v36 = vpack.c.bf16 %v5899_v17, %v5896_v16  ;;  %v5904_v16 = vld [vmem:[#allocation12 + $0xd8] sm:$0xff] }
 0xe2d   :  { %v14846_v34 = vpack.c.bf16 %v5892_v42, %v5889_v2  ;;  %15818 = vst [vmem:[#allocation35_spill] sm:$0xff] %v14848_v24  ;;  %v14856_v2 = vpack.c.bf16 %v5898_v18, %v5895_v0  ;;  %v14858_v42 = vpack.c.bf16 %v5900_v32, %v5897_v58  ;;  %15822 = vst [vmem:[#allocation39_spill] sm:$0xff] %v14862_v54  ;;  %v5903_v17 = vld [vmem:[#allocation12 + $0xd0] sm:$0xff]  ;;  %v5909_v55 = vld [vmem:[#allocation12 + $0x100] sm:$0xff] }
 0xe2e   :  { %5801 = vmatmul.mubr.f32.vlgmr.msra.gmra.mrb[44].mxu1 %v14825_v19  ;;  %9737 = vmatmul.mubr.f32.vlgmr.msra.gmra.mrb[70].mxu0 %v14825_v19  ;;  %15816 = vst [vmem:[#allocation33_spill] sm:$0xff] %v14839_v8  ;;  %15819 = vst [vmem:[#allocation36_spill] sm:$0xff] %v14852_v36  ;;  %v14866_v0 = vpack.c.bf16 %v5904_v16, %v5901_v31  ;;  %v5907_v58 = vld [vmem:[#allocation12 + $0xf0] sm:$0xff]  ;;  %v5913_v16 = vld [vmem:[#allocation12 + $0x120] sm:$0xff] }
 0xe2f   :  { %11831 = vmatpush1.bf16.msra.mxu1 %v14821_v51  ;;  %11862 = vmatpush3.bf16.msra.mxu0 %v14823_v1  ;;  %15817 = vst [vmem:[#allocation34_spill] sm:$0xff] %v14846_v34  ;;  %15820 = vst [vmem:[#allocation37_spill] sm:$0xff] %v14856_v2  ;;  %v14876_v31 = vpack.c.bf16 %v5910_v60, %v5907_v58  ;;  %v5919_v60 = vld [vmem:[#allocation12 + $0x150] sm:$0xff] }
 0xe30   :  { %11833 = vmatprep.subr.bf16.mxu1 %v14827_v59  ;;  %11863 = vmatprep.subr.bf16.mxu0 %v15474_v20  ;;  %15821 = vst [vmem:[#allocation38_spill] sm:$0xff] %v14858_v42 }
 0xe31   :  { %5989 = vmatprep.mubr.f32.mxu1 %v15476_v38  ;;  %9771 = vmatprep.mubr.msk.f32.mxu0 %vm12860_vm1, %v15476_v38  ;;  %15824 = vst [vmem:[#allocation41_spill] sm:$0xff] %v14876_v31 }
 0xe33   :  { %11835 = vmatpush1.bf16.msra.mxu1 %v14833_v53  ;;  %11865 = vmatpush3.bf16.msra.mxu0 %v14835_v48  ;;  %v5908_v48 = vld [vmem:[#allocation12 + $0xf8] sm:$0xff]  ;;  %v5911_v53 = vld [vmem:[#allocation12 + $0x110] sm:$0xff] }
 0xe34   :  { %11837 = vmatprep.subr.bf16.mxu1 %v14839_v8  ;;  %11866 = vmatprep.subr.bf16.mxu0 %v15474_v20  ;;  %v5906_v8 = vld [vmem:[#allocation12 + $0xe8] sm:$0xff]  ;;  %v14872_v32 = vpack.c.bf16 %v5911_v53, %v5908_v48  ;;  %v5916_v48 = vld [vmem:[#allocation12 + $0x138] sm:$0xff] }
 0xe35   :  { %v14868_v18 = vpack.c.bf16 %v5906_v8, %v5903_v17  ;;  %v5915_v17 = vld [vmem:[#allocation12 + $0x130] sm:$0xff]  ;;  %v14886_v58 = vpack.c.bf16 %v5916_v48, %v5913_v16 }
 0xe36   :  { %15823 = vst [vmem:[#allocation40_spill] sm:$0xff] %v14872_v32  ;;  %v15839_v48 = vld [vmem:[#allocation82_spill] sm:$0xff] }
 0xe37   :  { %11839 = vmatpush1.bf16.msra.mxu1 %v14846_v34  ;;  %11868 = vmatpush3.bf16.msra.mxu0 %v14848_v24  ;;  %v5914_v24 = vld [vmem:[#allocation12 + $0x128] sm:$0xff]  ;;  %v5917_v34 = vld [vmem:[#allocation12 + $0x140] sm:$0xff] }
 0xe38   :  { %11841 = vmatprep.subr.bf16.mxu1 %v14852_v36  ;;  %11869 = vmatprep.subr.bf16.mxu0 %v15474_v20  ;;  %v5912_v36 = vld [vmem:[#allocation12 + $0x118] sm:$0xff]  ;;  %v14882_v53 = vpack.c.bf16 %v5917_v34, %v5914_v24  ;;  %v5922_v24 = vld [vmem:[#allocation12 + $0x168] sm:$0xff] }
 0xe39   :  { %v14878_v8 = vpack.c.bf16 %v5912_v36, %v5909_v55  ;;  %v5921_v55 = vld [vmem:[#allocation12 + $0x160] sm:$0xff] }
 0xe3b   :  { %11843 = vmatpush1.bf16.msra.mxu1 %v14856_v2  ;;  %11871 = vmatpush3.bf16.msra.mxu0 %v14858_v42  ;;  %v5920_v42 = vld [vmem:[#allocation12 + $0x158] sm:$0xff]  ;;  %v5923_v2 = vld [vmem:[#allocation12 + $0x170] sm:$0xff] }
 0xe3c   :  { %11845 = vmatprep.subr.bf16.mxu1 %v14862_v54  ;;  %11872 = vmatprep.subr.bf16.mxu0 %v15474_v20  ;;  %v5918_v54 = vld [vmem:[#allocation12 + $0x148] sm:$0xff]  ;;  %v14892_v34 = vpack.c.bf16 %v5923_v2, %v5920_v42  ;;  %v15836_v42 = vld [vmem:[#allocation79_spill] sm:$0xff] }
 0xe3d   :  { %v14888_v36 = vpack.c.bf16 %v5918_v54, %v5915_v17  ;;  %v15837_v54 = vld [vmem:[#allocation80_spill] sm:$0xff] }
 0xe3e   :  { %v15840_v17 = vld [vmem:[#allocation68_spill] sm:$0xff] }
 0xe3f   :  { %11847 = vmatpush1.bf16.msra.mxu1 %v14866_v0  ;;  %11874 = vmatpush3.bf16.msra.mxu0 %v14868_v18 }
 0xe40   :  { %11849 = vmatprep.subr.bf16.mxu1 %v14872_v32  ;;  %11875 = vmatprep.subr.bf16.mxu0 %v15474_v20  ;;  %v5924_v32 = vld [vmem:[#allocation12 + $0x178] sm:$0xff] }
 0xe41   :  { %v14898_v16 = vpack.c.bf16 %v5924_v32, %v5921_v55  ;;  %v15838_v32 = vld [vmem:[#allocation81_spill] sm:$0xff]  ;;  %v15843_v55 = vld [vmem:[#allocation87_spill] sm:$0xff] }
 0xe43   :  { %11851 = vmatpush1.bf16.msra.mxu1 %v14876_v31  ;;  %11877 = vmatpush3.bf16.msra.mxu0 %v14878_v8  ;;  %v14896_v31 = vpack.c.bf16 %v5922_v24, %v5919_v60  ;;  %v15841_v60 = vld [vmem:[#allocation57_spill] sm:$0xff]  ;;  %v15842_v24 = vld [vmem:[#allocation56_spill] sm:$0xff] }
 0xe44   :  { %11853 = vmatprep.subr.bf16.mxu1 %v14882_v53  ;;  %11878 = vmatprep.subr.bf16.mxu0 %v15474_v20 }
 0xe47   :  { %11855 = vmatpush1.bf16.msra.mxu1 %v14886_v58  ;;  %11880 = vmatpush3.bf16.msra.mxu0 %v14888_v36 }
 0xe48   :  { %11857 = vmatprep.subr.bf16.mxu1 %v14892_v34  ;;  %11881 = vmatprep.subr.bf16.mxu0 %v15474_v20 }
 0xe4b   :  { %11859 = vmatpush1.bf16.msra.mxu1 %v14896_v31  ;;  %11883 = vmatpush3.bf16.msra.mxu0 %v14898_v16 }
 0xe4c   :  { %11885 = vmatprep.subr.bf16.mxu1 %v14536_v9  ;;  %11916 = vmatprep.subr.bf16.mxu0 %v15474_v20 }
 0xe4e   :  { %5990 = vmatmul.mubr.f32.vlgmr.msra.gmra.mrb[44].mxu1 %v14628_v26  ;;  %9772 = vmatmul.mubr.f32.vlgmr.msra.gmra.mrb[72].mxu0 %v14628_v26 }
 0xe4f   :  { %11887 = vmatpush1.bf16.msra.mxu1 %v14538_v23  ;;  %11918 = vmatpush3.bf16.msra.mxu0 %v14541_v62 }
 0xe50   :  { %11889 = vmatprep.subr.bf16.mxu1 %v14545_v44  ;;  %11919 = vmatprep.subr.bf16.mxu0 %v15474_v20 }
 0xe51   :  { %6202 = vmatprep.mubr.f32.mxu1 %v15476_v38  ;;  %9806 = vmatprep.mubr.msk.f32.mxu0 %vm12860_vm1, %v15476_v38 }
 0xe53   :  { %11891 = vmatpush1.bf16.msra.mxu1 %v14548_v6  ;;  %11921 = vmatpush3.bf16.msra.mxu0 %v14551_v5 }
 0xe54   :  { %11893 = vmatprep.subr.bf16.mxu1 %v14555_v37  ;;  %11922 = vmatprep.subr.bf16.mxu0 %v15474_v20 }
 0xe57   :  { %11895 = vmatpush1.bf16.msra.mxu1 %v14558_v25  ;;  %11924 = vmatpush3.bf16.msra.mxu0 %v14561_v11 }
 0xe58   :  { %11897 = vmatprep.subr.bf16.mxu1 %v14565_v15  ;;  %11925 = vmatprep.subr.bf16.mxu0 %v15474_v20 }
 0xe5b   :  { %11899 = vmatpush1.bf16.msra.mxu1 %v14568_v49  ;;  %11927 = vmatpush3.bf16.msra.mxu0 %v14571_v40 }
 0xe5c   :  { %11901 = vmatprep.subr.bf16.mxu1 %v14575_v61  ;;  %11928 = vmatprep.subr.bf16.mxu0 %v15474_v20 }
 0xe5f   :  { %11903 = vmatpush1.bf16.msra.mxu1 %v14578_v41  ;;  %11930 = vmatpush3.bf16.msra.mxu0 %v14581_v45  ;;  %v14948_v45 = vld [vmem:[%s15225_s13] ss:$0 sm:$0xff] }
 0xe60   :  { %11905 = vmatprep.subr.bf16.mxu1 %v14585_v63  ;;  %11931 = vmatprep.subr.bf16.mxu0 %v15474_v20 }
 0xe63   :  { %11907 = vmatpush1.bf16.msra.mxu1 %v14588_v46  ;;  %11933 = vmatpush3.bf16.msra.mxu0 %v14591_v56 }
 0xe64   :  { %11909 = vmatprep.subr.bf16.mxu1 %v14595_v29  ;;  %11934 = vmatprep.subr.bf16.mxu0 %v15474_v20 }
 0xe67   :  { %11911 = vmatpush1.bf16.msra.mxu1 %v14598_v39  ;;  %11936 = vmatpush3.bf16.msra.mxu0 %v14601_v7 }
 0xe68   :  { %11913 = vmatprep.subr.bf16.mxu1 %v14605_v35  ;;  %11937 = vmatprep.subr.bf16.mxu0 %v15474_v20 }
 0xe6b   :  { %11915 = vmatpush1.bf16.msra.mxu1 %v14608_v43  ;;  %11939 = vmatpush3.bf16.msra.mxu0 %v14611_v27 }
 0xe6c   :  { %11941 = vmatprep.subr.bf16.mxu1 %v14615_v28  ;;  %11972 = vmatprep.subr.bf16.mxu0 %v15474_v20 }
 0xf01   :  { %v5873_v9 = vpop.f32.mrb[70].mxu0 }
 0xf02   :  { %v9738_v23 = vpop.f32.mrb[71].mxu0  ;;  %v5874_v56 = vadd.f32 %v5873_v9, %v13563_v13  ;;  %v15844_v9 = vld [vmem:[#allocation60_spill] sm:$0xff] }
 0xf03   :  { %v15845_v23 = vld [vmem:[#allocation58_spill] sm:$0xff] }
 0xf21   :  { %v5991_v62 = vpop.f32.mrb[44].mxu1  ;;  %v6062_v44 = vpop.f32.mrb[72].mxu0 }
 0xf22   :  { %v12414_v6 = vadd.f32 %v5991_v62, %v15688_v12  ;;  %v5993_v5 = vpop.f32.mrb[45].mxu1  ;;  %v9773_v37 = vpop.f32.mrb[73].mxu0  ;;  %v6080_v63 = vadd.f32 %v14948_v45, %v6062_v44  ;;  %v15846_v62 = vld [vmem:[#allocation85_spill] sm:$0xff]  ;;  %v15847_v44 = vld [vmem:[#allocation86_spill] sm:$0xff] }
 0xf23   :  { %v12415_v11 = vadd.f32 %v5993_v5, %v15689_v21  ;;  %v15849_v5 = vld [vmem:[#allocation20_spill] sm:$0xff]  ;;  %v15850_v37 = vld [vmem:[#allocation67_spill] sm:$0xff] }
 0xf24   :  { %v7907_v25 = vmul.f32 -1.442695, %v12414_v6  ;;  %v15848_v6 = vld [vmem:[#allocation54_spill] sm:$0xff] }
 0xf25   :  { %v7908_v15 = vmul.f32 -1.442695, %v12415_v11  ;;  %v15852_v11 = vld [vmem:[#allocation16_spill] sm:$0xff] }
 0xf26   :  { %12676 = vpow2.f32 %v7907_v25  ;;  %v15851_v25 = vld [vmem:[#allocation53_spill] sm:$0xff] }
 0xf27   :  { %12678 = vpow2.f32 %v7908_v15  ;;  %v15853_v15 = vld [vmem:[#allocation21_spill] sm:$0xff] }
 0xf30   :  { %v12677_v49 = vpop.eup %12676 }
 0xf31   :  { %v6070_v40 = vadd.f32 1.0, %v12677_v49  ;;  %v12679_v61 = vpop.eup %12678  ;;  %v15854_v49 = vld [vmem:[#allocation22_spill] sm:$0xff] }
 0xf32   :  { %v6077_v41 = vadd.f32 1.0, %v12679_v61  ;;  %v15856_v61 = vld [vmem:[#allocation23_spill] sm:$0xff] }
 0xf33   :  { %12680 = vrcp.f32 %v6070_v40  ;;  %v15855_v40 = vld [vmem:[#allocation17_spill] sm:$0xff] }
 0xf34   :  { %12682 = vrcp.f32 %v6077_v41  ;;  %v15857_v41 = vld [vmem:[#allocation24_spill] sm:$0xff] }
 0xf3d   :  { %v12681_v46 = vpop.eup %12680 }
 0xf3e   :  { %v6081_v29 = vmul.f32 %v12681_v46, %v6080_v63  ;;  %v12683_v7 = vpop.eup %12682  ;;  %v15858_v63 = vld [vmem:[#allocation18_spill] sm:$0xff]  ;;  %v15859_v46 = vld [vmem:[#allocation25_spill] sm:$0xff] }
 0xf3f   :  { %v6084_v35 = vsub.f32 1.0, %v12683_v7  ;;  %v6086_v28 = vmul.f32 %v12683_v7, %v14628_v26  ;;  %v15862_v7 = vld [vmem:[#allocation27_spill] sm:$0xff] }
 0xf40   :  { %v6082_v39 = vadd.f32 %v6081_v29, %v5874_v56  ;;  %v15860_v56 = vld [vmem:[#allocation26_spill] sm:$0xff]  ;;  %v15861_v29 = vld [vmem:[#allocation19_spill] sm:$0xff] }
 0xf42   :  { %12684 = vtanh.f32 %v6082_v39 }
 0xf4c   :  { %v12685_v43 = vpop.eup %12684 }
 0xf4d   :  { %v6085_v27 = vmul.f32 %v12685_v43, %v6084_v35 }
 0xf4f   :  { %v14953_v2 = vadd.f32 %v6086_v28, %v6085_v27  ;;  %v15863_v27 = vld [vmem:[#allocation64_spill] sm:$0xff] }
 0xf51   :  { %6203 = vmatmul.mubr.f32.vlgmr.msra.gmra.mrb[6].mxu1 %v14953_v2  ;;  %9807 = vmatmul.mubr.f32.vlgmr.msra.gmra.mrb[74].mxu0 %v14953_v2 }
 0xf52   :  { %11943 = vmatpush1.bf16.msra.mxu1 %v14624_v10  ;;  %11974 = vmatpush3.bf16.msra.mxu0 %v14626_v3  ;;  %v15825_v10 = vld [vmem:[#allocation55_spill] sm:$0xff]  ;;  %v15826_v3 = vld [vmem:[#allocation69_spill] sm:$0xff] }
 0xf53   :  { %11945 = vmatprep.subr.bf16.mxu1 %v14630_v30  ;;  %11975 = vmatprep.subr.bf16.mxu0 %v15474_v20  ;;  %v15827_v30 = vld [vmem:[#allocation70_spill] sm:$0xff] }
 0xf54   :  { %6399 = vmatprep.mubr.f32.mxu1 %v15476_v38  ;;  %9841 = vmatprep.mubr.msk.f32.mxu0 %vm12860_vm1, %v15476_v38 }
 0xf56   :  { %11947 = vmatpush1.bf16.msra.mxu1 %v14636_v57  ;;  %11977 = vmatpush3.bf16.msra.mxu0 %v14638_v33  ;;  %v15828_v57 = vld [vmem:[#allocation71_spill] sm:$0xff]  ;;  %v15829_v33 = vld [vmem:[#allocation72_spill] sm:$0xff] }
 0xf57   :  { %11949 = vmatprep.subr.bf16.mxu1 %v14642_v22  ;;  %11978 = vmatprep.subr.bf16.mxu0 %v15474_v20  ;;  %v15830_v22 = vld [vmem:[#allocation73_spill] sm:$0xff] }
 0xf5a   :  { %11951 = vmatpush1.bf16.msra.mxu1 %v14649_v50  ;;  %11980 = vmatpush3.bf16.msra.mxu0 %v14651_v47  ;;  %v15831_v50 = vld [vmem:[#allocation74_spill] sm:$0xff]  ;;  %v15832_v47 = vld [vmem:[#allocation75_spill] sm:$0xff] }
 0xf5b   :  { %11953 = vmatprep.subr.bf16.mxu1 %v14655_v14  ;;  %11981 = vmatprep.subr.bf16.mxu0 %v15474_v20  ;;  %v15833_v14 = vld [vmem:[#allocation76_spill] sm:$0xff] }
 0xf5e   :  { %11955 = vmatpush1.bf16.msra.mxu1 %v14659_v4  ;;  %11983 = vmatpush3.bf16.msra.mxu0 %v15825_v10  ;;  %v15834_v4 = vld [vmem:[#allocation77_spill] sm:$0xff] }
 0xf5f   :  { %11957 = vmatprep.subr.bf16.mxu1 %v15826_v3  ;;  %11984 = vmatprep.subr.bf16.mxu0 %v15474_v20 }
 0xf62   :  { %11959 = vmatpush1.bf16.msra.mxu1 %v14669_v52  ;;  %11986 = vmatpush3.bf16.msra.mxu0 %v15827_v30  ;;  %v15835_v52 = vld [vmem:[#allocation78_spill] sm:$0xff]  ;;  %v15864_v30 = vld [vmem:[#allocation28_spill] sm:$0xff] }
 0xf63   :  { %11961 = vmatprep.subr.bf16.mxu1 %v15828_v57  ;;  %11987 = vmatprep.subr.bf16.mxu0 %v15474_v20 }
 0xf66   :  { %11963 = vmatpush1.bf16.msra.mxu1 %v15829_v33  ;;  %11989 = vmatpush3.bf16.msra.mxu0 %v15830_v22 }
 0xf67   :  { %11965 = vmatprep.subr.bf16.mxu1 %v15831_v50  ;;  %11990 = vmatprep.subr.bf16.mxu0 %v15474_v20 }
 0xf6a   :  { %11967 = vmatpush1.bf16.msra.mxu1 %v15832_v47  ;;  %11992 = vmatpush3.bf16.msra.mxu0 %v15833_v14  ;;  %v15865_v47 = vld [vmem:[#allocation29_spill] sm:$0xff] }
 0xf6b   :  { %11969 = vmatprep.subr.bf16.mxu1 %v15834_v4  ;;  %11993 = vmatprep.subr.bf16.mxu0 %v15474_v20 }
 0xf6e   :  { %11971 = vmatpush1.bf16.msra.mxu1 %v15835_v52  ;;  %11995 = vmatpush3.bf16.msra.mxu0 %v15836_v42 }
 0xf6f   :  { %11997 = vmatprep.subr.bf16.mxu1 %v15837_v54  ;;  %12028 = vmatprep.subr.bf16.mxu0 %v15474_v20 }
 0xf71   :  { %6400 = vmatmul.mubr.f32.vlgmr.msra.gmra.mrb[6].mxu1 %v14825_v19  ;;  %9842 = vmatmul.mubr.f32.vlgmr.msra.gmra.mrb[76].mxu0 %v14825_v19 }
 0xf72   :  { %11999 = vmatpush1.bf16.msra.mxu1 %v15838_v32  ;;  %12030 = vmatpush3.bf16.msra.mxu0 %v15839_v48  ;;  %v15866_v48 = vld [vmem:[#allocation30_spill] sm:$0xff] }
 0xf73   :  { %12001 = vmatprep.subr.bf16.mxu1 %v15840_v17  ;;  %12031 = vmatprep.subr.bf16.mxu0 %v15474_v20 }
 0xf74   :  { %6610 = vmatprep.mubr.f32.mxu1 %v15476_v38  ;;  %9876 = vmatprep.mubr.msk.f32.mxu0 %vm12860_vm1, %v15476_v38 }
 0xf76   :  { %12003 = vmatpush1.bf16.msra.mxu1 %v15841_v60  ;;  %12033 = vmatpush3.bf16.msra.mxu0 %v15842_v24 }
 0xf77   :  { %12005 = vmatprep.subr.bf16.mxu1 %v15843_v55  ;;  %12034 = vmatprep.subr.bf16.mxu0 %v15474_v20 }
 0xf7a   :  { %12007 = vmatpush1.bf16.msra.mxu1 %v15844_v9  ;;  %12036 = vmatpush3.bf16.msra.mxu0 %v15845_v23 }
 0xf7b   :  { %12009 = vmatprep.subr.bf16.mxu1 %v15846_v62  ;;  %12037 = vmatprep.subr.bf16.mxu0 %v15474_v20 }
 0xf7e   :  { %12011 = vmatpush1.bf16.msra.mxu1 %v15847_v44  ;;  %12039 = vmatpush3.bf16.msra.mxu0 %v15848_v6 }
 0xf7f   :  { %12013 = vmatprep.subr.bf16.mxu1 %v15849_v5  ;;  %12040 = vmatprep.subr.bf16.mxu0 %v15474_v20 }
 0xf82   :  { %12015 = vmatpush1.bf16.msra.mxu1 %v15850_v37  ;;  %12042 = vmatpush3.bf16.msra.mxu0 %v15851_v25  ;;  %v15868_v37 = vld [vmem:[#allocation32_spill] sm:$0xff]  ;;  %v15869_v25 = vld [vmem:[#allocation33_spill] sm:$0xff] }
 0xf83   :  { %12017 = vmatprep.subr.bf16.mxu1 %v15852_v11  ;;  %12043 = vmatprep.subr.bf16.mxu0 %v15474_v20  ;;  %v15873_v11 = vld [vmem:[#allocation37_spill] sm:$0xff] }
 0xf86   :  { %12019 = vmatpush1.bf16.msra.mxu1 %v15853_v15  ;;  %12045 = vmatpush3.bf16.msra.mxu0 %v15854_v49  ;;  %v15874_v15 = vld [vmem:[#allocation38_spill] sm:$0xff]  ;;  %v15875_v49 = vld [vmem:[#allocation39_spill] sm:$0xff] }
 0xf87   :  { %12021 = vmatprep.subr.bf16.mxu1 %v15855_v40  ;;  %12046 = vmatprep.subr.bf16.mxu0 %v15474_v20  ;;  %v15876_v40 = vld [vmem:[#allocation40_spill] sm:$0xff] }
 0xf8a   :  { %12023 = vmatpush1.bf16.msra.mxu1 %v15856_v61  ;;  %12048 = vmatpush3.bf16.msra.mxu0 %v15857_v41  ;;  %v15877_v61 = vld [vmem:[#allocation41_spill] sm:$0xff]  ;;  %v6907_v41 = vld [vmem:[#allocation9 + $0x38] sm:$0xff] }
 0xf8b   :  { %12025 = vmatprep.subr.bf16.mxu1 %v15858_v63  ;;  %12049 = vmatprep.subr.bf16.mxu0 %v15474_v20  ;;  %v6910_v63 = vld [vmem:[#allocation9 + $0x50] sm:$0xff] }
 0xf8e   :  { %12027 = vmatpush1.bf16.msra.mxu1 %v15859_v46  ;;  %12051 = vmatpush3.bf16.msra.mxu0 %v15860_v56  ;;  %v12112_v46 = vpack.c.bf16 %v6910_v63, %v6907_v41  ;;  %v6906_v56 = vld [vmem:[#allocation9 + $0x30] sm:$0xff]  ;;  %v6941_v41 = vld [vmem:[#allocation9 + $0x148] sm:$0xff] }
 0xf8f   :  { %12053 = vmatprep.subr.bf16.mxu1 %v15861_v29  ;;  %12084 = vmatprep.subr.bf16.mxu0 %v15474_v20  ;;  %v6909_v29 = vld [vmem:[#allocation9 + $0x48] sm:$0xff] }
0x1024   :  { %v6275_v39 = vpop.f32.mrb[74].mxu0 }
0x1025   :  { %v6276_v35 = vadd.f32 %v6275_v39, %v15862_v7  ;;  %v9808_v43 = vpop.f32.mrb[75].mxu0  ;;  %v6908_v39 = vld [vmem:[#allocation9 + $0x40] sm:$0xff] }
0x1026   :  { %v6911_v43 = vld [vmem:[#allocation9 + $0x58] sm:$0xff] }
0x1027   :  { %v6286_v28 = vadd.f32 %v6276_v35, %v15863_v27  ;;  %v12114_v35 = vpack.c.bf16 %v6909_v29, %v6906_v56  ;;  %v12144_v27 = vpack.c.bf16 %v6911_v43, %v6908_v39  ;;  %v6946_v56 = vld [vmem:[#allocation9 + $0x170] sm:$0xff]  ;;  %v6944_v43 = vld [vmem:[#allocation9 + $0x160] sm:$0xff] }
0x1028   :  { %v6942_v39 = vld [vmem:[#allocation9 + $0x150] sm:$0xff] }
0x1044   :  { %v6401_v10 = vpop.f32.mrb[6].mxu1  ;;  %v6472_v3 = vpop.f32.mrb[76].mxu0 }
0x1045   :  { %v12389_v57 = vadd.f32 %v15864_v30, %v6401_v10  ;;  %v6403_v33 = vpop.f32.mrb[7].mxu1  ;;  %v9843_v22 = vpop.f32.mrb[77].mxu0  ;;  %v6490_v17 = vadd.f32 %v15866_v48, %v6472_v3  ;;  %v6916_v10 = vld [vmem:[#allocation9 + $0x80] sm:$0xff]  ;;  %v6921_v48 = vld [vmem:[#allocation9 + $0xa8] sm:$0xff] }
0x1046   :  { %v12391_v14 = vadd.f32 %v15865_v47, %v6403_v33  ;;  %v6915_v33 = vld [vmem:[#allocation9 + $0x78] sm:$0xff]  ;;  %v6914_v22 = vld [vmem:[#allocation9 + $0x70] sm:$0xff] }
0x1047   :  { %v7909_v50 = vmul.f32 -1.442695, %v12389_v57  ;;  %v6912_v57 = vld [vmem:[#allocation9 + $0x60] sm:$0xff] }
0x1048   :  { %v7910_v4 = vmul.f32 -1.442695, %v12391_v14  ;;  %v6917_v14 = vld [vmem:[#allocation9 + $0x88] sm:$0xff] }
0x1049   :  { %12686 = vpow2.f32 %v7909_v50  ;;  %v12118_v50 = vpack.c.bf16 %v6915_v33, %v6912_v57  ;;  %v7101_v57 = vld [vmem:[#allocation5 + $0x20] sm:$0xff] }
0x104a   :  { %12688 = vpow2.f32 %v7910_v4  ;;  %v12147_v4 = vpack.c.bf16 %v6917_v14, %v6914_v22 }
0x1053   :  { %v12687_v52 = vpop.eup %12686 }
0x1054   :  { %v6480_v42 = vadd.f32 1.0, %v12687_v52  ;;  %v12689_v54 = vpop.eup %12688  ;;  %v6919_v52 = vld [vmem:[#allocation9 + $0x98] sm:$0xff] }
0x1055   :  { %v6487_v32 = vadd.f32 1.0, %v12689_v54 }
0x1056   :  { %12690 = vrcp.f32 %v6480_v42  ;;  %v6922_v42 = vld [vmem:[#allocation9 + $0xb0] sm:$0xff] }
0x1057   :  { %12692 = vrcp.f32 %v6487_v32  ;;  %v12120_v54 = vpack.c.bf16 %v6922_v42, %v6919_v52  ;;  %v6918_v32 = vld [vmem:[#allocation9 + $0x90] sm:$0xff] }
0x1060   :  { %v12691_v60 = vpop.eup %12690 }
0x1061   :  { %v6491_v24 = vmul.f32 %v12691_v60, %v6490_v17  ;;  %v12693_v9 = vpop.eup %12692  ;;  %v6920_v17 = vld [vmem:[#allocation9 + $0xa0] sm:$0xff]  ;;  %v12122_v60 = vpack.c.bf16 %v6921_v48, %v6918_v32 }
0x1062   :  { %v6494_v23 = vsub.f32 1.0, %v12693_v9  ;;  %v6496_v6 = vmul.f32 %v12693_v9, %v14825_v19  ;;  %v15867_v19 = vld [vmem:[#allocation31_spill] sm:$0xff]  ;;  %v6925_v9 = vld [vmem:[#allocation9 + $0xc8] sm:$0xff] }
0x1063   :  { %v6492_v55 = vadd.f32 %v6491_v24, %v6286_v28  ;;  %v6913_v28 = vld [vmem:[#allocation9 + $0x68] sm:$0xff]  ;;  %v6923_v24 = vld [vmem:[#allocation9 + $0xb8] sm:$0xff] }
0x1064   :  { %v12116_v3 = vpack.c.bf16 %v6916_v10, %v6913_v28  ;;  %v6947_v28 = vld [vmem:[#allocation9 + $0x178] sm:$0xff] }
0x1065   :  { %12694 = vtanh.f32 %v6492_v55  ;;  %v12150_v55 = vpack.c.bf16 %v6923_v24, %v6920_v17  ;;  %v12162_v10 = vpack.c.bf16 %v6947_v28, %v6944_v43  ;;  %v7114_v43 = vld [vmem:[#allocation5 + $0x88] sm:$0xff]  ;;  %v7119_v28 = vld [vmem:[#allocation5 + $0xb0] sm:$0xff] }
0x106f   :  { %v12695_v62 = vpop.eup %12694 }
0x1070   :  { %v6495_v44 = vmul.f32 %v12695_v62, %v6494_v23  ;;  %v6928_v23 = vld [vmem:[#allocation9 + $0xe0] sm:$0xff] }
0x1071   :  { %v12124_v62 = vpack.c.bf16 %v6928_v23, %v6925_v9 }
0x1072   :  { %v15035_v5 = vadd.f32 %v6496_v6, %v6495_v44  ;;  %v6924_v44 = vld [vmem:[#allocation9 + $0xc0] sm:$0xff]  ;;  %v6927_v6 = vld [vmem:[#allocation9 + $0xd8] sm:$0xff] }
0x1074   :  { %6611 = vmatmul.mubr.f32.vlgmr.msra.gmra.mrb[46].mxu1 %v15035_v5  ;;  %9877 = vmatmul.mubr.f32.vlgmr.msra.gmra.mrb[78].mxu0 %v15035_v5 }
0x1075   :  { %12055 = vmatpush1.bf16.msra.mxu1 %v14821_v51  ;;  %12086 = vmatpush3.bf16.msra.mxu0 %v14823_v1  ;;  %v15870_v51 = vld [vmem:[#allocation34_spill] sm:$0xff]  ;;  %v15871_v1 = vld [vmem:[#allocation35_spill] sm:$0xff] }
0x1076   :  { %12057 = vmatprep.subr.bf16.mxu1 %v14827_v59  ;;  %12087 = vmatprep.subr.bf16.mxu0 %v15474_v20  ;;  %v15872_v59 = vld [vmem:[#allocation36_spill] sm:$0xff] }
0x1077   :  { %6799 = vmatprep.mubr.f32.mxu1 %v15476_v38  ;;  %9911 = vmatprep.mubr.msk.f32.mxu0 %vm12860_vm1, %v15476_v38 }
0x1079   :  { %12059 = vmatpush1.bf16.msra.mxu1 %v15867_v19  ;;  %12089 = vmatpush3.bf16.msra.mxu0 %v15868_v37  ;;  %v6926_v19 = vld [vmem:[#allocation9 + $0xd0] sm:$0xff]  ;;  %v12126_v37 = vpack.c.bf16 %v6927_v6, %v6924_v44 }
0x107a   :  { %12061 = vmatprep.subr.bf16.mxu1 %v15869_v25  ;;  %12090 = vmatprep.subr.bf16.mxu0 %v15474_v20  ;;  %v6929_v25 = vld [vmem:[#allocation9 + $0xe8] sm:$0xff] }
0x107d   :  { %12063 = vmatpush1.bf16.msra.mxu1 %v15870_v51  ;;  %12092 = vmatpush3.bf16.msra.mxu0 %v15871_v1  ;;  %v12153_v51 = vpack.c.bf16 %v6929_v25, %v6926_v19  ;;  %v6931_v1 = vld [vmem:[#allocation9 + $0xf8] sm:$0xff]  ;;  %v7097_v25 = vld [vmem:[#allocation5] sm:$0xff] }
0x107e   :  { %12065 = vmatprep.subr.bf16.mxu1 %v15872_v59  ;;  %12093 = vmatprep.subr.bf16.mxu0 %v15474_v20  ;;  %v6934_v59 = vld [vmem:[#allocation9 + $0x110] sm:$0xff] }
0x1081   :  { %12067 = vmatpush1.bf16.msra.mxu1 %v15873_v11  ;;  %12095 = vmatpush3.bf16.msra.mxu0 %v15874_v15  ;;  %v12128_v11 = vpack.c.bf16 %v6934_v59, %v6931_v1  ;;  %v6930_v15 = vld [vmem:[#allocation9 + $0xf0] sm:$0xff]  ;;  %v7100_v1 = vld [vmem:[#allocation5 + $0x18] sm:$0xff] }
0x1082   :  { %12069 = vmatprep.subr.bf16.mxu1 %v15875_v49  ;;  %12096 = vmatprep.subr.bf16.mxu0 %v15474_v20  ;;  %v6933_v49 = vld [vmem:[#allocation9 + $0x108] sm:$0xff]  ;;  %v7099_v59 = vld [vmem:[#allocation5 + $0x10] sm:$0xff] }
0x1085   :  { %12071 = vmatpush1.bf16.msra.mxu1 %v14866_v0  ;;  %12098 = vmatpush3.bf16.msra.mxu0 %v14868_v18  ;;  %v6901_v0 = vld [vmem:[#allocation9 + $0x8] sm:$0xff]  ;;  %v6904_v18 = vld [vmem:[#allocation9 + $0x20] sm:$0xff] }
0x1086   :  { %12073 = vmatprep.subr.bf16.mxu1 %v15876_v40  ;;  %12099 = vmatprep.subr.bf16.mxu0 %v15474_v20  ;;  %v6932_v40 = vld [vmem:[#allocation9 + $0x100] sm:$0xff] }
0x1089   :  { %12075 = vmatpush1.bf16.msra.mxu1 %v15877_v61  ;;  %12101 = vmatpush3.bf16.msra.mxu0 %v14878_v8  ;;  %v12108_v8 = vpack.c.bf16 %v6904_v18, %v6901_v0  ;;  %v12130_v61 = vpack.c.bf16 %v6933_v49, %v6930_v15  ;;  %v6935_v0 = vld [vmem:[#allocation9 + $0x118] sm:$0xff] }
0x108a   :  { %12077 = vmatprep.subr.bf16.mxu1 %v14882_v53  ;;  %12102 = vmatprep.subr.bf16.mxu0 %v15474_v20  ;;  %v6900_v53 = vld [vmem:[#allocation9] sm:$0xff]  ;;  %v12156_v18 = vpack.c.bf16 %v6935_v0, %v6932_v40  ;;  %v7104_v49 = vld [vmem:[#allocation5 + $0x38] sm:$0xff]  ;;  %v7107_v40 = vld [vmem:[#allocation5 + $0x50] sm:$0xff] }
0x108d   :  { %12079 = vmatpush1.bf16.msra.mxu1 %v14886_v58  ;;  %12104 = vmatpush3.bf16.msra.mxu0 %v14888_v36  ;;  %v6903_v58 = vld [vmem:[#allocation9 + $0x18] sm:$0xff]  ;;  %v6902_v36 = vld [vmem:[#allocation9 + $0x10] sm:$0xff] }
0x108e   :  { %12081 = vmatprep.subr.bf16.mxu1 %v14892_v34  ;;  %12105 = vmatprep.subr.bf16.mxu0 %v15474_v20  ;;  %v6905_v34 = vld [vmem:[#allocation9 + $0x28] sm:$0xff] }
0x1091   :  { %12083 = vmatpush1.bf16.msra.mxu1 %v14896_v31  ;;  %12107 = vmatpush3.bf16.msra.mxu0 %v14898_v16  ;;  %v12110_v31 = vpack.c.bf16 %v6903_v58, %v6900_v53  ;;  %v12141_v16 = vpack.c.bf16 %v6905_v34, %v6902_v36  ;;  %v6940_v53 = vld [vmem:[#allocation9 + $0x140] sm:$0xff]  ;;  %v6938_v34 = vld [vmem:[#allocation9 + $0x130] sm:$0xff] }
0x1092   :  { %12140 = vmatprep.subr.bf16.mxu0 %v15474_v20  ;;  %12109 = vmatprep.subr.bf16.mxu1 %v12108_v8  ;;  %v6937_v8 = vld [vmem:[#allocation9 + $0x128] sm:$0xff]  ;;  %v6936_v36 = vld [vmem:[#allocation9 + $0x120] sm:$0xff]  ;;  %v12159_v63 = vpack.c.bf16 %v6941_v41, %v6938_v34  ;;  %v7108_v34 = vld [vmem:[#allocation5 + $0x58] sm:$0xff] }
0x1093   :  { %v12132_v58 = vpack.c.bf16 %v6940_v53, %v6937_v8  ;;  %v7103_v8 = vld [vmem:[#allocation5 + $0x30] sm:$0xff]  ;;  %v7113_v41 = vld [vmem:[#allocation5 + $0x80] sm:$0xff] }
0x1094   :  { %6800 = vmatmul.mubr.f32.vlgmr.msra.gmra.mrb[46].mxu1 %v14953_v2  ;;  %9912 = vmatmul.mubr.f32.vlgmr.msra.gmra.mrb[80].mxu0 %v14953_v2 }
0x1095   :  { %7012 = vmatprep.mubr.f32.mxu1 %v15476_v38  ;;  %9946 = vmatprep.mubr.msk.f32.mxu0 %vm12860_vm1, %v15476_v38 }
0x1096   :  { %12111 = vmatpush1.bf16.msra.mxu1 %v12110_v31  ;;  %12142 = vmatpush3.bf16.msra.mxu0 %v12141_v16  ;;  %v6939_v31 = vld [vmem:[#allocation9 + $0x138] sm:$0xff] }
0x1097   :  { %12143 = vmatprep.subr.bf16.mxu0 %v15474_v20  ;;  %12113 = vmatprep.subr.bf16.mxu1 %v12112_v46  ;;  %v12134_v16 = vpack.c.bf16 %v6939_v31, %v6936_v36  ;;  %v6943_v46 = vld [vmem:[#allocation9 + $0x158] sm:$0xff]  ;;  %v7106_v36 = vld [vmem:[#allocation5 + $0x48] sm:$0xff]  ;;  %v7105_v31 = vld [vmem:[#allocation5 + $0x40] sm:$0xff] }
0x1098   :  { %v12136_v29 = vpack.c.bf16 %v6946_v56, %v6943_v46  ;;  %v12200_v46 = vpack.c.bf16 %v7108_v34, %v7105_v31  ;;  %v7109_v56 = vld [vmem:[#allocation5 + $0x60] sm:$0xff]  ;;  %v7142_v34 = vld [vmem:[#allocation5 + $0x168] sm:$0xff] }
0x109a   :  { %12115 = vmatpush1.bf16.msra.mxu1 %v12114_v35  ;;  %12145 = vmatpush3.bf16.msra.mxu0 %v12144_v27  ;;  %v6945_v35 = vld [vmem:[#allocation9 + $0x168] sm:$0xff] }
0x109b   :  { %12146 = vmatprep.subr.bf16.mxu0 %v15474_v20  ;;  %12117 = vmatprep.subr.bf16.mxu1 %v12116_v3  ;;  %v12138_v27 = vpack.c.bf16 %v6945_v35, %v6942_v39  ;;  %v7098_v3 = vld [vmem:[#allocation5 + $0x8] sm:$0xff]  ;;  %v7112_v39 = vld [vmem:[#allocation5 + $0x78] sm:$0xff]  ;;  %v7111_v35 = vld [vmem:[#allocation5 + $0x70] sm:$0xff] }
0x109c   :  { %v12164_v33 = vpack.c.bf16 %v7101_v57, %v7098_v3  ;;  %v12203_v3 = vpack.c.bf16 %v7114_v43, %v7111_v35  ;;  %v7115_v57 = vld [vmem:[#allocation5 + $0x90] sm:$0xff]  ;;  %v7308_v35 = vld [vmem:[#allocation10] sm:$0xff]  ;;  %v7311_v43 = vld [vmem:[#allocation10 + $0x18] sm:$0xff] }
0x109e   :  { %12119 = vmatpush1.bf16.msra.mxu1 %v12118_v50  ;;  %12148 = vmatpush3.bf16.msra.mxu0 %v12147_v4 }
0x109f   :  { %12149 = vmatprep.subr.bf16.mxu0 %v15474_v20  ;;  %12121 = vmatprep.subr.bf16.mxu1 %v12120_v54 }
0x10a2   :  { %12123 = vmatpush1.bf16.msra.mxu1 %v12122_v60  ;;  %12151 = vmatpush3.bf16.msra.mxu0 %v12150_v55 }
0x10a3   :  { %12152 = vmatprep.subr.bf16.mxu0 %v15474_v20  ;;  %12125 = vmatprep.subr.bf16.mxu1 %v12124_v62 }
0x10a6   :  { %12127 = vmatpush1.bf16.msra.mxu1 %v12126_v37  ;;  %12154 = vmatpush3.bf16.msra.mxu0 %v12153_v51 }
0x10a7   :  { %12155 = vmatprep.subr.bf16.mxu0 %v15474_v20  ;;  %12129 = vmatprep.subr.bf16.mxu1 %v12128_v11  ;;  %v7102_v11 = vld [vmem:[#allocation5 + $0x28] sm:$0xff] }
0x10aa   :  { %12131 = vmatpush1.bf16.msra.mxu1 %v12130_v61  ;;  %12157 = vmatpush3.bf16.msra.mxu0 %v12156_v18  ;;  %v12197_v18 = vpack.c.bf16 %v7102_v11, %v7099_v59 }
0x10ab   :  { %12158 = vmatprep.subr.bf16.mxu0 %v15474_v20  ;;  %12133 = vmatprep.subr.bf16.mxu1 %v12132_v58  ;;  %v12168_v58 = vpack.c.bf16 %v7107_v40, %v7104_v49  ;;  %v7136_v40 = vld [vmem:[#allocation5 + $0x138] sm:$0xff] }
0x10ae   :  { %12135 = vmatpush1.bf16.msra.mxu1 %v12134_v16  ;;  %12160 = vmatpush3.bf16.msra.mxu0 %v12159_v63  ;;  %v7110_v16 = vld [vmem:[#allocation5 + $0x68] sm:$0xff]  ;;  %v12170_v63 = vpack.c.bf16 %v7106_v36, %v7103_v8  ;;  %v7139_v36 = vld [vmem:[#allocation5 + $0x150] sm:$0xff] }
0x10af   :  { %12161 = vmatprep.subr.bf16.mxu0 %v15474_v20  ;;  %12137 = vmatprep.subr.bf16.mxu1 %v12136_v29  ;;  %v12172_v29 = vpack.c.bf16 %v7113_v41, %v7110_v16  ;;  %v7141_v16 = vld [vmem:[#allocation5 + $0x160] sm:$0xff]  ;;  %v7144_v41 = vld [vmem:[#allocation5 + $0x178] sm:$0xff] }
0x10b2   :  { %12139 = vmatpush1.bf16.msra.mxu1 %v12138_v27  ;;  %12163 = vmatpush3.bf16.msra.mxu0 %v12162_v10  ;;  %v7116_v27 = vld [vmem:[#allocation5 + $0x98] sm:$0xff]  ;;  %v12174_v10 = vpack.c.bf16 %v7112_v39, %v7109_v56  ;;  %v7309_v56 = vld [vmem:[#allocation10 + $0x8] sm:$0xff] }
0x10b3   :  { %12196 = vmatprep.subr.bf16.mxu0 %v15474_v20  ;;  %12165 = vmatprep.subr.bf16.mxu1 %v12164_v33  ;;  %v12176_v33 = vpack.c.bf16 %v7119_v28, %v7116_v27  ;;  %v7310_v27 = vld [vmem:[#allocation10 + $0x10] sm:$0xff]  ;;  %v12222_v28 = vpack.c.bf16 %v7311_v43, %v7308_v35 }
0x1147   :  { %v6683_v22 = vpop.f32.mrb[78].mxu0 }
0x1148   :  { %v9878_v50 = vpop.f32.mrb[79].mxu0  ;;  %v6684_v44 = vadd.f32 %v6683_v22, %v13563_v13  ;;  %v7118_v22 = vld [vmem:[#allocation5 + $0xa8] sm:$0xff] }
0x1149   :  { %v7117_v50 = vld [vmem:[#allocation5 + $0xa0] sm:$0xff] }
0x1167   :  { %v6801_v14 = vpop.f32.mrb[46].mxu1  ;;  %v6872_v4 = vpop.f32.mrb[80].mxu0 }
0x1168   :  { %v12416_v52 = vadd.f32 %v6801_v14, %v15688_v12  ;;  %v6803_v42 = vpop.f32.mrb[47].mxu1  ;;  %v9913_v54 = vpop.f32.mrb[81].mxu0  ;;  %v6890_v23 = vadd.f32 %v14948_v45, %v6872_v4  ;;  %v12166_v45 = vpack.c.bf16 %v7100_v1, %v7097_v25  ;;  %v7120_v14 = vld [vmem:[#allocation5 + $0xb8] sm:$0xff]  ;;  %v7122_v4 = vld [vmem:[#allocation5 + $0xc8] sm:$0xff]  ;;  %v7137_v1 = vld [vmem:[#allocation5 + $0x140] sm:$0xff] }
0x1169   :  { %v12417_v48 = vadd.f32 %v6803_v42, %v15689_v21  ;;  %v12178_v42 = vpack.c.bf16 %v7118_v22, %v7115_v57  ;;  %v12206_v54 = vpack.c.bf16 %v7120_v14, %v7117_v50  ;;  %v7132_v25 = vld [vmem:[#allocation5 + $0x118] sm:$0xff]  ;;  %v7314_v50 = vld [vmem:[#allocation10 + $0x30] sm:$0xff]  ;;  %v7317_v14 = vld [vmem:[#allocation10 + $0x48] sm:$0xff] }
0x116a   :  { %v7911_v32 = vmul.f32 -1.442695, %v12416_v52  ;;  %v7125_v52 = vld [vmem:[#allocation5 + $0xe0] sm:$0xff]  ;;  %v7315_v57 = vld [vmem:[#allocation10 + $0x38] sm:$0xff] }
0x116b   :  { %v7912_v17 = vmul.f32 -1.442695, %v12417_v48  ;;  %v12180_v48 = vpack.c.bf16 %v7125_v52, %v7122_v4  ;;  %v7316_v4 = vld [vmem:[#allocation10 + $0x40] sm:$0xff]  ;;  %v12226_v52 = vpack.c.bf16 %v7317_v14, %v7314_v50 }
0x116c   :  { %12696 = vpow2.f32 %v7911_v32  ;;  %v7121_v32 = vld [vmem:[#allocation5 + $0xc0] sm:$0xff] }
0x116d   :  { %12698 = vpow2.f32 %v7912_v17  ;;  %v7124_v17 = vld [vmem:[#allocation5 + $0xd8] sm:$0xff] }
0x1176   :  { %v12697_v60 = vpop.eup %12696 }
0x1177   :  { %v6880_v24 = vadd.f32 1.0, %v12697_v60  ;;  %v12699_v55 = vpop.eup %12698  ;;  %v7123_v60 = vld [vmem:[#allocation5 + $0xd0] sm:$0xff] }
0x1178   :  { %v6887_v9 = vadd.f32 1.0, %v12699_v55  ;;  %v7128_v55 = vld [vmem:[#allocation5 + $0xf8] sm:$0xff] }
0x1179   :  { %12700 = vrcp.f32 %v6880_v24  ;;  %v7126_v24 = vld [vmem:[#allocation5 + $0xe8] sm:$0xff] }
0x117a   :  { %12702 = vrcp.f32 %v6887_v9  ;;  %v7131_v9 = vld [vmem:[#allocation5 + $0x110] sm:$0xff] }
0x1183   :  { %v12701_v62 = vpop.eup %12700 }
0x1184   :  { %v6891_v6 = vmul.f32 %v12701_v62, %v6890_v23  ;;  %v12703_v37 = vpop.eup %12702  ;;  %v12182_v23 = vpack.c.bf16 %v7124_v17, %v7121_v32  ;;  %v12209_v62 = vpack.c.bf16 %v7126_v24, %v7123_v60  ;;  %v7321_v32 = vld [vmem:[#allocation10 + $0x68] sm:$0xff]  ;;  %v7320_v60 = vld [vmem:[#allocation10 + $0x60] sm:$0xff]  ;;  %v7323_v24 = vld [vmem:[#allocation10 + $0x78] sm:$0xff] }
0x1185   :  { %v6894_v51 = vsub.f32 1.0, %v12703_v37  ;;  %v6896_v0 = vmul.f32 %v12703_v37, %v14953_v2  ;;  %v7129_v37 = vld [vmem:[#allocation5 + $0x100] sm:$0xff] }
0x1186   :  { %v6892_v19 = vadd.f32 %v6891_v6, %v6684_v44  ;;  %v7127_v44 = vld [vmem:[#allocation5 + $0xf0] sm:$0xff]  ;;  %v12184_v6 = vpack.c.bf16 %v7131_v9, %v7128_v55  ;;  %v12212_v11 = vpack.c.bf16 %v7132_v25, %v7129_v37  ;;  %v12230_v9 = vpack.c.bf16 %v7323_v24, %v7320_v60  ;;  %v7329_v25 = vld [vmem:[#allocation10 + $0xa8] sm:$0xff] }
0x1187   :  { %v7322_v55 = vld [vmem:[#allocation10 + $0x70] sm:$0xff] }
0x1188   :  { %12704 = vtanh.f32 %v6892_v19  ;;  %v7130_v19 = vld [vmem:[#allocation5 + $0x108] sm:$0xff]  ;;  %v7326_v37 = vld [vmem:[#allocation10 + $0x90] sm:$0xff] }
0x1189   :  { %v12186_v59 = vpack.c.bf16 %v7130_v19, %v7127_v44  ;;  %v7327_v44 = vld [vmem:[#allocation10 + $0x98] sm:$0xff] }
0x1192   :  { %v12705_v15 = vpop.eup %12704 }
0x1193   :  { %v6895_v61 = vmul.f32 %v12705_v15, %v6894_v51  ;;  %v7134_v51 = vld [vmem:[#allocation5 + $0x128] sm:$0xff]  ;;  %v7133_v15 = vld [vmem:[#allocation5 + $0x120] sm:$0xff] }
0x1194   :  { %v12188_v49 = vpack.c.bf16 %v7137_v1, %v7134_v51  ;;  %v12190_v8 = vpack.c.bf16 %v7136_v40, %v7133_v15  ;;  %v7328_v51 = vld [vmem:[#allocation10 + $0xa0] sm:$0xff]  ;;  %v12234_v1 = vpack.c.bf16 %v7329_v25, %v7326_v37  ;;  %v7333_v15 = vld [vmem:[#allocation10 + $0xc8] sm:$0xff] }
0x1195   :  { %v15091_v53 = vadd.f32 %v6896_v0, %v6895_v61  ;;  %v7135_v61 = vld [vmem:[#allocation5 + $0x130] sm:$0xff]  ;;  %v7138_v0 = vld [vmem:[#allocation5 + $0x148] sm:$0xff] }
0x1197   :  { %7013 = vmatmul.mubr.f32.vlgmr.msra.gmra.mrb[8].mxu1 %v15091_v53  ;;  %9947 = vmatmul.mubr.f32.vlgmr.msra.gmra.mrb[82].mxu0 %v15091_v53 }
0x1198   :  { %12167 = vmatpush1.bf16.msra.mxu1 %v12166_v45  ;;  %12198 = vmatpush3.bf16.msra.mxu0 %v12197_v18  ;;  %v7140_v45 = vld [vmem:[#allocation5 + $0x158] sm:$0xff]  ;;  %v7143_v18 = vld [vmem:[#allocation5 + $0x170] sm:$0xff] }
0x1199   :  { %12169 = vmatprep.subr.bf16.mxu1 %v12168_v58  ;;  %12199 = vmatprep.subr.bf16.mxu0 %v15474_v20  ;;  %v12215_v58 = vpack.c.bf16 %v7138_v0, %v7135_v61  ;;  %v12192_v31 = vpack.c.bf16 %v7143_v18, %v7140_v45  ;;  %v7332_v61 = vld [vmem:[#allocation10 + $0xc0] sm:$0xff]  ;;  %v7335_v0 = vld [vmem:[#allocation10 + $0xd8] sm:$0xff]  ;;  %v7334_v45 = vld [vmem:[#allocation10 + $0xd0] sm:$0xff] }
0x119a   :  { %7209 = vmatprep.mubr.f32.mxu1 %v15476_v38  ;;  %9981 = vmatprep.mubr.msk.f32.mxu0 %vm12860_vm1, %v15476_v38  ;;  %v12238_v18 = vpack.c.bf16 %v7335_v0, %v7332_v61  ;;  %v12733_v61 = vld [vmem:[%s15218_s6] ss:$0 sm:$0xff] }
0x119c   :  { %12171 = vmatpush1.bf16.msra.mxu1 %v12170_v63  ;;  %12201 = vmatpush3.bf16.msra.mxu0 %v12200_v46  ;;  %v12194_v63 = vpack.c.bf16 %v7142_v34, %v7139_v36  ;;  %v12218_v46 = vpack.c.bf16 %v7144_v41, %v7141_v16  ;;  %v7339_v36 = vld [vmem:[#allocation10 + $0xf8] sm:$0xff]  ;;  %v7338_v16 = vld [vmem:[#allocation10 + $0xf0] sm:$0xff]  ;;  %v7341_v41 = vld [vmem:[#allocation10 + $0x108] sm:$0xff] }
0x119d   :  { %12173 = vmatprep.subr.bf16.mxu1 %v12172_v29  ;;  %12202 = vmatprep.subr.bf16.mxu0 %v15474_v20  ;;  %v7312_v29 = vld [vmem:[#allocation10 + $0x20] sm:$0xff] }
0x119e   :  { %v12220_v39 = vpack.c.bf16 %v7312_v29, %v7309_v56  ;;  %v7343_v56 = vld [vmem:[#allocation10 + $0x118] sm:$0xff]  ;;  %v7345_v29 = vld [vmem:[#allocation10 + $0x128] sm:$0xff] }
0x11a0   :  { %12175 = vmatpush1.bf16.msra.mxu1 %v12174_v10  ;;  %12204 = vmatpush3.bf16.msra.mxu0 %v12203_v3  ;;  %v7313_v10 = vld [vmem:[#allocation10 + $0x28] sm:$0xff] }
0x11a1   :  { %12177 = vmatprep.subr.bf16.mxu1 %v12176_v33  ;;  %12205 = vmatprep.subr.bf16.mxu0 %v15474_v20  ;;  %v12253_v3 = vpack.c.bf16 %v7313_v10, %v7310_v27  ;;  %v7318_v33 = vld [vmem:[#allocation10 + $0x50] sm:$0xff]  ;;  %v7344_v27 = vld [vmem:[#allocation10 + $0x120] sm:$0xff] }
0x11a2   :  { %v12224_v22 = vpack.c.bf16 %v7318_v33, %v7315_v57  ;;  %v7346_v10 = vld [vmem:[#allocation10 + $0x130] sm:$0xff]  ;;  %v7349_v57 = vld [vmem:[#allocation10 + $0x148] sm:$0xff]  ;;  %v7351_v33 = vld [vmem:[#allocation10 + $0x158] sm:$0xff] }
0x11a3   :  { %v12271_v50 = vpack.c.bf16 %v7349_v57, %v7346_v10  ;;  %v7505_v10 = vld [vmem:[#allocation12 + $0x40] sm:$0xff]  ;;  %v7510_v57 = vld [vmem:[#allocation12 + $0x68] sm:$0xff] }
0x11a4   :  { %12179 = vmatpush1.bf16.msra.mxu1 %v12178_v42  ;;  %12207 = vmatpush3.bf16.msra.mxu0 %v12206_v54  ;;  %v7319_v42 = vld [vmem:[#allocation10 + $0x58] sm:$0xff] }
0x11a5   :  { %12181 = vmatprep.subr.bf16.mxu1 %v12180_v48  ;;  %12208 = vmatprep.subr.bf16.mxu0 %v15474_v20  ;;  %v12256_v54 = vpack.c.bf16 %v7319_v42, %v7316_v4  ;;  %v7324_v48 = vld [vmem:[#allocation10 + $0x80] sm:$0xff]  ;;  %v7350_v4 = vld [vmem:[#allocation10 + $0x150] sm:$0xff] }
0x11a6   :  { %v12228_v17 = vpack.c.bf16 %v7324_v48, %v7321_v32  ;;  %v7352_v42 = vld [vmem:[#allocation10 + $0x160] sm:$0xff]  ;;  %v7498_v32 = vld [vmem:[#allocation12 + $0x8] sm:$0xff] }
0x11a7   :  { %v7501_v48 = vld [vmem:[#allocation12 + $0x20] sm:$0xff] }
0x11a8   :  { %12183 = vmatpush1.bf16.msra.mxu1 %v12182_v23  ;;  %12210 = vmatpush3.bf16.msra.mxu0 %v12209_v62  ;;  %v7325_v23 = vld [vmem:[#allocation10 + $0x88] sm:$0xff]  ;;  %v12276_v24 = vpack.c.bf16 %v7501_v48, %v7498_v32  ;;  %v7519_v32 = vld [vmem:[#allocation12 + $0xb0] sm:$0xff] }
0x11a9   :  { %12185 = vmatprep.subr.bf16.mxu1 %v12184_v6  ;;  %12211 = vmatprep.subr.bf16.mxu0 %v15474_v20  ;;  %v12259_v62 = vpack.c.bf16 %v7325_v23, %v7322_v55  ;;  %v7330_v6 = vld [vmem:[#allocation10 + $0xb0] sm:$0xff] }
0x11aa   :  { %v12232_v19 = vpack.c.bf16 %v7330_v6, %v7327_v44 }
0x11ac   :  { %12187 = vmatpush1.bf16.msra.mxu1 %v12186_v59  ;;  %12213 = vmatpush3.bf16.msra.mxu0 %v12212_v11  ;;  %v7331_v59 = vld [vmem:[#allocation10 + $0xb8] sm:$0xff] }
0x11ad   :  { %12189 = vmatprep.subr.bf16.mxu1 %v12188_v49  ;;  %12214 = vmatprep.subr.bf16.mxu0 %v15474_v20  ;;  %v12262_v11 = vpack.c.bf16 %v7331_v59, %v7328_v51  ;;  %v7336_v49 = vld [vmem:[#allocation10 + $0xe0] sm:$0xff] }
0x11ae   :  { %v12236_v40 = vpack.c.bf16 %v7336_v49, %v7333_v15 }
0x11b0   :  { %12191 = vmatpush1.bf16.msra.mxu1 %v12190_v8  ;;  %12216 = vmatpush3.bf16.msra.mxu0 %v12215_v58  ;;  %v7337_v8 = vld [vmem:[#allocation10 + $0xe8] sm:$0xff] }
0x11b1   :  { %12193 = vmatprep.subr.bf16.mxu1 %v12192_v31  ;;  %12217 = vmatprep.subr.bf16.mxu0 %v15474_v20  ;;  %v12265_v58 = vpack.c.bf16 %v7337_v8, %v7334_v45  ;;  %v7342_v31 = vld [vmem:[#allocation10 + $0x110] sm:$0xff] }
0x11b2   :  { %v12240_v34 = vpack.c.bf16 %v7342_v31, %v7339_v36  ;;  %v7500_v36 = vld [vmem:[#allocation12 + $0x18] sm:$0xff]  ;;  %v7499_v31 = vld [vmem:[#allocation12 + $0x10] sm:$0xff] }
0x11b4   :  { %12195 = vmatpush1.bf16.msra.mxu1 %v12194_v63  ;;  %12219 = vmatpush3.bf16.msra.mxu0 %v12218_v46  ;;  %v7340_v63 = vld [vmem:[#allocation10 + $0x100] sm:$0xff]  ;;  %v12242_v46 = vpack.c.bf16 %v7341_v41, %v7338_v16  ;;  %v7504_v41 = vld [vmem:[#allocation12 + $0x38] sm:$0xff] }
0x11b5   :  { %12252 = vmatprep.subr.bf16.mxu0 %v15474_v20  ;;  %12221 = vmatprep.subr.bf16.mxu1 %v12220_v39  ;;  %v7348_v39 = vld [vmem:[#allocation10 + $0x140] sm:$0xff]  ;;  %v12268_v35 = vpack.c.bf16 %v7343_v56, %v7340_v63  ;;  %v7507_v63 = vld [vmem:[#allocation12 + $0x50] sm:$0xff] }
0x11b6   :  { %v12244_v43 = vpack.c.bf16 %v7348_v39, %v7345_v29 }
0x11b7   :  { %7210 = vmatmul.mubr.f32.vlgmr.msra.gmra.mrb[8].mxu1 %v15035_v5  ;;  %9982 = vmatmul.mubr.f32.vlgmr.msra.gmra.mrb[84].mxu0 %v15035_v5 }
0x11b8   :  { %7420 = vmatprep.mubr.f32.mxu1 %v15476_v38  ;;  %10016 = vmatprep.mubr.msk.f32.mxu0 %vm12860_vm1, %v15476_v38 }
0x11b9   :  { %12223 = vmatpush1.bf16.msra.mxu1 %v12222_v28  ;;  %12254 = vmatpush3.bf16.msra.mxu0 %v12253_v3  ;;  %v7347_v28 = vld [vmem:[#allocation10 + $0x138] sm:$0xff] }
0x11ba   :  { %12255 = vmatprep.subr.bf16.mxu0 %v15474_v20  ;;  %12225 = vmatprep.subr.bf16.mxu1 %v12224_v22  ;;  %v12246_v3 = vpack.c.bf16 %v7347_v28, %v7344_v27  ;;  %v7354_v22 = vld [vmem:[#allocation10 + $0x170] sm:$0xff]  ;;  %v12280_v27 = vpack.c.bf16 %v7507_v63, %v7504_v41  ;;  %v7506_v28 = vld [vmem:[#allocation12 + $0x48] sm:$0xff]  ;;  %v7540_v41 = vld [vmem:[#allocation12 + $0x158] sm:$0xff] }
0x11bb   :  { %v12248_v14 = vpack.c.bf16 %v7354_v22, %v7351_v33  ;;  %v7513_v33 = vld [vmem:[#allocation12 + $0x80] sm:$0xff]  ;;  %v7543_v63 = vld [vmem:[#allocation12 + $0x170] sm:$0xff] }
0x11bd   :  { %12227 = vmatpush1.bf16.msra.mxu1 %v12226_v52  ;;  %12257 = vmatpush3.bf16.msra.mxu0 %v12256_v54  ;;  %v7353_v52 = vld [vmem:[#allocation10 + $0x168] sm:$0xff]  ;;  %v7355_v54 = vld [vmem:[#allocation10 + $0x178] sm:$0xff] }
0x11be   :  { %12258 = vmatprep.subr.bf16.mxu0 %v15474_v20  ;;  %12229 = vmatprep.subr.bf16.mxu1 %v12228_v17  ;;  %v12250_v17 = vpack.c.bf16 %v7353_v52, %v7350_v4  ;;  %v12274_v60 = vpack.c.bf16 %v7355_v54, %v7352_v42  ;;  %v7512_v4 = vld [vmem:[#allocation12 + $0x78] sm:$0xff]  ;;  %v7511_v52 = vld [vmem:[#allocation12 + $0x70] sm:$0xff]  ;;  %v7514_v42 = vld [vmem:[#allocation12 + $0x88] sm:$0xff] }
0x11bf   :  { %v7516_v54 = vld [vmem:[#allocation12 + $0x98] sm:$0xff] }
0x11c1   :  { %12231 = vmatpush1.bf16.msra.mxu1 %v12230_v9  ;;  %12260 = vmatpush3.bf16.msra.mxu0 %v12259_v62  ;;  %v15878_v62 = vld [vmem:[#allocation63_spill] sm:$0xff] }
0x11c2   :  { %12261 = vmatprep.subr.bf16.mxu0 %v15474_v20  ;;  %12233 = vmatprep.subr.bf16.mxu1 %v12232_v19 }
0x11c5   :  { %12235 = vmatpush1.bf16.msra.mxu1 %v12234_v1  ;;  %12263 = vmatpush3.bf16.msra.mxu0 %v12262_v11 }
0x11c6   :  { %12264 = vmatprep.subr.bf16.mxu0 %v15474_v20  ;;  %12237 = vmatprep.subr.bf16.mxu1 %v12236_v40 }
0x11c9   :  { %12239 = vmatpush1.bf16.msra.mxu1 %v12238_v18  ;;  %12266 = vmatpush3.bf16.msra.mxu0 %v12265_v58 }
0x11ca   :  { %12267 = vmatprep.subr.bf16.mxu0 %v15474_v20  ;;  %12241 = vmatprep.subr.bf16.mxu1 %v12240_v34  ;;  %v7502_v34 = vld [vmem:[#allocation12 + $0x28] sm:$0xff] }
0x11cb   :  { %v12309_v39 = vpack.c.bf16 %v7502_v34, %v7499_v31  ;;  %v7536_v31 = vld [vmem:[#allocation12 + $0x138] sm:$0xff]  ;;  %v7535_v34 = vld [vmem:[#allocation12 + $0x130] sm:$0xff] }
0x11cd   :  { %12243 = vmatpush1.bf16.msra.mxu1 %v12242_v46  ;;  %12269 = vmatpush3.bf16.msra.mxu0 %v12268_v35  ;;  %v7503_v35 = vld [vmem:[#allocation12 + $0x30] sm:$0xff] }
0x11ce   :  { %12245 = vmatprep.subr.bf16.mxu1 %v12244_v43  ;;  %12270 = vmatprep.subr.bf16.mxu0 %v15474_v20  ;;  %v12282_v22 = vpack.c.bf16 %v7506_v28, %v7503_v35  ;;  %v7542_v35 = vld [vmem:[#allocation12 + $0x168] sm:$0xff]  ;;  %v7721_v28 = vld [vmem:[%s15226_s14] sm:$0xff] }
0x11d1   :  { %12247 = vmatpush1.bf16.msra.mxu1 %v12246_v3  ;;  %12272 = vmatpush3.bf16.msra.mxu0 %v12271_v50  ;;  %v7508_v3 = vld [vmem:[#allocation12 + $0x58] sm:$0xff] }
0x11d2   :  { %12249 = vmatprep.subr.bf16.mxu1 %v12248_v14  ;;  %12273 = vmatprep.subr.bf16.mxu0 %v15474_v20  ;;  %v12312_v50 = vpack.c.bf16 %v7508_v3, %v7505_v10  ;;  %v7509_v14 = vld [vmem:[#allocation12 + $0x60] sm:$0xff]  ;;  %v7722_v10 = vld [vmem:[%s15226_s14 + $0x8] sm:$0xff] }
0x11d3   :  { %v12286_v48 = vpack.c.bf16 %v7512_v4, %v7509_v14 }
0x11d5   :  { %12251 = vmatpush1.bf16.msra.mxu1 %v12250_v17  ;;  %12275 = vmatpush3.bf16.msra.mxu0 %v12274_v60  ;;  %v12315_v17 = vpack.c.bf16 %v7514_v42, %v7511_v52  ;;  %v7515_v60 = vld [vmem:[#allocation12 + $0x90] sm:$0xff]  ;;  %v7728_v42 = vld [vmem:[%s15226_s14 + $0x38] sm:$0xff] }
0x11d6   :  { %12277 = vmatprep.subr.bf16.mxu1 %v12276_v24  ;;  %12308 = vmatprep.subr.bf16.mxu0 %v15474_v20  ;;  %v12288_v24 = vpack.c.bf16 %v7519_v32, %v7516_v54  ;;  %v7727_v52 = vld [vmem:[%s15226_s14 + $0x30] sm:$0xff]  ;;  %v7729_v32 = vld [vmem:[%s15226_s14 + $0x40] sm:$0xff] }
0x11d7   :  { %v12344_v54 = vpack.c.bf16 %v7728_v42, %v7727_v52 }
0x126a   :  { %v7085_v55 = vpop.f32.mrb[82].mxu0 }
0x126b   :  { %v7086_v9 = vadd.f32 %v7085_v55, %v15862_v7  ;;  %v9948_v23 = vpop.f32.mrb[83].mxu0  ;;  %v7518_v55 = vld [vmem:[#allocation12 + $0xa8] sm:$0xff] }
0x126c   :  { %v7520_v23 = vld [vmem:[#allocation12 + $0xb8] sm:$0xff] }
0x126d   :  { %v7096_v44 = vadd.f32 %v7086_v9, %v15878_v62  ;;  %v7517_v9 = vld [vmem:[#allocation12 + $0xa0] sm:$0xff]  ;;  %v7522_v62 = vld [vmem:[#allocation12 + $0xc8] sm:$0xff] }
0x128a   :  { %v7211_v6 = vpop.f32.mrb[8].mxu1  ;;  %v7282_v19 = vpop.f32.mrb[84].mxu0 }
0x128b   :  { %v12393_v37 = vadd.f32 %v15864_v30, %v7211_v6  ;;  %v7213_v25 = vpop.f32.mrb[9].mxu1  ;;  %v9983_v51 = vpop.f32.mrb[85].mxu0  ;;  %v7300_v0 = vadd.f32 %v12733_v61, %v7282_v19  ;;  %v12290_v6 = vpack.c.bf16 %v7518_v55, %v7515_v60  ;;  %v12318_v19 = vpack.c.bf16 %v7520_v23, %v7517_v9  ;;  %v7530_v61 = vld [vmem:[#allocation12 + $0x108] sm:$0xff]  ;;  %v7732_v60 = vld [vmem:[%s15226_s14 + $0x58] sm:$0xff]  ;;  %v7733_v55 = vld [vmem:[%s15226_s14 + $0x60] sm:$0xff] }
0x128c   :  { %v12395_v59 = vadd.f32 %v15865_v47, %v7213_v25  ;;  %v7497_v47 = vld [vmem:[#allocation12] sm:$0xff]  ;;  %v7524_v25 = vld [vmem:[#allocation12 + $0xd8] sm:$0xff]  ;;  %v7523_v51 = vld [vmem:[#allocation12 + $0xd0] sm:$0xff] }
0x128d   :  { %v7913_v1 = vmul.f32 -1.442695, %v12393_v37  ;;  %v12278_v29 = vpack.c.bf16 %v7500_v36, %v7497_v47  ;;  %v7521_v37 = vld [vmem:[#allocation12 + $0xc0] sm:$0xff]  ;;  %v7734_v9 = vld [vmem:[%s15226_s14 + $0x68] sm:$0xff] }
0x128e   :  { %v7914_v11 = vmul.f32 -1.442695, %v12395_v59  ;;  %v7528_v59 = vld [vmem:[#allocation12 + $0xf8] sm:$0xff]  ;;  %v12356_v23 = vpack.c.bf16 %v7734_v9, %v7733_v55 }
0x128f   :  { %12706 = vpow2.f32 %v7913_v1  ;;  %v7526_v1 = vld [vmem:[#allocation12 + $0xe8] sm:$0xff] }
0x1290   :  { %12708 = vpow2.f32 %v7914_v11  ;;  %v7531_v11 = vld [vmem:[#allocation12 + $0x110] sm:$0xff] }
0x1299   :  { %v12707_v15 = vpop.eup %12706 }
0x129a   :  { %v7290_v49 = vadd.f32 1.0, %v12707_v15  ;;  %v12709_v40 = vpop.eup %12708  ;;  %v12294_v15 = vpack.c.bf16 %v7524_v25, %v7521_v37 }
0x129b   :  { %v7297_v7 = vadd.f32 1.0, %v12709_v40  ;;  %v7527_v40 = vld [vmem:[#allocation12 + $0xf0] sm:$0xff] }
0x129c   :  { %12710 = vrcp.f32 %v7290_v49  ;;  %v12321_v49 = vpack.c.bf16 %v7526_v1, %v7523_v51 }
0x129d   :  { %12712 = vrcp.f32 %v7297_v7  ;;  %v12296_v7 = vpack.c.bf16 %v7531_v11, %v7528_v59 }
0x12a6   :  { %v12711_v45 = vpop.eup %12710 }
0x12a7   :  { %v7301_v30 = vmul.f32 %v12711_v45, %v7300_v0  ;;  %v12713_v8 = vpop.eup %12712  ;;  %v7529_v0 = vld [vmem:[#allocation12 + $0x100] sm:$0xff]  ;;  %v7532_v45 = vld [vmem:[#allocation12 + $0x118] sm:$0xff] }
0x12a8   :  { %v7304_v58 = vsub.f32 1.0, %v12713_v8  ;;  %v7306_v56 = vmul.f32 %v12713_v8, %v15035_v5  ;;  %v12284_v5 = vpack.c.bf16 %v7513_v33, %v7510_v57  ;;  %v12298_v8 = vpack.c.bf16 %v7530_v61, %v7527_v40 }
0x12a9   :  { %v7302_v18 = vadd.f32 %v7301_v30, %v7096_v44  ;;  %v7525_v44 = vld [vmem:[#allocation12 + $0xe0] sm:$0xff]  ;;  %v7534_v30 = vld [vmem:[#allocation12 + $0x128] sm:$0xff]  ;;  %v12324_v47 = vpack.c.bf16 %v7532_v45, %v7529_v0  ;;  %v12332_v33 = vpack.c.bf16 %v7722_v10, %v7721_v28 }
0x12aa   :  { %v12734_v0 = vld [vmem:[%s15225_s13] ss:$0 sm:$0xff] }
0x12ab   :  { %12714 = vtanh.f32 %v7302_v18  ;;  %v7537_v18 = vld [vmem:[#allocation12 + $0x140] sm:$0xff] }
0x12ac   :  { %v12300_v36 = vpack.c.bf16 %v7537_v18, %v7534_v30 }
0x12b5   :  { %v12715_v16 = vpop.eup %12714 }
0x12b6   :  { %v7305_v46 = vmul.f32 %v12715_v16, %v7304_v58  ;;  %v7533_v58 = vld [vmem:[#allocation12 + $0x120] sm:$0xff]  ;;  %v7538_v16 = vld [vmem:[#allocation12 + $0x148] sm:$0xff] }
0x12b8   :  { %v7307_v43 = vadd.f32 %v7306_v56, %v7305_v46  ;;  %v12302_v46 = vpack.c.bf16 %v7536_v31, %v7533_v58  ;;  %v12327_v56 = vpack.c.bf16 %v7538_v16, %v7535_v34 }
0x12ba   :  { %7421 = vmatmul.mubr.f32.vlgmr.msra.gmra.mrb[48].mxu1 %v7307_v43  ;;  %10017 = vmatmul.mubr.f32.vlgmr.msra.gmra.mrb[86].mxu0 %v7307_v43  ;;  %v7541_v43 = vld [vmem:[#allocation12 + $0x160] sm:$0xff] }
0x12bb   :  { %12279 = vmatpush1.bf16.msra.mxu1 %v12278_v29  ;;  %12310 = vmatpush3.bf16.msra.mxu0 %v12309_v39  ;;  %v7539_v29 = vld [vmem:[#allocation12 + $0x150] sm:$0xff]  ;;  %v12304_v39 = vpack.c.bf16 %v7543_v63, %v7540_v41 }
0x12bc   :  { %12281 = vmatprep.subr.bf16.mxu1 %v12280_v27  ;;  %12311 = vmatprep.subr.bf16.mxu0 %v15474_v20  ;;  %v7544_v27 = vld [vmem:[#allocation12 + $0x178] sm:$0xff]  ;;  %v12306_v3 = vpack.c.bf16 %v7542_v35, %v7539_v29 }
0x12bd   :  { %7609 = vmatprep.mubr.f32.mxu1 %v15476_v38  ;;  %10051 = vmatprep.mubr.msk.f32.mxu0 %vm12860_vm1, %v15476_v38  ;;  %v12292_v38 = vpack.c.bf16 %v7525_v44, %v7522_v62  ;;  %v12330_v57 = vpack.c.bf16 %v7544_v27, %v7541_v43  ;;  %v7735_v62 = vld [vmem:[%s15226_s14 + $0x70] sm:$0xff]  ;;  %v7736_v44 = vld [vmem:[%s15226_s14 + $0x78] sm:$0xff] }
0x12bf   :  { %12283 = vmatpush1.bf16.msra.mxu1 %v12282_v22  ;;  %12313 = vmatpush3.bf16.msra.mxu0 %v12312_v50  ;;  %v7723_v22 = vld [vmem:[%s15226_s14 + $0x10] sm:$0xff]  ;;  %v7724_v50 = vld [vmem:[%s15226_s14 + $0x18] sm:$0xff] }
0x12c0   :  { %12285 = vmatprep.subr.bf16.mxu1 %v12284_v5  ;;  %12314 = vmatprep.subr.bf16.mxu0 %v15474_v20  ;;  %v12336_v14 = vpack.c.bf16 %v7724_v50, %v7723_v22  ;;  %v7725_v5 = vld [vmem:[%s15226_s14 + $0x20] sm:$0xff] }
0x12c3   :  { %12287 = vmatpush1.bf16.msra.mxu1 %v12286_v48  ;;  %12316 = vmatpush3.bf16.msra.mxu0 %v12315_v17  ;;  %v7731_v17 = vld [vmem:[%s15226_s14 + $0x50] sm:$0xff] }
0x12c4   :  { %12289 = vmatprep.subr.bf16.mxu1 %v12288_v24  ;;  %12317 = vmatprep.subr.bf16.mxu0 %v15474_v20  ;;  %v12352_v24 = vpack.c.bf16 %v7732_v60, %v7731_v17 }
0x12c7   :  { %12291 = vmatpush1.bf16.msra.mxu1 %v12290_v6  ;;  %12319 = vmatpush3.bf16.msra.mxu0 %v12318_v19  ;;  %v12360_v6 = vpack.c.bf16 %v7736_v44, %v7735_v62 }
0x12c8   :  { %12293 = vmatprep.subr.bf16.mxu1 %v12292_v38  ;;  %12320 = vmatprep.subr.bf16.mxu0 %v15474_v20 }
0x12cb   :  { %12295 = vmatpush1.bf16.msra.mxu1 %v12294_v15  ;;  %12322 = vmatpush3.bf16.msra.mxu0 %v12321_v49 }
0x12cc   :  { %12297 = vmatprep.subr.bf16.mxu1 %v12296_v7  ;;  %12323 = vmatprep.subr.bf16.mxu0 %v15474_v20 }
0x12cf   :  { %12299 = vmatpush1.bf16.msra.mxu1 %v12298_v8  ;;  %12325 = vmatpush3.bf16.msra.mxu0 %v12324_v47 }
0x12d0   :  { %12301 = vmatprep.subr.bf16.mxu1 %v12300_v36  ;;  %12326 = vmatprep.subr.bf16.mxu0 %v15474_v20 }
0x12d3   :  { %12303 = vmatpush1.bf16.msra.mxu1 %v12302_v46  ;;  %12328 = vmatpush3.bf16.msra.mxu0 %v12327_v56 }
0x12d4   :  { %12305 = vmatprep.subr.bf16.mxu1 %v12304_v39  ;;  %12329 = vmatprep.subr.bf16.mxu0 %v15474_v20  ;;  %v7726_v20 = vld [vmem:[%s15226_s14 + $0x28] sm:$0xff] }
0x12d5   :  { %v12340_v4 = vpack.c.bf16 %v7726_v20, %v7725_v5 }
0x12d7   :  { %12307 = vmatpush1.bf16.msra.mxu1 %v12306_v3  ;;  %12331 = vmatpush3.bf16.msra.mxu0 %v12330_v57 }
0x12d8   :  { %12333 = vmatprep.subr.bf16.mxu1 %v12332_v33 }
0x12da   :  { %7610 = vmatmul.mubr.f32.vlgmr.msra.gmra.mrb[48].mxu1 %v15091_v53  ;;  %10052 = vmatmul.mubr.f32.vlgmr.msra.gmra.mrb[88].mxu0 %v15091_v53 }
0x12db   :  { %12335 = vmatpush3.bf16.msra.mxu1 %v12332_v33  ;;  %10086 = vmatprep.mubr.f32.mxu1 %v14628_v26  ;;  %v7730_v26 = vld [vmem:[%s15226_s14 + $0x48] sm:$0xff] }
0x12dc   :  { %12337 = vmatprep.subr.bf16.mxu1 %v12336_v14  ;;  %v12348_v48 = vpack.c.bf16 %v7730_v26, %v7729_v32 }
0x12df   :  { %12339 = vmatpush3.bf16.msra.mxu1 %v12336_v14 }
0x12e0   :  { %12341 = vmatprep.subr.bf16.mxu1 %v12340_v4 }
0x12e3   :  { %12343 = vmatpush3.bf16.msra.mxu1 %v12340_v4 }
0x12e4   :  { %12345 = vmatprep.subr.bf16.mxu1 %v12344_v54 }
0x12e7   :  { %12347 = vmatpush3.bf16.msra.mxu1 %v12344_v54 }
0x12e8   :  { %12349 = vmatprep.subr.bf16.mxu1 %v12348_v48 }
0x12eb   :  { %12351 = vmatpush3.bf16.msra.mxu1 %v12348_v48 }
0x12ec   :  { %12353 = vmatprep.subr.bf16.mxu1 %v12352_v24 }
0x12ef   :  { %12355 = vmatpush3.bf16.msra.mxu1 %v12352_v24 }
0x12f0   :  { %12357 = vmatprep.subr.bf16.mxu1 %v12356_v23 }
0x12f3   :  { %12359 = vmatpush3.bf16.msra.mxu1 %v12356_v23 }
0x12f4   :  { %12361 = vmatprep.subr.bf16.mxu1 %v12360_v6 }
0x12f7   :  { %12363 = vmatpush3.bf16.msra.mxu1 %v12360_v6 }
0x12fa   :  { %10087 = vmatmul.mubr.f32.vlgmr.msra.gmra.mrb[50].mxu1 %v14953_v2 }
0x12fb   :  { %10089 = vmatprep.mubr.f32.mxu1 %v15091_v53 }
0x138d   :  { %v7493_v19 = vpop.f32.mrb[86].mxu0 }
0x138e   :  { %v10018_v37 = vpop.f32.mrb[87].mxu0 }
0x13ad   :  { %v7611_v38 = vpop.f32.mrb[48].mxu1  ;;  %v7682_v25 = vpop.f32.mrb[88].mxu0 }
0x13ae   :  { %v12418_v51 = vadd.f32 %v7611_v38, %v15688_v12  ;;  %v7613_v1 = vpop.f32.mrb[49].mxu1  ;;  %v10053_v59 = vpop.f32.mrb[89].mxu0  ;;  %v7700_v45 = vadd.f32 %v12734_v0, %v7682_v25  ;;  %v7494_v12 = vadd.f32 %v7493_v19, %v13563_v13 }
0x13af   :  { %v12419_v15 = vadd.f32 %v7613_v1, %v15689_v21  ;;  %v7917_v21 = vld [vmem:[%s15227_s15] ss:$0 sm:$0xff] }
0x13b0   :  { %v7915_v11 = vmul.f32 -1.442695, %v12418_v51 }
0x13b1   :  { %v7916_v49 = vmul.f32 -1.442695, %v12419_v15 }
0x13b2   :  { %12716 = vpow2.f32 %v7915_v11 }
0x13b3   :  { %12718 = vpow2.f32 %v7916_v49 }
0x13bc   :  { %v12717_v40 = vpop.eup %12716 }
0x13bd   :  { %v7690_v7 = vadd.f32 1.0, %v12717_v40  ;;  %v12719_v2 = vpop.eup %12718 }
0x13be   :  { %v7697_v61 = vadd.f32 1.0, %v12719_v2 }
0x13bf   :  { %12720 = vrcp.f32 %v7690_v7 }
0x13c0   :  { %12722 = vrcp.f32 %v7697_v61 }
0x13c9   :  { %v12721_v30 = vpop.eup %12720 }
0x13ca   :  { %v7701_v18 = vmul.f32 %v12721_v30, %v7700_v45  ;;  %v12723_v13 = vpop.eup %12722 }
0x13cb   :  { %v7704_v34 = vsub.f32 1.0, %v12723_v13  ;;  %v7706_v63 = vmul.f32 %v12723_v13, %v15091_v53 }
0x13cc   :  { %v7702_v8 = vadd.f32 %v7701_v18, %v7494_v12 }
0x13cd   :  { %v10088_v47 = vpop.f32.mrb[50].mxu1 }
0x13ce   :  { %12724 = vtanh.f32 %v7702_v8  ;;  %v7809_v58 = vadd.f32 %v10088_v47, %v7917_v21  ;;  %v7803_v36 = vpop.f32.mrb[51].mxu1 }
0x13cf   :  { %v7804_v31 = vadd.f32 %v7917_v21, %v7803_v36 }
0x13d0   :  { %7823 = vst [vmem:[%s15228_s16 + $0x8] sm:$0xff] %v7809_v58 }
0x13d1   :  { %7822 = vst [vmem:[%s15228_s16] sm:$0xff] %v7804_v31 }
0x13d8   :  { %v12725_v16 = vpop.eup %12724 }
0x13d9   :  { %v7705_v41 = vmul.f32 %v12725_v16, %v7704_v34 }
0x13db   :  { %v7707_v46 = vadd.f32 %v7706_v63, %v7705_v41 }
0x13dd   :  { %10090 = vmatmul.mubr.f32.gmra.mrb[52].mxu1 %v7707_v46 }
0x14b0   :  { %v10091_v56 = vpop.f32.mrb[52].mxu1 }
0x14b1   :  { %v7819_v29 = vadd.f32 %v10091_v56, %v7917_v21  ;;  %v7813_v39 = vpop.f32.mrb[53].mxu1 }
0x14b2   :  { %v7814_v35 = vadd.f32 %v7917_v21, %v7813_v39 }
0x14b3   :  { %7825 = vst [vmem:[%s15228_s16 + $0x18] sm:$0xff] %v7819_v29 }
0x14b4   :  { %7824 = vst [vmem:[%s15228_s16 + $0x10] sm:$0xff] %v7814_v35 }
0x14b5   :  { %7830 = vsyncpa [#allocation6], 1 }
0x14b6   :  { %7831 = vsyncpa [#allocation8], 1 }
0x14b7   :  { %7832 = vsyncpa [#allocation11], 1 }

</bundles_post_ra>
